<compile_context>
chip_gen: v5e
topology: v5e:2x2
jax: 0.10.0
libtpu: 0.0.40
codegen_flags: <defaults>
</compile_context>

<pallas_src>
import jax
import jax.numpy as jnp
from jax.experimental import pallas as pl
from jax.experimental.pallas import tpu as pltpu


def _round_up(x, m):
    return ((x + m - 1) // m) * m


def mlp_kernel(x_ref, w1_ref, b1_ref, w2_ref, o_ref, acc_ref):
    """One (h_tile, k_step) grid point of
        partial_h = relu(x @ W1[:, h_tile] + b1[h_tile]) @ W2[h_tile, :].

    Grid axis 0 ("parallel") tiles the hidden dimension H (on v7x each
    TensorCore streams half of W1). Grid axis 1 ("arbitrary") walks the
    input-feature (K) dimension, accumulating layer-1 pre-activations
    (seeded with b1) in acc_ref. On the last K step we apply ReLU and the
    small second matmul, writing this H tile's partial output slab; partials
    are summed (and b2 added) outside the kernel.
    """
    k = pl.program_id(1)

    @pl.when(k == 0)
    def _():
        # Fold b1 into the accumulator init (saves a VPU add in the epilogue).
        acc_ref[...] = jnp.broadcast_to(b1_ref[...], acc_ref.shape)

    # bf16 x bf16 -> f32 accumulate: native MXU path.
    acc_ref[...] += jnp.dot(
        x_ref[...], w1_ref[...], preferred_element_type=jnp.float32
    )

    @pl.when(k == pl.num_programs(1) - 1)
    def _():
        h = jnp.maximum(acc_ref[...], 0.0)
        partial = jnp.dot(h, w2_ref[...], preferred_element_type=jnp.float32)
        o_ref[0, :, :] = partial.astype(o_ref.dtype)


def make_policy_head_fn(w1, b1, w2, b2, *, num_h_tiles=2, num_k_steps=2):
    """Build the fused-MLP forward fn.

    w1: [D_in, H] f32, b1: [H] f32, w2: [H, 7] f32, b2: [7] f32.
    Weight padding + bf16 cast happens ONCE here; the returned fn only pads x.
    Zero padding is mathematically inert: padded x cols hit zero W1 rows; padded
    hidden cols have zero W1 col + zero b1 -> relu(0)=0 -> zero W2 row; padded
    output cols are sliced off.
    """
    D_in, H = w1.shape
    N_out = w2.shape[1]

    D_p = _round_up(D_in, 128 * num_k_steps)
    tk = D_p // num_k_steps
    H_p = _round_up(H, 128 * num_h_tiles)
    H_t = H_p // num_h_tiles
    N_p = _round_up(N_out, 128)

    # One-time padding / casting (kept on device, reused every call).
    w1_p = jnp.zeros((D_p, H_p), jnp.bfloat16).at[:D_in, :H].set(
        w1.astype(jnp.bfloat16))
    b1_p = jnp.zeros((1, H_p), jnp.float32).at[0, :H].set(b1)
    w2_p = jnp.zeros((H_p, N_p), jnp.float32).at[:H, :N_out].set(w2)
    b2_f = jnp.asarray(b2, jnp.float32)

    grid = (num_h_tiles, num_k_steps)

    @jax.jit
    def forward(x):
        B = x.shape[0]
        B_p = _round_up(B, 8)
        x_p = jnp.zeros((B_p, D_p), jnp.bfloat16).at[:B, :D_in].set(
            x.astype(jnp.bfloat16))

        partials = pl.pallas_call(
            mlp_kernel,
            out_shape=jax.ShapeDtypeStruct((num_h_tiles, B_p, N_p), jnp.float32),
            grid_spec=pltpu.PrefetchScalarGridSpec(
                num_scalar_prefetch=0,
                grid=grid,
                in_specs=[
                    pl.BlockSpec((B_p, tk), lambda h, k: (0, k)),    # x chunk (bf16)
                    pl.BlockSpec((tk, H_t), lambda h, k: (k, h)),    # W1 chunk (bf16)
                    pl.BlockSpec((1, H_t), lambda h, k: (0, h)),     # b1 tile
                    pl.BlockSpec((H_t, N_p), lambda h, k: (h, 0)),   # W2 tile
                ],
                out_specs=pl.BlockSpec((1, B_p, N_p), lambda h, k: (h, 0, 0)),
                scratch_shapes=[pltpu.VMEM((B_p, H_t), jnp.float32)],
            ),
            compiler_params=pltpu.CompilerParams(
                dimension_semantics=("parallel", "arbitrary"),
                vmem_limit_bytes=32 * 1024 * 1024,
            ),
        )(x_p, w1_p, b1_p, w2_p)

        # Sum the per-H-tile partial slabs, crop padding, add b2 (tiny, XLA).
        return partials.sum(axis=0)[:B, :N_out] + b2_f

    return forward


if __name__ == "__main__":
    # Small-but-consistent shapes: encoding_size = 32 -> D_in = 32 + 4608.
    encoding_size = 32
    D_in = encoding_size + 4608          # 4640
    H = D_in // 2                        # 2320
    N_out = 7
    B = 2

    key = jax.random.PRNGKey(0)
    kx, kw1, kb1, kw2, kb2 = jax.random.split(key, 5)

    x = jax.random.normal(kx, (B, D_in), jnp.float32)
    w1 = jax.random.normal(kw1, (D_in, H), jnp.float32) * 0.02
    b1 = jax.random.normal(kb1, (H,), jnp.float32) * 0.02
    w2 = jax.random.normal(kw2, (H, N_out), jnp.float32) * 0.02
    b2 = jax.random.normal(kb2, (N_out,), jnp.float32) * 0.02

    forward = make_policy_head_fn(w1, b1, w2, b2)
    out = jax.block_until_ready(forward(x))

    # Pure-JAX reference, using the same bf16 cast of x/W1 the kernel streams.
    x_bf = x.astype(jnp.bfloat16).astype(jnp.float32)
    w1_bf = w1.astype(jnp.bfloat16).astype(jnp.float32)
    ref = jnp.maximum(x_bf @ w1_bf + b1, 0.0) @ w2 + b2

    assert out.shape == (B, N_out)
    assert jnp.allclose(out, ref, atol=2e-2, rtol=2e-2), "mismatch vs reference"

    print("KERNEL_OK")
</pallas_src>

<mosaic_0001>
module attributes {stable_mosaic.version = 11 : i64} {
  func.func @mlp_kernel(%arg0: i32, %arg1: i32, %arg2: memref<8x2432xbf16, #tpu.memory_space<vmem>>, %arg3: memref<2432x1280xbf16, #tpu.memory_space<vmem>>, %arg4: memref<1x1280xf32, #tpu.memory_space<vmem>>, %arg5: memref<1280x128xf32, #tpu.memory_space<vmem>>, %arg6: memref<1x8x128xf32, #tpu.memory_space<vmem>>, %arg7: memref<8x1280xf32, #tpu.memory_space<vmem>>) attributes {dimension_semantics = [#tpu.dimension_semantics<parallel>, #tpu.dimension_semantics<arbitrary>], iteration_bounds = array<i64: 2, 2>, scalar_prefetch = 0 : i64, scratch_operands = 1 : i64, tpu.core_type = #tpu.core_type<tc>, window_params = [{transform_indices = @transform_0, window_bounds = array<i64: 8, 2432>}, {transform_indices = @transform_1, window_bounds = array<i64: 2432, 1280>}, {transform_indices = @transform_2, window_bounds = array<i64: 1, 1280>}, {transform_indices = @transform_3, window_bounds = array<i64: 1280, 128>}, {transform_indices = @transform_4, window_bounds = array<i64: 1, 8, 128>}]} {
    %c0_i32 = arith.constant 0 : i32
    %0 = arith.cmpi eq, %arg1, %c0_i32 : i32
    %1 = arith.extui %0 : i1 to i32
    %c0_i32_0 = arith.constant 0 : i32
    %2 = arith.cmpi ne, %1, %c0_i32_0 : i32
    scf.if %2 {
      %c0_9 = arith.constant 0 : index
      %c0_10 = arith.constant 0 : index
      %12 = vector.load %arg4[%c0_9, %c0_10] : memref<1x1280xf32, #tpu.memory_space<vmem>>, vector<1x1280xf32>
      %13 = vector.shape_cast %12 : vector<1x1280xf32> to vector<1x1280xf32>
      %14 = vector.broadcast %13 : vector<1x1280xf32> to vector<8x1280xf32>
      %c0_11 = arith.constant 0 : index
      %c0_12 = arith.constant 0 : index
      %15 = vector.load %arg7[%c0_11, %c0_12] : memref<8x1280xf32, #tpu.memory_space<vmem>>, vector<8x1280xf32>
      tpu.vector_store %arg7[%c0_11, %c0_12], %14 {strides = array<i32>} : memref<8x1280xf32, #tpu.memory_space<vmem>>, vector<8x1280xf32>,
    } else {
    }
    %c0 = arith.constant 0 : index
    %c0_1 = arith.constant 0 : index
    %3 = vector.load %arg7[%c0, %c0_1] : memref<8x1280xf32, #tpu.memory_space<vmem>>, vector<8x1280xf32>
    %c0_2 = arith.constant 0 : index
    %c0_3 = arith.constant 0 : index
    %4 = vector.load %arg2[%c0_2, %c0_3] : memref<8x2432xbf16, #tpu.memory_space<vmem>>, vector<8x2432xbf16>
    %c0_4 = arith.constant 0 : index
    %c0_5 = arith.constant 0 : index
    %5 = vector.load %arg3[%c0_4, %c0_5] : memref<2432x1280xbf16, #tpu.memory_space<vmem>>, vector<2432x1280xbf16>
    %cst = arith.constant dense<0.000000e+00> : vector<8x1280xf32>
    %6 = tpu.matmul %4, %5, %cst {dimension_numbers = #tpu.dot_dimension_numbers<[1], [0], [0], [1], [0, 0, 1, 1], [], []>} : vector<8x2432xbf16>, vector<2432x1280xbf16>, vector<8x1280xf32> -> vector<8x1280xf32>
    %7 = arith.addf %3, %6 : vector<8x1280xf32>
    %c0_6 = arith.constant 0 : index
    %c0_7 = arith.constant 0 : index
    %8 = vector.load %arg7[%c0_6, %c0_7] : memref<8x1280xf32, #tpu.memory_space<vmem>>, vector<8x1280xf32>
    tpu.vector_store %arg7[%c0_6, %c0_7], %7 {strides = array<i32>} : memref<8x1280xf32, #tpu.memory_space<vmem>>, vector<8x1280xf32>,
    %c1_i32 = arith.constant 1 : i32
    %9 = arith.cmpi eq, %arg1, %c1_i32 : i32
    %10 = arith.extui %9 : i1 to i32
    %c0_i32_8 = arith.constant 0 : i32
    %11 = arith.cmpi ne, %10, %c0_i32_8 : i32
    scf.if %11 {
      %c0_9 = arith.constant 0 : index
      %c0_10 = arith.constant 0 : index
      %12 = vector.load %arg7[%c0_9, %c0_10] : memref<8x1280xf32, #tpu.memory_space<vmem>>, vector<8x1280xf32>
      %cst_11 = arith.constant 0.000000e+00 : f32
      %13 = vector.broadcast %cst_11 : f32 to vector<8x1280xf32>
      %14 = arith.maximumf %12, %13 : vector<8x1280xf32>
      %c0_12 = arith.constant 0 : index
      %c0_13 = arith.constant 0 : index
      %15 = vector.load %arg5[%c0_12, %c0_13] : memref<1280x128xf32, #tpu.memory_space<vmem>>, vector<1280x128xf32>
      %cst_14 = arith.constant dense<0.000000e+00> : vector<8x128xf32>
      %16 = tpu.matmul %14, %15, %cst_14 {dimension_numbers = #tpu.dot_dimension_numbers<[1], [0], [0], [1], [0, 0, 1, 1], [], []>} : vector<8x1280xf32>, vector<1280x128xf32>, vector<8x128xf32> -> vector<8x128xf32>
      %c0_15 = arith.constant 0 : index
      %c0_16 = arith.constant 0 : index
      %c0_17 = arith.constant 0 : index
      %17 = vector.load %arg6[%c0_15, %c0_16, %c0_17] : memref<1x8x128xf32, #tpu.memory_space<vmem>>, vector<1x8x128xf32>
      %18 = vector.shape_cast %17 : vector<1x8x128xf32> to vector<8x128xf32>
      %19 = vector.shape_cast %16 : vector<8x128xf32> to vector<1x8x128xf32>
      tpu.vector_store %arg6[%c0_15, %c0_16, %c0_17], %19 {strides = array<i32>} : memref<1x8x128xf32, #tpu.memory_space<vmem>>, vector<1x8x128xf32>,
    } else {
    }
    return
  }
  func.func @transform_0(%arg0: i32, %arg1: i32) -> (i32, i32) {
    %c0_i32 = arith.constant 0 : i32
    %c0_i32_0 = arith.constant 0 : i32
    return %c0_i32, %arg1 : i32, i32
  }
  func.func @transform_1(%arg0: i32, %arg1: i32) -> (i32, i32) {
    %c0_i32 = arith.constant 0 : i32
    return %arg1, %arg0 : i32, i32
  }
  func.func @transform_2(%arg0: i32, %arg1: i32) -> (i32, i32) {
    %c0_i32 = arith.constant 0 : i32
    %c0_i32_0 = arith.constant 0 : i32
    return %c0_i32, %arg0 : i32, i32
  }
  func.func @transform_3(%arg0: i32, %arg1: i32) -> (i32, i32) {
    %c0_i32 = arith.constant 0 : i32
    %c0_i32_0 = arith.constant 0 : i32
    return %arg0, %c0_i32 : i32, i32
  }
  func.func @transform_4(%arg0: i32, %arg1: i32) -> (i32, i32, i32) {
    %c0_i32 = arith.constant 0 : i32
    %c0_i32_0 = arith.constant 0 : i32
    %c0_i32_1 = arith.constant 0 : i32
    return %arg0, %c0_i32, %c0_i32_0 : i32, i32, i32
  }
}

</mosaic_0001>

<bundles_post_ra>
// kernel: forward.1
= control target key start
LH: loop header
LB: loop body
LE: loop exit
PB: predicated region body
PF: predicated region fallthrough
CT: control target
= control target key end

     0   :  { %s24510_s0 = inlined_call_operand.vmem [shape: bf16[8,4864], index: 0, kind: input, shape index: {}]   ;;  %s24511_s1 = inlined_call_operand.hbm [shape: bf16[4864,2560], index: 1, kind: input, shape index: {}]   ;;  %s24512_s2 = inlined_call_operand.hbm [shape: f32[1,2560], index: 2, kind: input, shape index: {}]   ;;  %s24513_s3 = inlined_call_operand.hbm [shape: f32[2560,128], index: 3, kind: input, shape index: {}]   ;;  %s24514_s4 = inlined_call_operand.vmem [shape: f32[2,8,128], index: 4, kind: output, shape index: {}]  }
   0x1   :  { %24520 = sst [smem:[#allocation16_spill]] %s24510_s0 }
   0x2   :  { %24521 = sst [smem:[#allocation17_spill]] %s24511_s1 }
   0x3   :  { %24522 = sst [smem:[#allocation18_spill]] %s24512_s2 }
   0x4   :  { %24523 = sst [smem:[#allocation19_spill]] %s24514_s4 }
   0x5   :  { %9 = vsyncpa [#allocation4], 0 }
   0x6   :  { %11 = vsyncpa [#allocation4 + $0x1], 0 }
   0x7   :  { %12 = vsyncpa [#allocation6], 0 }
   0x8   :  { %14 = vsyncpa [#allocation6 + $0x1], 0  ;;  %s20541_s15 = smov 0   ;;  %s20543_s16 = smov 0  }
   0x9   :  { %s20545_s17 = smov 0   ;;  %s20547_s18 = smov 0  }
   0xa   :  { %s20549_s19 = smov 0   ;;  %s20551_s20 = smov 0  }
   0xb   :  { %s20553_s21 = smov 0   ;;  %s20555_s22 = smov 0  }
   0xc   :  { %s20557_s23 = smov 0   ;;  %s20559_s24 = smov 0  }
   0xd   :  { %s20561_s25 = smov 0  }
   0xe LB: > { %24524 = sst [smem:[#allocation10_spill]] %s20493_s21  ;;  %s24515_s26 = sadd.s32 4294967295, %s20509_s25   ;;  %s20509_s25 = sphi %s20561_s25, %s20_s25   ;;  %s20505_s24 = sphi %s20559_s24, %s24557_s24   ;;  %s20501_s23 = sphi %s20557_s23, %s24548_s23   ;;  %s20497_s22 = sphi %s20555_s22, %s24556_s22   ;;  %s20493_s21 = sphi %s20553_s21, %s24547_s21   ;;  %s20489_s20 = sphi %s20551_s20, %s24555_s20   ;;  %s20485_s19 = sphi %s20549_s19, %s24554_s19   ;;  %s20481_s18 = sphi %s20547_s18, %s24553_s18   ;;  %s20477_s17 = sphi %s20545_s17, %s24552_s17   ;;  %s20473_s16 = sphi %s20543_s16, %s24551_s16   ;;  %s20469_s15 = sphi %s20541_s15, %s24550_s15  }
   0xf   : > { %24525 = sst [smem:[#allocation11_spill]] %s20501_s23  ;;  %s29_s27 = sadd.s32 1, %s20501_s23 }
  0x10   : > { %p30_p0 = scmp.ge.s32.totalorder %s29_s27, 2  ;;  %s32_s28 = sadd.s32 1, %s20505_s24 }
  0x11   : > { %s67_s29 = sadd.s32 1, %s20489_s20  ;;  %p74_p1 = scmp.ne.s32.totalorder %s20489_s20, %s20485_s19 }
  0x12   : > { %s24559_s27 = smov (%p30_p0, %s29_s27), 0  ;;  %s24561_s28 = smov (!%p30_p0, %s32_s28), %s20505_s24 }
  0x13   : > { %24526 = sst [smem:[#allocation12_spill]] %s24559_s27  ;;  %s62_s30 = ssub.s32 %s20501_s23, %s24559_s27 }
  0x14   : > { %p75_p2 = scmp.eq.s32.totalorder %s20509_s25, 0  ;;  %p34_p3 = scmp.ge.s32.totalorder %s24561_s28, 2 }
  0x15   : > { %p80_p4 = scmp.ne.s32.totalorder %s20485_s19, %s20481_s18  ;;  %p20615_p6 = scmp.eq.s32.totalorder %s24515_s26, 0 }
  0x16   : > { %p20609_p5 = por %p75_p2, %p74_p1  ;;  %s24563_s28 = smov (%p34_p3, %s24561_s28), 0 }
  0x17   : > { %24529 = sst [smem:[#allocation13_spill]] %s24563_s28  ;;  %p20623_p7 = por %p20615_p6, %p80_p4 }
  0x18   : > { %s93_s8 = sadd.s32 1, %s20477_s17  ;;  %s63_s9 = ssub.s32 %s20505_s24, %s24563_s28 }
  0x19   : > { %p100_p8 = scmp.ne.s32.totalorder %s20477_s17, %s20473_s16  ;;  %s64_s10 = sor.u32 %s63_s9, %s62_s30 }
  0x1a   : > { %p91_p9 = scmp.eq.s32.totalorder %s63_s9, 0  ;;  %p65_p10 = scmp.eq.s32.totalorder %s64_s10, 0 }
  0x1b   : > { %p20634_p11 = por %p100_p8, %p75_p2  ;;  %p106_p12 = scmp.ne.s32.totalorder %s20473_s16, %s20469_s15 }
  0x1c   : > { %s20639_s12 = scalar_select %p91_p9, %s20477_s17, %s93_s8  }
  0x1d   : > { %s20642_s13 = scalar_select %p65_p10, %s20489_s20, %s67_s29  }
  0x1e   : > { %24532 = sst [smem:[#allocation14_spill]] %s20639_s12  ;;  %p20230_p13 = scmp.lt.s32.totalorder %s20509_s25, 4 }
  0x1f   : > { %24533 = sst [smem:[#allocation15_spill]] %s20642_s13  ;;  %p20649_p0 = por %p106_p12, %p20615_p6 }
  0x20   : > { %s197_s18 = smul.u32 10, %s20505_s24  ;;  %p20659_p1 = pnand %p20230_p13, %p20609_p5 }
  0x21   : > { %s20231_s30 = smul.u32 6080, %s20501_s23  ;;  %s216_s8 = sand.u32 1, %s20509_s25  }
  0x22   : > { %s218_s29 = sand.u32 1, %s20477_s17   ;;  %s24536_s1 = sld [smem:[#allocation17_spill]] }
  0x23   : > { %s201_s15 = sadd.s32 %s20231_s30, %s197_s18  ;;  %s20209_s27 = smul.u32 10, %s218_s29 }
  0x24   : > { %s12597_s6 = sshll.u32 %s201_s15, 2  ;;  %s24537_s2 = sld [smem:[#allocation18_spill]] }
  0x25   : > { %s220_s4 = scalar_lea.vmem [#allocation5], %s20209_s27  ;;  %p20677_p2 = pnand %p20230_p13, %p20634_p11 }
  0x26   : > { %s228_s21 = sshll.u32 %s220_s4, 4  ;;  %p12599_p3 = scmp.ge.s32.totalorder %s20509_s25, 1  ;;  %s229_s21 = int_to_ptr.vmem [resolvable:$true] %s228_s21 }
  0x27   : > { %p255_p4 = scmp.lt.s32.totalorder %s20509_s25, 5  ;;  %s217_s13 = scalar_lea.sflag [#allocation6], %s216_s8 }
  0x28   : > { %s203_s28 = scalar_lea.hbm %s24536_s1, %s12597_s6  ;;  %s191_s11 = sand.u32 1, %s20489_s20  }
  0x29   : > { %s204_s23 = sshll.u32 %s203_s28, 4  ;;  %s20210_s28 = smul.u32 1280, %s218_s29  ;;  %s20671_s23 = int_to_ptr.hbm [resolvable:$true] %s204_s23 }
  0x2a   : > { %s224_s12 = scalar_lea.hbm %s24537_s2, %s197_s18  ;;  %p20685_p5 = pnand %p12599_p3, %p255_p4 }
  0x2b   : > { %s226_s0 = sshll.u32 %s224_s12, 4  ;;  %s239_s27 = scalar_lea.vmem [#allocation7], %s20210_s28  ;;  %s227_s0 = int_to_ptr.hbm [resolvable:$true] %s226_s0 }
  0x2c   : > { %20226 = dma.hbm_to_vmem [thread:$0]  (!%p20677_p2), %s227_s0, 160, %s229_s21, %s217_s13  }
  0x2d   : > { %s247_s4 = sshll.u32 %s239_s27, 4  ;;  %s20207_s18 = smul.u32 12160, %s191_s11  ;;  %s248_s4 = int_to_ptr.vmem [resolvable:$true] %s247_s4 }
  0x2e   : > { %s18686_s29 = smul.u32 1280, %s20505_s24  ;;  %s192_s6 = scalar_lea.sflag [#allocation4], %s191_s11 }
  0x2f   : > { %s195_s30 = scalar_lea.vmem [#allocation3], %s20207_s18  ;;  %s20511_s8 = smov 1280  }
  0x30   : > { %s206_s15 = sshll.u32 %s195_s30, 4  ;;  %s20512_s10 = smov 640   ;;  %s207_s15 = int_to_ptr.vmem [resolvable:$true] %s206_s15 }
  0x31   : > { %s20513_s5 = smov 40   ;;  %s244_s28 = scalar_lea.hbm %s24513_s3, %s18686_s29 }
  0x32   : > { %20223 = dma.hbm_to_vmem [thread:$0]  (!%p20659_p1), %s20671_s23, 194560, %s207_s15, %s192_s6, %s20511_s8, %s20512_s10, %s20513_s5  }
  0x33   : > { %s245_s27 = sshll.u32 %s244_s28, 4  ;;  %s20514_s1 = smov 128   ;;  %s246_s27 = int_to_ptr.hbm [resolvable:$true] %s245_s27 }
  0x34   : > { %s20515_s2 = smov 8   ;;  %259 = sbr.rel (%p20685_p5) target bundleno = 1991 (0x7c7), region = 36 }
  0x35   : > { %20229 = dma.hbm_to_vmem [thread:$0]  (!%p20677_p2), %s246_s27, 20480, %s248_s4, %s217_s13, %s20514_s1, %s20514_s1, %s20515_s2  }
  0x36   : > { %s261_s11 = sand.u32 (!%p20685_p5), 1, %s20485_s19  }
  0x37   : > { %s20211_s18 = smul.u32 (!%p20685_p5), 12160, %s261_s11  ;;  %s262_s30 = scalar_lea.sflag (!%p20685_p5), [#allocation4], %s261_s11 }
  0x39   : > { %s20702_s9 = scalar_lea.vmem [#allocation3], %s20211_s18 }
  0x3a   : > { %20460 = dma.done.wait (%p20623_p7), %s262_s30, 194560  }
  0x3b   : > { %20462 = vsyncadd (%p20623_p7), %s262_s30, 4294772736  ;;  %s24540_s23 = sadd.s32 4294967295, %s20509_s25   ;;  %s273_s2 = sand.u32 1, %s20473_s16  }
  0x3c   : > { %s271_s1 = sand.u32 1, %s24540_s23   ;;  %s20212_s26 = smul.u32 10, %s273_s2 }
  0x3d   : > { %s272_s13 = scalar_lea.sflag [#allocation6], %s271_s1 }
  0x3e   : > { %s275_s4 = scalar_lea.vmem [#allocation5], %s20212_s26 }
  0x3f   : > { %20464 = dma.done.wait (%p20649_p0), %s272_s13, 20640  }
  0x40   : > { %20466 = vsyncadd (%p20649_p0), %s272_s13, 4294946656  ;;  %s24541_s12 = sld [smem:[#allocation10_spill]]  ;;  %s20213_s15 = smul.u32 1280, %s273_s2 }
  0x41   : > { %p335_p6 = scmp.lt.s32.totalorder %s20497_s22, 1  ;;  %s24542_s5 = sld [smem:[#allocation19_spill]] }
  0x42   : > { %s24543_s14 = sld [smem:[#allocation16_spill]]  ;;  %s20728_s11 = scalar_lea.vmem [#allocation7], %s20213_s15 }
  0x43   : > { %s24565_s22 = smov (!%p335_p6, %s20497_s22), 1 }
  0x44   : > { %s12601_s29 = sshll.u32 %s24565_s22, 3 }
  0x46   : > { %s325_s7 = smul.u32 19, %s24541_s12  ;;  %p12602_p8 = scmp.ne.s32.totalorder %s24541_s12, 0 }
  0x47   : > { %s20721_s0 = scalar_lea.vmem %s24542_s5, %s12601_s29 }
  0x48   : > { %p326_p7 = scmp.lt.s32.totalorder %s325_s7, 37  ;;  %342 = sbr.rel (%p12602_p8) target bundleno = 90 (0x5a), region = 52 }
  0x4a   : > { %s24567_s7 = smov (!%p326_p7, %s325_s7), 37 }
  0x4b   : > { %s12600_s6 = sshll.u32 %s24567_s7, 2 }
  0x4c   : > { %s20726_s27 = scalar_lea.vmem %s24543_s14, %s12600_s6 }
  0x4d   : > { %v343_v0 = vld [vmem:[%s275_s4] sm:$0xff]  ;;  %v344_v7 = vld [vmem:[%s275_s4 + $0x8] sm:$0x3] }
  0x4e   : > { %v347_v1 = vperm.slane %v343_v0, 0  ;;  %v348_v2 = vperm.slane %v343_v0, 1  ;;  %v349_v3 = vperm.slane %v343_v0, 2  ;;  %v350_v4 = vperm.slane %v343_v0, 3 }
  0x4f   : > { %v351_v5 = vperm.slane %v343_v0, 4  ;;  %v352_v6 = vperm.slane %v343_v0, 5  ;;  %v353_v8 = vperm.slane %v343_v0, 6  ;;  %v354_v9 = vperm.slane %v343_v0, 7 }
  0x50   : > { %367 = vst [vmem:[#allocation2 + $0x30] sm:$0xff] %v347_v1  ;;  %v355_v10 = vperm.slane %v344_v7, 0  ;;  %v356_v11 = vperm.slane %v344_v7, 1 }
  0x51   : > { %368 = vst [vmem:[#allocation2] sm:$0xff] %v348_v2 }
  0x52   : > { %369 = vst [vmem:[#allocation2 + $0x18] sm:$0xff] %v349_v3 }
  0x53   : > { %370 = vst [vmem:[#allocation2 + $0x10] sm:$0xff] %v350_v4 }
  0x54   : > { %371 = vst [vmem:[#allocation2 + $0x48] sm:$0xff] %v351_v5 }
  0x55   : > { %372 = vst [vmem:[#allocation2 + $0x28] sm:$0xff] %v352_v6 }
  0x56   : > { %373 = vst [vmem:[#allocation2 + $0x8] sm:$0xff] %v353_v8 }
  0x57   : > { %374 = vst [vmem:[#allocation2 + $0x20] sm:$0xff] %v354_v9 }
  0x58   : > { %375 = vst [vmem:[#allocation2 + $0x40] sm:$0xff] %v355_v10 }
  0x59   : > { %376 = vst [vmem:[#allocation2 + $0x38] sm:$0xff] %v356_v11 }
  0x5a PF: > { %v12885_v12 = vld [vmem:[%s20702_s9 + $0x230] sm:$0xf]  ;;  %v18762_v13 = vld [vmem:[%s20702_s9 + $0x254] sm:$0xf0]  ;;  %v12845_v23 = vld [vmem:[%s20702_s9 + $0x1e0] sm:$0xf] }
  0x5b   : > { %v13205_v14 = vld [vmem:[%s20702_s9 + $0x4b0] sm:$0xf]  ;;  %v12886_v15 = vor.u32 %v18762_v13, %v12885_v12  ;;  %v18842_v16 = vld [vmem:[%s20702_s9 + $0x4d4] sm:$0xf0]  ;;  %v18752_v25 = vld [vmem:[%s20702_s9 + $0x204] sm:$0xf0] }
  0x5c   : > { %v13525_v17 = vld [vmem:[%s20702_s9 + $0x730] sm:$0xf]  ;;  %v18922_v18 = vld [vmem:[%s20702_s9 + $0x754] sm:$0xf0]  ;;  %v13206_v19 = vor.u32 %v18842_v16, %v13205_v14  ;;  %v13165_v26 = vld [vmem:[%s20702_s9 + $0x460] sm:$0xf]  ;;  %v12846_v28 = vor.u32 %v18752_v25, %v12845_v23 }
  0x5d   : > { %v13526_v20 = vor.u32 %v18922_v18, %v13525_v17  ;;  %v13845_v21 = vld [vmem:[%s20702_s9 + $0x9b0] sm:$0xf]  ;;  %v19002_v22 = vld [vmem:[%s20702_s9 + $0x9d4] sm:$0xf0]  ;;  %9584 = vmatpush.bf16.msra.mxu0 %v12886_v15  ;;  %v18832_v27 = vld [vmem:[%s20702_s9 + $0x484] sm:$0xf0] }
  0x5e   : > { %v13846_v24 = vor.u32 %v19002_v22, %v13845_v21  ;;  %9597 = vmatpush.bf16.msra.mxu1 %v13206_v19  ;;  %v13166_v29 = vor.u32 %v18832_v27, %v13165_v26  ;;  %v13485_v30 = vld [vmem:[%s20702_s9 + $0x6e0] sm:$0xf]  ;;  %v18912_v31 = vld [vmem:[%s20702_s9 + $0x704] sm:$0xf0]  ;;  %v12805_v35 = vld [vmem:[%s20702_s9 + $0x190] sm:$0xf] }
  0x5f   : > { %9610 = vmatpush.bf16.msra.mxu2 %v13526_v20  ;;  %v13805_v32 = vld [vmem:[%s20702_s9 + $0x960] sm:$0xf]  ;;  %v13486_v33 = vor.u32 %v18912_v31, %v13485_v30  ;;  %v18992_v34 = vld [vmem:[%s20702_s9 + $0x984] sm:$0xf0]  ;;  %v18742_v36 = vld [vmem:[%s20702_s9 + $0x1b4] sm:$0xf0] }
  0x60   : > { %9623 = vmatpush.bf16.msra.mxu3 %v13846_v24  ;;  %v13806_v37 = vor.u32 %v18992_v34, %v13805_v32  ;;  %v13125_v38 = vld [vmem:[%s20702_s9 + $0x410] sm:$0xf]  ;;  %v18822_v39 = vld [vmem:[%s20702_s9 + $0x434] sm:$0xf0]  ;;  %v12806_v41 = vor.u32 %v18742_v36, %v12805_v35  ;;  %v12765_v47 = vld [vmem:[%s20702_s9 + $0x140] sm:$0xf] }
  0x61   : > { %v13445_v40 = vld [vmem:[%s20702_s9 + $0x690] sm:$0xf]  ;;  %9585 = vmatpush.bf16.msra.mxu0 %v12846_v28  ;;  %v18902_v42 = vld [vmem:[%s20702_s9 + $0x6b4] sm:$0xf0]  ;;  %v13126_v45 = vor.u32 %v18822_v39, %v13125_v38  ;;  %v18732_v48 = vld [vmem:[%s20702_s9 + $0x164] sm:$0xf0] }
  0x62   : > { %v13765_v43 = vld [vmem:[%s20702_s9 + $0x910] sm:$0xf]  ;;  %v18982_v44 = vld [vmem:[%s20702_s9 + $0x934] sm:$0xf0]  ;;  %9598 = vmatpush.bf16.msra.mxu1 %v13166_v29  ;;  %v13446_v46 = vor.u32 %v18902_v42, %v13445_v40  ;;  %v13085_v49 = vld [vmem:[%s20702_s9 + $0x3c0] sm:$0xf]  ;;  %v12766_v56 = vor.u32 %v18732_v48, %v12765_v47 }
  0x63   : > { %9611 = vmatpush.bf16.msra.mxu2 %v13486_v33  ;;  %v13766_v50 = vor.u32 %v18982_v44, %v13765_v43  ;;  %v18812_v51 = vld [vmem:[%s20702_s9 + $0x3e4] sm:$0xf0]  ;;  %v13405_v52 = vld [vmem:[%s20702_s9 + $0x640] sm:$0xf]  ;;  %v12725_v59 = vld [vmem:[%s20702_s9 + $0xf0] sm:$0xf] }
  0x64   : > { %9624 = vmatpush.bf16.msra.mxu3 %v13806_v37  ;;  %v18892_v53 = vld [vmem:[%s20702_s9 + $0x664] sm:$0xf0]  ;;  %v13725_v54 = vld [vmem:[%s20702_s9 + $0x8c0] sm:$0xf]  ;;  %v13086_v57 = vor.u32 %v18812_v51, %v13085_v49  ;;  %v18722_v60 = vld [vmem:[%s20702_s9 + $0x114] sm:$0xf0] }
  0x65   : > { %v18972_v55 = vld [vmem:[%s20702_s9 + $0x8e4] sm:$0xf0]  ;;  %9586 = vmatpush.bf16.msra.mxu0 %v12806_v41  ;;  %v13406_v58 = vor.u32 %v18892_v53, %v13405_v52  ;;  %v13045_v61 = vld [vmem:[%s20702_s9 + $0x370] sm:$0xf]  ;;  %v18802_v63 = vld [vmem:[%s20702_s9 + $0x394] sm:$0xf0]  ;;  %v12726_v4 = vor.u32 %v18722_v60, %v12725_v59 }
  0x66   : > { %9599 = vmatpush.bf16.msra.mxu1 %v13126_v45  ;;  %v13726_v62 = vor.u32 %v18972_v55, %v13725_v54  ;;  %v13365_v0 = vld [vmem:[%s20702_s9 + $0x5f0] sm:$0xf]  ;;  %v18882_v1 = vld [vmem:[%s20702_s9 + $0x614] sm:$0xf0]  ;;  %v13046_v5 = vor.u32 %v18802_v63, %v13045_v61  ;;  %v12685_v7 = vld [vmem:[%s20702_s9 + $0xa0] sm:$0xf] }
  0x67   : > { %9612 = vmatpush.bf16.msra.mxu2 %v13446_v46  ;;  %v13685_v2 = vld [vmem:[%s20702_s9 + $0x870] sm:$0xf]  ;;  %v18962_v3 = vld [vmem:[%s20702_s9 + $0x894] sm:$0xf0]  ;;  %v13366_v6 = vor.u32 %v18882_v1, %v13365_v0  ;;  %v18712_v8 = vld [vmem:[%s20702_s9 + $0xc4] sm:$0xf0] }
  0x68   : > { %9625 = vmatpush.bf16.msra.mxu3 %v13766_v50  ;;  %v13005_v9 = vld [vmem:[%s20702_s9 + $0x320] sm:$0xf]  ;;  %v13686_v10 = vor.u32 %v18962_v3, %v13685_v2  ;;  %v18792_v11 = vld [vmem:[%s20702_s9 + $0x344] sm:$0xf0]  ;;  %v12686_v16 = vor.u32 %v18712_v8, %v12685_v7  ;;  %v12645_v19 = vld [vmem:[%s20702_s9 + $0x50] sm:$0xf] }
  0x69   : > { %9587 = vmatpush.bf16.msra.mxu0 %v12766_v56  ;;  %v13325_v12 = vld [vmem:[%s20702_s9 + $0x5a0] sm:$0xf]  ;;  %v18872_v13 = vld [vmem:[%s20702_s9 + $0x5c4] sm:$0xf0]  ;;  %v13006_v17 = vor.u32 %v18792_v11, %v13005_v9  ;;  %v18702_v20 = vld [vmem:[%s20702_s9 + $0x74] sm:$0xf0] }
  0x6a   : > { %9600 = vmatpush.bf16.msra.mxu1 %v13086_v57  ;;  %v13645_v14 = vld [vmem:[%s20702_s9 + $0x820] sm:$0xf]  ;;  %v18952_v15 = vld [vmem:[%s20702_s9 + $0x844] sm:$0xf0]  ;;  %v13326_v18 = vor.u32 %v18872_v13, %v13325_v12  ;;  %v12965_v21 = vld [vmem:[%s20702_s9 + $0x2d0] sm:$0xf]  ;;  %v12646_v28 = vor.u32 %v18702_v20, %v12645_v19 }
  0x6b   : > { %9613 = vmatpush.bf16.msra.mxu2 %v13406_v58  ;;  %v13646_v22 = vor.u32 %v18952_v15, %v13645_v14  ;;  %v18782_v23 = vld [vmem:[%s20702_s9 + $0x2f4] sm:$0xf0]  ;;  %v13285_v24 = vld [vmem:[%s20702_s9 + $0x550] sm:$0xf]  ;;  %v12605_v29 = vld [vmem:[%s20702_s9] sm:$0xf] }
  0x6c   : > { %9626 = vmatpush.bf16.msra.mxu3 %v13726_v62  ;;  %v18862_v25 = vld [vmem:[%s20702_s9 + $0x574] sm:$0xf0]  ;;  %v13605_v26 = vld [vmem:[%s20702_s9 + $0x7d0] sm:$0xf]  ;;  %v18692_v30 = vld [vmem:[%s20702_s9 + $0x24] sm:$0xf0]  ;;  %v12966_v31 = vor.u32 %v18782_v23, %v12965_v21 }
  0x6d   : > { %9588 = vmatpush.bf16.msra.mxu0 %v12726_v4  ;;  %v18942_v27 = vld [vmem:[%s20702_s9 + $0x7f4] sm:$0xf0]  ;;  %v13286_v32 = vor.u32 %v18862_v25, %v13285_v24  ;;  %v12925_v33 = vld [vmem:[%s20702_s9 + $0x280] sm:$0xf]  ;;  %v18772_v34 = vld [vmem:[%s20702_s9 + $0x2a4] sm:$0xf0]  ;;  %v12606_v43 = vor.u32 %v18692_v30, %v12605_v29 }
  0x6e   : > { %9601 = vmatpush.bf16.msra.mxu1 %v13046_v5  ;;  %v13245_v35 = vld [vmem:[%s20702_s9 + $0x500] sm:$0xf]  ;;  %v13606_v36 = vor.u32 %v18942_v27, %v13605_v26  ;;  %v18852_v37 = vld [vmem:[%s20702_s9 + $0x524] sm:$0xf0]  ;;  %v14165_v38 = vld [vmem:[%s20702_s9 + $0xc30] sm:$0xf]  ;;  %v12926_v47 = vor.u32 %v18772_v34, %v12925_v33 }
  0x6f   : > { %9614 = vmatpush.bf16.msra.mxu2 %v13366_v6  ;;  %v19082_v39 = vld [vmem:[%s20702_s9 + $0xc54] sm:$0xf0]  ;;  %v14485_v40 = vld [vmem:[%s20702_s9 + $0xeb0] sm:$0xf]  ;;  %v13565_v45 = vld [vmem:[%s20702_s9 + $0x780] sm:$0xf]  ;;  %v13246_v48 = vor.u32 %v18852_v37, %v13245_v35 }
  0x70   : > { %9627 = vmatpush.bf16.msra.mxu3 %v13686_v10  ;;  %v19162_v41 = vld [vmem:[%s20702_s9 + $0xed4] sm:$0xf0]  ;;  %v14805_v42 = vld [vmem:[%s20702_s9 + $0x1130] sm:$0xf]  ;;  %v18932_v46 = vld [vmem:[%s20702_s9 + $0x7a4] sm:$0xf0]  ;;  %v14166_v51 = vor.u32 %v19082_v39, %v14165_v38 }
  0x71   : > { %9589 = vmatpush.bf16.msra.mxu0 %v12686_v16  ;;  %v19242_v44 = vld [vmem:[%s20702_s9 + $0x1154] sm:$0xf0]  ;;  %v15125_v49 = vld [vmem:[%s20702_s9 + $0x13b0] sm:$0xf]  ;;  %v14486_v52 = vor.u32 %v19162_v41, %v14485_v40  ;;  %v14125_v53 = vld [vmem:[%s20702_s9 + $0xbe0] sm:$0xf]  ;;  %v13566_v55 = vor.u32 %v18932_v46, %v13565_v45 }
  0x72   : > { %9602 = vmatpush.bf16.msra.mxu1 %v13006_v17  ;;  %v19322_v50 = vld [vmem:[%s20702_s9 + $0x13d4] sm:$0xf0]  ;;  %v14806_v54 = vor.u32 %v19242_v44, %v14805_v42  ;;  %v19072_v56 = vld [vmem:[%s20702_s9 + $0xc04] sm:$0xf0]  ;;  %v14445_v57 = vld [vmem:[%s20702_s9 + $0xe60] sm:$0xf] }
  0x73   : > { %9615 = vmatpush.bf16.msra.mxu2 %v13326_v18  ;;  %v19152_v58 = vld [vmem:[%s20702_s9 + $0xe84] sm:$0xf0]  ;;  %v15126_v59 = vor.u32 %v19322_v50, %v15125_v49  ;;  %v14765_v60 = vld [vmem:[%s20702_s9 + $0x10e0] sm:$0xf]  ;;  %v14126_v0 = vor.u32 %v19072_v56, %v14125_v53  ;;  %v14085_v2 = vld [vmem:[%s20702_s9 + $0xb90] sm:$0xf] }
  0x74   : > { %9628 = vmatpush.bf16.msra.mxu3 %v13646_v22  ;;  %v19232_v61 = vld [vmem:[%s20702_s9 + $0x1104] sm:$0xf0]  ;;  %v15085_v62 = vld [vmem:[%s20702_s9 + $0x1360] sm:$0xf]  ;;  %v14446_v1 = vor.u32 %v19152_v58, %v14445_v57  ;;  %v19062_v3 = vld [vmem:[%s20702_s9 + $0xbb4] sm:$0xf0] }
  0x75   : > { %9590 = vmatpush.bf16.msra.mxu0 %v12646_v28  ;;  %v19312_v63 = vld [vmem:[%s20702_s9 + $0x1384] sm:$0xf0]  ;;  %v14766_v4 = vor.u32 %v19232_v61, %v14765_v60  ;;  %v14405_v5 = vld [vmem:[%s20702_s9 + $0xe10] sm:$0xf]  ;;  %v19142_v6 = vld [vmem:[%s20702_s9 + $0xe34] sm:$0xf0]  ;;  %v14086_v14 = vor.u32 %v19062_v3, %v14085_v2 }
  0x76   : > { %9603 = vmatpush.bf16.msra.mxu1 %v12966_v31  ;;  %v388_v7 = vld [vmem:[%s20726_s27 + $0x8] sm:$0xff]  ;;  %v15086_v8 = vor.u32 %v19312_v63, %v15085_v62  ;;  %v14725_v9 = vld [vmem:[%s20702_s9 + $0x1090] sm:$0xf]  ;;  %v14406_v19 = vor.u32 %v19142_v6, %v14405_v5  ;;  %v14045_v20 = vld [vmem:[%s20702_s9 + $0xb40] sm:$0xf]  ;;  %s24544_s22 = sld [smem:[#allocation10_spill]] }
  0x77   : > { %9616 = vmatpush.bf16.msra.mxu2 %v13286_v32  ;;  %v19222_v10 = vld [vmem:[%s20702_s9 + $0x10b4] sm:$0xf0]  ;;  %v1929_v11 = vunpack.c.l.b16 %v388_v7  ;;  %v387_v12 = vld [vmem:[%s20726_s27] sm:$0xff]  ;;  %v1930_v13 = vunpack.c.h.b16 %v388_v7  ;;  %v19052_v24 = vld [vmem:[%s20702_s9 + $0xb64] sm:$0xf0] }
  0x78   : > { %9629 = vmatpush.bf16.msra.mxu3 %v13606_v36  ;;  %v15045_v15 = vld [vmem:[%s20702_s9 + $0x1310] sm:$0xf]  ;;  %v19302_v16 = vld [vmem:[%s20702_s9 + $0x1334] sm:$0xf0]  ;;  %v1927_v17 = vunpack.c.l.b16 %v387_v12  ;;  %v1928_v18 = vunpack.c.h.b16 %v387_v12  ;;  %v14726_v23 = vor.u32 %v19222_v10, %v14725_v9  ;;  %v14365_v25 = vld [vmem:[%s20702_s9 + $0xdc0] sm:$0xf]  ;;  %v14046_v34 = vor.u32 %v19052_v24, %v14045_v20 }
  0x79   : > { %9591 = vmatpush.bf16.msra.mxu0 %v12606_v43  ;;  %v20822_v21 = vpack.c.b16 %v1929_v11, %v1929_v11  ;;  %v20824_v22 = vpack.c.b16 %v1930_v13, %v1930_v13  ;;  %v19132_v26 = vld [vmem:[%s20702_s9 + $0xde4] sm:$0xf0]  ;;  %v15046_v29 = vor.u32 %v19302_v16, %v15045_v15  ;;  %v14685_v30 = vld [vmem:[%s20702_s9 + $0x1040] sm:$0xf]  ;;  %v14005_v36 = vld [vmem:[%s20702_s9 + $0xaf0] sm:$0xf] }
  0x7a   : > { %9604 = vmatpush.bf16.msra.mxu1 %v12926_v47  ;;  %v20829_v27 = vpack.c.b16 %v1927_v17, %v1927_v17  ;;  %v20831_v28 = vpack.c.b16 %v1928_v18, %v1928_v18  ;;  %v19212_v31 = vld [vmem:[%s20702_s9 + $0x1064] sm:$0xf0]  ;;  %v15005_v32 = vld [vmem:[%s20702_s9 + $0x12c0] sm:$0xf]  ;;  %v14366_v35 = vor.u32 %v19132_v26, %v14365_v25  ;;  %v19042_v38 = vld [vmem:[%s20702_s9 + $0xb14] sm:$0xf0] }
  0x7b   : > { %9617 = vmatpush.bf16.msra.mxu2 %v13246_v48  ;;  %v19292_v33 = vld [vmem:[%s20702_s9 + $0x12e4] sm:$0xf0]  ;;  %v14686_v37 = vor.u32 %v19212_v31, %v14685_v30  ;;  %v14325_v39 = vld [vmem:[%s20702_s9 + $0xd70] sm:$0xf]  ;;  %v19122_v40 = vld [vmem:[%s20702_s9 + $0xd94] sm:$0xf0]  ;;  %v14006_v46 = vor.u32 %v19042_v38, %v14005_v36 }
  0x7c   : > { %9630 = vmatpush.bf16.msra.mxu3 %v13566_v55  ;;  %9592 = vmatmul.bf16.vlgmr.msra.gmra.mxu0 %v20829_v27  ;;  %v15006_v41 = vor.u32 %v19292_v33, %v15005_v32  ;;  %v14645_v42 = vld [vmem:[%s20702_s9 + $0xff0] sm:$0xf]  ;;  %v19202_v43 = vld [vmem:[%s20702_s9 + $0x1014] sm:$0xf0]  ;;  %v14326_v47 = vor.u32 %v19122_v40, %v14325_v39  ;;  %v13965_v48 = vld [vmem:[%s20702_s9 + $0xaa0] sm:$0xf] }
  0x7d   : > { %9636 = vmatpush.bf16.msrb.mxu0 %v14166_v51  ;;  %9605 = vmatmul.bf16.vlgmr.msra.gmra.mxu1 %v20831_v28  ;;  %v14965_v44 = vld [vmem:[%s20702_s9 + $0x1270] sm:$0xf]  ;;  %v19282_v45 = vld [vmem:[%s20702_s9 + $0x1294] sm:$0xf0]  ;;  %v14646_v49 = vor.u32 %v19202_v43, %v14645_v42  ;;  %v19032_v50 = vld [vmem:[%s20702_s9 + $0xac4] sm:$0xf0] }
  0x7e   : > { %9649 = vmatpush.bf16.msrb.mxu1 %v14486_v52  ;;  %9618 = vmatmul.bf16.vlgmr.msra.gmra.mxu2 %v20822_v21  ;;  %v14285_v51 = vld [vmem:[%s20702_s9 + $0xd20] sm:$0xf]  ;;  %v19112_v52 = vld [vmem:[%s20702_s9 + $0xd44] sm:$0xf0]  ;;  %v14966_v53 = vor.u32 %v19282_v45, %v14965_v44  ;;  %v13966_v58 = vor.u32 %v19032_v50, %v13965_v48  ;;  %v13925_v60 = vld [vmem:[%s20702_s9 + $0xa50] sm:$0xf] }
  0x7f   : > { %9662 = vmatpush.bf16.msrb.mxu2 %v14806_v54  ;;  %9631 = vmatmul.bf16.vlgmr.msra.gmra.mxu3 %v20824_v22  ;;  %v14605_v54 = vld [vmem:[%s20702_s9 + $0xfa0] sm:$0xf]  ;;  %v19192_v55 = vld [vmem:[%s20702_s9 + $0xfc4] sm:$0xf0]  ;;  %v19022_v62 = vld [vmem:[%s20702_s9 + $0xa74] sm:$0xf0] }
  0x80   : > { %9675 = vmatpush.bf16.msrb.mxu3 %v15126_v59  ;;  %v14925_v56 = vld [vmem:[%s20702_s9 + $0x1220] sm:$0xf]  ;;  %v19272_v57 = vld [vmem:[%s20702_s9 + $0x1244] sm:$0xf0]  ;;  %v14286_v59 = vor.u32 %v19112_v52, %v14285_v51  ;;  %v14606_v61 = vor.u32 %v19192_v55, %v14605_v54  ;;  %v14245_v63 = vld [vmem:[%s20702_s9 + $0xcd0] sm:$0xf] }
  0x81   : > { %9637 = vmatpush.bf16.msrb.mxu0 %v14126_v0  ;;  %v19102_v0 = vld [vmem:[%s20702_s9 + $0xcf4] sm:$0xf0]  ;;  %v14565_v2 = vld [vmem:[%s20702_s9 + $0xf50] sm:$0xf]  ;;  %v13885_v6 = vld [vmem:[%s20702_s9 + $0xa00] sm:$0xf] }
  0x82   : > { %9650 = vmatpush.bf16.msrb.mxu1 %v14446_v1  ;;  %v14926_v1 = vor.u32 %v19272_v57, %v14925_v56  ;;  %v19182_v3 = vld [vmem:[%s20702_s9 + $0xf74] sm:$0xf0]  ;;  %v19012_v7 = vld [vmem:[%s20702_s9 + $0xa24] sm:$0xf0]  ;;  %v14246_v9 = vor.u32 %v19102_v0, %v14245_v63  ;;  %v14205_v10 = vld [vmem:[%s20702_s9 + $0xc80] sm:$0xf] }
  0x83   : > { %9663 = vmatpush.bf16.msrb.mxu2 %v14766_v4  ;;  %v14885_v4 = vld [vmem:[%s20702_s9 + $0x11d0] sm:$0xf]  ;;  %v19262_v5 = vld [vmem:[%s20702_s9 + $0x11f4] sm:$0xf0]  ;;  %v19092_v11 = vld [vmem:[%s20702_s9 + $0xca4] sm:$0xf0]  ;;  %v14566_v13 = vor.u32 %v19182_v3, %v14565_v2 }
  0x84   : > { %9676 = vmatpush.bf16.msrb.mxu3 %v15086_v8  ;;  %v13926_v8 = vor.u32 %v19022_v62, %v13925_v60  ;;  %v389_v12 = vld [vmem:[%s20726_s27 + $0x10] sm:$0xff]  ;;  %v19172_v15 = vld [vmem:[%s20702_s9 + $0xf24] sm:$0xf0]  ;;  %v14886_v17 = vor.u32 %v19262_v5, %v14885_v4  ;;  %v15445_v18 = vld [vmem:[%s20702_s9 + $0x1630] sm:$0xf]  ;;  %v14206_v30 = vor.u32 %v19092_v11, %v14205_v10  ;;  %p18683_p9 = scmp.ne.s32.totalorder %s24544_s22, 1 }
  0x85   : > { %9638 = vmatpush.bf16.msrb.mxu0 %v14086_v14  ;;  %v14525_v14 = vld [vmem:[%s20702_s9 + $0xf00] sm:$0xf]  ;;  %v390_v16 = vld [vmem:[%s20726_s27 + $0x18] sm:$0xff]  ;;  %v15765_v20 = vld [vmem:[%s20702_s9 + $0x18b0] sm:$0xf]  ;;  %v1931_v26 = vunpack.c.l.b16 %v389_v12  ;;  %v1932_v38 = vunpack.c.h.b16 %v389_v12 }
  0x86   : > { %9651 = vmatpush.bf16.msrb.mxu1 %v14406_v19  ;;  %v19402_v19 = vld [vmem:[%s20702_s9 + $0x1654] sm:$0xf0]  ;;  %v16085_v24 = vld [vmem:[%s20702_s9 + $0x1b30] sm:$0xf]  ;;  %v14845_v31 = vld [vmem:[%s20702_s9 + $0x1180] sm:$0xf]  ;;  %v1933_v33 = vunpack.c.l.b16 %v390_v16 }
  0x87   : > { %9664 = vmatpush.bf16.msrb.mxu2 %v14726_v23  ;;  %v19482_v23 = vld [vmem:[%s20702_s9 + $0x18d4] sm:$0xf0]  ;;  %v19252_v32 = vld [vmem:[%s20702_s9 + $0x11a4] sm:$0xf0]  ;;  %v16405_v36 = vld [vmem:[%s20702_s9 + $0x1db0] sm:$0xf]  ;;  %v20889_v48 = vpack.c.b16 %v1931_v26, %v1931_v26  ;;  %v20895_v55 = vpack.c.b16 %v1932_v38, %v1932_v38 }
  0x88   : > { %9677 = vmatpush.bf16.msrb.mxu3 %v15046_v29  ;;  %v19562_v25 = vld [vmem:[%s20702_s9 + $0x1b54] sm:$0xf0]  ;;  %v13886_v29 = vor.u32 %v19012_v7, %v13885_v6  ;;  %v15766_v39 = vor.u32 %v19482_v23, %v15765_v20  ;;  %v19392_v42 = vld [vmem:[%s20702_s9 + $0x1604] sm:$0xf0]  ;;  %v15725_v43 = vld [vmem:[%s20702_s9 + $0x1860] sm:$0xf]  ;;  %v14846_v44 = vor.u32 %v19252_v32, %v14845_v31  ;;  %v20891_v51 = vpack.c.b16 %v1933_v33, %v1933_v33 }
  0x89   : > { %9639 = vmatpush.bf16.msrb.mxu0 %v14046_v34  ;;  %v14526_v34 = vor.u32 %v19172_v15, %v14525_v14  ;;  %v16086_v40 = vor.u32 %v19562_v25, %v16085_v24  ;;  %v19472_v45 = vld [vmem:[%s20702_s9 + $0x1884] sm:$0xf0]  ;;  %v15685_v60 = vld [vmem:[%s20702_s9 + $0x1810] sm:$0xf]  ;;  %v19462_v62 = vld [vmem:[%s20702_s9 + $0x1834] sm:$0xf0] }
  0x8a   : > { %9652 = vmatpush.bf16.msrb.mxu1 %v14366_v35  ;;  %v15446_v35 = vor.u32 %v19402_v19, %v15445_v18  ;;  %v19632_v54 = vld [vmem:[%s20702_s9 + $0x1d84] sm:$0xf0]  ;;  %v15726_v56 = vor.u32 %v19472_v45, %v15725_v43  ;;  %v16005_v63 = vld [vmem:[%s20702_s9 + $0x1a90] sm:$0xf]  ;;  %v19542_v0 = vld [vmem:[%s20702_s9 + $0x1ab4] sm:$0xf0]  ;;  %v15686_v5 = vor.u32 %v19462_v62, %v15685_v60 }
  0x8b   : > { %9665 = vmatpush.bf16.msrb.mxu2 %v14686_v37  ;;  %v19642_v37 = vld [vmem:[%s20702_s9 + $0x1dd4] sm:$0xf0]  ;;  %v16325_v3 = vld [vmem:[%s20702_s9 + $0x1d10] sm:$0xf]  ;;  %v16006_v6 = vor.u32 %v19542_v0, %v16005_v63  ;;  %v15325_v7 = vld [vmem:[%s20702_s9 + $0x1540] sm:$0xf] }
  0x8c   : > { %9678 = vmatpush.bf16.msrb.mxu3 %v15006_v41  ;;  %v15405_v41 = vld [vmem:[%s20702_s9 + $0x15e0] sm:$0xf]  ;;  %v16406_v50 = vor.u32 %v19642_v37, %v16405_v36  ;;  %v19622_v4 = vld [vmem:[%s20702_s9 + $0x1d34] sm:$0xf0]  ;;  %v19452_v10 = vld [vmem:[%s20702_s9 + $0x17e4] sm:$0xf0] }
  0x8d   : > { %9640 = vmatpush.bf16.msrb.mxu0 %v14006_v46  ;;  %v16045_v46 = vld [vmem:[%s20702_s9 + $0x1ae0] sm:$0xf]  ;;  %v15406_v52 = vor.u32 %v19392_v42, %v15405_v41  ;;  %v19532_v12 = vld [vmem:[%s20702_s9 + $0x1a64] sm:$0xf0]  ;;  %v15285_v19 = vld [vmem:[%s20702_s9 + $0x14f0] sm:$0xf] }
  0x8e   : > { %9653 = vmatpush.bf16.msrb.mxu1 %v14326_v47  ;;  %v19552_v47 = vld [vmem:[%s20702_s9 + $0x1b04] sm:$0xf0]  ;;  %v15965_v11 = vld [vmem:[%s20702_s9 + $0x1a40] sm:$0xf]  ;;  %v19362_v20 = vld [vmem:[%s20702_s9 + $0x1514] sm:$0xf0] }
  0x8f   : > { %9666 = vmatpush.bf16.msrb.mxu2 %v14646_v49  ;;  %v1934_v49 = vunpack.c.h.b16 %v390_v16  ;;  %v16046_v57 = vor.u32 %v19552_v47, %v16045_v46  ;;  %v16285_v15 = vld [vmem:[%s20702_s9 + $0x1cc0] sm:$0xf]  ;;  %v19612_v16 = vld [vmem:[%s20702_s9 + $0x1ce4] sm:$0xf0]  ;;  %v15966_v18 = vor.u32 %v19532_v12, %v15965_v11  ;;  %v15605_v23 = vld [vmem:[%s20702_s9 + $0x1770] sm:$0xf] }
  0x90   : > { %9679 = vmatpush.bf16.msrb.mxu3 %v14966_v53  ;;  %v16365_v53 = vld [vmem:[%s20702_s9 + $0x1d60] sm:$0xf]  ;;  %v19442_v24 = vld [vmem:[%s20702_s9 + $0x1794] sm:$0xf0]  ;;  %v15925_v25 = vld [vmem:[%s20702_s9 + $0x19f0] sm:$0xf] }
  0x91   : > { %9641 = vmatpush.bf16.msrb.mxu0 %v13966_v58  ;;  %v15365_v58 = vld [vmem:[%s20702_s9 + $0x1590] sm:$0xf]  ;;  %v19522_v26 = vld [vmem:[%s20702_s9 + $0x1a14] sm:$0xf0]  ;;  %v15606_v33 = vor.u32 %v19442_v24, %v15605_v23  ;;  %v19352_v36 = vld [vmem:[%s20702_s9 + $0x14c4] sm:$0xf0] }
  0x92   : > { %9654 = vmatpush.bf16.msrb.mxu1 %v14286_v59  ;;  %v19382_v59 = vld [vmem:[%s20702_s9 + $0x15b4] sm:$0xf0]  ;;  %v16245_v31 = vld [vmem:[%s20702_s9 + $0x1c70] sm:$0xf]  ;;  %v15565_v37 = vld [vmem:[%s20702_s9 + $0x1720] sm:$0xf] }
  0x93   : > { %9667 = vmatpush.bf16.msrb.mxu2 %v14606_v61  ;;  %v20901_v61 = vpack.c.b16 %v1934_v49, %v1934_v49  ;;  %v15366_v2 = vor.u32 %v19382_v59, %v15365_v58  ;;  %v19602_v32 = vld [vmem:[%s20702_s9 + $0x1c94] sm:$0xf0]  ;;  %v19432_v38 = vld [vmem:[%s20702_s9 + $0x1744] sm:$0xf0]  ;;  %v16205_v43 = vld [vmem:[%s20702_s9 + $0x1c20] sm:$0xf] }
  0x94   : > { %9680 = vmatpush.bf16.msrb.mxu3 %v14926_v1  ;;  %v16366_v1 = vor.u32 %v19632_v54, %v16365_v53  ;;  %v16246_v41 = vor.u32 %v19602_v32, %v16245_v31  ;;  %v15566_v45 = vor.u32 %v19432_v38, %v15565_v37  ;;  %v15205_v47 = vld [vmem:[%s20702_s9 + $0x1450] sm:$0xf]  ;;  %v19342_v49 = vld [vmem:[%s20702_s9 + $0x1474] sm:$0xf0]  ;;  %v15165_v59 = vld [vmem:[%s20702_s9 + $0x1400] sm:$0xf] }
  0x95   : > { %9642 = vmatpush.bf16.msrb.mxu0 %v13926_v8  ;;  %v19372_v8 = vld [vmem:[%s20702_s9 + $0x1564] sm:$0xf0]  ;;  %v15845_v53 = vld [vmem:[%s20702_s9 + $0x1950] sm:$0xf]  ;;  %v19502_v54 = vld [vmem:[%s20702_s9 + $0x1974] sm:$0xf0]  ;;  %v15206_v60 = vor.u32 %v19342_v49, %v15205_v47 }
  0x96   : > { %9655 = vmatpush.bf16.msrb.mxu1 %v14246_v9  ;;  %v15645_v9 = vld [vmem:[%s20702_s9 + $0x17c0] sm:$0xf]  ;;  %v15326_v14 = vor.u32 %v19372_v8, %v15325_v7  ;;  %v19582_v58 = vld [vmem:[%s20702_s9 + $0x1bf4] sm:$0xf0]  ;;  %v19332_v62 = vld [vmem:[%s20702_s9 + $0x1424] sm:$0xf0] }
  0x97   : > { %9668 = vmatpush.bf16.msrb.mxu2 %v14566_v13  ;;  %v16326_v13 = vor.u32 %v19622_v4, %v16325_v3  ;;  %v15485_v63 = vld [vmem:[%s20702_s9 + $0x1680] sm:$0xf]  ;;  %v19412_v0 = vld [vmem:[%s20702_s9 + $0x16a4] sm:$0xf0]  ;;  %v391_v4 = vld [vmem:[%s20726_s27 + $0x20] sm:$0xff] }
  0x98   : > { %9681 = vmatpush.bf16.msrb.mxu3 %v14886_v17  ;;  %v15646_v17 = vor.u32 %v19452_v10, %v15645_v9  ;;  %v15805_v3 = vld [vmem:[%s20702_s9 + $0x1900] sm:$0xf]  ;;  %v16725_v7 = vld [vmem:[%s20702_s9 + $0x2030] sm:$0xf]  ;;  %v19722_v8 = vld [vmem:[%s20702_s9 + $0x2054] sm:$0xf0]  ;;  %v1936_v23 = vunpack.c.h.b16 %v391_v4 }
  0x99   : > { %9643 = vmatpush.bf16.msrb.mxu0 %v13886_v29  ;;  %v16286_v29 = vor.u32 %v19612_v16, %v16285_v15  ;;  %v17045_v10 = vld [vmem:[%s20702_s9 + $0x22b0] sm:$0xf]  ;;  %v19802_v11 = vld [vmem:[%s20702_s9 + $0x22d4] sm:$0xf0]  ;;  %v16125_v15 = vld [vmem:[%s20702_s9 + $0x1b80] sm:$0xf]  ;;  %v16726_v24 = vor.u32 %v19722_v8, %v16725_v7 }
  0x9a   : > { %9656 = vmatpush.bf16.msrb.mxu1 %v14206_v30  ;;  %v15286_v30 = vor.u32 %v19362_v20, %v15285_v19  ;;  %v17365_v12 = vld [vmem:[%s20702_s9 + $0x2530] sm:$0xf]  ;;  %v19572_v16 = vld [vmem:[%s20702_s9 + $0x1ba4] sm:$0xf0]  ;;  %v15486_v19 = vor.u32 %v19412_v0, %v15485_v63 }
  0x9b   : > { %9669 = vmatpush.bf16.msrb.mxu2 %v14526_v34  ;;  %v15926_v34 = vor.u32 %v19522_v26, %v15925_v25  ;;  %v17046_v25 = vor.u32 %v19802_v11, %v17045_v10  ;;  %v17685_v26 = vld [vmem:[%s20702_s9 + $0x27b0] sm:$0xf]  ;;  %v16126_v32 = vor.u32 %v19572_v16, %v16125_v15  ;;  %v19792_v38 = vld [vmem:[%s20702_s9 + $0x2284] sm:$0xf0]  ;;  %v19762_v16 = vld [vmem:[%s20702_s9 + $0x2194] sm:$0xf0] }
  0x9c   : > { %9682 = vmatpush.bf16.msrb.mxu3 %v14846_v44  ;;  %9644 = vmatmul.bf16.vlgmr.msrb.gmra.mxu0 %v20889_v48  ;;  %v19592_v44 = vld [vmem:[%s20702_s9 + $0x1c44] sm:$0xf0]  ;;  %v16885_v15 = vld [vmem:[%s20702_s9 + $0x2170] sm:$0xf] }
  0x9d   : > { %9688 = vmatpush.bf16.msra.mxu0 %v15446_v35  ;;  %9657 = vmatmul.bf16.vlgmr.msrb.gmra.mxu1 %v20895_v55  ;;  %v15245_v35 = vld [vmem:[%s20702_s9 + $0x14a0] sm:$0xf]  ;;  %v19932_v10 = vld [vmem:[%s20702_s9 + $0x26e4] sm:$0xf0] }
  0x9e   : > { %9701 = vmatpush.bf16.msra.mxu1 %v15766_v39  ;;  %9670 = vmatmul.bf16.vlgmr.msrb.gmra.mxu2 %v20891_v51  ;;  %v15885_v39 = vld [vmem:[%s20702_s9 + $0x19a0] sm:$0xf]  ;;  %v15246_v42 = vor.u32 %v19352_v36, %v15245_v35 }
  0x9f   : > { %9714 = vmatpush.bf16.msra.mxu2 %v16086_v40  ;;  %9683 = vmatmul.bf16.vlgmr.msrb.gmra.mxu3 %v20901_v61  ;;  %v19512_v40 = vld [vmem:[%s20702_s9 + $0x19c4] sm:$0xf0]  ;;  %v17005_v35 = vld [vmem:[%s20702_s9 + $0x2260] sm:$0xf] }
  0xa0   : > { %9727 = vmatpush.bf16.msra.mxu3 %v16406_v50  ;;  %v15886_v46 = vor.u32 %v19512_v40, %v15885_v39  ;;  %v15525_v50 = vld [vmem:[%s20702_s9 + $0x16d0] sm:$0xf]  ;;  %v17325_v39 = vld [vmem:[%s20702_s9 + $0x24e0] sm:$0xf]  ;;  %v19872_v40 = vld [vmem:[%s20702_s9 + $0x2504] sm:$0xf0]  ;;  %v17006_v47 = vor.u32 %v19792_v38, %v17005_v35 }
  0xa1   : > { %9689 = vmatpush.bf16.msra.mxu0 %v15406_v52  ;;  %v19422_v52 = vld [vmem:[%s20702_s9 + $0x16f4] sm:$0xf0]  ;;  %v17326_v49 = vor.u32 %v19872_v40, %v17325_v39  ;;  %v17485_v39 = vld [vmem:[%s20702_s9 + $0x2620] sm:$0xf]  ;;  %v19912_v40 = vld [vmem:[%s20702_s9 + $0x2644] sm:$0xf0] }
  0xa2   : > { %9702 = vmatpush.bf16.msra.mxu1 %v15726_v56  ;;  %v16206_v56 = vor.u32 %v19592_v44, %v16205_v43 }
  0xa3   : > { %9715 = vmatpush.bf16.msra.mxu2 %v16046_v57  ;;  %v16165_v57 = vld [vmem:[%s20702_s9 + $0x1bd0] sm:$0xf] }
  0xa4   : > { %9728 = vmatpush.bf16.msra.mxu3 %v16366_v1  ;;  %v15526_v1 = vor.u32 %v19422_v52, %v15525_v50  ;;  %v16166_v9 = vor.u32 %v19582_v58, %v16165_v57  ;;  %v16645_v50 = vld [vmem:[%s20702_s9 + $0x1f90] sm:$0xf]  ;;  %v19702_v52 = vld [vmem:[%s20702_s9 + $0x1fb4] sm:$0xf0] }
  0xa5   : > { %9690 = vmatpush.bf16.msra.mxu0 %v15366_v2  ;;  %v15846_v2 = vor.u32 %v19502_v54, %v15845_v53  ;;  %v16965_v53 = vld [vmem:[%s20702_s9 + $0x2210] sm:$0xf]  ;;  %v19782_v54 = vld [vmem:[%s20702_s9 + $0x2234] sm:$0xf0] }
  0xa6   : > { %9703 = vmatpush.bf16.msra.mxu1 %v15686_v5  ;;  %v392_v5 = vld [vmem:[%s20726_s27 + $0x28] sm:$0xff]  ;;  %v16966_v63 = vor.u32 %v19782_v54, %v16965_v53  ;;  %v17486_v53 = vor.u32 %v19912_v40, %v17485_v39  ;;  %v17445_v54 = vld [vmem:[%s20702_s9 + $0x25d0] sm:$0xf]  ;;  %v18605_v39 = vld [vmem:[%s20702_s9 + $0x2ee0] sm:$0xf] }
  0xa7   : > { %9716 = vmatpush.bf16.msra.mxu2 %v16006_v6  ;;  %v19492_v6 = vld [vmem:[%s20702_s9 + $0x1924] sm:$0xf0]  ;;  %v19862_v57 = vld [vmem:[%s20702_s9 + $0x24b4] sm:$0xf0] }
  0xa8   : > { %9729 = vmatpush.bf16.msra.mxu3 %v16326_v13  ;;  %v15166_v13 = vor.u32 %v19332_v62, %v15165_v59  ;;  %v15806_v20 = vor.u32 %v19492_v6, %v15805_v3  ;;  %v16646_v59 = vor.u32 %v19702_v52, %v16645_v50  ;;  %v19942_v62 = vld [vmem:[%s20702_s9 + $0x2734] sm:$0xf0]  ;;  %v16925_v3 = vld [vmem:[%s20702_s9 + $0x21c0] sm:$0xf]  ;;  %v19852_v6 = vld [vmem:[%s20702_s9 + $0x2464] sm:$0xf0] }
  0xa9   : > { %9691 = vmatpush.bf16.msra.mxu0 %v15326_v14  ;;  %v19882_v14 = vld [vmem:[%s20702_s9 + $0x2554] sm:$0xf0]  ;;  %v17125_v50 = vld [vmem:[%s20702_s9 + $0x2350] sm:$0xf]  ;;  %v20192_v40 = vld [vmem:[%s20702_s9 + $0x2f04] sm:$0xf0] }
  0xaa   : > { %9704 = vmatpush.bf16.msra.mxu1 %v15646_v17  ;;  %v1935_v17 = vunpack.c.l.b16 %v391_v4  ;;  %v17366_v31 = vor.u32 %v19882_v14, %v17365_v12  ;;  %v19772_v4 = vld [vmem:[%s20702_s9 + $0x21e4] sm:$0xf0]  ;;  %v19682_v14 = vld [vmem:[%s20702_s9 + $0x1f14] sm:$0xf0] }
  0xab   : > { %9717 = vmatpush.bf16.msra.mxu2 %v15966_v18  ;;  %v1937_v18 = vunpack.c.l.b16 %v392_v5  ;;  %v16926_v11 = vor.u32 %v19772_v4, %v16925_v3  ;;  %v19822_v52 = vld [vmem:[%s20702_s9 + $0x2374] sm:$0xf0]  ;;  %v394_v3 = vld [vmem:[%s20726_s27 + $0x38] sm:$0xff] }
  0xac   : > { %9730 = vmatpush.bf16.msra.mxu3 %v16286_v29  ;;  %v19962_v29 = vld [vmem:[%s20702_s9 + $0x27d4] sm:$0xf0]  ;;  %v20964_v36 = vpack.c.b16 %v1935_v17, %v1935_v17  ;;  %v17205_v17 = vld [vmem:[%s20702_s9 + $0x23f0] sm:$0xf]  ;;  %v19812_v4 = vld [vmem:[%s20702_s9 + $0x2324] sm:$0xf0] }
  0xad   : > { %9692 = vmatpush.bf16.msra.mxu0 %v15286_v30  ;;  %v1938_v30 = vunpack.c.h.b16 %v392_v5  ;;  %v20966_v37 = vpack.c.b16 %v1937_v18, %v1937_v18  ;;  %v17245_v5 = vld [vmem:[%s20702_s9 + $0x2440] sm:$0xf]  ;;  %v19842_v18 = vld [vmem:[%s20702_s9 + $0x2414] sm:$0xf0] }
  0xae   : > { %9705 = vmatpush.bf16.msra.mxu1 %v15606_v33  ;;  %v16685_v33 = vld [vmem:[%s20702_s9 + $0x1fe0] sm:$0xf]  ;;  %v17246_v12 = vor.u32 %v19852_v6, %v17245_v5  ;;  %v18005_v5 = vld [vmem:[%s20702_s9 + $0x2a30] sm:$0xf]  ;;  %v20042_v6 = vld [vmem:[%s20702_s9 + $0x2a54] sm:$0xf0] }
  0xaf   : > { %9718 = vmatpush.bf16.msra.mxu2 %v15926_v34  ;;  %v19712_v34 = vld [vmem:[%s20702_s9 + $0x2004] sm:$0xf0]  ;;  %v20973_v43 = vpack.c.b16 %v1938_v30, %v1938_v30 }
  0xb0   : > { %9731 = vmatpush.bf16.msra.mxu3 %v16246_v41  ;;  %v17686_v41 = vor.u32 %v19962_v29, %v17685_v26  ;;  %v16686_v44 = vor.u32 %v19712_v34, %v16685_v33  ;;  %v17206_v26 = vor.u32 %v19842_v18, %v17205_v17  ;;  %v16525_v29 = vld [vmem:[%s20702_s9 + $0x1ea0] sm:$0xf]  ;;  %v19672_v30 = vld [vmem:[%s20702_s9 + $0x1ec4] sm:$0xf0] }
  0xb1   : > { %9693 = vmatpush.bf16.msra.mxu0 %v15246_v42  ;;  %v20971_v42 = vpack.c.b16 %v1936_v23, %v1936_v23  ;;  %v17525_v23 = vld [vmem:[%s20702_s9 + $0x2670] sm:$0xf]  ;;  %v17165_v33 = vld [vmem:[%s20702_s9 + $0x23a0] sm:$0xf]  ;;  %v19832_v34 = vld [vmem:[%s20702_s9 + $0x23c4] sm:$0xf0]  ;;  %v16526_v38 = vor.u32 %v19672_v30, %v16525_v29 }
  0xb2   : > { %9706 = vmatpush.bf16.msra.mxu1 %v15566_v45  ;;  %v17645_v45 = vld [vmem:[%s20702_s9 + $0x2760] sm:$0xf] }
  0xb3   : > { %9719 = vmatpush.bf16.msra.mxu2 %v15886_v46  ;;  %v19952_v46 = vld [vmem:[%s20702_s9 + $0x2784] sm:$0xf0] }
  0xb4   : > { %9732 = vmatpush.bf16.msra.mxu3 %v16206_v56  ;;  %v17285_v56 = vld [vmem:[%s20702_s9 + $0x2490] sm:$0xf]  ;;  %v17646_v58 = vor.u32 %v19952_v46, %v17645_v45  ;;  %v19662_v46 = vld [vmem:[%s20702_s9 + $0x1e74] sm:$0xf0] }
  0xb5   : > { %9694 = vmatpush.bf16.msra.mxu0 %v15206_v60  ;;  %v17605_v60 = vld [vmem:[%s20702_s9 + $0x2710] sm:$0xf]  ;;  %v17286_v0 = vor.u32 %v19862_v57, %v17285_v56  ;;  %v19902_v56 = vld [vmem:[%s20702_s9 + $0x25f4] sm:$0xf0]  ;;  %v16445_v57 = vld [vmem:[%s20702_s9 + $0x1e00] sm:$0xf] }
  0xb6   : > { %9707 = vmatpush.bf16.msra.mxu1 %v15526_v1  ;;  %v16605_v1 = vld [vmem:[%s20702_s9 + $0x1f40] sm:$0xf]  ;;  %v17606_v7 = vor.u32 %v19942_v62, %v17605_v60  ;;  %v16485_v45 = vld [vmem:[%s20702_s9 + $0x1e50] sm:$0xf]  ;;  %v19732_v62 = vld [vmem:[%s20702_s9 + $0x20a4] sm:$0xf0] }
  0xb7   : > { %9720 = vmatpush.bf16.msra.mxu2 %v15846_v2  ;;  %v19692_v2 = vld [vmem:[%s20702_s9 + $0x1f64] sm:$0xf0]  ;;  %v16765_v60 = vld [vmem:[%s20702_s9 + $0x2080] sm:$0xf] }
  0xb8   : > { %9733 = vmatpush.bf16.msra.mxu3 %v16166_v9  ;;  %v16606_v8 = vor.u32 %v19692_v2, %v16605_v1  ;;  %v17565_v9 = vld [vmem:[%s20702_s9 + $0x26c0] sm:$0xf]  ;;  %v16766_v17 = vor.u32 %v19732_v62, %v16765_v60 }
  0xb9   : > { %9695 = vmatpush.bf16.msra.mxu0 %v15166_v13  ;;  %v16565_v13 = vld [vmem:[%s20702_s9 + $0x1ef0] sm:$0xf]  ;;  %v17085_v1 = vld [vmem:[%s20702_s9 + $0x2300] sm:$0xf] }
  0xba   : > { %9708 = vmatpush.bf16.msra.mxu1 %v15486_v19  ;;  %v17566_v19 = vor.u32 %v19932_v10, %v17565_v9  ;;  %v393_v2 = vld [vmem:[%s20726_s27 + $0x30] sm:$0xff]  ;;  %v20122_v9 = vld [vmem:[%s20702_s9 + $0x2cd4] sm:$0xf0]  ;;  %v18645_v10 = vld [vmem:[%s20702_s9 + $0x2f30] sm:$0xf]  ;;  %v17086_v18 = vor.u32 %v19812_v4, %v17085_v1 }
  0xbb   : > { %9721 = vmatpush.bf16.msra.mxu2 %v15806_v20  ;;  %v16566_v20 = vor.u32 %v19682_v14, %v16565_v13  ;;  %v17405_v13 = vld [vmem:[%s20702_s9 + $0x2580] sm:$0xf]  ;;  %v19892_v14 = vld [vmem:[%s20702_s9 + $0x25a4] sm:$0xf0] }
  0xbc   : > { %9734 = vmatpush.bf16.msra.mxu3 %v16126_v32  ;;  %9696 = vmatmul.bf16.vlgmr.msra.gmra.mxu0 %v20964_v36  ;;  %v19752_v32 = vld [vmem:[%s20702_s9 + $0x2144] sm:$0xf0]  ;;  %v17406_v30 = vor.u32 %v19892_v14, %v17405_v13 }
  0xbd   : > { %9740 = vmatpush.bf16.msrb.mxu0 %v16726_v24  ;;  %9709 = vmatmul.bf16.vlgmr.msra.gmra.mxu1 %v20971_v42  ;;  %v19922_v24 = vld [vmem:[%s20702_s9 + $0x2694] sm:$0xf0]  ;;  %v20012_v4 = vld [vmem:[%s20702_s9 + $0x2964] sm:$0xf0] }
  0xbe   : > { %9753 = vmatpush.bf16.msrb.mxu1 %v17046_v25  ;;  %9722 = vmatmul.bf16.vlgmr.msra.gmra.mxu2 %v20966_v37  ;;  %v16886_v25 = vor.u32 %v19762_v16, %v16885_v15  ;;  %v17526_v35 = vor.u32 %v19922_v24, %v17525_v23  ;;  %v1939_v15 = vunpack.c.l.b16 %v393_v2  ;;  %v1941_v16 = vunpack.c.l.b16 %v394_v3  ;;  %v18757_v24 = vld [vmem:[%s20702_s9 + $0x234] sm:$0xf] }
  0xbf   : > { %9766 = vmatpush.bf16.msrb.mxu2 %v17366_v31  ;;  %9735 = vmatmul.bf16.vlgmr.msra.gmra.mxu3 %v20973_v43  ;;  %v16845_v31 = vld [vmem:[%s20702_s9 + $0x2120] sm:$0xf] }
  0xc0   : > { %9779 = vmatpush.bf16.msrb.mxu3 %v17686_v41  ;;  %v16846_v41 = vor.u32 %v19752_v32, %v16845_v31  ;;  %v17965_v31 = vld [vmem:[%s20702_s9 + $0x29e0] sm:$0xf]  ;;  %v20032_v32 = vld [vmem:[%s20702_s9 + $0x2a04] sm:$0xf0] }
  0xc1   : > { %9741 = vmatpush.bf16.msrb.mxu0 %v16686_v44  ;;  %v17166_v44 = vor.u32 %v19832_v34, %v17165_v33  ;;  %v18285_v33 = vld [vmem:[%s20702_s9 + $0x2c60] sm:$0xf]  ;;  %v21042_v34 = vpack.c.b16 %v1939_v15, %v1939_v15  ;;  %v17845_v15 = vld [vmem:[%s20702_s9 + $0x28f0] sm:$0xf] }
  0xc2   : > { %9754 = vmatpush.bf16.msrb.mxu1 %v17006_v47  ;;  %v16805_v47 = vld [vmem:[%s20702_s9 + $0x20d0] sm:$0xf] }
  0xc3   : > { %9767 = vmatpush.bf16.msrb.mxu2 %v17326_v49  ;;  %v19742_v49 = vld [vmem:[%s20702_s9 + $0x20f4] sm:$0xf0] }
  0xc4   : > { %9780 = vmatpush.bf16.msrb.mxu3 %v17646_v58  ;;  %v16486_v58 = vor.u32 %v19662_v46, %v16485_v45  ;;  %v17966_v46 = vor.u32 %v20032_v32, %v17965_v31  ;;  %v17805_v31 = vld [vmem:[%s20702_s9 + $0x28a0] sm:$0xf]  ;;  %v19992_v32 = vld [vmem:[%s20702_s9 + $0x28c4] sm:$0xf0] }
  0xc5   : > { %9742 = vmatpush.bf16.msrb.mxu0 %v16646_v59  ;;  %v19652_v59 = vld [vmem:[%s20702_s9 + $0x1e24] sm:$0xf0] }
  0xc6   : > { %9755 = vmatpush.bf16.msrb.mxu1 %v16966_v63  ;;  %v16806_v63 = vor.u32 %v19742_v49, %v16805_v47  ;;  %v18747_v47 = vld [vmem:[%s20702_s9 + $0x1e4] sm:$0xf]  ;;  %v12847_v49 = vld [vmem:[%s20702_s9 + $0x208] sm:$0xf0] }
  0xc7   : > { %9768 = vmatpush.bf16.msrb.mxu2 %v17286_v0  ;;  %v17126_v0 = vor.u32 %v19822_v52, %v17125_v50  ;;  %v18606_v52 = vor.u32 %v20192_v40, %v18605_v39  ;;  %v12850_v60 = vor.u32 %v18747_v47, %v12847_v49  ;;  %v18445_v39 = vld [vmem:[%s20702_s9 + $0x2da0] sm:$0xf]  ;;  %v20152_v40 = vld [vmem:[%s20702_s9 + $0x2dc4] sm:$0xf0]  ;;  %v18707_v47 = vld [vmem:[%s20702_s9 + $0xa4] sm:$0xf] }
  0xc8   : > { %9781 = vmatpush.bf16.msrb.mxu3 %v17606_v7  ;;  %v17446_v7 = vor.u32 %v19902_v56, %v17445_v54  ;;  %v20022_v54 = vld [vmem:[%s20702_s9 + $0x29b4] sm:$0xf0]  ;;  %v18245_v56 = vld [vmem:[%s20702_s9 + $0x2c10] sm:$0xf]  ;;  %v12687_v49 = vld [vmem:[%s20702_s9 + $0xc8] sm:$0xf0] }
  0xc9   : > { %9743 = vmatpush.bf16.msrb.mxu0 %v16606_v8  ;;  %v18325_v8 = vld [vmem:[%s20702_s9 + $0x2cb0] sm:$0xf] }
  0xca   : > { %9756 = vmatpush.bf16.msrb.mxu1 %v16926_v11  ;;  %v16446_v11 = vor.u32 %v19652_v59, %v16445_v57  ;;  %v18326_v23 = vor.u32 %v20122_v9, %v18325_v8  ;;  %v20102_v57 = vld [vmem:[%s20702_s9 + $0x2c34] sm:$0xf0]  ;;  %v20172_v8 = vld [vmem:[%s20702_s9 + $0x2e64] sm:$0xf0] }
  0xcb   : > { %9769 = vmatpush.bf16.msrb.mxu2 %v17246_v12  ;;  %v20202_v12 = vld [vmem:[%s20702_s9 + $0x2f54] sm:$0xf0]  ;;  %v18246_v1 = vor.u32 %v20102_v57, %v18245_v56  ;;  %v18085_v56 = vld [vmem:[%s20702_s9 + $0x2ad0] sm:$0xf] }
  0xcc   : > { %9782 = vmatpush.bf16.msrb.mxu3 %v17566_v19  ;;  %v1940_v19 = vunpack.c.h.b16 %v393_v2  ;;  %v18646_v29 = vor.u32 %v20202_v12, %v18645_v10  ;;  %v20182_v59 = vld [vmem:[%s20702_s9 + $0x2eb4] sm:$0xf0]  ;;  %v12767_v12 = vld [vmem:[%s20702_s9 + $0x168] sm:$0xf0] }
  0xcd   : > { %9744 = vmatpush.bf16.msrb.mxu0 %v16566_v20  ;;  %v18006_v20 = vor.u32 %v20042_v6, %v18005_v5  ;;  %v18205_v5 = vld [vmem:[%s20702_s9 + $0x2bc0] sm:$0xf]  ;;  %v20092_v6 = vld [vmem:[%s20702_s9 + $0x2be4] sm:$0xf0]  ;;  %v20062_v57 = vld [vmem:[%s20702_s9 + $0x2af4] sm:$0xf0] }
  0xce   : > { %9757 = vmatpush.bf16.msrb.mxu1 %v16886_v25  ;;  %v12887_v25 = vld [vmem:[%s20702_s9 + $0x258] sm:$0xf0]  ;;  %v18206_v13 = vor.u32 %v20092_v6, %v18205_v5  ;;  %v18086_v5 = vor.u32 %v20062_v57, %v18085_v56 }
  0xcf   : > { %9770 = vmatpush.bf16.msrb.mxu2 %v17206_v26  ;;  %v1942_v26 = vunpack.c.h.b16 %v394_v3  ;;  %v17885_v3 = vld [vmem:[%s20702_s9 + $0x2940] sm:$0xf] }
  0xd0   : > { %9783 = vmatpush.bf16.msrb.mxu3 %v17526_v35  ;;  %v21044_v35 = vpack.c.b16 %v1941_v16, %v1941_v16  ;;  %v17886_v10 = vor.u32 %v20012_v4, %v17885_v3  ;;  %v20002_v16 = vld [vmem:[%s20702_s9 + $0x2914] sm:$0xf0]  ;;  %v18045_v3 = vld [vmem:[%s20702_s9 + $0x2a80] sm:$0xf]  ;;  %v20052_v4 = vld [vmem:[%s20702_s9 + $0x2aa4] sm:$0xf0] }
  0xd1   : > { %9745 = vmatpush.bf16.msrb.mxu0 %v16526_v38  ;;  %v20112_v38 = vld [vmem:[%s20702_s9 + $0x2c84] sm:$0xf0]  ;;  %v21051_v45 = vpack.c.b16 %v1942_v26, %v1942_v26  ;;  %v12727_v26 = vld [vmem:[%s20702_s9 + $0x118] sm:$0xf0] }
  0xd2   : > { %9758 = vmatpush.bf16.msrb.mxu1 %v16846_v41  ;;  %v12890_v41 = vor.u32 %v18757_v24, %v12887_v25  ;;  %v18286_v50 = vor.u32 %v20112_v38, %v18285_v33  ;;  %v17846_v24 = vor.u32 %v20002_v16, %v17845_v15  ;;  %v18717_v25 = vld [vmem:[%s20702_s9 + $0xf4] sm:$0xf]  ;;  %v18125_v33 = vld [vmem:[%s20702_s9 + $0x2b20] sm:$0xf]  ;;  %v20072_v38 = vld [vmem:[%s20702_s9 + $0x2b44] sm:$0xf0] }
  0xd3   : > { %9771 = vmatpush.bf16.msrb.mxu2 %v17166_v44  ;;  %v21049_v44 = vpack.c.b16 %v1940_v19, %v1940_v19  ;;  %v18485_v19 = vld [vmem:[%s20702_s9 + $0x2df0] sm:$0xf]  ;;  %v13527_v15 = vld [vmem:[%s20702_s9 + $0x758] sm:$0xf0]  ;;  %v18997_v16 = vld [vmem:[%s20702_s9 + $0x9b4] sm:$0xf] }
  0xd4   : > { %9784 = vmatpush.bf16.msrb.mxu3 %v17486_v53  ;;  %v17925_v53 = vld [vmem:[%s20702_s9 + $0x2990] sm:$0xf] }
  0xd5   : > { %9746 = vmatpush.bf16.msrb.mxu0 %v16486_v58  ;;  %v18565_v58 = vld [vmem:[%s20702_s9 + $0x2e90] sm:$0xf]  ;;  %v17926_v62 = vor.u32 %v20022_v54, %v17925_v53  ;;  %v19982_v54 = vld [vmem:[%s20702_s9 + $0x2874] sm:$0xf0] }
  0xd6   : > { %9759 = vmatpush.bf16.msrb.mxu1 %v16806_v63  ;;  %v18737_v63 = vld [vmem:[%s20702_s9 + $0x194] sm:$0xf]  ;;  %v18566_v2 = vor.u32 %v20182_v59, %v18565_v58  ;;  %v17765_v53 = vld [vmem:[%s20702_s9 + $0x2850] sm:$0xf]  ;;  %v20142_v59 = vld [vmem:[%s20702_s9 + $0x2d74] sm:$0xf0] }
  0xd7   : > { %9772 = vmatpush.bf16.msrb.mxu2 %v17126_v0  ;;  %v12807_v0 = vld [vmem:[%s20702_s9 + $0x1b8] sm:$0xf0]  ;;  %v18405_v58 = vld [vmem:[%s20702_s9 + $0x2d50] sm:$0xf] }
  0xd8   : > { %9785 = vmatpush.bf16.msrb.mxu3 %v17446_v7  ;;  %v18525_v7 = vld [vmem:[%s20702_s9 + $0x2e40] sm:$0xf]  ;;  %v12810_v9 = vor.u32 %v18737_v63, %v12807_v0  ;;  %v12647_v63 = vld [vmem:[%s20702_s9 + $0x78] sm:$0xf0]  ;;  %v18406_v6 = vor.u32 %v20142_v59, %v18405_v58  ;;  %v19067_v59 = vld [vmem:[%s20702_s9 + $0xbe4] sm:$0xf] }
  0xd9   : > { %9747 = vmatpush.bf16.msrb.mxu0 %v16446_v11  ;;  %v18727_v11 = vld [vmem:[%s20702_s9 + $0x144] sm:$0xf]  ;;  %v18526_v14 = vor.u32 %v20172_v8, %v18525_v7  ;;  %v17725_v0 = vld [vmem:[%s20702_s9 + $0x2800] sm:$0xf]  ;;  %v395_v8 = vld [vmem:[%s20726_s27 + $0x40] sm:$0xff] }
  0xda   : > { %9760 = vmatpush.bf16.msrb.mxu1 %v16766_v17  ;;  %v18165_v17 = vld [vmem:[%s20702_s9 + $0x2b70] sm:$0xf]  ;;  %v18365_v7 = vld [vmem:[%s20702_s9 + $0x2d00] sm:$0xf] }
  0xdb   : > { %9773 = vmatpush.bf16.msrb.mxu2 %v17086_v18  ;;  %v20082_v18 = vld [vmem:[%s20702_s9 + $0x2b94] sm:$0xf0] }
  0xdc   : > { %9786 = vmatpush.bf16.msrb.mxu3 %v17406_v30  ;;  %9748 = vmatmul.bf16.vlgmr.msrb.gmra.mxu0 %v21042_v34 }
  0xdd   : > { %9792 = vmatpush.bf16.msra.mxu0 %v18006_v20  ;;  %9761 = vmatmul.bf16.vlgmr.msrb.gmra.mxu1 %v21049_v44  ;;  %v20162_v20 = vld [vmem:[%s20702_s9 + $0x2e14] sm:$0xf0] }
  0xde   : > { %9805 = vmatpush.bf16.msra.mxu1 %v18326_v23  ;;  %9774 = vmatmul.bf16.vlgmr.msrb.gmra.mxu2 %v21044_v35  ;;  %v12770_v23 = vor.u32 %v18727_v11, %v12767_v12  ;;  %v18486_v30 = vor.u32 %v20162_v20, %v18485_v19  ;;  %v18837_v11 = vld [vmem:[%s20702_s9 + $0x4b4] sm:$0xf]  ;;  %v13207_v12 = vld [vmem:[%s20702_s9 + $0x4d8] sm:$0xf0]  ;;  %v18687_v19 = vld [vmem:[%s20702_s9 + $0x4] sm:$0xf] }
  0xdf   : > { %9818 = vmatpush.bf16.msra.mxu2 %v18646_v29  ;;  %9787 = vmatmul.bf16.vlgmr.msrb.gmra.mxu3 %v21051_v45  ;;  %v18166_v29 = vor.u32 %v20082_v18, %v18165_v17  ;;  %v13847_v18 = vld [vmem:[%s20702_s9 + $0x9d8] sm:$0xf0]  ;;  %v12607_v20 = vld [vmem:[%s20702_s9 + $0x28] sm:$0xf0] }
  0xe0   : > { %9831 = vmatpush.bf16.msra.mxu3 %v12890_v41  ;;  %v12730_v41 = vor.u32 %v18717_v25, %v12727_v26  ;;  %v18046_v25 = vor.u32 %v20052_v4, %v18045_v3  ;;  %v18977_v3 = vld [vmem:[%s20702_s9 + $0x914] sm:$0xf]  ;;  %v13767_v4 = vld [vmem:[%s20702_s9 + $0x938] sm:$0xf0] }
  0xe1   : > { %9793 = vmatpush.bf16.msra.mxu0 %v17966_v46  ;;  %v17806_v46 = vor.u32 %v19992_v32, %v17805_v31  ;;  %v19077_v32 = vld [vmem:[%s20702_s9 + $0xc34] sm:$0xf] }
  0xe2   : > { %9806 = vmatpush.bf16.msra.mxu1 %v18286_v50  ;;  %v18126_v50 = vor.u32 %v20072_v38, %v18125_v33  ;;  %v14167_v33 = vld [vmem:[%s20702_s9 + $0xc58] sm:$0xf0]  ;;  %v18827_v38 = vld [vmem:[%s20702_s9 + $0x464] sm:$0xf] }
  0xe3   : > { %9819 = vmatpush.bf16.msra.mxu2 %v18606_v52  ;;  %v18446_v52 = vor.u32 %v20152_v40, %v18445_v39  ;;  %v13850_v39 = vor.u32 %v18997_v16, %v13847_v18  ;;  %v12610_v40 = vor.u32 %v18687_v19, %v12607_v20  ;;  %v13727_v16 = vld [vmem:[%s20702_s9 + $0x8e8] sm:$0xf0]  ;;  %v19047_v20 = vld [vmem:[%s20702_s9 + $0xb44] sm:$0xf] }
  0xe4   : > { %9832 = vmatpush.bf16.msra.mxu3 %v12850_v60  ;;  %v12690_v60 = vor.u32 %v18707_v47, %v12687_v49  ;;  %v13487_v47 = vld [vmem:[%s20702_s9 + $0x708] sm:$0xf0] }
  0xe5   : > { %9794 = vmatpush.bf16.msra.mxu0 %v17926_v62  ;;  %v18697_v62 = vld [vmem:[%s20702_s9 + $0x54] sm:$0xf] }
  0xe6   : > { %9807 = vmatpush.bf16.msra.mxu1 %v18246_v1  ;;  %v17766_v1 = vor.u32 %v19982_v54, %v17765_v53  ;;  %v13807_v53 = vld [vmem:[%s20702_s9 + $0x988] sm:$0xf0]  ;;  %v14170_v54 = vor.u32 %v19077_v32, %v14167_v33  ;;  %v13687_v32 = vld [vmem:[%s20702_s9 + $0x898] sm:$0xf0] }
  0xe7   : > { %9820 = vmatpush.bf16.msra.mxu2 %v18566_v2  ;;  %v19972_v2 = vld [vmem:[%s20702_s9 + $0x2824] sm:$0xf0] }
  0xe8   : > { %9833 = vmatpush.bf16.msra.mxu3 %v12810_v9  ;;  %v396_v9 = vld [vmem:[%s20726_s27 + $0x48] sm:$0xf]  ;;  %v17726_v17 = vor.u32 %v19972_v2, %v17725_v0  ;;  %v13127_v0 = vld [vmem:[%s20702_s9 + $0x438] sm:$0xf0] }
  0xe9   : > { %9795 = vmatpush.bf16.msra.mxu0 %v17886_v10  ;;  %v20132_v10 = vld [vmem:[%s20702_s9 + $0x2d24] sm:$0xf0]  ;;  %v13447_v2 = vld [vmem:[%s20702_s9 + $0x6b8] sm:$0xf0] }
  0xea   : > { %9808 = vmatpush.bf16.msra.mxu1 %v18206_v13  ;;  %v12650_v13 = vor.u32 %v18697_v62, %v12647_v63  ;;  %v18366_v26 = vor.u32 %v20132_v10, %v18365_v7  ;;  %v18817_v62 = vld [vmem:[%s20702_s9 + $0x414] sm:$0xf]  ;;  %v18807_v10 = vld [vmem:[%s20702_s9 + $0x3c4] sm:$0xf] }
  0xeb   : > { %9821 = vmatpush.bf16.msra.mxu2 %v18526_v14  ;;  %v18917_v14 = vld [vmem:[%s20702_s9 + $0x734] sm:$0xf] }
  0xec   : > { %9834 = vmatpush.bf16.msra.mxu3 %v12770_v23  ;;  %v1943_v23 = vunpack.c.l.b16 %v395_v8  ;;  %v13530_v31 = vor.u32 %v18917_v14, %v13527_v15  ;;  %v13407_v14 = vld [vmem:[%s20702_s9 + $0x668] sm:$0xf0]  ;;  %v18967_v15 = vld [vmem:[%s20702_s9 + $0x8c4] sm:$0xf] }
  0xed   : > { %9796 = vmatpush.bf16.msra.mxu0 %v17846_v24  ;;  %v1945_v24 = vunpack.c.l.b16 %v396_v9  ;;  %v14087_v9 = vld [vmem:[%s20702_s9 + $0xbb8] sm:$0xf0] }
  0xee   : > { %9809 = vmatpush.bf16.msra.mxu1 %v18166_v29  ;;  %v1944_v29 = vunpack.c.h.b16 %v395_v8  ;;  %v21121_v49 = vpack.c.b16 %v1943_v23, %v1943_v23  ;;  %v19057_v8 = vld [vmem:[%s20702_s9 + $0xb94] sm:$0xf]  ;;  %v14047_v23 = vld [vmem:[%s20702_s9 + $0xb68] sm:$0xf0] }
  0xef   : > { %9822 = vmatpush.bf16.msra.mxu2 %v18486_v30  ;;  %v13210_v30 = vor.u32 %v18837_v11, %v13207_v12  ;;  %v13770_v11 = vor.u32 %v18977_v3, %v13767_v4  ;;  %v13087_v12 = vld [vmem:[%s20702_s9 + $0x3e8] sm:$0xf0]  ;;  %v14050_v33 = vor.u32 %v19047_v20, %v14047_v23  ;;  %v18777_v3 = vld [vmem:[%s20702_s9 + $0x2d4] sm:$0xf]  ;;  %v18847_v23 = vld [vmem:[%s20702_s9 + $0x504] sm:$0xf] }
  0xf0   : > { %9835 = vmatpush.bf16.msra.mxu3 %v12730_v41  ;;  %v13167_v41 = vld [vmem:[%s20702_s9 + $0x488] sm:$0xf0]  ;;  %v21127_v56 = vpack.c.b16 %v1944_v29, %v1944_v29  ;;  %v13090_v18 = vor.u32 %v18807_v10, %v13087_v12  ;;  %v18877_v29 = vld [vmem:[%s20702_s9 + $0x5f4] sm:$0xf]  ;;  %v13607_v10 = vld [vmem:[%s20702_s9 + $0x7f8] sm:$0xf0] }
  0xf1   : > { %9797 = vmatpush.bf16.msra.mxu0 %v17806_v46  ;;  %v18907_v46 = vld [vmem:[%s20702_s9 + $0x6e4] sm:$0xf]  ;;  %v13170_v57 = vor.u32 %v18827_v38, %v13167_v41  ;;  %v14007_v41 = vld [vmem:[%s20702_s9 + $0xb18] sm:$0xf0]  ;;  %v12927_v20 = vld [vmem:[%s20702_s9 + $0x2a8] sm:$0xf0] }
  0xf2   : > { %9810 = vmatpush.bf16.msra.mxu1 %v18126_v50  ;;  %v21123_v50 = vpack.c.b16 %v1945_v24, %v1945_v24  ;;  %v13490_v58 = vor.u32 %v18907_v46, %v13487_v47  ;;  %v18797_v24 = vld [vmem:[%s20702_s9 + $0x374] sm:$0xf]  ;;  %v18787_v46 = vld [vmem:[%s20702_s9 + $0x324] sm:$0xf] }
  0xf3   : > { %9823 = vmatpush.bf16.msra.mxu2 %v18446_v52  ;;  %v18987_v52 = vld [vmem:[%s20702_s9 + $0x964] sm:$0xf] }
  0xf4   : > { %9836 = vmatpush.bf16.msra.mxu3 %v12690_v60  ;;  %v14127_v60 = vld [vmem:[%s20702_s9 + $0xc08] sm:$0xf0]  ;;  %v13810_v63 = vor.u32 %v18987_v52, %v13807_v53  ;;  %v18867_v53 = vld [vmem:[%s20702_s9 + $0x5a4] sm:$0xf] }
  0xf5   : > { %9798 = vmatpush.bf16.msra.mxu0 %v17766_v1  ;;  %v18897_v1 = vld [vmem:[%s20702_s9 + $0x694] sm:$0xf]  ;;  %v13007_v52 = vld [vmem:[%s20702_s9 + $0x348] sm:$0xf0] }
  0xf6   : > { %9811 = vmatpush.bf16.msra.mxu1 %v18086_v5  ;;  %v14130_v5 = vor.u32 %v19067_v59, %v14127_v60  ;;  %v13450_v7 = vor.u32 %v18897_v1, %v13447_v2  ;;  %v13647_v59 = vld [vmem:[%s20702_s9 + $0x848] sm:$0xf0]  ;;  %v19027_v1 = vld [vmem:[%s20702_s9 + $0xaa4] sm:$0xf] }
  0xf7   : > { %9824 = vmatpush.bf16.msra.mxu2 %v18406_v6  ;;  %v13130_v6 = vor.u32 %v18817_v62, %v13127_v0  ;;  %v13967_v2 = vld [vmem:[%s20702_s9 + $0xac8] sm:$0xf0] }
  0xf8   : > { %9837 = vmatpush.bf16.msra.mxu3 %v12650_v13  ;;  %v18887_v13 = vld [vmem:[%s20702_s9 + $0x644] sm:$0xf]  ;;  %v13970_v12 = vor.u32 %v19027_v1, %v13967_v2  ;;  %v14447_v2 = vld [vmem:[%s20702_s9 + $0xe88] sm:$0xf0] }
  0xf9   : > { %9799 = vmatpush.bf16.msra.mxu0 %v17726_v17  ;;  %v14090_v17 = vor.u32 %v19057_v8, %v14087_v9  ;;  %v13410_v19 = vor.u32 %v18887_v13, %v13407_v14  ;;  %v13287_v8 = vld [vmem:[%s20702_s9 + $0x578] sm:$0xf0]  ;;  %v18937_v9 = vld [vmem:[%s20702_s9 + $0x7d4] sm:$0xf]  ;;  %v19147_v1 = vld [vmem:[%s20702_s9 + $0xe64] sm:$0xf] }
  0xfa   : > { %9812 = vmatpush.bf16.msra.mxu1 %v18046_v25  ;;  %v13730_v25 = vor.u32 %v18967_v15, %v13727_v16  ;;  %v9606_v62 = vpop.f32.mrf.mxu1  ;;  %v19017_v13 = vld [vmem:[%s20702_s9 + $0xa54] sm:$0xf]  ;;  %v13927_v14 = vld [vmem:[%s20702_s9 + $0xa78] sm:$0xf0] }
  0xfb   : > { %9825 = vmatpush.bf16.msra.mxu2 %v18366_v26  ;;  %v13047_v26 = vld [vmem:[%s20702_s9 + $0x398] sm:$0xf0] }
  0xfc   : > { %9838 = vmatpush.bf16.msra.mxu3 %v12610_v40  ;;  %9800 = vmatmul.bf16.vlgmr.msra.gmra.mxu0 %v21121_v49  ;;  %v13050_v38 = vor.u32 %v18797_v24, %v13047_v26  ;;  %v19037_v40 = vld [vmem:[%s20702_s9 + $0xaf4] sm:$0xf]  ;;  %v13610_v24 = vor.u32 %v18937_v9, %v13607_v10  ;;  %v18927_v26 = vld [vmem:[%s20702_s9 + $0x784] sm:$0xf] }
  0xfd   : > { %9844 = vmatpush.bf16.msrb.mxu0 %v13210_v30  ;;  %9813 = vmatmul.bf16.vlgmr.msra.gmra.mxu1 %v21127_v56  ;;  %v13367_v30 = vld [vmem:[%s20702_s9 + $0x618] sm:$0xf0]  ;;  %v14010_v60 = vor.u32 %v19037_v40, %v14007_v41  ;;  %v19317_v41 = vld [vmem:[%s20702_s9 + $0x13b4] sm:$0xf] }
  0xfe   : > { %9857 = vmatpush.bf16.msrb.mxu1 %v13530_v31  ;;  %9826 = vmatmul.bf16.vlgmr.msra.gmra.mxu2 %v21123_v50  ;;  %v18957_v31 = vld [vmem:[%s20702_s9 + $0x874] sm:$0xf]  ;;  %v14807_v40 = vld [vmem:[%s20702_s9 + $0x1158] sm:$0xf0] }
  0xff   : > { %9870 = vmatpush.bf16.msrb.mxu2 %v13850_v39  ;;  %9839 = vmatmul.bf16.vlgmr.msra.gmra.mxu3 %v20829_v27  ;;  %v13370_v39 = vor.u32 %v18877_v29, %v13367_v30  ;;  %v13690_v47 = vor.u32 %v18957_v31, %v13687_v32  ;;  %v13567_v29 = vld [vmem:[%s20702_s9 + $0x7a8] sm:$0xf0]  ;;  %v19157_v32 = vld [vmem:[%s20702_s9 + $0xeb4] sm:$0xf] }
 0x100   : > { %9883 = vmatpush.bf16.msrb.mxu3 %v14170_v54  ;;  %v13327_v54 = vld [vmem:[%s20702_s9 + $0x5c8] sm:$0xf0] }
 0x101   : > { %9845 = vmatpush.bf16.msrb.mxu0 %v13170_v57  ;;  %v9593_v57 = vpop.f32.mrf.mxu0  ;;  %v13330_v0 = vor.u32 %v18867_v53, %v13327_v54  ;;  %v19007_v54 = vld [vmem:[%s20702_s9 + $0xa04] sm:$0xf] }
 0x102   : > { %9858 = vmatpush.bf16.msrb.mxu1 %v13490_v58  ;;  %v18947_v58 = vld [vmem:[%s20702_s9 + $0x824] sm:$0xf]  ;;  %v9607_v4 = vadd.f32 %v9606_v62, %v9593_v57  ;;  %v9632_v16 = vpop.f32.mrf.mxu3  ;;  %v13887_v57 = vld [vmem:[%s20702_s9 + $0xa28] sm:$0xf0]  ;;  %v15447_v62 = vld [vmem:[%s20702_s9 + $0x1658] sm:$0xf0] }
 0x103   : > { %9871 = vmatpush.bf16.msrb.mxu2 %v13810_v63  ;;  %v13010_v63 = vor.u32 %v18787_v46, %v13007_v52  ;;  %v15127_v46 = vld [vmem:[%s20702_s9 + $0x13d8] sm:$0xf0] }
 0x104   : > { %9884 = vmatpush.bf16.msrb.mxu3 %v14130_v5  ;;  %v13650_v5 = vor.u32 %v18947_v58, %v13647_v59  ;;  %v13570_v58 = vor.u32 %v18927_v26, %v13567_v29  ;;  %v19377_v26 = vld [vmem:[%s20702_s9 + $0x1594] sm:$0xf]  ;;  %v15367_v29 = vld [vmem:[%s20702_s9 + $0x15b8] sm:$0xf0] }
 0x105   : > { %9846 = vmatpush.bf16.msrb.mxu0 %v13130_v6  ;;  %v12967_v6 = vld [vmem:[%s20702_s9 + $0x2f8] sm:$0xf0] }
 0x106   : > { %9859 = vmatpush.bf16.msrb.mxu1 %v13450_v7  ;;  %v18857_v7 = vld [vmem:[%s20702_s9 + $0x554] sm:$0xf] }
 0x107   : > { %9872 = vmatpush.bf16.msrb.mxu2 %v13770_v11  ;;  %v9619_v11 = vpop.f32.mrf.mxu2 }
 0x108   : > { %9885 = vmatpush.bf16.msrb.mxu3 %v14090_v17  ;;  %v9620_v15 = vadd.f32 %v9619_v11, %v9607_v4  ;;  %v12970_v17 = vor.u32 %v18777_v3, %v12967_v6  ;;  %v19227_v3 = vld [vmem:[%s20702_s9 + $0x10e4] sm:$0xf]  ;;  %v14767_v6 = vld [vmem:[%s20702_s9 + $0x1108] sm:$0xf0]  ;;  %v14450_v11 = vor.u32 %v19147_v1, %v14447_v2  ;;  %v14647_v1 = vld [vmem:[%s20702_s9 + $0x1018] sm:$0xf0] }
 0x109   : > { %9847 = vmatpush.bf16.msrb.mxu0 %v13090_v18  ;;  %v13290_v18 = vor.u32 %v18857_v7, %v13287_v8  ;;  %v9595_v31 = vpop.f32.mrf.mxu0  ;;  %v19307_v7 = vld [vmem:[%s20702_s9 + $0x1364] sm:$0xf]  ;;  %v15087_v8 = vld [vmem:[%s20702_s9 + $0x1388] sm:$0xf0]  ;;  %v19277_v2 = vld [vmem:[%s20702_s9 + $0x1274] sm:$0xf] }
 0x10a   : > { %9860 = vmatpush.bf16.msrb.mxu1 %v13410_v19  ;;  %v18767_v19 = vld [vmem:[%s20702_s9 + $0x284] sm:$0xf]  ;;  %v21181_v30 = vadd.f32 %v9632_v16, %v9620_v15  ;;  %v9634_v9 = vpop.f32.mrf.mxu3  ;;  %v15090_v15 = vor.u32 %v19307_v7, %v15087_v8  ;;  %v19137_v16 = vld [vmem:[%s20702_s9 + $0xe14] sm:$0xf] }
 0x10b   : > { %9873 = vmatpush.bf16.msrb.mxu2 %v13730_v25  ;;  %v13247_v25 = vld [vmem:[%s20702_s9 + $0x528] sm:$0xf0]  ;;  %v12930_v52 = vor.u32 %v18767_v19, %v12927_v20  ;;  %v14727_v19 = vld [vmem:[%s20702_s9 + $0x10b8] sm:$0xf0]  ;;  %v19297_v20 = vld [vmem:[%s20702_s9 + $0x1314] sm:$0xf] }
 0x10c   : > { %9886 = vmatpush.bf16.msrb.mxu3 %v14050_v33  ;;  %v14487_v33 = vld [vmem:[%s20702_s9 + $0xed8] sm:$0xf0]  ;;  %v13250_v53 = vor.u32 %v18847_v23, %v13247_v25  ;;  %v19357_v8 = vld [vmem:[%s20702_s9 + $0x14f4] sm:$0xf] }
 0x10d   : > { %9848 = vmatpush.bf16.msrb.mxu0 %v13050_v38  ;;  %v19237_v38 = vld [vmem:[%s20702_s9 + $0x1134] sm:$0xf]  ;;  %v14490_v59 = vor.u32 %v19157_v32, %v14487_v33  ;;  %v15047_v23 = vld [vmem:[%s20702_s9 + $0x1338] sm:$0xf0]  ;;  %v19127_v33 = vld [vmem:[%s20702_s9 + $0xdc4] sm:$0xf] }
 0x10e   : > { %9861 = vmatpush.bf16.msrb.mxu1 %v13370_v39  ;;  %v13930_v39 = vor.u32 %v19017_v13, %v13927_v14  ;;  %v15407_v13 = vld [vmem:[%s20702_s9 + $0x1608] sm:$0xf0]  ;;  %v14770_v14 = vor.u32 %v19227_v3, %v14767_v6  ;;  %v15050_v32 = vor.u32 %v19297_v20, %v15047_v23  ;;  %v14967_v3 = vld [vmem:[%s20702_s9 + $0x1298] sm:$0xf0]  ;;  %v19347_v23 = vld [vmem:[%s20702_s9 + $0x14a4] sm:$0xf] }
 0x10f   : > { %9874 = vmatpush.bf16.msrb.mxu2 %v13690_v47  ;;  %v9608_v47 = vpop.f32.mrf.mxu1  ;;  %v9621_v4 = vpop.f32.mrf.mxu2 }
 0x110   : > { %9887 = vmatpush.bf16.msrb.mxu3 %v14010_v60  ;;  %v19397_v60 = vld [vmem:[%s20702_s9 + $0x1634] sm:$0xf]  ;;  %v15370_v47 = vor.u32 %v19377_v26, %v15367_v29 }
 0x111   : > { %9849 = vmatpush.bf16.msrb.mxu0 %v13010_v63  ;;  %v14810_v63 = vor.u32 %v19237_v38, %v14807_v40  ;;  %v15450_v10 = vor.u32 %v19397_v60, %v15447_v62  ;;  %v14367_v38 = vld [vmem:[%s20702_s9 + $0xde8] sm:$0xf0]  ;;  %v19117_v62 = vld [vmem:[%s20702_s9 + $0xd74] sm:$0xf] }
 0x112   : > { %9862 = vmatpush.bf16.msrb.mxu1 %v13330_v0  ;;  %v15130_v0 = vor.u32 %v19317_v41, %v15127_v46  ;;  %v14687_v40 = vld [vmem:[%s20702_s9 + $0x1068] sm:$0xf0]  ;;  %v19287_v41 = vld [vmem:[%s20702_s9 + $0x12c4] sm:$0xf] }
 0x113   : > { %9875 = vmatpush.bf16.msrb.mxu2 %v13650_v5  ;;  %v13890_v5 = vor.u32 %v19007_v54, %v13887_v57  ;;  %v15007_v46 = vld [vmem:[%s20702_s9 + $0x12e8] sm:$0xf0] }
 0x114   : > { %9888 = vmatpush.bf16.msrb.mxu3 %v13970_v12  ;;  %v19387_v12 = vld [vmem:[%s20702_s9 + $0x15e4] sm:$0xf]  ;;  %v15327_v54 = vld [vmem:[%s20702_s9 + $0x1568] sm:$0xf0] }
 0x115   : > { %9850 = vmatpush.bf16.msrb.mxu0 %v12970_v17  ;;  %v14407_v17 = vld [vmem:[%s20702_s9 + $0xe38] sm:$0xf0] }
 0x116   : > { %9863 = vmatpush.bf16.msrb.mxu1 %v13290_v18  ;;  %v19217_v18 = vld [vmem:[%s20702_s9 + $0x1094] sm:$0xf]  ;;  %v14410_v25 = vor.u32 %v19137_v16, %v14407_v17  ;;  %v14927_v16 = vld [vmem:[%s20702_s9 + $0x1248] sm:$0xf0] }
 0x117   : > { %9876 = vmatpush.bf16.msrb.mxu2 %v13610_v24  ;;  %v15410_v24 = vor.u32 %v19387_v12, %v15407_v13  ;;  %v14730_v31 = vor.u32 %v19217_v18, %v14727_v19  ;;  %v14287_v12 = vld [vmem:[%s20702_s9 + $0xd48] sm:$0xf0]  ;;  %v19187_v13 = vld [vmem:[%s20702_s9 + $0xfa4] sm:$0xf] }
 0x118   : > { %9889 = vmatpush.bf16.msrb.mxu3 %v13930_v39  ;;  %v19207_v39 = vld [vmem:[%s20702_s9 + $0x1044] sm:$0xf] }
 0x119   : > { %9851 = vmatpush.bf16.msrb.mxu0 %v12930_v52  ;;  %v14370_v52 = vor.u32 %v19127_v33, %v14367_v38  ;;  %v9645_v57 = vpop.f32.mrf.mxu0  ;;  %v19177_v33 = vld [vmem:[%s20702_s9 + $0xf54] sm:$0xf] }
 0x11a   : > { %9864 = vmatpush.bf16.msrb.mxu1 %v13250_v53  ;;  %v19367_v53 = vld [vmem:[%s20702_s9 + $0x1544] sm:$0xf]  ;;  %v9646_v60 = vadd.f32 %v9645_v57, %v21181_v30  ;;  %v9658_v4 = vpop.f32.mrf.mxu1  ;;  %v15287_v30 = vld [vmem:[%s20702_s9 + $0x1518] sm:$0xf0] }
 0x11b   : > { %9877 = vmatpush.bf16.msrb.mxu2 %v13570_v58  ;;  %v14690_v58 = vor.u32 %v19207_v39, %v14687_v40  ;;  %v15290_v17 = vor.u32 %v19357_v8, %v15287_v30  ;;  %v14567_v39 = vld [vmem:[%s20702_s9 + $0xf78] sm:$0xf0]  ;;  %v19257_v40 = vld [vmem:[%s20702_s9 + $0x11d4] sm:$0xf] }
 0x11c   : > { %9890 = vmatpush.bf16.msrb.mxu3 %v13890_v5  ;;  %9852 = vmatmul.bf16.vlgmr.msrb.gmra.mxu0 %v20831_v28  ;;  %v15330_v5 = vor.u32 %v19367_v53, %v15327_v54  ;;  %v9659_v6 = vadd.f32 %v9658_v4, %v9646_v60  ;;  %v19337_v53 = vld [vmem:[%s20702_s9 + $0x1454] sm:$0xf]  ;;  %v15207_v57 = vld [vmem:[%s20702_s9 + $0x1478] sm:$0xf0]  ;;  %v14570_v60 = vor.u32 %v19177_v33, %v14567_v39  ;;  %v16367_v33 = vld [vmem:[%s20702_s9 + $0x1d88] sm:$0xf0] }
 0x11d   : > { %9896 = vmatpush.bf16.msra.mxu0 %v14490_v59  ;;  %9865 = vmatmul.bf16.vlgmr.msrb.gmra.mxu1 %v20822_v21  ;;  %v15010_v59 = vor.u32 %v19287_v41, %v15007_v46  ;;  %v14887_v41 = vld [vmem:[%s20702_s9 + $0x11f8] sm:$0xf0]  ;;  %v19637_v8 = vld [vmem:[%s20702_s9 + $0x1db4] sm:$0xf]  ;;  %v16687_v39 = vld [vmem:[%s20702_s9 + $0x2008] sm:$0xf0] }
 0x11e   : > { %9909 = vmatpush.bf16.msra.mxu1 %v14810_v63  ;;  %9878 = vmatmul.bf16.vlgmr.msrb.gmra.mxu2 %v20824_v22  ;;  %v14327_v63 = vld [vmem:[%s20702_s9 + $0xd98] sm:$0xf0] }
 0x11f   : > { %9922 = vmatpush.bf16.msra.mxu2 %v15130_v0  ;;  %9891 = vmatmul.bf16.vlgmr.msrb.gmra.mxu3 %v20889_v48  ;;  %v19197_v0 = vld [vmem:[%s20702_s9 + $0xff4] sm:$0xf]  ;;  %v14330_v7 = vor.u32 %v19117_v62, %v14327_v63  ;;  %v14890_v62 = vor.u32 %v19257_v40, %v14887_v41  ;;  %v19167_v63 = vld [vmem:[%s20702_s9 + $0xf04] sm:$0xf]  ;;  %v15767_v4 = vld [vmem:[%s20702_s9 + $0x18d8] sm:$0xf0] }
 0x120   : > { %9935 = vmatpush.bf16.msra.mxu3 %v15450_v10  ;;  %v14650_v9 = vor.u32 %v19197_v0, %v14647_v1  ;;  %v14970_v10 = vor.u32 %v19277_v2, %v14967_v3  ;;  %v14527_v0 = vld [vmem:[%s20702_s9 + $0xf28] sm:$0xf0]  ;;  %v19247_v1 = vld [vmem:[%s20702_s9 + $0x1184] sm:$0xf]  ;;  %v19477_v3 = vld [vmem:[%s20702_s9 + $0x18b4] sm:$0xf] }
 0x121   : > { %9897 = vmatpush.bf16.msra.mxu0 %v14450_v11  ;;  %v19107_v11 = vld [vmem:[%s20702_s9 + $0xd24] sm:$0xf]  ;;  %v9671_v18 = vpop.f32.mrf.mxu2  ;;  %v14847_v2 = vld [vmem:[%s20702_s9 + $0x11a8] sm:$0xf0] }
 0x122   : > { %9910 = vmatpush.bf16.msra.mxu1 %v14770_v14  ;;  %v14607_v14 = vld [vmem:[%s20702_s9 + $0xfc8] sm:$0xf0]  ;;  %v9672_v19 = vadd.f32 %v9671_v18, %v9659_v6  ;;  %v14290_v20 = vor.u32 %v19107_v11, %v14287_v12  ;;  %v9684_v38 = vpop.f32.mrf.mxu3  ;;  %v9660_v46 = vpop.f32.mrf.mxu1  ;;  %v19557_v6 = vld [vmem:[%s20702_s9 + $0x1b34] sm:$0xf]  ;;  %v19327_v11 = vld [vmem:[%s20702_s9 + $0x1404] sm:$0xf] }
 0x123   : > { %9923 = vmatpush.bf16.msra.mxu2 %v15090_v15  ;;  %v19267_v15 = vld [vmem:[%s20702_s9 + $0x1224] sm:$0xf]  ;;  %v14610_v26 = vor.u32 %v19187_v13, %v14607_v14  ;;  %v15167_v12 = vld [vmem:[%s20702_s9 + $0x1428] sm:$0xf0]  ;;  %v14530_v13 = vor.u32 %v19167_v63, %v14527_v0  ;;  %v14850_v14 = vor.u32 %v19247_v1, %v14847_v2  ;;  %v19457_v46 = vld [vmem:[%s20702_s9 + $0x1814] sm:$0xf] }
 0x124   : > { %9936 = vmatpush.bf16.msra.mxu3 %v15410_v24  ;;  %v15247_v24 = vld [vmem:[%s20702_s9 + $0x14c8] sm:$0xf0]  ;;  %v14930_v29 = vor.u32 %v19267_v15, %v14927_v16  ;;  %v19717_v15 = vld [vmem:[%s20702_s9 + $0x2034] sm:$0xf]  ;;  %v16727_v16 = vld [vmem:[%s20702_s9 + $0x2058] sm:$0xf0] }
 0x125   : > { %9898 = vmatpush.bf16.msra.mxu0 %v14410_v25  ;;  %v9647_v25 = vpop.f32.mrf.mxu0  ;;  %v16647_v63 = vld [vmem:[%s20702_s9 + $0x1fb8] sm:$0xf0]  ;;  %v19447_v2 = vld [vmem:[%s20702_s9 + $0x17c4] sm:$0xf] }
 0x126   : > { %9911 = vmatpush.bf16.msra.mxu1 %v14730_v31  ;;  %v19097_v31 = vld [vmem:[%s20702_s9 + $0xcd4] sm:$0xf]  ;;  %v15727_v25 = vld [vmem:[%s20702_s9 + $0x1888] sm:$0xf0] }
 0x127   : > { %9924 = vmatpush.bf16.msra.mxu2 %v15050_v32  ;;  %v14247_v32 = vld [vmem:[%s20702_s9 + $0xcf8] sm:$0xf0] }
 0x128   : > { %9937 = vmatpush.bf16.msra.mxu3 %v15370_v47  ;;  %v21244_v47 = vadd.f32 %v9684_v38, %v9672_v19  ;;  %v14250_v54 = vor.u32 %v19097_v31, %v14247_v32  ;;  %v19467_v19 = vld [vmem:[%s20702_s9 + $0x1864] sm:$0xf]  ;;  %v16730_v31 = vor.u32 %v19717_v15, %v16727_v16 }
 0x129   : > { %9899 = vmatpush.bf16.msra.mxu0 %v14370_v52  ;;  %v15250_v52 = vor.u32 %v19347_v23, %v15247_v24  ;;  %v9673_v30 = vpop.f32.mrf.mxu2  ;;  %v15170_v24 = vor.u32 %v19327_v11, %v15167_v12  ;;  %v19627_v32 = vld [vmem:[%s20702_s9 + $0x1d64] sm:$0xf]  ;;  %v15730_v40 = vor.u32 %v19467_v19, %v15727_v25  ;;  %v15927_v19 = vld [vmem:[%s20702_s9 + $0x1a18] sm:$0xf0]  ;;  %v19677_v25 = vld [vmem:[%s20702_s9 + $0x1ef4] sm:$0xf] }
 0x12a   : > { %9912 = vmatpush.bf16.msra.mxu1 %v14690_v58  ;;  %v19087_v58 = vld [vmem:[%s20702_s9 + $0xc84] sm:$0xf]  ;;  %v16287_v30 = vld [vmem:[%s20702_s9 + $0x1ce8] sm:$0xf0] }
 0x12b   : > { %9925 = vmatpush.bf16.msra.mxu2 %v15010_v59  ;;  %v14207_v59 = vld [vmem:[%s20702_s9 + $0xca8] sm:$0xf0]  ;;  %v19707_v38 = vld [vmem:[%s20702_s9 + $0x1fe4] sm:$0xf] }
 0x12c   : > { %9938 = vmatpush.bf16.msra.mxu3 %v15330_v5  ;;  %v15210_v5 = vor.u32 %v19337_v53, %v15207_v57  ;;  %v15687_v53 = vld [vmem:[%s20702_s9 + $0x1838] sm:$0xf0] }
 0x12d   : > { %9900 = vmatpush.bf16.msra.mxu0 %v14330_v7  ;;  %v16087_v7 = vld [vmem:[%s20702_s9 + $0x1b58] sm:$0xf0]  ;;  %v15690_v0 = vor.u32 %v19457_v46, %v15687_v53  ;;  %v16207_v53 = vld [vmem:[%s20702_s9 + $0x1c48] sm:$0xf0] }
 0x12e   : > { %9913 = vmatpush.bf16.msra.mxu1 %v14650_v9  ;;  %v14210_v9 = vor.u32 %v19087_v58, %v14207_v59  ;;  %v16090_v18 = vor.u32 %v19557_v6, %v16087_v7  ;;  %v16007_v57 = vld [vmem:[%s20702_s9 + $0x1ab8] sm:$0xf0]  ;;  %v16690_v58 = vor.u32 %v19707_v38, %v16687_v39  ;;  %v19617_v59 = vld [vmem:[%s20702_s9 + $0x1d14] sm:$0xf]  ;;  %v15967_v6 = vld [vmem:[%s20702_s9 + $0x1a68] sm:$0xf0] }
 0x12f   : > { %9926 = vmatpush.bf16.msra.mxu2 %v14970_v10  ;;  %v16407_v10 = vld [vmem:[%s20702_s9 + $0x1dd8] sm:$0xf0]  ;;  %v15567_v38 = vld [vmem:[%s20702_s9 + $0x1748] sm:$0xf0]  ;;  %v19507_v39 = vld [vmem:[%s20702_s9 + $0x19a4] sm:$0xf] }
 0x130   : > { %9939 = vmatpush.bf16.msra.mxu3 %v15290_v17  ;;  %v15770_v17 = vor.u32 %v19477_v3, %v15767_v4  ;;  %v16410_v23 = vor.u32 %v19637_v8, %v16407_v10  ;;  %v15647_v4 = vld [vmem:[%s20702_s9 + $0x17e8] sm:$0xf0]  ;;  %v19607_v8 = vld [vmem:[%s20702_s9 + $0x1cc4] sm:$0xf] }
 0x131   : > { %9901 = vmatpush.bf16.msra.mxu0 %v14290_v20  ;;  %v9686_v20 = vpop.f32.mrf.mxu3  ;;  %v16607_v10 = vld [vmem:[%s20702_s9 + $0x1f68] sm:$0xf0]  ;;  %v15650_v12 = vor.u32 %v19447_v2, %v15647_v4  ;;  %v16290_v15 = vor.u32 %v19607_v8, %v16287_v30  ;;  %v19497_v2 = vld [vmem:[%s20702_s9 + $0x1954] sm:$0xf]  ;;  %v16487_v30 = vld [vmem:[%s20702_s9 + $0x1e78] sm:$0xf0] }
 0x132   : > { %9914 = vmatpush.bf16.msra.mxu1 %v14610_v26  ;;  %v19547_v26 = vld [vmem:[%s20702_s9 + $0x1ae4] sm:$0xf]  ;;  %v19657_v8 = vld [vmem:[%s20702_s9 + $0x1e54] sm:$0xf] }
 0x133   : > { %9927 = vmatpush.bf16.msra.mxu2 %v14930_v29  ;;  %v16047_v29 = vld [vmem:[%s20702_s9 + $0x1b08] sm:$0xf0] }
 0x134   : > { %9940 = vmatpush.bf16.msra.mxu3 %v15250_v52  ;;  %v16050_v41 = vor.u32 %v19547_v26, %v16047_v29  ;;  %v16370_v52 = vor.u32 %v19627_v32, %v16367_v33  ;;  %v16567_v26 = vld [vmem:[%s20702_s9 + $0x1f18] sm:$0xf0]  ;;  %v19427_v32 = vld [vmem:[%s20702_s9 + $0x1724] sm:$0xf] }
 0x135   : > { %9902 = vmatpush.bf16.msra.mxu0 %v14250_v54  ;;  %v19537_v54 = vld [vmem:[%s20702_s9 + $0x1a94] sm:$0xf]  ;;  %v16570_v46 = vor.u32 %v19677_v25, %v16567_v26 }
 0x136   : > { %9915 = vmatpush.bf16.msra.mxu1 %v14570_v60  ;;  %v16327_v60 = vld [vmem:[%s20702_s9 + $0x1d38] sm:$0xf0]  ;;  %v16010_v1 = vor.u32 %v19537_v54, %v16007_v57  ;;  %v19667_v54 = vld [vmem:[%s20702_s9 + $0x1ea4] sm:$0xf]  ;;  %v16527_v57 = vld [vmem:[%s20702_s9 + $0x1ec8] sm:$0xf0] }
 0x137   : > { %9928 = vmatpush.bf16.msra.mxu2 %v14890_v62  ;;  %v19697_v62 = vld [vmem:[%s20702_s9 + $0x1f94] sm:$0xf]  ;;  %v16330_v3 = vor.u32 %v19617_v59, %v16327_v60  ;;  %v15570_v59 = vor.u32 %v19427_v32, %v15567_v38  ;;  %v17687_v32 = vld [vmem:[%s20702_s9 + $0x27d8] sm:$0xf0] }
 0x138   : > { %9941 = vmatpush.bf16.msra.mxu3 %v15210_v5  ;;  %v19527_v5 = vld [vmem:[%s20702_s9 + $0x1a44] sm:$0xf]  ;;  %v16650_v7 = vor.u32 %v19697_v62, %v16647_v63  ;;  %v19417_v62 = vld [vmem:[%s20702_s9 + $0x16d4] sm:$0xf] }
 0x139   : > { %9903 = vmatpush.bf16.msra.mxu0 %v14210_v9  ;;  %v19687_v9 = vld [vmem:[%s20702_s9 + $0x1f44] sm:$0xf]  ;;  %v21292_v11 = vpop.f32.mrf.mxu0  ;;  %v19877_v25 = vld [vmem:[%s20702_s9 + $0x2534] sm:$0xf] }
 0x13a   : > { %9916 = vmatpush.bf16.msra.mxu1 %v14530_v13  ;;  %v15970_v13 = vor.u32 %v19527_v5, %v15967_v6  ;;  %v21295_v16 = vpop.f32.mrf.mxu1  ;;  %v16610_v20 = vor.u32 %v19687_v9, %v16607_v10  ;;  %v16530_v5 = vor.u32 %v19667_v54, %v16527_v57  ;;  %v19577_v6 = vld [vmem:[%s20702_s9 + $0x1bd4] sm:$0xf]  ;;  %v18007_v57 = vld [vmem:[%s20702_s9 + $0x2a58] sm:$0xf0] }
 0x13b   : > { %9929 = vmatpush.bf16.msra.mxu2 %v14850_v14  ;;  %v19437_v14 = vld [vmem:[%s20702_s9 + $0x1774] sm:$0xf] }
 0x13c   : > { %9942 = vmatpush.bf16.msra.mxu3 %v15170_v24  ;;  %9904 = vmatmul.bf16.vlgmr.msra.gmra.mxu0 %v20895_v55  ;;  %v16247_v24 = vld [vmem:[%s20702_s9 + $0x1c98] sm:$0xf0]  ;;  %v20037_v54 = vld [vmem:[%s20702_s9 + $0x2a34] sm:$0xf] }
 0x13d   : > { %9948 = vmatpush.bf16.msrb.mxu0 %v15770_v17  ;;  %9917 = vmatmul.bf16.vlgmr.msra.gmra.mxu1 %v20891_v51  ;;  %v15607_v17 = vld [vmem:[%s20702_s9 + $0x1798] sm:$0xf0] }
 0x13e   : > { %9961 = vmatpush.bf16.msrb.mxu1 %v16090_v18  ;;  %9930 = vmatmul.bf16.vlgmr.msra.gmra.mxu2 %v20901_v61  ;;  %v19517_v18 = vld [vmem:[%s20702_s9 + $0x19f4] sm:$0xf]  ;;  %v15610_v29 = vor.u32 %v19437_v14, %v15607_v17  ;;  %v19487_v14 = vld [vmem:[%s20702_s9 + $0x1904] sm:$0xf]  ;;  %v15807_v17 = vld [vmem:[%s20702_s9 + $0x1928] sm:$0xf0] }
 0x13f   : > { %9974 = vmatpush.bf16.msrb.mxu2 %v16410_v23  ;;  %9943 = vmatmul.bf16.vlgmr.msra.gmra.mxu3 %v20964_v36  ;;  %v19597_v23 = vld [vmem:[%s20702_s9 + $0x1c74] sm:$0xf]  ;;  %v15810_v38 = vor.u32 %v19487_v14, %v15807_v17  ;;  %v17287_v14 = vld [vmem:[%s20702_s9 + $0x24b8] sm:$0xf0] }
 0x140   : > { %9987 = vmatpush.bf16.msrb.mxu3 %v16730_v31  ;;  %v15930_v31 = vor.u32 %v19517_v18, %v15927_v19  ;;  %v16250_v33 = vor.u32 %v19597_v23, %v16247_v24  ;;  %v19567_v18 = vld [vmem:[%s20702_s9 + $0x1b84] sm:$0xf]  ;;  %v16127_v19 = vld [vmem:[%s20702_s9 + $0x1ba8] sm:$0xf0]  ;;  %v19797_v23 = vld [vmem:[%s20702_s9 + $0x22b4] sm:$0xf] }
 0x141   : > { %9949 = vmatpush.bf16.msrb.mxu0 %v15730_v40  ;;  %v15887_v40 = vld [vmem:[%s20702_s9 + $0x19c8] sm:$0xf0]  ;;  %v9699_v63 = vpop.f32.mrf.mxu0  ;;  %v17047_v24 = vld [vmem:[%s20702_s9 + $0x22d8] sm:$0xf0]  ;;  %v19937_v17 = vld [vmem:[%s20702_s9 + $0x2714] sm:$0xf] }
 0x142   : > { %9962 = vmatpush.bf16.msrb.mxu1 %v16050_v41  ;;  %v21308_v41 = vpop.f32.mrf.mxu2  ;;  %v15890_v60 = vor.u32 %v19507_v39, %v15887_v40  ;;  %v9712_v4 = vpop.f32.mrf.mxu1  ;;  %v19647_v39 = vld [vmem:[%s20702_s9 + $0x1e04] sm:$0xf]  ;;  %v16447_v40 = vld [vmem:[%s20702_s9 + $0x1e28] sm:$0xf0] }
 0x143   : > { %9975 = vmatpush.bf16.msrb.mxu2 %v16370_v52  ;;  %v19587_v52 = vld [vmem:[%s20702_s9 + $0x1c24] sm:$0xf]  ;;  %v17007_v63 = vld [vmem:[%s20702_s9 + $0x2288] sm:$0xf0] }
 0x144   : > { %9988 = vmatpush.bf16.msrb.mxu3 %v16690_v58  ;;  %v21314_v58 = vpop.f32.mrf.mxu3  ;;  %v19947_v4 = vld [vmem:[%s20702_s9 + $0x2764] sm:$0xf] }
 0x145   : > { %9950 = vmatpush.bf16.msrb.mxu0 %v15690_v0  ;;  %v16210_v0 = vor.u32 %v19587_v52, %v16207_v53  ;;  %v16130_v52 = vor.u32 %v19567_v18, %v16127_v19  ;;  %v17050_v53 = vor.u32 %v19797_v23, %v17047_v24  ;;  %v17607_v18 = vld [vmem:[%s20702_s9 + $0x2738] sm:$0xf0] }
 0x146   : > { %9963 = vmatpush.bf16.msrb.mxu1 %v16010_v1  ;;  %v15527_v1 = vld [vmem:[%s20702_s9 + $0x16f8] sm:$0xf0] }
 0x147   : > { %9976 = vmatpush.bf16.msrb.mxu2 %v16330_v3  ;;  %v15847_v3 = vld [vmem:[%s20702_s9 + $0x1978] sm:$0xf0]  ;;  %v15530_v9 = vor.u32 %v19417_v62, %v15527_v1  ;;  %v19787_v62 = vld [vmem:[%s20702_s9 + $0x2264] sm:$0xf] }
 0x148   : > { %9989 = vmatpush.bf16.msrb.mxu3 %v16650_v7  ;;  %v16167_v7 = vld [vmem:[%s20702_s9 + $0x1bf8] sm:$0xf0]  ;;  %v15850_v10 = vor.u32 %v19497_v2, %v15847_v3  ;;  %v19867_v1 = vld [vmem:[%s20702_s9 + $0x24e4] sm:$0xf]  ;;  %v17327_v2 = vld [vmem:[%s20702_s9 + $0x2508] sm:$0xf0]  ;;  %v18010_v3 = vor.u32 %v20037_v54, %v18007_v57 }
 0x149   : > { %9951 = vmatpush.bf16.msrb.mxu0 %v15650_v12  ;;  %v19407_v12 = vld [vmem:[%s20702_s9 + $0x1684] sm:$0xf]  ;;  %v17927_v23 = vld [vmem:[%s20702_s9 + $0x29b8] sm:$0xf0]  ;;  %v19757_v57 = vld [vmem:[%s20702_s9 + $0x2174] sm:$0xf] }
 0x14a   : > { %9964 = vmatpush.bf16.msrb.mxu1 %v15970_v13  ;;  %v15487_v13 = vld [vmem:[%s20702_s9 + $0x16a8] sm:$0xf0]  ;;  %v9725_v26 = vpop.f32.mrf.mxu2 }
 0x14b   : > { %9977 = vmatpush.bf16.msrb.mxu2 %v16290_v15  ;;  %v16170_v15 = vor.u32 %v19577_v6, %v16167_v7  ;;  %v17010_v6 = vor.u32 %v19787_v62, %v17007_v63  ;;  %v20027_v7 = vld [vmem:[%s20702_s9 + $0x29e4] sm:$0xf]  ;;  %v16927_v26 = vld [vmem:[%s20702_s9 + $0x21e8] sm:$0xf0]  ;;  %v19837_v63 = vld [vmem:[%s20702_s9 + $0x23f4] sm:$0xf] }
 0x14c   : > { %9990 = vmatpush.bf16.msrb.mxu3 %v16610_v20  ;;  %v16490_v20 = vor.u32 %v19657_v8, %v16487_v30  ;;  %v17967_v8 = vld [vmem:[%s20702_s9 + $0x2a08] sm:$0xf0]  ;;  %v17330_v30 = vor.u32 %v19867_v1, %v17327_v2  ;;  %v19917_v2 = vld [vmem:[%s20702_s9 + $0x2674] sm:$0xf] }
 0x14d   : > { %9952 = vmatpush.bf16.msrb.mxu0 %v15610_v29  ;;  %v17367_v29 = vld [vmem:[%s20702_s9 + $0x2558] sm:$0xf0] }
 0x14e   : > { %9965 = vmatpush.bf16.msrb.mxu1 %v15930_v31  ;;  %v19957_v31 = vld [vmem:[%s20702_s9 + $0x27b4] sm:$0xf] }
 0x14f   : > { %9978 = vmatpush.bf16.msrb.mxu2 %v16250_v33  ;;  %v15490_v33 = vor.u32 %v19407_v12, %v15487_v13  ;;  %v19857_v13 = vld [vmem:[%s20702_s9 + $0x2494] sm:$0xf] }
 0x150   : > { %9991 = vmatpush.bf16.msrb.mxu3 %v16570_v46  ;;  %v9738_v46 = vpop.f32.mrf.mxu3  ;;  %v17290_v24 = vor.u32 %v19857_v13, %v17287_v14 }
 0x151   : > { %9953 = vmatpush.bf16.msrb.mxu0 %v15570_v59  ;;  %v17370_v59 = vor.u32 %v19877_v25, %v17367_v29  ;;  %v19767_v25 = vld [vmem:[%s20702_s9 + $0x21c4] sm:$0xf]  ;;  %v17610_v29 = vor.u32 %v19937_v17, %v17607_v18  ;;  %v17487_v17 = vld [vmem:[%s20702_s9 + $0x2648] sm:$0xf0]  ;;  %v9698_v18 = vadd.f32 %v21292_v11, %v21244_v47  ;;  %v19817_v47 = vld [vmem:[%s20702_s9 + $0x2354] sm:$0xf] }
 0x152   : > { %9966 = vmatpush.bf16.msrb.mxu1 %v15890_v60  ;;  %v17690_v60 = vor.u32 %v19957_v31, %v17687_v32  ;;  %v19847_v31 = vld [vmem:[%s20702_s9 + $0x2444] sm:$0xf]  ;;  %v17247_v32 = vld [vmem:[%s20702_s9 + $0x2468] sm:$0xf0]  ;;  %v17127_v11 = vld [vmem:[%s20702_s9 + $0x2378] sm:$0xf0] }
 0x153   : > { %9979 = vmatpush.bf16.msrb.mxu2 %v16210_v0  ;;  %v16450_v0 = vor.u32 %v19647_v39, %v16447_v40  ;;  %v17567_v39 = vld [vmem:[%s20702_s9 + $0x26e8] sm:$0xf0]  ;;  %v16930_v40 = vor.u32 %v19767_v25, %v16927_v26  ;;  %v20007_v46 = vld [vmem:[%s20702_s9 + $0x2944] sm:$0xf]  ;;  %v17250_v54 = vor.u32 %v19847_v31, %v17247_v32  ;;  %v19737_v26 = vld [vmem:[%s20702_s9 + $0x20d4] sm:$0xf] }
 0x154   : > { %9992 = vmatpush.bf16.msrb.mxu3 %v16530_v5  ;;  %v17647_v5 = vld [vmem:[%s20702_s9 + $0x2788] sm:$0xf0] }
 0x155   : > { %9954 = vmatpush.bf16.msrb.mxu0 %v15530_v9  ;;  %v19777_v9 = vld [vmem:[%s20702_s9 + $0x2214] sm:$0xf]  ;;  %v17650_v12 = vor.u32 %v19947_v4, %v17647_v5 }
 0x156   : > { %9967 = vmatpush.bf16.msrb.mxu1 %v15850_v10  ;;  %v16967_v10 = vld [vmem:[%s20702_s9 + $0x2238] sm:$0xf0]  ;;  %v19997_v5 = vld [vmem:[%s20702_s9 + $0x28f4] sm:$0xf] }
 0x157   : > { %9980 = vmatpush.bf16.msrb.mxu2 %v16170_v15  ;;  %v17970_v15 = vor.u32 %v20027_v7, %v17967_v8  ;;  %v16970_v19 = vor.u32 %v19777_v9, %v16967_v10  ;;  %v19747_v8 = vld [vmem:[%s20702_s9 + $0x2124] sm:$0xf] }
 0x158   : > { %9993 = vmatpush.bf16.msrb.mxu3 %v16490_v20  ;;  %v20017_v20 = vld [vmem:[%s20702_s9 + $0x2994] sm:$0xf]  ;;  %v19827_v10 = vld [vmem:[%s20702_s9 + $0x23a4] sm:$0xf] }
 0x159   : > { %9955 = vmatpush.bf16.msrb.mxu0 %v15490_v33  ;;  %v17930_v33 = vor.u32 %v20017_v20, %v17927_v23  ;;  %v19987_v20 = vld [vmem:[%s20702_s9 + $0x28a4] sm:$0xf]  ;;  %v17807_v23 = vld [vmem:[%s20702_s9 + $0x28c8] sm:$0xf0] }
 0x15a   : > { %9968 = vmatpush.bf16.msrb.mxu1 %v15810_v38  ;;  %v19927_v38 = vld [vmem:[%s20702_s9 + $0x26c4] sm:$0xf]  ;;  %v21372_v62 = vpop.f32.mrf.mxu1 }
 0x15b   : > { %9981 = vmatpush.bf16.msrb.mxu2 %v16130_v52  ;;  %v17887_v52 = vld [vmem:[%s20702_s9 + $0x2968] sm:$0xf0] }
 0x15c   : > { %9994 = vmatpush.bf16.msrb.mxu3 %v16450_v0  ;;  %9956 = vmatmul.bf16.vlgmr.msrb.gmra.mxu0 %v20971_v42  ;;  %v17207_v0 = vld [vmem:[%s20702_s9 + $0x2418] sm:$0xf0]  ;;  %v17890_v1 = vor.u32 %v20007_v46, %v17887_v52  ;;  %v19977_v46 = vld [vmem:[%s20702_s9 + $0x2854] sm:$0xf]  ;;  %v9711_v52 = vadd.f32 %v21295_v16, %v9698_v18 }
 0x15d   : > { %10000 = vmatpush.bf16.msra.mxu0 %v17050_v53  ;;  %9969 = vmatmul.bf16.vlgmr.msrb.gmra.mxu1 %v20966_v37  ;;  %v21368_v53 = vpop.f32.mrf.mxu0  ;;  %v17210_v7 = vor.u32 %v19837_v63, %v17207_v0  ;;  %v17130_v63 = vor.u32 %v19817_v47, %v17127_v11  ;;  %v19807_v0 = vld [vmem:[%s20702_s9 + $0x2304] sm:$0xf]  ;;  %v18287_v11 = vld [vmem:[%s20702_s9 + $0x2c88] sm:$0xf0] }
 0x15e   : > { %10013 = vmatpush.bf16.msra.mxu1 %v17370_v59  ;;  %9982 = vmatmul.bf16.vlgmr.msrb.gmra.mxu2 %v20973_v43  ;;  %v16887_v59 = vld [vmem:[%s20702_s9 + $0x2198] sm:$0xf0]  ;;  %v20107_v47 = vld [vmem:[%s20702_s9 + $0x2c64] sm:$0xf] }
 0x15f   : > { %10026 = vmatpush.bf16.msra.mxu2 %v17690_v60  ;;  %9995 = vmatmul.bf16.vlgmr.msrb.gmra.mxu3 %v21042_v34  ;;  %v17570_v60 = vor.u32 %v19927_v38, %v17567_v39  ;;  %v16890_v4 = vor.u32 %v19757_v57, %v16887_v59  ;;  %v17810_v38 = vor.u32 %v19987_v20, %v17807_v23  ;;  %v19897_v39 = vld [vmem:[%s20702_s9 + $0x25d4] sm:$0xf]  ;;  %v17767_v57 = vld [vmem:[%s20702_s9 + $0x2878] sm:$0xf0]  ;;  %v19727_v59 = vld [vmem:[%s20702_s9 + $0x2084] sm:$0xf] }
 0x160   : > { %10039 = vmatpush.bf16.msra.mxu3 %v18010_v3  ;;  %v17527_v3 = vld [vmem:[%s20702_s9 + $0x2698] sm:$0xf0]  ;;  %v18843_v20 = vld [vmem:[%s20702_s9 + $0x4dc] sm:$0xf0] }
 0x161   : > { %10001 = vmatpush.bf16.msra.mxu0 %v17010_v6  ;;  %v17847_v6 = vld [vmem:[%s20702_s9 + $0x2918] sm:$0xf0]  ;;  %v17530_v9 = vor.u32 %v19917_v2, %v17527_v3  ;;  %v21384_v13 = vpop.f32.mrf.mxu2  ;;  %v19887_v2 = vld [vmem:[%s20702_s9 + $0x2584] sm:$0xf]  ;;  %v9724_v3 = vadd.f32 %v21308_v41, %v9711_v52  ;;  %v17727_v41 = vld [vmem:[%s20702_s9 + $0x2828] sm:$0xf0] }
 0x162   : > { %10014 = vmatpush.bf16.msra.mxu1 %v17330_v30  ;;  %v16847_v30 = vld [vmem:[%s20702_s9 + $0x2148] sm:$0xf0]  ;;  %v17850_v14 = vor.u32 %v19997_v5, %v17847_v6  ;;  %v20117_v5 = vld [vmem:[%s20702_s9 + $0x2cb4] sm:$0xf]  ;;  %v18327_v6 = vld [vmem:[%s20702_s9 + $0x2cd8] sm:$0xf0] }
 0x163   : > { %10027 = vmatpush.bf16.msra.mxu2 %v17650_v12  ;;  %v17167_v12 = vld [vmem:[%s20702_s9 + $0x23c8] sm:$0xf0]  ;;  %v18330_v18 = vor.u32 %v20117_v5, %v18327_v6  ;;  %v13173_v52 = vld [vmem:[%s20702_s9 + $0x468] sm:$0xf]  ;;  %v13133_v5 = vld [vmem:[%s20702_s9 + $0x418] sm:$0xf] }
 0x164   : > { %10040 = vmatpush.bf16.msra.mxu3 %v17970_v15  ;;  %v19907_v15 = vld [vmem:[%s20702_s9 + $0x2624] sm:$0xf]  ;;  %v17170_v25 = vor.u32 %v19827_v10, %v17167_v12  ;;  %v18823_v6 = vld [vmem:[%s20702_s9 + $0x43c] sm:$0xf0] }
 0x165   : > { %10002 = vmatpush.bf16.msra.mxu0 %v16970_v19  ;;  %v16850_v19 = vor.u32 %v19747_v8, %v16847_v30  ;;  %v9751_v31 = vpop.f32.mrf.mxu0  ;;  %v17490_v32 = vor.u32 %v19907_v15, %v17487_v17  ;;  %v20197_v8 = vld [vmem:[%s20702_s9 + $0x2f34] sm:$0xf]  ;;  %v18647_v30 = vld [vmem:[%s20702_s9 + $0x2f58] sm:$0xf0]  ;;  %v19967_v15 = vld [vmem:[%s20702_s9 + $0x2804] sm:$0xf] }
 0x166   : > { %10015 = vmatpush.bf16.msra.mxu1 %v17290_v24  ;;  %v21392_v24 = vpop.f32.mrf.mxu3 }
 0x167   : > { %10028 = vmatpush.bf16.msra.mxu2 %v17610_v29  ;;  %v16807_v29 = vld [vmem:[%s20702_s9 + $0x20f8] sm:$0xf0] }
 0x168   : > { %10041 = vmatpush.bf16.msra.mxu3 %v17930_v33  ;;  %v9764_v33 = vpop.f32.mrf.mxu1 }
 0x169   : > { %10003 = vmatpush.bf16.msra.mxu0 %v16930_v40  ;;  %v17447_v40 = vld [vmem:[%s20702_s9 + $0x25f8] sm:$0xf0]  ;;  %v9777_v10 = vpop.f32.mrf.mxu2  ;;  %v20187_v33 = vld [vmem:[%s20702_s9 + $0x2ee4] sm:$0xf] }
 0x16a   : > { %10016 = vmatpush.bf16.msra.mxu1 %v17250_v54  ;;  %v16810_v54 = vor.u32 %v19737_v26, %v16807_v29  ;;  %v17450_v16 = vor.u32 %v19897_v39, %v17447_v40  ;;  %v18650_v29 = vor.u32 %v20197_v8, %v18647_v30  ;;  %v18607_v40 = vld [vmem:[%s20702_s9 + $0x2f08] sm:$0xf0] }
 0x16b   : > { %10029 = vmatpush.bf16.msra.mxu2 %v17570_v60  ;;  %v16767_v60 = vld [vmem:[%s20702_s9 + $0x20a8] sm:$0xf0] }
 0x16c   : > { %10042 = vmatpush.bf16.msra.mxu3 %v17890_v1  ;;  %v17087_v1 = vld [vmem:[%s20702_s9 + $0x2328] sm:$0xf0]  ;;  %v16770_v12 = vor.u32 %v19727_v59, %v16767_v60  ;;  %v20097_v60 = vld [vmem:[%s20702_s9 + $0x2c14] sm:$0xf] }
 0x16d   : > { %10004 = vmatpush.bf16.msra.mxu0 %v16890_v4  ;;  %v17407_v4 = vld [vmem:[%s20702_s9 + $0x25a8] sm:$0xf0]  ;;  %v17090_v17 = vor.u32 %v19807_v0, %v17087_v1  ;;  %v20177_v0 = vld [vmem:[%s20702_s9 + $0x2e94] sm:$0xf] }
 0x16e   : > { %10017 = vmatpush.bf16.msra.mxu1 %v17210_v7  ;;  %v17770_v7 = vor.u32 %v19977_v46, %v17767_v57  ;;  %v9790_v23 = vpop.f32.mrf.mxu3  ;;  %v17410_v26 = vor.u32 %v19887_v2, %v17407_v4  ;;  %v18753_v46 = vld [vmem:[%s20702_s9 + $0x20c] sm:$0xf0]  ;;  %v18290_v57 = vor.u32 %v20107_v47, %v18287_v11  ;;  %v18743_v4 = vld [vmem:[%s20702_s9 + $0x1bc] sm:$0xf0]  ;;  %v18207_v10 = vld [vmem:[%s20702_s9 + $0x2be8] sm:$0xf0] }
 0x16f   : > { %10030 = vmatpush.bf16.msra.mxu2 %v17530_v9  ;;  %v12893_v9 = vld [vmem:[%s20702_s9 + $0x238] sm:$0xf] }
 0x170   : > { %10043 = vmatpush.bf16.msra.mxu3 %v17850_v14  ;;  %v18763_v14 = vld [vmem:[%s20702_s9 + $0x25c] sm:$0xf0] }
 0x171   : > { %10005 = vmatpush.bf16.msra.mxu0 %v16850_v19  ;;  %v13213_v19 = vld [vmem:[%s20702_s9 + $0x4b8] sm:$0xf]  ;;  %v12894_v31 = vor.u32 %v18763_v14, %v12893_v9  ;;  %v20087_v9 = vld [vmem:[%s20702_s9 + $0x2bc4] sm:$0xf]  ;;  %v13134_v14 = vor.u32 %v18823_v6, %v13133_v5  ;;  %v18793_v5 = vld [vmem:[%s20702_s9 + $0x34c] sm:$0xf0] }
 0x172   : > { %10018 = vmatpush.bf16.msra.mxu1 %v17170_v25  ;;  %v9737_v25 = vadd.f32 %v21314_v58, %v9724_v3  ;;  %v13214_v39 = vor.u32 %v18843_v20, %v13213_v19  ;;  %v12853_v58 = vld [vmem:[%s20702_s9 + $0x1e8] sm:$0xf]  ;;  %v18567_v3 = vld [vmem:[%s20702_s9 + $0x2eb8] sm:$0xf0]  ;;  %v18210_v20 = vor.u32 %v20087_v9, %v18207_v10  ;;  %v20137_v10 = vld [vmem:[%s20702_s9 + $0x2d54] sm:$0xf] }
 0x173   : > { %10031 = vmatpush.bf16.msra.mxu2 %v17490_v32  ;;  %v17730_v32 = vor.u32 %v19967_v15, %v17727_v41  ;;  %v12854_v59 = vor.u32 %v18753_v46, %v12853_v58  ;;  %v18570_v8 = vor.u32 %v20177_v0, %v18567_v3  ;;  %v18527_v15 = vld [vmem:[%s20702_s9 + $0x2e68] sm:$0xf0]  ;;  %v18733_v41 = vld [vmem:[%s20702_s9 + $0x16c] sm:$0xf0]  ;;  %v18803_v58 = vld [vmem:[%s20702_s9 + $0x39c] sm:$0xf0] }
 0x174   : > { %10044 = vmatpush.bf16.msra.mxu3 %v17810_v38  ;;  %v9750_v38 = vadd.f32 %v21368_v53, %v9737_v25  ;;  %v18610_v53 = vor.u32 %v20187_v33, %v18607_v40  ;;  %v18487_v33 = vld [vmem:[%s20702_s9 + $0x2e18] sm:$0xf0]  ;;  %v13053_v40 = vld [vmem:[%s20702_s9 + $0x378] sm:$0xf]  ;;  %v18447_v0 = vld [vmem:[%s20702_s9 + $0x2dc8] sm:$0xf0] }
 0x175   : > { %10006 = vmatpush.bf16.msra.mxu0 %v16810_v54  ;;  %v18833_v54 = vld [vmem:[%s20702_s9 + $0x48c] sm:$0xf0]  ;;  %v377_v3 = vld [vmem:[#allocation2 + $0x30] sm:$0xff]  ;;  %v18087_v9 = vld [vmem:[%s20702_s9 + $0x2af8] sm:$0xf0] }
 0x176   : > { %10019 = vmatpush.bf16.msra.mxu1 %v17130_v63  ;;  %v18247_v63 = vld [vmem:[%s20702_s9 + $0x2c38] sm:$0xf0]  ;;  %v9763_v1 = vadd.f32 %v21372_v62, %v9750_v38  ;;  %v13174_v2 = vor.u32 %v18833_v54, %v13173_v52  ;;  %v12733_v38 = vld [vmem:[%s20702_s9 + $0xf8] sm:$0xf] }
 0x177   : > { %10032 = vmatpush.bf16.msra.mxu2 %v17450_v16  ;;  %v12813_v16 = vld [vmem:[%s20702_s9 + $0x198] sm:$0xf] }
 0x178   : > { %10045 = vmatpush.bf16.msra.mxu3 %v17770_v7  ;;  %v9776_v62 = vadd.f32 %v21384_v13, %v9763_v1  ;;  %v18250_v7 = vor.u32 %v20097_v60, %v18247_v63  ;;  %v12814_v30 = vor.u32 %v18743_v4, %v12813_v16  ;;  %v12773_v13 = vld [vmem:[%s20702_s9 + $0x148] sm:$0xf]  ;;  %v13054_v63 = vor.u32 %v18803_v58, %v13053_v40  ;;  %v18923_v40 = vld [vmem:[%s20702_s9 + $0x75c] sm:$0xf0]  ;;  %v13853_v58 = vld [vmem:[%s20702_s9 + $0x9b8] sm:$0xf] }
 0x179   : > { %10007 = vmatpush.bf16.msra.mxu0 %v16770_v12  ;;  %v20167_v12 = vld [vmem:[%s20702_s9 + $0x2e44] sm:$0xf]  ;;  %v9801_v23 = vpop.f32.mrf.mxu0  ;;  %v12693_v1 = vld [vmem:[%s20702_s9 + $0xa8] sm:$0xf] }
 0x17a   : > { %10020 = vmatpush.bf16.msra.mxu1 %v17090_v17  ;;  %v13093_v17 = vld [vmem:[%s20702_s9 + $0x3c8] sm:$0xf]  ;;  %v9789_v19 = vadd.f32 %v21392_v24, %v9776_v62  ;;  %v18530_v25 = vor.u32 %v20167_v12, %v18527_v15  ;;  %v9814_v24 = vpop.f32.mrf.mxu1 }
 0x17b   : > { %10033 = vmatpush.bf16.msra.mxu2 %v17410_v26  ;;  %v12774_v26 = vor.u32 %v18733_v41, %v12773_v13  ;;  %v13013_v4 = vld [vmem:[%s20702_s9 + $0x328] sm:$0xf]  ;;  %v18407_v13 = vld [vmem:[%s20702_s9 + $0x2d78] sm:$0xf0]  ;;  %v12653_v41 = vld [vmem:[%s20702_s9 + $0x58] sm:$0xf] }
 0x17c   : > { %10046 = vmatpush.bf16.msra.mxu3 %v17730_v32  ;;  %10008 = vmatmul.bf16.vlgmr.msra.gmra.mxu0 %v21049_v44  ;;  %v20157_v32 = vld [vmem:[%s20702_s9 + $0x2df4] sm:$0xf]  ;;  %v9802_v47 = vadd.f32 %v9801_v23, %v9789_v19  ;;  %v13014_v15 = vor.u32 %v18793_v5, %v13013_v4  ;;  %v18783_v23 = vld [vmem:[%s20702_s9 + $0x2fc] sm:$0xf0]  ;;  %v13493_v4 = vld [vmem:[%s20702_s9 + $0x6e8] sm:$0xf] }
 0x17d   : > { %10052 = vmatpush.bf16.msrb.mxu0 %v18330_v18  ;;  %10021 = vmatmul.bf16.vlgmr.msra.gmra.mxu1 %v21044_v35  ;;  %v18813_v18 = vld [vmem:[%s20702_s9 + $0x3ec] sm:$0xf0]  ;;  %v18490_v52 = vor.u32 %v20157_v32, %v18487_v33 }
 0x17e   : > { %10065 = vmatpush.bf16.msrb.mxu1 %v18650_v29  ;;  %10034 = vmatmul.bf16.vlgmr.msra.gmra.mxu2 %v21051_v45  ;;  %v20077_v29 = vld [vmem:[%s20702_s9 + $0x2b74] sm:$0xf]  ;;  %v13094_v11 = vor.u32 %v18813_v18, %v13093_v17  ;;  %v9815_v60 = vadd.f32 %v9814_v24, %v9802_v47  ;;  %v18703_v17 = vld [vmem:[%s20702_s9 + $0x7c] sm:$0xf0]  ;;  %v20127_v47 = vld [vmem:[%s20702_s9 + $0x2d04] sm:$0xf] }
 0x17f   : > { %10078 = vmatpush.bf16.msrb.mxu2 %v12894_v31  ;;  %10047 = vmatmul.bf16.vlgmr.msra.gmra.mxu3 %v21121_v49  ;;  %v18167_v31 = vld [vmem:[%s20702_s9 + $0x2b98] sm:$0xf0]  ;;  %v12654_v32 = vor.u32 %v18703_v17, %v12653_v41  ;;  %v18367_v24 = vld [vmem:[%s20702_s9 + $0x2d28] sm:$0xf0]  ;;  %v13453_v17 = vld [vmem:[%s20702_s9 + $0x698] sm:$0xf] }
 0x180   : > { %10091 = vmatpush.bf16.msrb.mxu3 %v13214_v39  ;;  %v18723_v39 = vld [vmem:[%s20702_s9 + $0x11c] sm:$0xf0]  ;;  %v18170_v46 = vor.u32 %v20077_v29, %v18167_v31  ;;  %v18047_v29 = vld [vmem:[%s20702_s9 + $0x2aa8] sm:$0xf0]  ;;  %v18410_v31 = vor.u32 %v20137_v10, %v18407_v13  ;;  %v14133_v10 = vld [vmem:[%s20702_s9 + $0xbe8] sm:$0xf] }
 0x181   : > { %10053 = vmatpush.bf16.msrb.mxu0 %v18290_v57  ;;  %v12734_v54 = vor.u32 %v18723_v39, %v12733_v38  ;;  %v20067_v57 = vld [vmem:[%s20702_s9 + $0x2b24] sm:$0xf]  ;;  %v9827_v16 = vpop.f32.mrf.mxu2  ;;  %v9803_v12 = vpop.f32.mrf.mxu0  ;;  %v18693_v38 = vld [vmem:[%s20702_s9 + $0x2c] sm:$0xf0]  ;;  %v13533_v39 = vld [vmem:[%s20702_s9 + $0x738] sm:$0xf] }
 0x182   : > { %10066 = vmatpush.bf16.msrb.mxu1 %v18610_v53  ;;  %v18127_v53 = vld [vmem:[%s20702_s9 + $0x2b48] sm:$0xf0]  ;;  %v9828_v6 = vadd.f32 %v9827_v16, %v9815_v60  ;;  %v9816_v18 = vpop.f32.mrf.mxu1  ;;  %v21475_v19 = vpop.f32.mrf.mxu3  ;;  %v18773_v60 = vld [vmem:[%s20702_s9 + $0x2ac] sm:$0xf0] }
 0x183   : > { %10079 = vmatpush.bf16.msrb.mxu2 %v12854_v59  ;;  %v20147_v59 = vld [vmem:[%s20702_s9 + $0x2da4] sm:$0xf]  ;;  %v18130_v62 = vor.u32 %v20067_v57, %v18127_v53  ;;  %v19083_v53 = vld [vmem:[%s20702_s9 + $0xc5c] sm:$0xf0]  ;;  %v19073_v12 = vld [vmem:[%s20702_s9 + $0xc0c] sm:$0xf0] }
 0x184   : > { %10092 = vmatpush.bf16.msrb.mxu3 %v13174_v2  ;;  %v18713_v2 = vld [vmem:[%s20702_s9 + $0xcc] sm:$0xf0]  ;;  %v14134_v18 = vor.u32 %v19073_v12, %v14133_v10 }
 0x185   : > { %10054 = vmatpush.bf16.msrb.mxu0 %v18250_v7  ;;  %v18450_v7 = vor.u32 %v20147_v59, %v18447_v0  ;;  %v12933_v59 = vld [vmem:[%s20702_s9 + $0x288] sm:$0xf] }
 0x186   : > { %10067 = vmatpush.bf16.msrb.mxu1 %v18570_v8  ;;  %v12694_v8 = vor.u32 %v18713_v2, %v12693_v1  ;;  %v14493_v1 = vld [vmem:[%s20702_s9 + $0xeb8] sm:$0xf]  ;;  %v19163_v2 = vld [vmem:[%s20702_s9 + $0xedc] sm:$0xf0] }
 0x187   : > { %10080 = vmatpush.bf16.msrb.mxu2 %v12814_v30  ;;  %v20057_v30 = vld [vmem:[%s20702_s9 + $0x2ad4] sm:$0xf] }
 0x188   : > { %10093 = vmatpush.bf16.msrb.mxu3 %v13134_v14  ;;  %v12054_v14 = vadd.f32 %v9828_v6, %v377_v3  ;;  %v13534_v3 = vor.u32 %v18923_v40, %v13533_v39  ;;  %v18893_v39 = vld [vmem:[%s20702_s9 + $0x66c] sm:$0xf0]  ;;  %v13733_v40 = vld [vmem:[%s20702_s9 + $0x8c8] sm:$0xf] }
 0x189   : > { %10055 = vmatpush.bf16.msrb.mxu0 %v18210_v20  ;;  %v12973_v20 = vld [vmem:[%s20702_s9 + $0x2d8] sm:$0xf] }
 0x18a   : > { %10068 = vmatpush.bf16.msrb.mxu1 %v18530_v25  ;;  %12064 = vst [vmem:[#allocation2 + $0x30] sm:$0xff] %v12054_v14  ;;  %v18090_v25 = vor.u32 %v20057_v30, %v18087_v9  ;;  %v12974_v33 = vor.u32 %v18783_v23, %v12973_v20  ;;  %v9842_v5 = vpop.f32.mrf.mxu3  ;;  %v18993_v30 = vld [vmem:[%s20702_s9 + $0x98c] sm:$0xf0]  ;;  %v14494_v9 = vor.u32 %v19163_v2, %v14493_v1  ;;  %v14453_v14 = vld [vmem:[%s20702_s9 + $0xe68] sm:$0xf] }
 0x18b   : > { %10081 = vmatpush.bf16.msrb.mxu2 %v12774_v26  ;;  %v20047_v26 = vld [vmem:[%s20702_s9 + $0x2a84] sm:$0xf]  ;;  %v18903_v20 = vld [vmem:[%s20702_s9 + $0x6bc] sm:$0xf0]  ;;  %v13773_v23 = vld [vmem:[%s20702_s9 + $0x918] sm:$0xf] }
 0x18c   : > { %10094 = vmatpush.bf16.msrb.mxu3 %v13094_v11  ;;  %v12613_v11 = vld [vmem:[%s20702_s9 + $0x8] sm:$0xf]  ;;  %v18050_v57 = vor.u32 %v20047_v26, %v18047_v29  ;;  %v14093_v29 = vld [vmem:[%s20702_s9 + $0xb98] sm:$0xf]  ;;  %v18883_v2 = vld [vmem:[%s20702_s9 + $0x61c] sm:$0xf0] }
 0x18d   : > { %10056 = vmatpush.bf16.msrb.mxu0 %v18170_v46  ;;  %v19003_v46 = vld [vmem:[%s20702_s9 + $0x9dc] sm:$0xf0]  ;;  %v12614_v0 = vor.u32 %v18693_v38, %v12613_v11 }
 0x18e   : > { %10069 = vmatpush.bf16.msrb.mxu1 %v18490_v52  ;;  %v14173_v52 = vld [vmem:[%s20702_s9 + $0xc38] sm:$0xf]  ;;  %v13854_v16 = vor.u32 %v19003_v46, %v13853_v58  ;;  %v18973_v58 = vld [vmem:[%s20702_s9 + $0x8ec] sm:$0xf0] }
 0x18f   : > { %10082 = vmatpush.bf16.msrb.mxu2 %v12734_v54  ;;  %v9829_v54 = vpop.f32.mrf.mxu2  ;;  %v14174_v6 = vor.u32 %v19083_v53, %v14173_v52  ;;  %v14053_v52 = vld [vmem:[%s20702_s9 + $0xb48] sm:$0xf]  ;;  %v19133_v53 = vld [vmem:[%s20702_s9 + $0xdec] sm:$0xf0] }
 0x190   : > { %10095 = vmatpush.bf16.msrb.mxu3 %v13054_v63  ;;  %v18370_v63 = vor.u32 %v20127_v47, %v18367_v24  ;;  %v19143_v47 = vld [vmem:[%s20702_s9 + $0xe3c] sm:$0xf0]  ;;  %v13454_v24 = vor.u32 %v18903_v20, %v13453_v17  ;;  %v19053_v54 = vld [vmem:[%s20702_s9 + $0xb6c] sm:$0xf0] }
 0x191   : > { %10057 = vmatpush.bf16.msrb.mxu0 %v18130_v62  ;;  %v12934_v62 = vor.u32 %v18773_v60, %v12933_v59  ;;  %v13734_v60 = vor.u32 %v18973_v58, %v13733_v40  ;;  %v14054_v1 = vor.u32 %v19053_v54, %v14053_v52  ;;  %v19033_v20 = vld [vmem:[%s20702_s9 + $0xacc] sm:$0xf0]  ;;  %v13933_v58 = vld [vmem:[%s20702_s9 + $0xa58] sm:$0xf] }
 0x192   : > { %10070 = vmatpush.bf16.msrb.mxu1 %v18450_v7  ;;  %v18913_v7 = vld [vmem:[%s20702_s9 + $0x70c] sm:$0xf0] }
 0x193   : > { %10083 = vmatpush.bf16.msrb.mxu2 %v12694_v8  ;;  %v13813_v8 = vld [vmem:[%s20702_s9 + $0x968] sm:$0xf]  ;;  %v13494_v13 = vor.u32 %v18913_v7, %v13493_v4 }
 0x194   : > { %10096 = vmatpush.bf16.msrb.mxu3 %v13014_v15  ;;  %v19153_v15 = vld [vmem:[%s20702_s9 + $0xe8c] sm:$0xf0]  ;;  %v13814_v41 = vor.u32 %v18993_v30, %v13813_v8  ;;  %v14333_v8 = vld [vmem:[%s20702_s9 + $0xd78] sm:$0xf]  ;;  %v19123_v30 = vld [vmem:[%s20702_s9 + $0xd9c] sm:$0xf0] }
 0x195   : > { %10058 = vmatpush.bf16.msrb.mxu0 %v18090_v25  ;;  %v18983_v25 = vld [vmem:[%s20702_s9 + $0x93c] sm:$0xf0]  ;;  %v14454_v26 = vor.u32 %v19153_v15, %v14453_v14  ;;  %v18873_v15 = vld [vmem:[%s20702_s9 + $0x5cc] sm:$0xf0]  ;;  %v14334_v17 = vor.u32 %v19123_v30, %v14333_v8  ;;  %v15133_v8 = vld [vmem:[%s20702_s9 + $0x13b8] sm:$0xf] }
 0x196   : > { %10071 = vmatpush.bf16.msrb.mxu1 %v18410_v31  ;;  %v19063_v31 = vld [vmem:[%s20702_s9 + $0xbbc] sm:$0xf0]  ;;  %v13774_v11 = vor.u32 %v18983_v25, %v13773_v23  ;;  %v14293_v23 = vld [vmem:[%s20702_s9 + $0xd28] sm:$0xf]  ;;  %v19113_v25 = vld [vmem:[%s20702_s9 + $0xd4c] sm:$0xf0] }
 0x197   : > { %10084 = vmatpush.bf16.msrb.mxu2 %v12654_v32  ;;  %v14413_v32 = vld [vmem:[%s20702_s9 + $0xe18] sm:$0xf]  ;;  %v14094_v38 = vor.u32 %v19063_v31, %v14093_v29  ;;  %v14294_v40 = vor.u32 %v19113_v25, %v14293_v23  ;;  %v19323_v30 = vld [vmem:[%s20702_s9 + $0x13dc] sm:$0xf0] }
 0x198   : > { %10097 = vmatpush.bf16.msrb.mxu3 %v12974_v33  ;;  %v13413_v33 = vld [vmem:[%s20702_s9 + $0x648] sm:$0xf]  ;;  %v14414_v46 = vor.u32 %v19143_v47, %v14413_v32  ;;  %v13293_v32 = vld [vmem:[%s20702_s9 + $0x558] sm:$0xf]  ;;  %v15134_v23 = vor.u32 %v19323_v30, %v15133_v8  ;;  %v19293_v8 = vld [vmem:[%s20702_s9 + $0x12ec] sm:$0xf0] }
 0x199   : > { %10059 = vmatpush.bf16.msrb.mxu0 %v18050_v57  ;;  %v14373_v57 = vld [vmem:[%s20702_s9 + $0xdc8] sm:$0xf]  ;;  %v13414_v59 = vor.u32 %v18893_v39, %v13413_v33  ;;  %v18863_v33 = vld [vmem:[%s20702_s9 + $0x57c] sm:$0xf0] }
 0x19a   : > { %10072 = vmatpush.bf16.msrb.mxu1 %v18370_v63  ;;  %v13373_v63 = vld [vmem:[%s20702_s9 + $0x5f8] sm:$0xf]  ;;  %v14374_v5 = vor.u32 %v19133_v53, %v14373_v57  ;;  %v9866_v7 = vpop.f32.mrf.mxu1  ;;  %v18943_v39 = vld [vmem:[%s20702_s9 + $0x7fc] sm:$0xf0]  ;;  %v15333_v30 = vld [vmem:[%s20702_s9 + $0x1548] sm:$0xf] }
 0x19b   : > { %10085 = vmatpush.bf16.msrb.mxu2 %v12614_v0  ;;  %v9853_v0 = vpop.f32.mrf.mxu0  ;;  %v13374_v10 = vor.u32 %v18883_v2, %v13373_v63  ;;  %v14253_v57 = vld [vmem:[%s20702_s9 + $0xcd8] sm:$0xf]  ;;  %v19103_v53 = vld [vmem:[%s20702_s9 + $0xcfc] sm:$0xf0]  ;;  %v13573_v2 = vld [vmem:[%s20702_s9 + $0x788] sm:$0xf] }
 0x19c   : > { %10098 = vmatpush.bf16.msrb.mxu3 %v12934_v62  ;;  %10060 = vmatmul.bf16.vlgmr.msrb.gmra.mxu0 %v21127_v56  ;;  %v9854_v4 = vadd.f32 %v9853_v0, %v21475_v19  ;;  %v19043_v62 = vld [vmem:[%s20702_s9 + $0xb1c] sm:$0xf0]  ;;  %v13333_v19 = vld [vmem:[%s20702_s9 + $0x5a8] sm:$0xf] }
 0x19d   : > { %10104 = vmatpush.bf16.msra.mxu0 %v13534_v3  ;;  %10073 = vmatmul.bf16.vlgmr.msrb.gmra.mxu1 %v21123_v50  ;;  %v13693_v3 = vld [vmem:[%s20702_s9 + $0x878] sm:$0xf]  ;;  %v13334_v29 = vor.u32 %v18873_v15, %v13333_v19  ;;  %v13253_v0 = vld [vmem:[%s20702_s9 + $0x508] sm:$0xf] }
 0x19e   : > { %10117 = vmatpush.bf16.msra.mxu1 %v13854_v16  ;;  %10086 = vmatmul.bf16.vlgmr.msrb.gmra.mxu2 %v20829_v27  ;;  %v18963_v16 = vld [vmem:[%s20702_s9 + $0x89c] sm:$0xf0]  ;;  %v14213_v15 = vld [vmem:[%s20702_s9 + $0xc88] sm:$0xf] }
 0x19f   : > { %10130 = vmatpush.bf16.msra.mxu2 %v14174_v6  ;;  %10099 = vmatmul.bf16.vlgmr.msrb.gmra.mxu3 %v20831_v28  ;;  %v14013_v6 = vld [vmem:[%s20702_s9 + $0xaf8] sm:$0xf]  ;;  %v13694_v12 = vor.u32 %v18963_v16, %v13693_v3  ;;  %v18933_v16 = vld [vmem:[%s20702_s9 + $0x7ac] sm:$0xf0] }
 0x1a0   : > { %10143 = vmatpush.bf16.msra.mxu3 %v14494_v9  ;;  %v9867_v9 = vadd.f32 %v9866_v7, %v9854_v4  ;;  %v14014_v14 = vor.u32 %v19043_v62, %v14013_v6  ;;  %v13893_v4 = vld [vmem:[%s20702_s9 + $0xa08] sm:$0xf]  ;;  %v14254_v6 = vor.u32 %v19103_v53, %v14253_v57  ;;  %v14813_v62 = vld [vmem:[%s20702_s9 + $0x1138] sm:$0xf]  ;;  %v19243_v7 = vld [vmem:[%s20702_s9 + $0x115c] sm:$0xf0] }
 0x1a1   : > { %10105 = vmatpush.bf16.msra.mxu0 %v13494_v13  ;;  %v13653_v13 = vld [vmem:[%s20702_s9 + $0x828] sm:$0xf]  ;;  %v19223_v57 = vld [vmem:[%s20702_s9 + $0x10bc] sm:$0xf0]  ;;  %v15053_v53 = vld [vmem:[%s20702_s9 + $0x1318] sm:$0xf] }
 0x1a2   : > { %10118 = vmatpush.bf16.msra.mxu1 %v13814_v41  ;;  %v18953_v41 = vld [vmem:[%s20702_s9 + $0x84c] sm:$0xf0]  ;;  %v9892_v52 = vpop.f32.mrf.mxu3  ;;  %v9868_v54 = vpop.f32.mrf.mxu1 }
 0x1a3   : > { %10131 = vmatpush.bf16.msra.mxu2 %v14134_v18  ;;  %v13973_v18 = vld [vmem:[%s20702_s9 + $0xaa8] sm:$0xf]  ;;  %v13654_v31 = vor.u32 %v18953_v41, %v13653_v13  ;;  %v19093_v13 = vld [vmem:[%s20702_s9 + $0xcac] sm:$0xf0]  ;;  %v14733_v54 = vld [vmem:[%s20702_s9 + $0x1098] sm:$0xf] }
 0x1a4   : > { %10144 = vmatpush.bf16.msra.mxu3 %v14454_v26  ;;  %v9879_v26 = vpop.f32.mrf.mxu2 }
 0x1a5   : > { %10106 = vmatpush.bf16.msra.mxu0 %v13454_v24  ;;  %v9880_v47 = vadd.f32 %v9879_v26, %v9867_v9  ;;  %v9855_v24 = vpop.f32.mrf.mxu0  ;;  %v15453_v9 = vld [vmem:[%s20702_s9 + $0x1638] sm:$0xf]  ;;  %v14773_v26 = vld [vmem:[%s20702_s9 + $0x10e8] sm:$0xf] }
 0x1a6   : > { %10119 = vmatpush.bf16.msra.mxu1 %v13774_v11  ;;  %v13974_v11 = vor.u32 %v19033_v20, %v13973_v18  ;;  %v15773_v18 = vld [vmem:[%s20702_s9 + $0x18b8] sm:$0xf]  ;;  %v19483_v20 = vld [vmem:[%s20702_s9 + $0x18dc] sm:$0xf0]  ;;  %v19313_v24 = vld [vmem:[%s20702_s9 + $0x138c] sm:$0xf0] }
 0x1a7   : > { %10132 = vmatpush.bf16.msra.mxu2 %v14094_v38  ;;  %v13613_v38 = vld [vmem:[%s20702_s9 + $0x7d8] sm:$0xf] }
 0x1a8   : > { %10145 = vmatpush.bf16.msra.mxu3 %v14414_v46  ;;  %v19023_v46 = vld [vmem:[%s20702_s9 + $0xa7c] sm:$0xf0]  ;;  %v13614_v63 = vor.u32 %v18943_v39, %v13613_v38  ;;  %v15774_v38 = vor.u32 %v19483_v20, %v15773_v18  ;;  %v14973_v18 = vld [vmem:[%s20702_s9 + $0x1278] sm:$0xf] }
 0x1a9   : > { %10107 = vmatpush.bf16.msra.mxu0 %v13414_v59  ;;  %v21548_v59 = vadd.f32 %v9892_v52, %v9880_v47  ;;  %v13934_v3 = vor.u32 %v19023_v46, %v13933_v58  ;;  %v14214_v47 = vor.u32 %v19093_v13, %v14213_v15  ;;  %v19473_v58 = vld [vmem:[%s20702_s9 + $0x188c] sm:$0xf0] }
 0x1aa   : > { %10120 = vmatpush.bf16.msra.mxu1 %v13734_v60  ;;  %v13294_v60 = vor.u32 %v18863_v33, %v13293_v32  ;;  %v9894_v32 = vpop.f32.mrf.mxu3  ;;  %v19393_v33 = vld [vmem:[%s20702_s9 + $0x160c] sm:$0xf0] }
 0x1ab   : > { %10133 = vmatpush.bf16.msra.mxu2 %v14054_v1  ;;  %v18853_v1 = vld [vmem:[%s20702_s9 + $0x52c] sm:$0xf0] }
 0x1ac   : > { %10146 = vmatpush.bf16.msra.mxu3 %v14374_v5  ;;  %v19013_v5 = vld [vmem:[%s20702_s9 + $0xa2c] sm:$0xf0]  ;;  %v13254_v19 = vor.u32 %v18853_v1, %v13253_v0  ;;  %v19383_v0 = vld [vmem:[%s20702_s9 + $0x15bc] sm:$0xf0] }
 0x1ad   : > { %10108 = vmatpush.bf16.msra.mxu0 %v13374_v10  ;;  %v19403_v10 = vld [vmem:[%s20702_s9 + $0x165c] sm:$0xf0]  ;;  %v13894_v41 = vor.u32 %v19013_v5, %v13893_v4 }
 0x1ae   : > { %10121 = vmatpush.bf16.msra.mxu1 %v13694_v12  ;;  %v9881_v12 = vpop.f32.mrf.mxu2  ;;  %v15454_v25 = vor.u32 %v19403_v10, %v15453_v9  ;;  %v19373_v9 = vld [vmem:[%s20702_s9 + $0x156c] sm:$0xf0] }
 0x1af   : > { %10134 = vmatpush.bf16.msra.mxu2 %v14014_v14  ;;  %v13574_v14 = vor.u32 %v18933_v16, %v13573_v2  ;;  %v14734_v2 = vor.u32 %v19223_v57, %v14733_v54  ;;  %v19463_v16 = vld [vmem:[%s20702_s9 + $0x183c] sm:$0xf0]  ;;  %v15334_v13 = vor.u32 %v19373_v9, %v15333_v30  ;;  %v19353_v54 = vld [vmem:[%s20702_s9 + $0x14cc] sm:$0xf0]  ;;  %v15533_v9 = vld [vmem:[%s20702_s9 + $0x16d8] sm:$0xf] }
 0x1b0   : > { %10147 = vmatpush.bf16.msra.mxu3 %v14334_v17  ;;  %v14814_v17 = vor.u32 %v19243_v7, %v14813_v62  ;;  %v19213_v62 = vld [vmem:[%s20702_s9 + $0x106c] sm:$0xf0]  ;;  %v15013_v7 = vld [vmem:[%s20702_s9 + $0x12c8] sm:$0xf] }
 0x1b1   : > { %10109 = vmatpush.bf16.msra.mxu0 %v13334_v29  ;;  %v19233_v29 = vld [vmem:[%s20702_s9 + $0x110c] sm:$0xf0]  ;;  %v15014_v15 = vor.u32 %v19293_v8, %v15013_v7  ;;  %v19343_v7 = vld [vmem:[%s20702_s9 + $0x147c] sm:$0xf0] }
 0x1b2   : > { %10122 = vmatpush.bf16.msra.mxu1 %v13654_v31  ;;  %v15093_v31 = vld [vmem:[%s20702_s9 + $0x1368] sm:$0xf]  ;;  %v14774_v39 = vor.u32 %v19233_v29, %v14773_v26  ;;  %v19363_v26 = vld [vmem:[%s20702_s9 + $0x151c] sm:$0xf0] }
 0x1b3   : > { %10135 = vmatpush.bf16.msra.mxu2 %v13974_v11  ;;  %v15413_v11 = vld [vmem:[%s20702_s9 + $0x15e8] sm:$0xf]  ;;  %v15094_v46 = vor.u32 %v19313_v24, %v15093_v31  ;;  %v15613_v24 = vld [vmem:[%s20702_s9 + $0x1778] sm:$0xf] }
 0x1b4   : > { %10148 = vmatpush.bf16.msra.mxu3 %v14294_v40  ;;  %v15733_v40 = vld [vmem:[%s20702_s9 + $0x1868] sm:$0xf]  ;;  %v15414_v52 = vor.u32 %v19393_v33, %v15413_v11  ;;  %v19443_v11 = vld [vmem:[%s20702_s9 + $0x179c] sm:$0xf0] }
 0x1b5   : > { %10110 = vmatpush.bf16.msra.mxu0 %v13294_v60  ;;  %v19303_v60 = vld [vmem:[%s20702_s9 + $0x133c] sm:$0xf0]  ;;  %v15734_v1 = vor.u32 %v19473_v58, %v15733_v40  ;;  %v14613_v40 = vld [vmem:[%s20702_s9 + $0xfa8] sm:$0xf]  ;;  %v19193_v58 = vld [vmem:[%s20702_s9 + $0xfcc] sm:$0xf0]  ;;  %v15614_v57 = vor.u32 %v19443_v11, %v15613_v24 }
 0x1b6   : > { %10123 = vmatpush.bf16.msra.mxu1 %v13614_v63  ;;  %v15373_v63 = vld [vmem:[%s20702_s9 + $0x1598] sm:$0xf]  ;;  %v15054_v4 = vor.u32 %v19303_v60, %v15053_v53  ;;  %v14614_v60 = vor.u32 %v19193_v58, %v14613_v40  ;;  %v19413_v40 = vld [vmem:[%s20702_s9 + $0x16ac] sm:$0xf0] }
 0x1b7   : > { %10136 = vmatpush.bf16.msra.mxu2 %v13934_v3  ;;  %v15693_v3 = vld [vmem:[%s20702_s9 + $0x1818] sm:$0xf]  ;;  %v15374_v5 = vor.u32 %v19383_v0, %v15373_v63  ;;  %v15573_v63 = vld [vmem:[%s20702_s9 + $0x1728] sm:$0xf]  ;;  %v19433_v0 = vld [vmem:[%s20702_s9 + $0x174c] sm:$0xf0] }
 0x1b8   : > { %10149 = vmatpush.bf16.msra.mxu3 %v14254_v6  ;;  %v14693_v6 = vld [vmem:[%s20702_s9 + $0x1048] sm:$0xf]  ;;  %v15694_v10 = vor.u32 %v19463_v16, %v15693_v3  ;;  %v14573_v3 = vld [vmem:[%s20702_s9 + $0xf58] sm:$0xf]  ;;  %v19183_v16 = vld [vmem:[%s20702_s9 + $0xf7c] sm:$0xf0]  ;;  %v15574_v30 = vor.u32 %v19433_v0, %v15573_v63 }
 0x1b9   : > { %10111 = vmatpush.bf16.msra.mxu0 %v13254_v19  ;;  %v14694_v12 = vor.u32 %v19213_v62, %v14693_v6  ;;  %v15653_v19 = vld [vmem:[%s20702_s9 + $0x17c8] sm:$0xf]  ;;  %v9905_v20 = vpop.f32.mrf.mxu0  ;;  %v19263_v6 = vld [vmem:[%s20702_s9 + $0x11fc] sm:$0xf0]  ;;  %v15213_v62 = vld [vmem:[%s20702_s9 + $0x1458] sm:$0xf] }
 0x1ba   : > { %10124 = vmatpush.bf16.msra.mxu1 %v13574_v14  ;;  %v19453_v14 = vld [vmem:[%s20702_s9 + $0x17ec] sm:$0xf0]  ;;  %v9918_v29 = vpop.f32.mrf.mxu1  ;;  %v9906_v32 = vadd.f32 %v9905_v20, %v21548_v59  ;;  %v15253_v59 = vld [vmem:[%s20702_s9 + $0x14a8] sm:$0xf] }
 0x1bb   : > { %10137 = vmatpush.bf16.msra.mxu2 %v13894_v41  ;;  %v14653_v41 = vld [vmem:[%s20702_s9 + $0xff8] sm:$0xf]  ;;  %v15654_v31 = vor.u32 %v19453_v14, %v15653_v19  ;;  %v19423_v19 = vld [vmem:[%s20702_s9 + $0x16fc] sm:$0xf0]  ;;  %v14533_v14 = vld [vmem:[%s20702_s9 + $0xf08] sm:$0xf] }
 0x1bc   : > { %10150 = vmatpush.bf16.msra.mxu3 %v14214_v47  ;;  %10112 = vmatmul.bf16.vlgmr.msra.gmra.mxu0 %v20822_v21  ;;  %v15173_v20 = vld [vmem:[%s20702_s9 + $0x1408] sm:$0xf] }
 0x1bd   : > { %10156 = vmatpush.bf16.msrb.mxu0 %v14814_v17  ;;  %10125 = vmatmul.bf16.vlgmr.msra.gmra.mxu1 %v20824_v22  ;;  %v19203_v17 = vld [vmem:[%s20702_s9 + $0x101c] sm:$0xf0] }
 0x1be   : > { %10169 = vmatpush.bf16.msrb.mxu1 %v15134_v23  ;;  %10138 = vmatmul.bf16.vlgmr.msra.gmra.mxu2 %v20889_v48  ;;  %v19283_v23 = vld [vmem:[%s20702_s9 + $0x129c] sm:$0xf0]  ;;  %v14654_v47 = vor.u32 %v19203_v17, %v14653_v41  ;;  %v15214_v41 = vor.u32 %v19343_v7, %v15213_v62  ;;  %v14853_v17 = vld [vmem:[%s20702_s9 + $0x1188] sm:$0xf]  ;;  %v19713_v62 = vld [vmem:[%s20702_s9 + $0x200c] sm:$0xf0] }
 0x1bf   : > { %10182 = vmatpush.bf16.msrb.mxu2 %v15454_v25  ;;  %10151 = vmatmul.bf16.vlgmr.msra.gmra.mxu3 %v20895_v55  ;;  %v15293_v25 = vld [vmem:[%s20702_s9 + $0x14f8] sm:$0xf]  ;;  %v14974_v33 = vor.u32 %v19283_v23, %v14973_v18  ;;  %v19253_v18 = vld [vmem:[%s20702_s9 + $0x11ac] sm:$0xf0]  ;;  %v17013_v7 = vld [vmem:[%s20702_s9 + $0x2268] sm:$0xf] }
 0x1c0   : > { %10195 = vmatpush.bf16.msrb.mxu3 %v15774_v38  ;;  %v15294_v38 = vor.u32 %v19363_v26, %v15293_v25  ;;  %v19333_v23 = vld [vmem:[%s20702_s9 + $0x142c] sm:$0xf0]  ;;  %v16093_v25 = vld [vmem:[%s20702_s9 + $0x1b38] sm:$0xf]  ;;  %v19563_v26 = vld [vmem:[%s20702_s9 + $0x1b5c] sm:$0xf0]  ;;  %v14854_v58 = vor.u32 %v19253_v18, %v14853_v17 }
 0x1c1   : > { %10157 = vmatpush.bf16.msrb.mxu0 %v14774_v39  ;;  %v21603_v39 = vadd.f32 %v9918_v29, %v9906_v32  ;;  %v21611_v53 = vpop.f32.mrf.mxu2  ;;  %v9907_v8 = vpop.f32.mrf.mxu0  ;;  %v15534_v29 = vor.u32 %v19423_v19, %v15533_v9  ;;  %v19643_v32 = vld [vmem:[%s20702_s9 + $0x1ddc] sm:$0xf0]  ;;  %v16973_v18 = vld [vmem:[%s20702_s9 + $0x2218] sm:$0xf] }
 0x1c2   : > { %10170 = vmatpush.bf16.msrb.mxu1 %v15094_v46  ;;  %v14933_v46 = vld [vmem:[%s20702_s9 + $0x1228] sm:$0xf]  ;;  %v19793_v8 = vld [vmem:[%s20702_s9 + $0x228c] sm:$0xf0]  ;;  %v19543_v19 = vld [vmem:[%s20702_s9 + $0x1abc] sm:$0xf0] }
 0x1c3   : > { %10183 = vmatpush.bf16.msrb.mxu2 %v15414_v52  ;;  %v19273_v52 = vld [vmem:[%s20702_s9 + $0x124c] sm:$0xf0]  ;;  %v19703_v17 = vld [vmem:[%s20702_s9 + $0x1fbc] sm:$0xf0] }
 0x1c4   : > { %10196 = vmatpush.bf16.msrb.mxu3 %v15734_v1  ;;  %v14934_v1 = vor.u32 %v19273_v52, %v14933_v46  ;;  %v15174_v46 = vor.u32 %v19333_v23, %v15173_v20  ;;  %v17053_v52 = vld [vmem:[%s20702_s9 + $0x22b8] sm:$0xf]  ;;  %v19783_v20 = vld [vmem:[%s20702_s9 + $0x223c] sm:$0xf0] }
 0x1c5   : > { %10158 = vmatpush.bf16.msrb.mxu0 %v14734_v2  ;;  %v15254_v2 = vor.u32 %v19353_v54, %v15253_v59  ;;  %v19803_v59 = vld [vmem:[%s20702_s9 + $0x22dc] sm:$0xf0]  ;;  %v16094_v54 = vor.u32 %v19563_v26, %v16093_v25  ;;  %v15973_v26 = vld [vmem:[%s20702_s9 + $0x1a48] sm:$0xf] }
 0x1c6   : > { %10171 = vmatpush.bf16.msrb.mxu1 %v15054_v4  ;;  %v14893_v4 = vld [vmem:[%s20702_s9 + $0x11d8] sm:$0xf] }
 0x1c7   : > { %10184 = vmatpush.bf16.msrb.mxu2 %v15374_v5  ;;  %v21618_v5 = vpop.f32.mrf.mxu3 }
 0x1c8   : > { %10197 = vmatpush.bf16.msrb.mxu3 %v15694_v10  ;;  %v9920_v10 = vpop.f32.mrf.mxu1 }
 0x1c9   : > { %10159 = vmatpush.bf16.msrb.mxu0 %v14694_v12  ;;  %v14574_v12 = vor.u32 %v19183_v16, %v14573_v3  ;;  %v9933_v24 = vpop.f32.mrf.mxu2  ;;  %v16373_v3 = vld [vmem:[%s20702_s9 + $0x1d68] sm:$0xf]  ;;  %v19633_v16 = vld [vmem:[%s20702_s9 + $0x1d8c] sm:$0xf0]  ;;  %v16013_v10 = vld [vmem:[%s20702_s9 + $0x1a98] sm:$0xf] }
 0x1ca   : > { %10172 = vmatpush.bf16.msrb.mxu1 %v15014_v15  ;;  %v19173_v15 = vld [vmem:[%s20702_s9 + $0xf2c] sm:$0xf0]  ;;  %v16374_v9 = vor.u32 %v19633_v16, %v16373_v3  ;;  %v16014_v23 = vor.u32 %v19543_v19, %v16013_v10  ;;  %v16974_v24 = vor.u32 %v19783_v20, %v16973_v18  ;;  %v19683_v3 = vld [vmem:[%s20702_s9 + $0x1f1c] sm:$0xf0]  ;;  %v16893_v16 = vld [vmem:[%s20702_s9 + $0x2178] sm:$0xf] }
 0x1cb   : > { %10185 = vmatpush.bf16.msrb.mxu2 %v15334_v13  ;;  %v14894_v13 = vor.u32 %v19263_v6, %v14893_v4  ;;  %v14534_v11 = vor.u32 %v19173_v15, %v14533_v14  ;;  %v17054_v4 = vor.u32 %v19803_v59, %v17053_v52  ;;  %v16693_v6 = vld [vmem:[%s20702_s9 + $0x1fe8] sm:$0xf]  ;;  %v16333_v14 = vld [vmem:[%s20702_s9 + $0x1d18] sm:$0xf]  ;;  %v19623_v15 = vld [vmem:[%s20702_s9 + $0x1d3c] sm:$0xf0] }
 0x1cc   : > { %10198 = vmatpush.bf16.msrb.mxu3 %v15654_v31  ;;  %v16413_v31 = vld [vmem:[%s20702_s9 + $0x1db8] sm:$0xf]  ;;  %v16334_v25 = vor.u32 %v19623_v15, %v16333_v14  ;;  %v19593_v10 = vld [vmem:[%s20702_s9 + $0x1c4c] sm:$0xf0]  ;;  %v16533_v19 = vld [vmem:[%s20702_s9 + $0x1ea8] sm:$0xf] }
 0x1cd   : > { %10160 = vmatpush.bf16.msrb.mxu0 %v14654_v47  ;;  %v16733_v47 = vld [vmem:[%s20702_s9 + $0x2038] sm:$0xf]  ;;  %v19673_v14 = vld [vmem:[%s20702_s9 + $0x1ecc] sm:$0xf0] }
 0x1ce   : > { %10173 = vmatpush.bf16.msrb.mxu1 %v14974_v33  ;;  %v19723_v33 = vld [vmem:[%s20702_s9 + $0x205c] sm:$0xf0]  ;;  %v15933_v59 = vld [vmem:[%s20702_s9 + $0x19f8] sm:$0xf] }
 0x1cf   : > { %10186 = vmatpush.bf16.msrb.mxu2 %v15294_v38  ;;  %v15493_v38 = vld [vmem:[%s20702_s9 + $0x1688] sm:$0xf]  ;;  %v9946_v63 = vpop.f32.mrf.mxu3  ;;  %v16734_v0 = vor.u32 %v19723_v33, %v16733_v47  ;;  %v19613_v47 = vld [vmem:[%s20702_s9 + $0x1cec] sm:$0xf0]  ;;  %v15853_v20 = vld [vmem:[%s20702_s9 + $0x1958] sm:$0xf] }
 0x1d0   : > { %10199 = vmatpush.bf16.msrb.mxu3 %v15614_v57  ;;  %v16414_v57 = vor.u32 %v19643_v32, %v16413_v31  ;;  %v19533_v31 = vld [vmem:[%s20702_s9 + $0x1a6c] sm:$0xf0]  ;;  %v16293_v32 = vld [vmem:[%s20702_s9 + $0x1cc8] sm:$0xf]  ;;  %v19603_v63 = vld [vmem:[%s20702_s9 + $0x1c9c] sm:$0xf0] }
 0x1d1   : > { %10161 = vmatpush.bf16.msrb.mxu0 %v14614_v60  ;;  %v16053_v60 = vld [vmem:[%s20702_s9 + $0x1ae8] sm:$0xf]  ;;  %v19693_v33 = vld [vmem:[%s20702_s9 + $0x1f6c] sm:$0xf0]  ;;  %v16294_v52 = vor.u32 %v19613_v47, %v16293_v32  ;;  %v19583_v32 = vld [vmem:[%s20702_s9 + $0x1bfc] sm:$0xf0] }
 0x1d2   : > { %10174 = vmatpush.bf16.msrb.mxu1 %v14934_v1  ;;  %v15494_v1 = vor.u32 %v19413_v40, %v15493_v38  ;;  %v16933_v38 = vld [vmem:[%s20702_s9 + $0x21c8] sm:$0xf]  ;;  %v19773_v40 = vld [vmem:[%s20702_s9 + $0x21ec] sm:$0xf0] }
 0x1d3   : > { %10187 = vmatpush.bf16.msrb.mxu2 %v15254_v2  ;;  %v19553_v2 = vld [vmem:[%s20702_s9 + $0x1b0c] sm:$0xf0] }
 0x1d4   : > { %10200 = vmatpush.bf16.msrb.mxu3 %v15574_v30  ;;  %v16054_v30 = vor.u32 %v19553_v2, %v16053_v60  ;;  %v16253_v60 = vld [vmem:[%s20702_s9 + $0x1c78] sm:$0xf] }
 0x1d5   : > { %10162 = vmatpush.bf16.msrb.mxu0 %v14574_v12  ;;  %v16694_v12 = vor.u32 %v19713_v62, %v16693_v6  ;;  %v16573_v2 = vld [vmem:[%s20702_s9 + $0x1ef8] sm:$0xf]  ;;  %v16254_v62 = vor.u32 %v19603_v63, %v16253_v60  ;;  %v19573_v63 = vld [vmem:[%s20702_s9 + $0x1bac] sm:$0xf0] }
 0x1d6   : > { %10175 = vmatpush.bf16.msrb.mxu1 %v14894_v13  ;;  %v17014_v13 = vor.u32 %v19793_v8, %v17013_v7  ;;  %v15893_v7 = vld [vmem:[%s20702_s9 + $0x19a8] sm:$0xf]  ;;  %v16574_v8 = vor.u32 %v19683_v3, %v16573_v2  ;;  %v19653_v2 = vld [vmem:[%s20702_s9 + $0x1e2c] sm:$0xf0] }
 0x1d7   : > { %10188 = vmatpush.bf16.msrb.mxu2 %v15214_v41  ;;  %v16653_v41 = vld [vmem:[%s20702_s9 + $0x1f98] sm:$0xf] }
 0x1d8   : > { %10201 = vmatpush.bf16.msrb.mxu3 %v15534_v29  ;;  %v16654_v29 = vor.u32 %v19703_v17, %v16653_v41  ;;  %v19753_v41 = vld [vmem:[%s20702_s9 + $0x214c] sm:$0xf0] }
 0x1d9   : > { %10163 = vmatpush.bf16.msrb.mxu0 %v14534_v11  ;;  %v16613_v11 = vld [vmem:[%s20702_s9 + $0x1f48] sm:$0xf] }
 0x1da   : > { %10176 = vmatpush.bf16.msrb.mxu1 %v14854_v58  ;;  %v21669_v58 = vpop.f32.mrf.mxu0 }
 0x1db   : > { %10189 = vmatpush.bf16.msrb.mxu2 %v15174_v46  ;;  %v15974_v46 = vor.u32 %v19533_v31, %v15973_v26  ;;  %v16534_v26 = vor.u32 %v19673_v14, %v16533_v19  ;;  %v16173_v31 = vld [vmem:[%s20702_s9 + $0x1bd8] sm:$0xf]  ;;  %v19733_v19 = vld [vmem:[%s20702_s9 + $0x20ac] sm:$0xf0] }
 0x1dc   : > { %10202 = vmatpush.bf16.msrb.mxu3 %v15494_v1  ;;  %10164 = vmatmul.bf16.vlgmr.msrb.gmra.mxu0 %v20891_v51  ;;  %v16934_v1 = vor.u32 %v19773_v40, %v16933_v38  ;;  %v16813_v38 = vld [vmem:[%s20702_s9 + $0x20d8] sm:$0xf]  ;;  %v19743_v40 = vld [vmem:[%s20702_s9 + $0x20fc] sm:$0xf0] }
 0x1dd   : > { %10208 = vmatpush.bf16.msra.mxu0 %v16094_v54  ;;  %10177 = vmatmul.bf16.vlgmr.msrb.gmra.mxu1 %v20901_v61  ;;  %v16614_v54 = vor.u32 %v19693_v33, %v16613_v11  ;;  %v19663_v11 = vld [vmem:[%s20702_s9 + $0x1e7c] sm:$0xf0]  ;;  %v16814_v3 = vor.u32 %v19743_v40, %v16813_v38  ;;  %v18293_v40 = vld [vmem:[%s20702_s9 + $0x2c68] sm:$0xf] }
 0x1de   : > { %10221 = vmatpush.bf16.msra.mxu1 %v16414_v57  ;;  %10190 = vmatmul.bf16.vlgmr.msrb.gmra.mxu2 %v20964_v36  ;;  %v19523_v57 = vld [vmem:[%s20702_s9 + $0x1a1c] sm:$0xf0] }
 0x1df   : > { %10234 = vmatpush.bf16.msra.mxu2 %v16734_v0  ;;  %10203 = vmatmul.bf16.vlgmr.msrb.gmra.mxu3 %v20971_v42  ;;  %v21675_v0 = vpop.f32.mrf.mxu1  ;;  %v15934_v6 = vor.u32 %v19523_v57, %v15933_v59  ;;  %v15813_v59 = vld [vmem:[%s20702_s9 + $0x1908] sm:$0xf] }
 0x1e0   : > { %10247 = vmatpush.bf16.msra.mxu3 %v17054_v4  ;;  %v19763_v4 = vld [vmem:[%s20702_s9 + $0x219c] sm:$0xf0]  ;;  %v16133_v57 = vld [vmem:[%s20702_s9 + $0x1b88] sm:$0xf] }
 0x1e1   : > { %10209 = vmatpush.bf16.msra.mxu0 %v16054_v30  ;;  %v19513_v30 = vld [vmem:[%s20702_s9 + $0x19cc] sm:$0xf0]  ;;  %v21687_v15 = vpop.f32.mrf.mxu2 }
 0x1e2   : > { %10222 = vmatpush.bf16.msra.mxu1 %v16374_v9  ;;  %v16213_v9 = vld [vmem:[%s20702_s9 + $0x1c28] sm:$0xf]  ;;  %v15894_v17 = vor.u32 %v19513_v30, %v15893_v7  ;;  %v18013_v7 = vld [vmem:[%s20702_s9 + $0x2a38] sm:$0xf] }
 0x1e3   : > { %10235 = vmatpush.bf16.msra.mxu2 %v16694_v12  ;;  %v16894_v12 = vor.u32 %v19763_v4, %v16893_v16  ;;  %v16214_v18 = vor.u32 %v19593_v10, %v16213_v9  ;;  %v17373_v16 = vld [vmem:[%s20702_s9 + $0x2538] sm:$0xf]  ;;  %v19883_v4 = vld [vmem:[%s20702_s9 + $0x255c] sm:$0xf0]  ;;  %v16134_v10 = vor.u32 %v19573_v63, %v16133_v57 }
 0x1e4   : > { %10248 = vmatpush.bf16.msra.mxu3 %v17014_v13  ;;  %v16853_v13 = vld [vmem:[%s20702_s9 + $0x2128] sm:$0xf]  ;;  %v19943_v63 = vld [vmem:[%s20702_s9 + $0x273c] sm:$0xf0] }
 0x1e5   : > { %10210 = vmatpush.bf16.msra.mxu0 %v16014_v23  ;;  %v9959_v23 = vpop.f32.mrf.mxu0  ;;  %v16854_v47 = vor.u32 %v19753_v41, %v16853_v13  ;;  %v17374_v13 = vor.u32 %v19883_v4, %v17373_v16  ;;  %v18333_v41 = vld [vmem:[%s20702_s9 + $0x2cb8] sm:$0xf] }
 0x1e6   : > { %10223 = vmatpush.bf16.msra.mxu1 %v16334_v25  ;;  %v21692_v25 = vpop.f32.mrf.mxu3  ;;  %v18253_v4 = vld [vmem:[%s20702_s9 + $0x2c18] sm:$0xf] }
 0x1e7   : > { %10236 = vmatpush.bf16.msra.mxu2 %v16654_v29  ;;  %v19503_v29 = vld [vmem:[%s20702_s9 + $0x197c] sm:$0xf0]  ;;  %v9972_v33 = vpop.f32.mrf.mxu1 }
 0x1e8   : > { %10249 = vmatpush.bf16.msra.mxu3 %v16974_v24  ;;  %v16493_v24 = vld [vmem:[%s20702_s9 + $0x1e58] sm:$0xf]  ;;  %v20033_v33 = vld [vmem:[%s20702_s9 + $0x2a0c] sm:$0xf0] }
 0x1e9   : > { %10211 = vmatpush.bf16.msra.mxu0 %v15974_v46  ;;  %v15854_v46 = vor.u32 %v19503_v29, %v15853_v20  ;;  %v16494_v60 = vor.u32 %v19663_v11, %v16493_v24  ;;  %v9985_v30 = vpop.f32.mrf.mxu2  ;;  %v19873_v29 = vld [vmem:[%s20702_s9 + $0x250c] sm:$0xf0]  ;;  %v17973_v11 = vld [vmem:[%s20702_s9 + $0x29e8] sm:$0xf] }
 0x1ea   : > { %10224 = vmatpush.bf16.msra.mxu1 %v16294_v52  ;;  %v16174_v52 = vor.u32 %v19583_v32, %v16173_v31  ;;  %v17653_v32 = vld [vmem:[%s20702_s9 + $0x2768] sm:$0xf]  ;;  %v17974_v57 = vor.u32 %v20033_v33, %v17973_v11  ;;  %v17853_v33 = vld [vmem:[%s20702_s9 + $0x28f8] sm:$0xf] }
 0x1eb   : > { %10237 = vmatpush.bf16.msra.mxu2 %v16614_v54  ;;  %v19493_v54 = vld [vmem:[%s20702_s9 + $0x192c] sm:$0xf0] }
 0x1ec   : > { %10250 = vmatpush.bf16.msra.mxu3 %v16934_v1  ;;  %v16453_v1 = vld [vmem:[%s20702_s9 + $0x1e08] sm:$0xf]  ;;  %v15814_v9 = vor.u32 %v19493_v54, %v15813_v59  ;;  %v17293_v59 = vld [vmem:[%s20702_s9 + $0x2498] sm:$0xf]  ;;  %v19863_v54 = vld [vmem:[%s20702_s9 + $0x24bc] sm:$0xf0] }
 0x1ed   : > { %10212 = vmatpush.bf16.msra.mxu0 %v15934_v6  ;;  %v17693_v6 = vld [vmem:[%s20702_s9 + $0x27b8] sm:$0xf]  ;;  %v16454_v14 = vor.u32 %v19653_v2, %v16453_v1  ;;  %v17294_v16 = vor.u32 %v19863_v54, %v17293_v59  ;;  %v19833_v59 = vld [vmem:[%s20702_s9 + $0x23cc] sm:$0xf0] }
 0x1ee   : > { %10225 = vmatpush.bf16.msra.mxu1 %v16254_v62  ;;  %v19963_v62 = vld [vmem:[%s20702_s9 + $0x27dc] sm:$0xf0]  ;;  %v17933_v2 = vld [vmem:[%s20702_s9 + $0x2998] sm:$0xf] }
 0x1ef   : > { %10238 = vmatpush.bf16.msra.mxu2 %v16574_v8  ;;  %v20043_v8 = vld [vmem:[%s20702_s9 + $0x2a5c] sm:$0xf0]  ;;  %v17694_v20 = vor.u32 %v19963_v62, %v17693_v6 }
 0x1f0   : > { %10251 = vmatpush.bf16.msra.mxu3 %v16894_v12  ;;  %v16773_v12 = vld [vmem:[%s20702_s9 + $0x2088] sm:$0xf]  ;;  %v18014_v23 = vor.u32 %v20043_v8, %v18013_v7  ;;  %v20103_v6 = vld [vmem:[%s20702_s9 + $0x2c3c] sm:$0xf0]  ;;  %v19853_v8 = vld [vmem:[%s20702_s9 + $0x246c] sm:$0xf0] }
 0x1f1   : > { %10213 = vmatpush.bf16.msra.mxu0 %v15894_v17  ;;  %v20123_v17 = vld [vmem:[%s20702_s9 + $0x2cdc] sm:$0xf0]  ;;  %v16774_v31 = vor.u32 %v19733_v19, %v16773_v12  ;;  %v17253_v7 = vld [vmem:[%s20702_s9 + $0x2448] sm:$0xf]  ;;  %v18254_v12 = vor.u32 %v20103_v6, %v18253_v4 }
 0x1f2   : > { %10226 = vmatpush.bf16.msra.mxu1 %v16214_v18  ;;  %v9998_v18 = vpop.f32.mrf.mxu3  ;;  %v18334_v24 = vor.u32 %v20123_v17, %v18333_v41  ;;  %v17893_v19 = vld [vmem:[%s20702_s9 + $0x2948] sm:$0xf]  ;;  %v20093_v17 = vld [vmem:[%s20702_s9 + $0x2bec] sm:$0xf0] }
 0x1f3   : > { %10239 = vmatpush.bf16.msra.mxu2 %v16534_v26  ;;  %v17333_v26 = vld [vmem:[%s20702_s9 + $0x24e8] sm:$0xf] }
 0x1f4   : > { %10252 = vmatpush.bf16.msra.mxu3 %v16854_v47  ;;  %v19953_v47 = vld [vmem:[%s20702_s9 + $0x278c] sm:$0xf0]  ;;  %v17334_v38 = vor.u32 %v19873_v29, %v17333_v26  ;;  %v18213_v41 = vld [vmem:[%s20702_s9 + $0x2bc8] sm:$0xf]  ;;  %v19843_v26 = vld [vmem:[%s20702_s9 + $0x241c] sm:$0xf0]  ;;  %v9932_v29 = vadd.f32 %v21611_v53, %v21603_v39 }
 0x1f5   : > { %10214 = vmatpush.bf16.msra.mxu0 %v15854_v46  ;;  %v20113_v46 = vld [vmem:[%s20702_s9 + $0x2c8c] sm:$0xf0]  ;;  %v18214_v11 = vor.u32 %v20093_v17, %v18213_v41  ;;  %v20083_v39 = vld [vmem:[%s20702_s9 + $0x2b9c] sm:$0xf0]  ;;  %v17773_v41 = vld [vmem:[%s20702_s9 + $0x2858] sm:$0xf] }
 0x1f6   : > { %10227 = vmatpush.bf16.msra.mxu1 %v16174_v52  ;;  %v17654_v52 = vor.u32 %v19953_v47, %v17653_v32  ;;  %v18294_v1 = vor.u32 %v20113_v46, %v18293_v40  ;;  %v17533_v47 = vld [vmem:[%s20702_s9 + $0x2678] sm:$0xf]  ;;  %v9945_v54 = vadd.f32 %v21618_v5, %v9932_v29  ;;  %v18133_v5 = vld [vmem:[%s20702_s9 + $0x2b28] sm:$0xf]  ;;  %v19983_v17 = vld [vmem:[%s20702_s9 + $0x287c] sm:$0xf0] }
 0x1f7   : > { %10240 = vmatpush.bf16.msra.mxu2 %v16494_v60  ;;  %v17613_v60 = vld [vmem:[%s20702_s9 + $0x2718] sm:$0xf]  ;;  %v20063_v29 = vld [vmem:[%s20702_s9 + $0x2afc] sm:$0xf0] }
 0x1f8   : > { %10253 = vmatpush.bf16.msra.mxu3 %v16814_v3  ;;  %v20023_v3 = vld [vmem:[%s20702_s9 + $0x29bc] sm:$0xf0]  ;;  %v17614_v62 = vor.u32 %v19943_v63, %v17613_v60  ;;  %v18173_v46 = vld [vmem:[%s20702_s9 + $0x2b78] sm:$0xf]  ;;  %v17493_v60 = vld [vmem:[%s20702_s9 + $0x2628] sm:$0xf] }
 0x1f9   : > { %10215 = vmatpush.bf16.msra.mxu0 %v15814_v9  ;;  %v17934_v30 = vor.u32 %v20023_v3, %v17933_v2  ;;  %v17573_v9 = vld [vmem:[%s20702_s9 + $0x26c8] sm:$0xf]  ;;  %v21745_v18 = vpop.f32.mrf.mxu0  ;;  %v19913_v63 = vld [vmem:[%s20702_s9 + $0x264c] sm:$0xf0] }
 0x1fa   : > { %10228 = vmatpush.bf16.msra.mxu1 %v16134_v10  ;;  %v19933_v10 = vld [vmem:[%s20702_s9 + $0x26ec] sm:$0xf0]  ;;  %v21751_v32 = vpop.f32.mrf.mxu1  ;;  %v17813_v2 = vld [vmem:[%s20702_s9 + $0x28a8] sm:$0xf] }
 0x1fb   : > { %10241 = vmatpush.bf16.msra.mxu2 %v16454_v14  ;;  %v20013_v14 = vld [vmem:[%s20702_s9 + $0x296c] sm:$0xf0] }
 0x1fc   : > { %10254 = vmatpush.bf16.msra.mxu3 %v16774_v31  ;;  %10216 = vmatmul.bf16.vlgmr.msra.gmra.mxu0 %v20966_v37  ;;  %v17894_v31 = vor.u32 %v20013_v14, %v17893_v19  ;;  %v19993_v3 = vld [vmem:[%s20702_s9 + $0x28cc] sm:$0xf0]  ;;  %v19903_v19 = vld [vmem:[%s20702_s9 + $0x25fc] sm:$0xf0] }
 0x1fd   : > { %10260 = vmatpush.bf16.msrb.mxu0 %v17374_v13  ;;  %10229 = vmatmul.bf16.vlgmr.msra.gmra.mxu1 %v20973_v43  ;;  %v17254_v13 = vor.u32 %v19853_v8, %v17253_v7  ;;  %v17494_v8 = vor.u32 %v19913_v63, %v17493_v60  ;;  %v13215_v63 = vld [vmem:[%s20702_s9 + $0x4e0] sm:$0xf0] }
 0x1fe   : > { %10273 = vmatpush.bf16.msrb.mxu1 %v17694_v20  ;;  %10242 = vmatmul.bf16.vlgmr.msra.gmra.mxu2 %v21042_v34  ;;  %v17574_v20 = vor.u32 %v19933_v10, %v17573_v9  ;;  %v19823_v9 = vld [vmem:[%s20702_s9 + $0x237c] sm:$0xf0] }
 0x1ff   : > { %10286 = vmatpush.bf16.msrb.mxu2 %v18014_v23  ;;  %10255 = vmatmul.bf16.vlgmr.msra.gmra.mxu3 %v21049_v44  ;;  %v17213_v23 = vld [vmem:[%s20702_s9 + $0x23f8] sm:$0xf] }
 0x200   : > { %10299 = vmatpush.bf16.msrb.mxu3 %v18334_v24  ;;  %v19923_v24 = vld [vmem:[%s20702_s9 + $0x269c] sm:$0xf0]  ;;  %v17214_v40 = vor.u32 %v19843_v26, %v17213_v23 }
 0x201   : > { %10261 = vmatpush.bf16.msrb.mxu0 %v17334_v38  ;;  %v20003_v38 = vld [vmem:[%s20702_s9 + $0x291c] sm:$0xf0]  ;;  %v17534_v53 = vor.u32 %v19923_v24, %v17533_v47  ;;  %v21767_v4 = vpop.f32.mrf.mxu2  ;;  %v10011_v10 = vpop.f32.mrf.mxu0  ;;  %v19813_v47 = vld [vmem:[%s20702_s9 + $0x232c] sm:$0xf0] }
 0x202   : > { %10274 = vmatpush.bf16.msrb.mxu1 %v17654_v52  ;;  %v17173_v52 = vld [vmem:[%s20702_s9 + $0x23a8] sm:$0xf]  ;;  %v21771_v7 = vpop.f32.mrf.mxu3  ;;  %v10024_v14 = vpop.f32.mrf.mxu1 }
 0x203   : > { %10287 = vmatpush.bf16.msrb.mxu2 %v17974_v57  ;;  %v17854_v57 = vor.u32 %v20003_v38, %v17853_v33  ;;  %v17174_v6 = vor.u32 %v19833_v59, %v17173_v52  ;;  %v19893_v33 = vld [vmem:[%s20702_s9 + $0x25ac] sm:$0xf0]  ;;  %v17733_v38 = vld [vmem:[%s20702_s9 + $0x2808] sm:$0xf]  ;;  %v18758_v59 = vld [vmem:[%s20702_s9 + $0x23c] sm:$0xf] }
 0x204   : > { %10300 = vmatpush.bf16.msrb.mxu3 %v18294_v1  ;;  %v18174_v1 = vor.u32 %v20083_v39, %v18173_v46  ;;  %v19973_v46 = vld [vmem:[%s20702_s9 + $0x282c] sm:$0xf0]  ;;  %v18653_v39 = vld [vmem:[%s20702_s9 + $0x2f38] sm:$0xf]  ;;  %v18748_v14 = vld [vmem:[%s20702_s9 + $0x1ec] sm:$0xf] }
 0x205   : > { %10262 = vmatpush.bf16.msrb.mxu0 %v17294_v16  ;;  %v9958_v16 = vadd.f32 %v21669_v58, %v9945_v54  ;;  %v17814_v58 = vor.u32 %v19993_v3, %v17813_v2  ;;  %v12895_v54 = vld [vmem:[%s20702_s9 + $0x260] sm:$0xf0]  ;;  %v20053_v2 = vld [vmem:[%s20702_s9 + $0x2aac] sm:$0xf0] }
 0x206   : > { %10275 = vmatpush.bf16.msrb.mxu1 %v17614_v62  ;;  %v20073_v62 = vld [vmem:[%s20702_s9 + $0x2b4c] sm:$0xf0] }
 0x207   : > { %10288 = vmatpush.bf16.msrb.mxu2 %v17934_v30  ;;  %v17133_v30 = vld [vmem:[%s20702_s9 + $0x2358] sm:$0xf]  ;;  %v9971_v23 = vadd.f32 %v21675_v0, %v9958_v16  ;;  %v17774_v0 = vor.u32 %v19983_v17, %v17773_v41  ;;  %v12855_v17 = vld [vmem:[%s20702_s9 + $0x210] sm:$0xf0] }
 0x208   : > { %10301 = vmatpush.bf16.msrb.mxu3 %v18254_v12  ;;  %v17453_v12 = vld [vmem:[%s20702_s9 + $0x25d8] sm:$0xf]  ;;  %v17134_v26 = vor.u32 %v19823_v9, %v17133_v30  ;;  %v17734_v30 = vor.u32 %v19973_v46, %v17733_v38  ;;  %v12898_v9 = vor.u32 %v18758_v59, %v12895_v54  ;;  %v13135_v46 = vld [vmem:[%s20702_s9 + $0x440] sm:$0xf0] }
 0x209   : > { %10263 = vmatpush.bf16.msrb.mxu0 %v17254_v13  ;;  %v18134_v13 = vor.u32 %v20073_v62, %v18133_v5  ;;  %v17454_v24 = vor.u32 %v19903_v19, %v17453_v12  ;;  %v13535_v5 = vld [vmem:[%s20702_s9 + $0x760] sm:$0xf0]  ;;  %v18613_v12 = vld [vmem:[%s20702_s9 + $0x2ee8] sm:$0xf]  ;;  %v20193_v19 = vld [vmem:[%s20702_s9 + $0x2f0c] sm:$0xf0] }
 0x20a   : > { %10276 = vmatpush.bf16.msrb.mxu1 %v17574_v20  ;;  %v18093_v20 = vld [vmem:[%s20702_s9 + $0x2ad8] sm:$0xf]  ;;  %v10050_v62 = vpop.f32.mrf.mxu3 }
 0x20b   : > { %10289 = vmatpush.bf16.msrb.mxu2 %v17894_v31  ;;  %v17093_v31 = vld [vmem:[%s20702_s9 + $0x2308] sm:$0xf]  ;;  %v18094_v52 = vor.u32 %v20063_v29, %v18093_v20  ;;  %v13175_v20 = vld [vmem:[%s20702_s9 + $0x490] sm:$0xf0]  ;;  %v18614_v29 = vor.u32 %v20193_v19, %v18613_v12 }
 0x20c   : > { %10302 = vmatpush.bf16.msrb.mxu3 %v18214_v11  ;;  %v17413_v11 = vld [vmem:[%s20702_s9 + $0x2588] sm:$0xf]  ;;  %v17094_v60 = vor.u32 %v19813_v47, %v17093_v31  ;;  %v18573_v47 = vld [vmem:[%s20702_s9 + $0x2e98] sm:$0xf] }
 0x20d   : > { %10264 = vmatpush.bf16.msrb.mxu0 %v17214_v40  ;;  %v9984_v40 = vadd.f32 %v21687_v15, %v9971_v23  ;;  %v10037_v15 = vpop.f32.mrf.mxu2  ;;  %v17414_v3 = vor.u32 %v19893_v33, %v17413_v11  ;;  %v18908_v23 = vld [vmem:[%s20702_s9 + $0x6ec] sm:$0xf]  ;;  %v18738_v11 = vld [vmem:[%s20702_s9 + $0x19c] sm:$0xf] }
 0x20e   : > { %10277 = vmatpush.bf16.msrb.mxu1 %v17534_v53  ;;  %v20203_v53 = vld [vmem:[%s20702_s9 + $0x2f5c] sm:$0xf0]  ;;  %v13095_v15 = vld [vmem:[%s20702_s9 + $0x3f0] sm:$0xf0] }
 0x20f   : > { %10290 = vmatpush.bf16.msrb.mxu2 %v17854_v57  ;;  %v18838_v57 = vld [vmem:[%s20702_s9 + $0x4bc] sm:$0xf]  ;;  %v18654_v16 = vor.u32 %v20203_v53, %v18653_v39  ;;  %v13455_v53 = vld [vmem:[%s20702_s9 + $0x6c0] sm:$0xf0] }
 0x210   : > { %10303 = vmatpush.bf16.msrb.mxu3 %v18174_v1  ;;  %v18053_v1 = vld [vmem:[%s20702_s9 + $0x2a88] sm:$0xf]  ;;  %v13218_v10 = vor.u32 %v18838_v57, %v13215_v63  ;;  %v18898_v39 = vld [vmem:[%s20702_s9 + $0x69c] sm:$0xf]  ;;  %v18728_v63 = vld [vmem:[%s20702_s9 + $0x14c] sm:$0xf] }
 0x211   : > { %10265 = vmatpush.bf16.msrb.mxu0 %v17174_v6  ;;  %v18918_v6 = vld [vmem:[%s20702_s9 + $0x73c] sm:$0xf]  ;;  %v18533_v57 = vld [vmem:[%s20702_s9 + $0x2e48] sm:$0xf] }
 0x212   : > { %10278 = vmatpush.bf16.msrb.mxu1 %v17494_v8  ;;  %v9997_v8 = vadd.f32 %v21692_v25, %v9984_v40  ;;  %v13538_v41 = vor.u32 %v18918_v6, %v13535_v5  ;;  %v18828_v25 = vld [vmem:[%s20702_s9 + $0x46c] sm:$0xf]  ;;  %v12815_v40 = vld [vmem:[%s20702_s9 + $0x1c0] sm:$0xf0] }
 0x213   : > { %10291 = vmatpush.bf16.msrb.mxu2 %v17814_v58  ;;  %v18054_v58 = vor.u32 %v20053_v2, %v18053_v1  ;;  %v13178_v31 = vor.u32 %v18828_v25, %v13175_v20  ;;  %v12818_v59 = vor.u32 %v18738_v11, %v12815_v40  ;;  %v13458_v1 = vor.u32 %v18898_v39, %v13455_v53  ;;  %v12775_v2 = vld [vmem:[%s20702_s9 + $0x170] sm:$0xf0]  ;;  %v18878_v25 = vld [vmem:[%s20702_s9 + $0x5fc] sm:$0xf]  ;;  %v13375_v20 = vld [vmem:[%s20702_s9 + $0x620] sm:$0xf0] }
 0x214   : > { %10304 = vmatpush.bf16.msrb.mxu3 %v18134_v13  ;;  %v10010_v13 = vadd.f32 %v21745_v18, %v9997_v8  ;;  %v12858_v18 = vor.u32 %v18748_v14, %v12855_v17  ;;  %v12778_v8 = vor.u32 %v18728_v63, %v12775_v2  ;;  %v12735_v14 = vld [vmem:[%s20702_s9 + $0x120] sm:$0xf0]  ;;  %v378_v17 = vld [vmem:[#allocation2] sm:$0xff]  ;;  %v18788_v40 = vld [vmem:[%s20702_s9 + $0x32c] sm:$0xf] }
 0x215   : > { %10266 = vmatpush.bf16.msrb.mxu0 %v17134_v26  ;;  %v13495_v26 = vld [vmem:[%s20702_s9 + $0x710] sm:$0xf0]  ;;  %v12655_v2 = vld [vmem:[%s20702_s9 + $0x80] sm:$0xf0] }
 0x216   : > { %10279 = vmatpush.bf16.msrb.mxu1 %v17454_v24  ;;  %v20183_v24 = vld [vmem:[%s20702_s9 + $0x2ebc] sm:$0xf0]  ;;  %v10023_v33 = vadd.f32 %v21751_v32, %v10010_v13  ;;  %v13498_v38 = vor.u32 %v18908_v23, %v13495_v26  ;;  %v18798_v13 = vld [vmem:[%s20702_s9 + $0x37c] sm:$0xf]  ;;  %v13335_v39 = vld [vmem:[%s20702_s9 + $0x5d0] sm:$0xf0] }
 0x217   : > { %10292 = vmatpush.bf16.msrb.mxu2 %v17774_v0  ;;  %v18818_v0 = vld [vmem:[%s20702_s9 + $0x41c] sm:$0xf] }
 0x218   : > { %10305 = vmatpush.bf16.msrb.mxu3 %v18094_v52  ;;  %v10036_v32 = vadd.f32 %v21767_v4, %v10023_v33  ;;  %v18574_v52 = vor.u32 %v20183_v24, %v18573_v47  ;;  %v13138_v54 = vor.u32 %v18818_v0, %v13135_v46  ;;  %v18808_v4 = vld [vmem:[%s20702_s9 + $0x3cc] sm:$0xf]  ;;  %v20153_v47 = vld [vmem:[%s20702_s9 + $0x2dcc] sm:$0xf0]  ;;  %v13378_v33 = vor.u32 %v18878_v25, %v13375_v20  ;;  %v13015_v0 = vld [vmem:[%s20702_s9 + $0x350] sm:$0xf0] }
 0x219   : > { %10267 = vmatpush.bf16.msrb.mxu0 %v17094_v60  ;;  %v20173_v60 = vld [vmem:[%s20702_s9 + $0x2e6c] sm:$0xf0]  ;;  %v10061_v62 = vpop.f32.mrf.mxu0  ;;  %v18708_v24 = vld [vmem:[%s20702_s9 + $0xac] sm:$0xf]  ;;  %v19078_v25 = vld [vmem:[%s20702_s9 + $0xc3c] sm:$0xf] }
 0x21a   : > { %10280 = vmatpush.bf16.msrb.mxu1 %v17414_v3  ;;  %v18888_v3 = vld [vmem:[%s20702_s9 + $0x64c] sm:$0xf]  ;;  %v10049_v6 = vadd.f32 %v21771_v7, %v10036_v32  ;;  %v18534_v5 = vor.u32 %v20173_v60, %v18533_v57  ;;  %v10074_v19 = vpop.f32.mrf.mxu1  ;;  %v20143_v57 = vld [vmem:[%s20702_s9 + $0x2d7c] sm:$0xf0]  ;;  %v18698_v60 = vld [vmem:[%s20702_s9 + $0x5c] sm:$0xf] }
 0x21b   : > { %10293 = vmatpush.bf16.msrb.mxu2 %v17734_v30  ;;  %v13098_v30 = vor.u32 %v18808_v4, %v13095_v15  ;;  %v18868_v46 = vld [vmem:[%s20702_s9 + $0x5ac] sm:$0xf]  ;;  %v18778_v4 = vld [vmem:[%s20702_s9 + $0x2dc] sm:$0xf]  ;;  %v12975_v15 = vld [vmem:[%s20702_s9 + $0x300] sm:$0xf0] }
 0x21c   : > { %10306 = vmatpush.bf16.msrb.mxu3 %v18054_v58  ;;  %10268 = vmatmul.bf16.vlgmr.msrb.gmra.mxu0 %v21044_v35  ;;  %v18718_v58 = vld [vmem:[%s20702_s9 + $0xfc] sm:$0xf]  ;;  %v10062_v12 = vadd.f32 %v10061_v62, %v10049_v6  ;;  %v14175_v20 = vld [vmem:[%s20702_s9 + $0xc60] sm:$0xf0] }
 0x21d   : > { %10312 = vmatpush.bf16.msra.mxu0 %v18654_v16  ;;  %10281 = vmatmul.bf16.vlgmr.msrb.gmra.mxu1 %v21051_v45  ;;  %v13415_v16 = vld [vmem:[%s20702_s9 + $0x670] sm:$0xf0]  ;;  %v18858_v6 = vld [vmem:[%s20702_s9 + $0x55c] sm:$0xf] }
 0x21e   : > { %10325 = vmatpush.bf16.msra.mxu1 %v12898_v9  ;;  %10294 = vmatmul.bf16.vlgmr.msrb.gmra.mxu2 %v21121_v49  ;;  %v18493_v9 = vld [vmem:[%s20702_s9 + $0x2df8] sm:$0xf]  ;;  %v13418_v7 = vor.u32 %v18888_v3, %v13415_v16  ;;  %v10075_v23 = vadd.f32 %v10074_v19, %v10062_v12  ;;  %v18688_v12 = vld [vmem:[%s20702_s9 + $0xc] sm:$0xf]  ;;  %v12615_v19 = vld [vmem:[%s20702_s9 + $0x30] sm:$0xf0] }
 0x21f   : > { %10338 = vmatpush.bf16.msra.mxu2 %v13218_v10  ;;  %10307 = vmatmul.bf16.vlgmr.msrb.gmra.mxu3 %v21127_v56  ;;  %v20163_v10 = vld [vmem:[%s20702_s9 + $0x2e1c] sm:$0xf0] }
 0x220   : > { %10351 = vmatpush.bf16.msra.mxu3 %v13538_v41  ;;  %v13055_v41 = vld [vmem:[%s20702_s9 + $0x3a0] sm:$0xf0]  ;;  %v18494_v26 = vor.u32 %v20163_v10, %v18493_v9  ;;  %v12055_v11 = vadd.f32 %v10075_v23, %v378_v17  ;;  %v20133_v9 = vld [vmem:[%s20702_s9 + $0x2d2c] sm:$0xf0]  ;;  %v12658_v10 = vor.u32 %v18698_v60, %v12655_v2  ;;  %v19158_v23 = vld [vmem:[%s20702_s9 + $0xebc] sm:$0xf] }
 0x221   : > { %10313 = vmatpush.bf16.msra.mxu0 %v18614_v29  ;;  %v12738_v29 = vor.u32 %v18718_v58, %v12735_v14  ;;  %v10087_v32 = vpop.f32.mrf.mxu2  ;;  %v10063_v63 = vpop.f32.mrf.mxu0  ;;  %v12978_v58 = vor.u32 %v18778_v4, %v12975_v15  ;;  %v13855_v17 = vld [vmem:[%s20702_s9 + $0x9e0] sm:$0xf0]  ;;  %v19148_v60 = vld [vmem:[%s20702_s9 + $0xe6c] sm:$0xf]  ;;  %v14775_v2 = vld [vmem:[%s20702_s9 + $0x1110] sm:$0xf0] }
 0x222   : > { %10326 = vmatpush.bf16.msra.mxu1 %v12858_v18  ;;  %v13058_v18 = vor.u32 %v18798_v13, %v13055_v41  ;;  %12065 = vst [vmem:[#allocation2] sm:$0xff] %v12055_v11  ;;  %v10076_v3 = vpop.f32.mrf.mxu1  ;;  %v10100_v16 = vpop.f32.mrf.mxu3  ;;  %v12935_v13 = vld [vmem:[%s20702_s9 + $0x2b0] sm:$0xf0]  ;;  %v18998_v41 = vld [vmem:[%s20702_s9 + $0x9bc] sm:$0xf] }
 0x223   : > { %10339 = vmatpush.bf16.msra.mxu2 %v13178_v31  ;;  %v18453_v31 = vld [vmem:[%s20702_s9 + $0x2da8] sm:$0xf]  ;;  %v21856_v62 = vadd.f32 %v10100_v16, %v10087_v32  ;;  %v14455_v63 = vld [vmem:[%s20702_s9 + $0xe90] sm:$0xf0]  ;;  %v18978_v3 = vld [vmem:[%s20702_s9 + $0x91c] sm:$0xf] }
 0x224   : > { %10352 = vmatpush.bf16.msra.mxu3 %v13498_v38  ;;  %v12695_v38 = vld [vmem:[%s20702_s9 + $0xd0] sm:$0xf0]  ;;  %v18454_v53 = vor.u32 %v20153_v47, %v18453_v31  ;;  %v14458_v16 = vor.u32 %v19148_v60, %v14455_v63 }
 0x225   : > { %10314 = vmatpush.bf16.msra.mxu0 %v18574_v52  ;;  %v12698_v52 = vor.u32 %v18708_v24, %v12695_v38  ;;  %v13255_v31 = vld [vmem:[%s20702_s9 + $0x530] sm:$0xf0]  ;;  %v12618_v24 = vor.u32 %v18688_v12, %v12615_v19  ;;  %v14815_v38 = vld [vmem:[%s20702_s9 + $0x1160] sm:$0xf0] }
 0x226   : > { %10327 = vmatpush.bf16.msra.mxu1 %v12818_v59  ;;  %v13018_v59 = vor.u32 %v18788_v40, %v13015_v0  ;;  %v13858_v40 = vor.u32 %v18998_v41, %v13855_v17  ;;  %v14178_v0 = vor.u32 %v19078_v25, %v14175_v20  ;;  %v14735_v12 = vld [vmem:[%s20702_s9 + $0x10c0] sm:$0xf0]  ;;  %v13735_v41 = vld [vmem:[%s20702_s9 + $0x8f0] sm:$0xf0]  ;;  %v19048_v17 = vld [vmem:[%s20702_s9 + $0xb4c] sm:$0xf] }
 0x227   : > { %10340 = vmatpush.bf16.msra.mxu2 %v13138_v54  ;;  %v18413_v54 = vld [vmem:[%s20702_s9 + $0x2d58] sm:$0xf]  ;;  %v14055_v25 = vld [vmem:[%s20702_s9 + $0xb70] sm:$0xf0] }
 0x228   : > { %10353 = vmatpush.bf16.msra.mxu3 %v13458_v1  ;;  %v13338_v1 = vor.u32 %v18868_v46, %v13335_v39  ;;  %v18988_v46 = vld [vmem:[%s20702_s9 + $0x96c] sm:$0xf] }
 0x229   : > { %10315 = vmatpush.bf16.msra.mxu0 %v18534_v5  ;;  %v13295_v5 = vld [vmem:[%s20702_s9 + $0x580] sm:$0xf0]  ;;  %v10089_v47 = vpop.f32.mrf.mxu2 }
 0x22a   : > { %10328 = vmatpush.bf16.msra.mxu1 %v12778_v8  ;;  %v18414_v8 = vor.u32 %v20143_v57, %v18413_v54  ;;  %v13298_v14 = vor.u32 %v18858_v6, %v13295_v5  ;;  %v10102_v39 = vpop.f32.mrf.mxu3  ;;  %v14135_v54 = vld [vmem:[%s20702_s9 + $0xc10] sm:$0xf0]  ;;  %v13775_v6 = vld [vmem:[%s20702_s9 + $0x940] sm:$0xf0]  ;;  %v19058_v5 = vld [vmem:[%s20702_s9 + $0xb9c] sm:$0xf]  ;;  %v14058_v47 = vor.u32 %v19048_v17, %v14055_v25 }
 0x22b   : > { %10341 = vmatpush.bf16.msra.mxu2 %v13098_v30  ;;  %v18373_v30 = vld [vmem:[%s20702_s9 + $0x2d08] sm:$0xf]  ;;  %v13778_v19 = vor.u32 %v18978_v3, %v13775_v6  ;;  %v14295_v6 = vld [vmem:[%s20702_s9 + $0xd50] sm:$0xf0]  ;;  %v19098_v25 = vld [vmem:[%s20702_s9 + $0xcdc] sm:$0xf] }
 0x22c   : > { %10354 = vmatpush.bf16.msra.mxu3 %v13418_v7  ;;  %v18768_v7 = vld [vmem:[%s20702_s9 + $0x28c] sm:$0xf] }
 0x22d   : > { %10316 = vmatpush.bf16.msra.mxu0 %v18494_v26  ;;  %v18374_v26 = vor.u32 %v20133_v9, %v18373_v30  ;;  %v12938_v11 = vor.u32 %v18768_v7, %v12935_v13  ;;  %v19138_v9 = vld [vmem:[%s20702_s9 + $0xe1c] sm:$0xf] }
 0x22e   : > { %10329 = vmatpush.bf16.msra.mxu1 %v12738_v29  ;;  %v14495_v29 = vld [vmem:[%s20702_s9 + $0xee0] sm:$0xf0] }
 0x22f   : > { %10342 = vmatpush.bf16.msra.mxu2 %v13058_v18  ;;  %v18848_v18 = vld [vmem:[%s20702_s9 + $0x50c] sm:$0xf] }
 0x230   : > { %10355 = vmatpush.bf16.msra.mxu3 %v13378_v33  ;;  %v19238_v33 = vld [vmem:[%s20702_s9 + $0x113c] sm:$0xf]  ;;  %v13258_v32 = vor.u32 %v18848_v18, %v13255_v31  ;;  %v14695_v18 = vld [vmem:[%s20702_s9 + $0x1070] sm:$0xf0] }
 0x231   : > { %10317 = vmatpush.bf16.msra.mxu0 %v18454_v53  ;;  %v14498_v53 = vor.u32 %v19158_v23, %v14495_v29  ;;  %v14818_v57 = vor.u32 %v19238_v33, %v14815_v38  ;;  %v19128_v23 = vld [vmem:[%s20702_s9 + $0xdcc] sm:$0xf]  ;;  %v13695_v38 = vld [vmem:[%s20702_s9 + $0x8a0] sm:$0xf0] }
 0x232   : > { %10330 = vmatpush.bf16.msra.mxu1 %v12698_v52  ;;  %v13815_v52 = vld [vmem:[%s20702_s9 + $0x990] sm:$0xf0]  ;;  %v19208_v29 = vld [vmem:[%s20702_s9 + $0x104c] sm:$0xf] }
 0x233   : > { %10343 = vmatpush.bf16.msra.mxu2 %v13018_v59  ;;  %v19068_v59 = vld [vmem:[%s20702_s9 + $0xbec] sm:$0xf]  ;;  %v13818_v4 = vor.u32 %v18988_v46, %v13815_v52  ;;  %v14698_v39 = vor.u32 %v19208_v29, %v14695_v18  ;;  %v19178_v29 = vld [vmem:[%s20702_s9 + $0xf5c] sm:$0xf]  ;;  %v14575_v18 = vld [vmem:[%s20702_s9 + $0xf80] sm:$0xf0] }
 0x234   : > { %10356 = vmatpush.bf16.msra.mxu3 %v13338_v1  ;;  %v19228_v1 = vld [vmem:[%s20702_s9 + $0x10ec] sm:$0xf]  ;;  %v14138_v15 = vor.u32 %v19068_v59, %v14135_v54  ;;  %v19198_v59 = vld [vmem:[%s20702_s9 + $0xffc] sm:$0xf]  ;;  %v14655_v54 = vld [vmem:[%s20702_s9 + $0x1020] sm:$0xf0] }
 0x235   : > { %10318 = vmatpush.bf16.msra.mxu0 %v18414_v8  ;;  %v14095_v8 = vld [vmem:[%s20702_s9 + $0xbc0] sm:$0xf0]  ;;  %v14778_v30 = vor.u32 %v19228_v1, %v14775_v2  ;;  %v13655_v2 = vld [vmem:[%s20702_s9 + $0x850] sm:$0xf0]  ;;  %v14658_v3 = vor.u32 %v19198_v59, %v14655_v54  ;;  %v19398_v59 = vld [vmem:[%s20702_s9 + $0x163c] sm:$0xf] }
 0x236   : > { %10331 = vmatpush.bf16.msra.mxu1 %v12658_v10  ;;  %v14415_v10 = vld [vmem:[%s20702_s9 + $0xe40] sm:$0xf0]  ;;  %v14098_v7 = vor.u32 %v19058_v5, %v14095_v8  ;;  %v19188_v5 = vld [vmem:[%s20702_s9 + $0xfac] sm:$0xf]  ;;  %v14615_v8 = vld [vmem:[%s20702_s9 + $0xfd0] sm:$0xf0] }
 0x237   : > { %10344 = vmatpush.bf16.msra.mxu2 %v12978_v58  ;;  %v19218_v58 = vld [vmem:[%s20702_s9 + $0x109c] sm:$0xf]  ;;  %v14418_v13 = vor.u32 %v19138_v9, %v14415_v10  ;;  %v14618_v17 = vor.u32 %v19188_v5, %v14615_v8  ;;  %v15455_v54 = vld [vmem:[%s20702_s9 + $0x1660] sm:$0xf0] }
 0x238   : > { %10357 = vmatpush.bf16.msra.mxu3 %v13298_v14  ;;  %v18968_v14 = vld [vmem:[%s20702_s9 + $0x8cc] sm:$0xf]  ;;  %v14738_v20 = vor.u32 %v19218_v58, %v14735_v12  ;;  %v18938_v58 = vld [vmem:[%s20702_s9 + $0x7dc] sm:$0xf]  ;;  %v15458_v5 = vor.u32 %v19398_v59, %v15455_v54  ;;  %v15335_v59 = vld [vmem:[%s20702_s9 + $0x1570] sm:$0xf0] }
 0x239   : > { %10319 = vmatpush.bf16.msra.mxu0 %v18374_v26  ;;  %v14375_v26 = vld [vmem:[%s20702_s9 + $0xdf0] sm:$0xf0]  ;;  %v13738_v31 = vor.u32 %v18968_v14, %v13735_v41  ;;  %v13615_v14 = vld [vmem:[%s20702_s9 + $0x800] sm:$0xf0] }
 0x23a   : > { %10332 = vmatpush.bf16.msra.mxu1 %v12618_v24  ;;  %v18958_v24 = vld [vmem:[%s20702_s9 + $0x87c] sm:$0xf]  ;;  %v14378_v33 = vor.u32 %v19128_v23, %v14375_v26  ;;  %v10126_v52 = vpop.f32.mrf.mxu1  ;;  %v13935_v41 = vld [vmem:[%s20702_s9 + $0xa80] sm:$0xf0] }
 0x23b   : > { %10345 = vmatpush.bf16.msra.mxu2 %v12938_v11  ;;  %v10113_v11 = vpop.f32.mrf.mxu0  ;;  %v13698_v60 = vor.u32 %v18958_v24, %v13695_v38  ;;  %v19008_v38 = vld [vmem:[%s20702_s9 + $0xa0c] sm:$0xf] }
 0x23c   : > { %10358 = vmatpush.bf16.msra.mxu3 %v13258_v32  ;;  %10320 = vmatmul.bf16.vlgmr.msra.gmra.mxu0 %v21123_v50  ;;  %v10114_v46 = vadd.f32 %v10113_v11, %v21856_v62  ;;  %v14335_v32 = vld [vmem:[%s20702_s9 + $0xda0] sm:$0xf0]  ;;  %v18948_v62 = vld [vmem:[%s20702_s9 + $0x82c] sm:$0xf] }
 0x23d   : > { %10364 = vmatpush.bf16.msrb.mxu0 %v13858_v40  ;;  %10333 = vmatmul.bf16.vlgmr.msra.gmra.mxu1 %v20829_v27  ;;  %v19038_v40 = vld [vmem:[%s20702_s9 + $0xafc] sm:$0xf]  ;;  %v13658_v9 = vor.u32 %v18948_v62, %v13655_v2  ;;  %v18928_v11 = vld [vmem:[%s20702_s9 + $0x78c] sm:$0xf] }
 0x23e   : > { %10377 = vmatpush.bf16.msrb.mxu1 %v14178_v0  ;;  %10346 = vmatmul.bf16.vlgmr.msra.gmra.mxu2 %v20831_v28  ;;  %v14015_v0 = vld [vmem:[%s20702_s9 + $0xb20] sm:$0xf0]  ;;  %v19168_v2 = vld [vmem:[%s20702_s9 + $0xf0c] sm:$0xf] }
 0x23f   : > { %10390 = vmatpush.bf16.msrb.mxu2 %v14498_v53  ;;  %10359 = vmatmul.bf16.vlgmr.msra.gmra.mxu3 %v20822_v21  ;;  %v19118_v53 = vld [vmem:[%s20702_s9 + $0xd7c] sm:$0xf]  ;;  %v14018_v63 = vor.u32 %v19038_v40, %v14015_v0  ;;  %v13895_v0 = vld [vmem:[%s20702_s9 + $0xa30] sm:$0xf0] }
 0x240   : > { %10403 = vmatpush.bf16.msrb.mxu3 %v14818_v57  ;;  %v10127_v57 = vadd.f32 %v10126_v52, %v10114_v46  ;;  %v14338_v1 = vor.u32 %v19118_v53, %v14335_v32  ;;  %v19088_v46 = vld [vmem:[%s20702_s9 + $0xc8c] sm:$0xf]  ;;  %v14578_v53 = vor.u32 %v19178_v29, %v14575_v18  ;;  %v19318_v32 = vld [vmem:[%s20702_s9 + $0x13bc] sm:$0xf]  ;;  %v15135_v52 = vld [vmem:[%s20702_s9 + $0x13e0] sm:$0xf0] }
 0x241   : > { %10365 = vmatpush.bf16.msrb.mxu0 %v13818_v4  ;;  %v19028_v4 = vld [vmem:[%s20702_s9 + $0xaac] sm:$0xf]  ;;  %v19378_v18 = vld [vmem:[%s20702_s9 + $0x159c] sm:$0xf] }
 0x242   : > { %10378 = vmatpush.bf16.msrb.mxu1 %v14138_v15  ;;  %v13975_v15 = vld [vmem:[%s20702_s9 + $0xad0] sm:$0xf0]  ;;  %v10152_v23 = vpop.f32.mrf.mxu3  ;;  %v10128_v26 = vpop.f32.mrf.mxu1 }
 0x243   : > { %10391 = vmatpush.bf16.msrb.mxu2 %v14458_v16  ;;  %v19108_v16 = vld [vmem:[%s20702_s9 + $0xd2c] sm:$0xf]  ;;  %v13978_v10 = vor.u32 %v19028_v4, %v13975_v15  ;;  %v14535_v4 = vld [vmem:[%s20702_s9 + $0xf30] sm:$0xf0]  ;;  %v15055_v26 = vld [vmem:[%s20702_s9 + $0x1340] sm:$0xf0] }
 0x244   : > { %10404 = vmatpush.bf16.msrb.mxu3 %v14778_v30  ;;  %v10139_v30 = vpop.f32.mrf.mxu2 }
 0x245   : > { %10366 = vmatpush.bf16.msrb.mxu0 %v13778_v19  ;;  %v10140_v12 = vadd.f32 %v10139_v30, %v10127_v57  ;;  %v10115_v19 = vpop.f32.mrf.mxu0  ;;  %v19478_v57 = vld [vmem:[%s20702_s9 + $0x18bc] sm:$0xf]  ;;  %v19308_v30 = vld [vmem:[%s20702_s9 + $0x136c] sm:$0xf] }
 0x246   : > { %10379 = vmatpush.bf16.msrb.mxu1 %v14098_v7  ;;  %v14298_v7 = vor.u32 %v19108_v16, %v14295_v6  ;;  %v19558_v16 = vld [vmem:[%s20702_s9 + $0x1b3c] sm:$0xf]  ;;  %v16095_v6 = vld [vmem:[%s20702_s9 + $0x1b60] sm:$0xf0]  ;;  %v15415_v19 = vld [vmem:[%s20702_s9 + $0x1610] sm:$0xf0] }
 0x247   : > { %10392 = vmatpush.bf16.msrb.mxu2 %v14418_v13  ;;  %v19018_v13 = vld [vmem:[%s20702_s9 + $0xa5c] sm:$0xf] }
 0x248   : > { %10405 = vmatpush.bf16.msrb.mxu3 %v14738_v20  ;;  %v14255_v20 = vld [vmem:[%s20702_s9 + $0xd00] sm:$0xf0]  ;;  %v13938_v24 = vor.u32 %v19018_v13, %v13935_v41  ;;  %v15735_v13 = vld [vmem:[%s20702_s9 + $0x1890] sm:$0xf0] }
 0x249   : > { %10367 = vmatpush.bf16.msrb.mxu0 %v13738_v31  ;;  %v21927_v31 = vadd.f32 %v10152_v23, %v10140_v12  ;;  %v14258_v40 = vor.u32 %v19098_v25, %v14255_v20  ;;  %v19388_v12 = vld [vmem:[%s20702_s9 + $0x15ec] sm:$0xf]  ;;  %v16055_v25 = vld [vmem:[%s20702_s9 + $0x1b10] sm:$0xf0]  ;;  %v19298_v23 = vld [vmem:[%s20702_s9 + $0x131c] sm:$0xf] }
 0x24a   : > { %10380 = vmatpush.bf16.msrb.mxu1 %v14058_v47  ;;  %v13618_v47 = vor.u32 %v18938_v58, %v13615_v14  ;;  %v14538_v58 = vor.u32 %v19168_v2, %v14535_v4  ;;  %v19468_v14 = vld [vmem:[%s20702_s9 + $0x186c] sm:$0xf]  ;;  %v15418_v20 = vor.u32 %v19388_v12, %v15415_v19  ;;  %v19278_v4 = vld [vmem:[%s20702_s9 + $0x127c] sm:$0xf] }
 0x24b   : > { %10393 = vmatpush.bf16.msrb.mxu2 %v14378_v33  ;;  %v13575_v33 = vld [vmem:[%s20702_s9 + $0x7b0] sm:$0xf0]  ;;  %v15738_v29 = vor.u32 %v19468_v14, %v15735_v13  ;;  %v19518_v19 = vld [vmem:[%s20702_s9 + $0x19fc] sm:$0xf] }
 0x24c   : > { %10406 = vmatpush.bf16.msrb.mxu3 %v14698_v39  ;;  %v14215_v39 = vld [vmem:[%s20702_s9 + $0xcb0] sm:$0xf0]  ;;  %v13578_v62 = vor.u32 %v18928_v11, %v13575_v33  ;;  %v19458_v11 = vld [vmem:[%s20702_s9 + $0x181c] sm:$0xf]  ;;  %v15695_v33 = vld [vmem:[%s20702_s9 + $0x1840] sm:$0xf0] }
 0x24d   : > { %10368 = vmatpush.bf16.msrb.mxu0 %v13698_v60  ;;  %v15775_v60 = vld [vmem:[%s20702_s9 + $0x18e0] sm:$0xf0]  ;;  %v14218_v15 = vor.u32 %v19088_v46, %v14215_v39  ;;  %v19288_v39 = vld [vmem:[%s20702_s9 + $0x12cc] sm:$0xf] }
 0x24e   : > { %10381 = vmatpush.bf16.msrb.mxu1 %v14018_v63  ;;  %v10141_v63 = vpop.f32.mrf.mxu2  ;;  %v15778_v8 = vor.u32 %v19478_v57, %v15775_v60  ;;  %v19448_v57 = vld [vmem:[%s20702_s9 + $0x17cc] sm:$0xf]  ;;  %v15655_v60 = vld [vmem:[%s20702_s9 + $0x17f0] sm:$0xf0] }
 0x24f   : > { %10394 = vmatpush.bf16.msrb.mxu2 %v14338_v1  ;;  %v13898_v1 = vor.u32 %v19008_v38, %v13895_v0  ;;  %v15058_v38 = vor.u32 %v19298_v23, %v15055_v26  ;;  %v16015_v0 = vld [vmem:[%s20702_s9 + $0x1ac0] sm:$0xf0] }
 0x250   : > { %10407 = vmatpush.bf16.msrb.mxu3 %v14658_v3  ;;  %v15138_v3 = vor.u32 %v19318_v32, %v15135_v52  ;;  %v15698_v32 = vor.u32 %v19458_v11, %v15695_v33  ;;  %v19368_v52 = vld [vmem:[%s20702_s9 + $0x154c] sm:$0xf]  ;;  %v15895_v11 = vld [vmem:[%s20702_s9 + $0x19d0] sm:$0xf0] }
 0x251   : > { %10369 = vmatpush.bf16.msrb.mxu0 %v13658_v9  ;;  %v15095_v9 = vld [vmem:[%s20702_s9 + $0x1390] sm:$0xf0]  ;;  %v15338_v2 = vor.u32 %v19368_v52, %v15335_v59  ;;  %v19418_v59 = vld [vmem:[%s20702_s9 + $0x16dc] sm:$0xf] }
 0x252   : > { %10382 = vmatpush.bf16.msrb.mxu1 %v13978_v10  ;;  %v10154_v10 = vpop.f32.mrf.mxu3  ;;  %v15098_v41 = vor.u32 %v19308_v30, %v15095_v9 }
 0x253   : > { %10395 = vmatpush.bf16.msrb.mxu2 %v14298_v7  ;;  %v16098_v7 = vor.u32 %v19558_v16, %v16095_v6  ;;  %v19358_v6 = vld [vmem:[%s20702_s9 + $0x14fc] sm:$0xf] }
 0x254   : > { %10408 = vmatpush.bf16.msrb.mxu3 %v14618_v17  ;;  %v19548_v17 = vld [vmem:[%s20702_s9 + $0x1aec] sm:$0xf]  ;;  %v19438_v10 = vld [vmem:[%s20702_s9 + $0x177c] sm:$0xf] }
 0x255   : > { %10370 = vmatpush.bf16.msrb.mxu0 %v13618_v47  ;;  %v15375_v47 = vld [vmem:[%s20702_s9 + $0x15c0] sm:$0xf0] }
 0x256   : > { %10383 = vmatpush.bf16.msrb.mxu1 %v13938_v24  ;;  %v16058_v24 = vor.u32 %v19548_v17, %v16055_v25  ;;  %v15378_v46 = vor.u32 %v19378_v18, %v15375_v47  ;;  %v14935_v17 = vld [vmem:[%s20702_s9 + $0x1250] sm:$0xf0]  ;;  %v19348_v25 = vld [vmem:[%s20702_s9 + $0x14ac] sm:$0xf] }
 0x257   : > { %10396 = vmatpush.bf16.msrb.mxu2 %v14258_v40  ;;  %v19538_v40 = vld [vmem:[%s20702_s9 + $0x1a9c] sm:$0xf]  ;;  %v15575_v18 = vld [vmem:[%s20702_s9 + $0x1750] sm:$0xf0] }
 0x258   : > { %10409 = vmatpush.bf16.msrb.mxu3 %v14578_v53  ;;  %v15015_v53 = vld [vmem:[%s20702_s9 + $0x12f0] sm:$0xf0]  ;;  %v16018_v54 = vor.u32 %v19538_v40, %v16015_v0  ;;  %v14895_v40 = vld [vmem:[%s20702_s9 + $0x1200] sm:$0xf0] }
 0x259   : > { %10371 = vmatpush.bf16.msrb.mxu0 %v13578_v62  ;;  %v15018_v63 = vor.u32 %v19288_v39, %v15015_v53  ;;  %v19528_v62 = vld [vmem:[%s20702_s9 + $0x1a4c] sm:$0xf]  ;;  %v10165_v16 = vpop.f32.mrf.mxu0  ;;  %v19338_v39 = vld [vmem:[%s20702_s9 + $0x145c] sm:$0xf]  ;;  %v15215_v53 = vld [vmem:[%s20702_s9 + $0x1480] sm:$0xf0] }
 0x25a   : > { %10384 = vmatpush.bf16.msrb.mxu1 %v13898_v1  ;;  %v15975_v1 = vld [vmem:[%s20702_s9 + $0x1a70] sm:$0xf0]  ;;  %v10166_v9 = vadd.f32 %v10165_v16, %v21927_v31  ;;  %v19408_v16 = vld [vmem:[%s20702_s9 + $0x168c] sm:$0xf] }
 0x25b   : > { %10397 = vmatpush.bf16.msrb.mxu2 %v14218_v15  ;;  %v14975_v15 = vld [vmem:[%s20702_s9 + $0x12a0] sm:$0xf0]  ;;  %v15978_v30 = vor.u32 %v19528_v62, %v15975_v1  ;;  %v19248_v1 = vld [vmem:[%s20702_s9 + $0x118c] sm:$0xf] }
 0x25c   : > { %10410 = vmatpush.bf16.msrb.mxu3 %v14538_v58  ;;  %10372 = vmatmul.bf16.vlgmr.msrb.gmra.mxu0 %v20824_v22  ;;  %v15615_v58 = vld [vmem:[%s20702_s9 + $0x17a0] sm:$0xf0]  ;;  %v14978_v12 = vor.u32 %v19278_v4, %v14975_v15  ;;  %v15218_v4 = vor.u32 %v19338_v39, %v15215_v53  ;;  %v19328_v15 = vld [vmem:[%s20702_s9 + $0x140c] sm:$0xf]  ;;  %v16695_v39 = vld [vmem:[%s20702_s9 + $0x2010] sm:$0xf0] }
 0x25d   : > { %10416 = vmatpush.bf16.msra.mxu0 %v15138_v3  ;;  %10385 = vmatmul.bf16.vlgmr.msrb.gmra.mxu1 %v20889_v48  ;;  %v15658_v3 = vor.u32 %v19448_v57, %v15655_v60  ;;  %v15618_v31 = vor.u32 %v19438_v10, %v15615_v58  ;;  %v19498_v57 = vld [vmem:[%s20702_s9 + $0x195c] sm:$0xf]  ;;  %v15855_v62 = vld [vmem:[%s20702_s9 + $0x1980] sm:$0xf0]  ;;  %v19788_v53 = vld [vmem:[%s20702_s9 + $0x226c] sm:$0xf] }
 0x25e   : > { %10429 = vmatpush.bf16.msra.mxu1 %v15458_v5  ;;  %10398 = vmatmul.bf16.vlgmr.msrb.gmra.mxu2 %v20895_v55  ;;  %v15295_v5 = vld [vmem:[%s20702_s9 + $0x1520] sm:$0xf0]  ;;  %v19718_v10 = vld [vmem:[%s20702_s9 + $0x203c] sm:$0xf] }
 0x25f   : > { %10442 = vmatpush.bf16.msra.mxu2 %v15778_v8  ;;  %10411 = vmatmul.bf16.vlgmr.msrb.gmra.mxu3 %v20891_v51  ;;  %v10178_v8 = vpop.f32.mrf.mxu1  ;;  %v15298_v14 = vor.u32 %v19358_v6, %v15295_v5  ;;  %v15495_v5 = vld [vmem:[%s20702_s9 + $0x16b0] sm:$0xf0]  ;;  %v16735_v58 = vld [vmem:[%s20702_s9 + $0x2060] sm:$0xf0] }
 0x260   : > { %10455 = vmatpush.bf16.msra.mxu3 %v16098_v7  ;;  %v15935_v7 = vld [vmem:[%s20702_s9 + $0x1a20] sm:$0xf0]  ;;  %v21982_v13 = vadd.f32 %v10178_v8, %v10166_v9  ;;  %v19638_v8 = vld [vmem:[%s20702_s9 + $0x1dbc] sm:$0xf]  ;;  %v15858_v9 = vor.u32 %v19498_v57, %v15855_v62 }
 0x261   : > { %10417 = vmatpush.bf16.msra.mxu0 %v15098_v41  ;;  %v19268_v41 = vld [vmem:[%s20702_s9 + $0x122c] sm:$0xf]  ;;  %v15938_v23 = vor.u32 %v19518_v19, %v15935_v7  ;;  %v21988_v26 = vpop.f32.mrf.mxu2  ;;  %v16335_v62 = vld [vmem:[%s20702_s9 + $0x1d40] sm:$0xf0] }
 0x262   : > { %10430 = vmatpush.bf16.msra.mxu1 %v15418_v20  ;;  %v15255_v20 = vld [vmem:[%s20702_s9 + $0x14d0] sm:$0xf0]  ;;  %v14938_v47 = vor.u32 %v19268_v41, %v14935_v17  ;;  %v19488_v41 = vld [vmem:[%s20702_s9 + $0x190c] sm:$0xf] }
 0x263   : > { %10443 = vmatpush.bf16.msra.mxu2 %v15738_v29  ;;  %v19428_v29 = vld [vmem:[%s20702_s9 + $0x172c] sm:$0xf]  ;;  %v15258_v33 = vor.u32 %v19348_v25, %v15255_v20  ;;  %v15815_v17 = vld [vmem:[%s20702_s9 + $0x1930] sm:$0xf0]  ;;  %v19878_v20 = vld [vmem:[%s20702_s9 + $0x253c] sm:$0xf] }
 0x264   : > { %10456 = vmatpush.bf16.msra.mxu3 %v16058_v24  ;;  %v19508_v24 = vld [vmem:[%s20702_s9 + $0x19ac] sm:$0xf]  ;;  %v15578_v0 = vor.u32 %v19428_v29, %v15575_v18  ;;  %v15498_v29 = vor.u32 %v19408_v16, %v15495_v5  ;;  %v16738_v18 = vor.u32 %v19718_v10, %v16735_v58  ;;  %v19858_v16 = vld [vmem:[%s20702_s9 + $0x249c] sm:$0xf]  ;;  %v16295_v10 = vld [vmem:[%s20702_s9 + $0x1cf0] sm:$0xf0] }
 0x265   : > { %10418 = vmatpush.bf16.msra.mxu0 %v15058_v38  ;;  %v19258_v38 = vld [vmem:[%s20702_s9 + $0x11dc] sm:$0xf]  ;;  %v15898_v52 = vor.u32 %v19508_v24, %v15895_v11  ;;  %v15818_v11 = vor.u32 %v19488_v41, %v15815_v17  ;;  %v19688_v58 = vld [vmem:[%s20702_s9 + $0x1f4c] sm:$0xf]  ;;  %v17255_v17 = vld [vmem:[%s20702_s9 + $0x2470] sm:$0xf0] }
 0x266   : > { %10431 = vmatpush.bf16.msra.mxu1 %v15378_v46  ;;  %v21996_v46 = vpop.f32.mrf.mxu3  ;;  %v19848_v41 = vld [vmem:[%s20702_s9 + $0x244c] sm:$0xf] }
 0x267   : > { %10444 = vmatpush.bf16.msra.mxu2 %v15698_v32  ;;  %v10167_v32 = vpop.f32.mrf.mxu0  ;;  %v10180_v60 = vpop.f32.mrf.mxu1 }
 0x268   : > { %10457 = vmatpush.bf16.msra.mxu3 %v16018_v54  ;;  %v15535_v54 = vld [vmem:[%s20702_s9 + $0x1700] sm:$0xf0]  ;;  %v17015_v32 = vld [vmem:[%s20702_s9 + $0x2290] sm:$0xf0] }
 0x269   : > { %10419 = vmatpush.bf16.msra.mxu0 %v15018_v63  ;;  %v14898_v63 = vor.u32 %v19258_v38, %v14895_v40  ;;  %v15538_v6 = vor.u32 %v19418_v59, %v15535_v54  ;;  %v10193_v19 = vpop.f32.mrf.mxu2  ;;  %v16375_v38 = vld [vmem:[%s20702_s9 + $0x1d90] sm:$0xf0]  ;;  %v19708_v40 = vld [vmem:[%s20702_s9 + $0x1fec] sm:$0xf]  ;;  %v17018_v60 = vor.u32 %v19788_v53, %v17015_v32 }
 0x26a   : > { %10432 = vmatpush.bf16.msra.mxu1 %v15338_v2  ;;  %v14855_v2 = vld [vmem:[%s20702_s9 + $0x11b0] sm:$0xf0]  ;;  %v16698_v57 = vor.u32 %v19708_v40, %v16695_v39  ;;  %v16895_v40 = vld [vmem:[%s20702_s9 + $0x21a0] sm:$0xf0] }
 0x26b   : > { %10445 = vmatpush.bf16.msra.mxu2 %v15658_v3  ;;  %v15175_v3 = vld [vmem:[%s20702_s9 + $0x1430] sm:$0xf0]  ;;  %v14858_v7 = vor.u32 %v19248_v1, %v14855_v2  ;;  %v19698_v1 = vld [vmem:[%s20702_s9 + $0x1f9c] sm:$0xf]  ;;  %v17215_v39 = vld [vmem:[%s20702_s9 + $0x2420] sm:$0xf0] }
 0x26c   : > { %10458 = vmatpush.bf16.msra.mxu3 %v15978_v30  ;;  %v16415_v30 = vld [vmem:[%s20702_s9 + $0x1de0] sm:$0xf0]  ;;  %v17335_v59 = vld [vmem:[%s20702_s9 + $0x2510] sm:$0xf0] }
 0x26d   : > { %10420 = vmatpush.bf16.msra.mxu0 %v14978_v12  ;;  %v19798_v12 = vld [vmem:[%s20702_s9 + $0x22bc] sm:$0xf]  ;;  %v16418_v25 = vor.u32 %v19638_v8, %v16415_v30  ;;  %v16615_v19 = vld [vmem:[%s20702_s9 + $0x1f70] sm:$0xf0] }
 0x26e   : > { %10433 = vmatpush.bf16.msra.mxu1 %v15298_v14  ;;  %v17055_v14 = vld [vmem:[%s20702_s9 + $0x22e0] sm:$0xf0] }
 0x26f   : > { %10446 = vmatpush.bf16.msra.mxu2 %v15618_v31  ;;  %v15178_v31 = vor.u32 %v19328_v15, %v15175_v3  ;;  %v17058_v24 = vor.u32 %v19798_v12, %v17055_v14  ;;  %v19778_v15 = vld [vmem:[%s20702_s9 + $0x221c] sm:$0xf]  ;;  %v16975_v3 = vld [vmem:[%s20702_s9 + $0x2240] sm:$0xf0]  ;;  %v16935_v14 = vld [vmem:[%s20702_s9 + $0x21f0] sm:$0xf0] }
 0x270   : > { %10459 = vmatpush.bf16.msra.mxu3 %v15938_v23  ;;  %v17375_v23 = vld [vmem:[%s20702_s9 + $0x2560] sm:$0xf0]  ;;  %v16978_v30 = vor.u32 %v19778_v15, %v16975_v3  ;;  %v17175_v15 = vld [vmem:[%s20702_s9 + $0x23d0] sm:$0xf0] }
 0x271   : > { %10421 = vmatpush.bf16.msra.mxu0 %v14938_v47  ;;  %v10206_v47 = vpop.f32.mrf.mxu3 }
 0x272   : > { %10434 = vmatpush.bf16.msra.mxu1 %v15258_v33  ;;  %v19628_v33 = vld [vmem:[%s20702_s9 + $0x1d6c] sm:$0xf]  ;;  %v19678_v47 = vld [vmem:[%s20702_s9 + $0x1efc] sm:$0xf] }
 0x273   : > { %10447 = vmatpush.bf16.msra.mxu2 %v15578_v0  ;;  %v17378_v0 = vor.u32 %v19878_v20, %v17375_v23  ;;  %v16378_v54 = vor.u32 %v19628_v33, %v16375_v38  ;;  %v16618_v20 = vor.u32 %v19688_v58, %v16615_v19  ;;  %v16575_v33 = vld [vmem:[%s20702_s9 + $0x1f20] sm:$0xf0]  ;;  %v19758_v38 = vld [vmem:[%s20702_s9 + $0x217c] sm:$0xf] }
 0x274   : > { %10460 = vmatpush.bf16.msra.mxu3 %v15898_v52  ;;  %v19868_v52 = vld [vmem:[%s20702_s9 + $0x24ec] sm:$0xf]  ;;  %v16578_v32 = vor.u32 %v19678_v47, %v16575_v33  ;;  %v19738_v19 = vld [vmem:[%s20702_s9 + $0x20dc] sm:$0xf] }
 0x275   : > { %10422 = vmatpush.bf16.msra.mxu0 %v14898_v63  ;;  %v19618_v63 = vld [vmem:[%s20702_s9 + $0x1d1c] sm:$0xf]  ;;  %v17338_v2 = vor.u32 %v19868_v52, %v17335_v59  ;;  %v16898_v52 = vor.u32 %v19758_v38, %v16895_v40  ;;  %v19588_v59 = vld [vmem:[%s20702_s9 + $0x1c2c] sm:$0xf]  ;;  %v16775_v40 = vld [vmem:[%s20702_s9 + $0x20b0] sm:$0xf0] }
 0x276   : > { %10435 = vmatpush.bf16.msra.mxu1 %v15218_v4  ;;  %v16655_v4 = vld [vmem:[%s20702_s9 + $0x1fc0] sm:$0xf0]  ;;  %v16338_v5 = vor.u32 %v19618_v63, %v16335_v62  ;;  %v16535_v63 = vld [vmem:[%s20702_s9 + $0x1ed0] sm:$0xf0]  ;;  %v19748_v62 = vld [vmem:[%s20702_s9 + $0x212c] sm:$0xf] }
 0x277   : > { %10448 = vmatpush.bf16.msra.mxu2 %v15538_v6  ;;  %v17295_v6 = vld [vmem:[%s20702_s9 + $0x24c0] sm:$0xf0]  ;;  %v16658_v8 = vor.u32 %v19698_v1, %v16655_v4  ;;  %v16855_v1 = vld [vmem:[%s20702_s9 + $0x2150] sm:$0xf0]  ;;  %v19828_v4 = vld [vmem:[%s20702_s9 + $0x23ac] sm:$0xf] }
 0x278   : > { %10461 = vmatpush.bf16.msra.mxu3 %v15858_v9  ;;  %v19608_v9 = vld [vmem:[%s20702_s9 + $0x1ccc] sm:$0xf]  ;;  %v17298_v12 = vor.u32 %v19858_v16, %v17295_v6  ;;  %v17178_v58 = vor.u32 %v19828_v4, %v17175_v15 }
 0x279   : > { %10423 = vmatpush.bf16.msra.mxu0 %v14858_v7  ;;  %v19768_v7 = vld [vmem:[%s20702_s9 + $0x21cc] sm:$0xf] }
 0x27a   : > { %10436 = vmatpush.bf16.msra.mxu1 %v15178_v31  ;;  %v22048_v31 = vpop.f32.mrf.mxu0  ;;  %v16938_v23 = vor.u32 %v19768_v7, %v16935_v14  ;;  %v16815_v7 = vld [vmem:[%s20702_s9 + $0x2100] sm:$0xf0]  ;;  %v19648_v47 = vld [vmem:[%s20702_s9 + $0x1e0c] sm:$0xf] }
 0x27b   : > { %10449 = vmatpush.bf16.msra.mxu2 %v15498_v29  ;;  %v19598_v29 = vld [vmem:[%s20702_s9 + $0x1c7c] sm:$0xf]  ;;  %v19728_v33 = vld [vmem:[%s20702_s9 + $0x208c] sm:$0xf] }
 0x27c   : > { %10462 = vmatpush.bf16.msra.mxu3 %v15818_v11  ;;  %10424 = vmatmul.bf16.vlgmr.msra.gmra.mxu0 %v20901_v61  ;;  %v17258_v11 = vor.u32 %v19848_v41, %v17255_v17  ;;  %v19818_v41 = vld [vmem:[%s20702_s9 + $0x235c] sm:$0xf]  ;;  %v17135_v17 = vld [vmem:[%s20702_s9 + $0x2380] sm:$0xf0] }
 0x27d   : > { %10468 = vmatpush.bf16.msrb.mxu0 %v16418_v25  ;;  %10437 = vmatmul.bf16.vlgmr.msra.gmra.mxu1 %v20964_v36  ;;  %v16298_v25 = vor.u32 %v19608_v9, %v16295_v10  ;;  %v16175_v9 = vld [vmem:[%s20702_s9 + $0x1c00] sm:$0xf0]  ;;  %v19658_v10 = vld [vmem:[%s20702_s9 + $0x1e5c] sm:$0xf]  ;;  %v17138_v38 = vor.u32 %v19818_v41, %v17135_v17  ;;  %v20188_v17 = vld [vmem:[%s20702_s9 + $0x2eec] sm:$0xf] }
 0x27e   : > { %10481 = vmatpush.bf16.msrb.mxu1 %v16738_v18  ;;  %10450 = vmatmul.bf16.vlgmr.msra.gmra.mxu2 %v20971_v42  ;;  %v16255_v18 = vld [vmem:[%s20702_s9 + $0x1ca0] sm:$0xf0] }
 0x27f   : > { %10494 = vmatpush.bf16.msrb.mxu2 %v17058_v24  ;;  %10463 = vmatmul.bf16.vlgmr.msra.gmra.mxu3 %v20966_v37  ;;  %v22053_v24 = vpop.f32.mrf.mxu1  ;;  %v16258_v53 = vor.u32 %v19598_v29, %v16255_v18  ;;  %v16818_v18 = vor.u32 %v19738_v19, %v16815_v7  ;;  %v20108_v19 = vld [vmem:[%s20702_s9 + $0x2c6c] sm:$0xf]  ;;  %v18295_v7 = vld [vmem:[%s20702_s9 + $0x2c90] sm:$0xf0] }
 0x280   : > { %10507 = vmatpush.bf16.msrb.mxu3 %v17378_v0  ;;  %v19838_v0 = vld [vmem:[%s20702_s9 + $0x23fc] sm:$0xf] }
 0x281   : > { %10469 = vmatpush.bf16.msrb.mxu0 %v16378_v54  ;;  %v16215_v54 = vld [vmem:[%s20702_s9 + $0x1c50] sm:$0xf0] }
 0x282   : > { %10482 = vmatpush.bf16.msrb.mxu1 %v16698_v57  ;;  %v19668_v57 = vld [vmem:[%s20702_s9 + $0x1eac] sm:$0xf]  ;;  %v16218_v3 = vor.u32 %v19588_v59, %v16215_v54  ;;  %v10219_v16 = vpop.f32.mrf.mxu0  ;;  %v22070_v6 = vpop.f32.mrf.mxu3 }
 0x283   : > { %10495 = vmatpush.bf16.msrb.mxu2 %v17018_v60  ;;  %v17218_v60 = vor.u32 %v19838_v0, %v17215_v39  ;;  %v19958_v0 = vld [vmem:[%s20702_s9 + $0x27bc] sm:$0xf]  ;;  %v17695_v39 = vld [vmem:[%s20702_s9 + $0x27e0] sm:$0xf0] }
 0x284   : > { %10508 = vmatpush.bf16.msrb.mxu3 %v17338_v2  ;;  %v22066_v2 = vpop.f32.mrf.mxu2  ;;  %v17698_v15 = vor.u32 %v19958_v0, %v17695_v39  ;;  %v20198_v16 = vld [vmem:[%s20702_s9 + $0x2f3c] sm:$0xf] }
 0x285   : > { %10470 = vmatpush.bf16.msrb.mxu0 %v16338_v5  ;;  %v16538_v5 = vor.u32 %v19668_v57, %v16535_v63  ;;  %v18335_v57 = vld [vmem:[%s20702_s9 + $0x2ce0] sm:$0xf0]  ;;  %v17095_v63 = vld [vmem:[%s20702_s9 + $0x2330] sm:$0xf0]  ;;  %v20178_v39 = vld [vmem:[%s20702_s9 + $0x2e9c] sm:$0xf] }
 0x286   : > { %10483 = vmatpush.bf16.msrb.mxu1 %v16658_v8  ;;  %v16858_v8 = vor.u32 %v19748_v62, %v16855_v1  ;;  %v16778_v1 = vor.u32 %v19728_v33, %v16775_v40  ;;  %v20098_v33 = vld [vmem:[%s20702_s9 + $0x2c1c] sm:$0xf] }
 0x287   : > { %10496 = vmatpush.bf16.msrb.mxu2 %v16978_v30  ;;  %v19578_v30 = vld [vmem:[%s20702_s9 + $0x1bdc] sm:$0xf]  ;;  %v10232_v14 = vpop.f32.mrf.mxu1 }
 0x288   : > { %10509 = vmatpush.bf16.msrb.mxu3 %v17298_v12  ;;  %v16495_v12 = vld [vmem:[%s20702_s9 + $0x1e80] sm:$0xf0] }
 0x289   : > { %10471 = vmatpush.bf16.msrb.mxu0 %v16298_v25  ;;  %v16178_v25 = vor.u32 %v19578_v30, %v16175_v9  ;;  %v16498_v29 = vor.u32 %v19658_v10, %v16495_v12  ;;  %v19948_v9 = vld [vmem:[%s20702_s9 + $0x276c] sm:$0xf]  ;;  %v17655_v10 = vld [vmem:[%s20702_s9 + $0x2790] sm:$0xf0] }
 0x28a   : > { %10484 = vmatpush.bf16.msrb.mxu1 %v16618_v20  ;;  %v19568_v20 = vld [vmem:[%s20702_s9 + $0x1b8c] sm:$0xf]  ;;  %v10258_v4 = vpop.f32.mrf.mxu3  ;;  %v17975_v12 = vld [vmem:[%s20702_s9 + $0x2a10] sm:$0xf0]  ;;  %v17658_v41 = vor.u32 %v19948_v9, %v17655_v10  ;;  %v19918_v10 = vld [vmem:[%s20702_s9 + $0x267c] sm:$0xf] }
 0x28b   : > { %10497 = vmatpush.bf16.msrb.mxu2 %v16938_v23  ;;  %v16135_v23 = vld [vmem:[%s20702_s9 + $0x1bb0] sm:$0xf0] }
 0x28c   : > { %10510 = vmatpush.bf16.msrb.mxu3 %v17258_v11  ;;  %v16455_v11 = vld [vmem:[%s20702_s9 + $0x1e30] sm:$0xf0]  ;;  %v10245_v59 = vpop.f32.mrf.mxu2  ;;  %v16138_v54 = vor.u32 %v19568_v20, %v16135_v23  ;;  %v18298_v23 = vor.u32 %v20108_v19, %v18295_v7  ;;  %v17855_v19 = vld [vmem:[%s20702_s9 + $0x2920] sm:$0xf0]  ;;  %v20078_v7 = vld [vmem:[%s20702_s9 + $0x2b7c] sm:$0xf] }
 0x28d   : > { %10472 = vmatpush.bf16.msrb.mxu0 %v16258_v53  ;;  %v20038_v53 = vld [vmem:[%s20702_s9 + $0x2a3c] sm:$0xf]  ;;  %v16458_v62 = vor.u32 %v19648_v47, %v16455_v11  ;;  %v17935_v11 = vld [vmem:[%s20702_s9 + $0x29c0] sm:$0xf0]  ;;  %v19928_v59 = vld [vmem:[%s20702_s9 + $0x26cc] sm:$0xf] }
 0x28e   : > { %10485 = vmatpush.bf16.msrb.mxu1 %v16578_v32  ;;  %v18015_v32 = vld [vmem:[%s20702_s9 + $0x2a60] sm:$0xf0]  ;;  %v20018_v47 = vld [vmem:[%s20702_s9 + $0x299c] sm:$0xf] }
 0x28f   : > { %10498 = vmatpush.bf16.msrb.mxu2 %v16898_v52  ;;  %v20118_v52 = vld [vmem:[%s20702_s9 + $0x2cbc] sm:$0xf] }
 0x290   : > { %10511 = vmatpush.bf16.msrb.mxu3 %v17218_v60  ;;  %v19808_v60 = vld [vmem:[%s20702_s9 + $0x230c] sm:$0xf] }
 0x291   : > { %10473 = vmatpush.bf16.msrb.mxu0 %v16218_v3  ;;  %v18018_v3 = vor.u32 %v20038_v53, %v18015_v32  ;;  %v17098_v30 = vor.u32 %v19808_v60, %v17095_v63  ;;  %v18575_v53 = vld [vmem:[%s20702_s9 + $0x2ec0] sm:$0xf0]  ;;  %v17938_v32 = vor.u32 %v20018_v47, %v17935_v11  ;;  %v17895_v60 = vld [vmem:[%s20702_s9 + $0x2970] sm:$0xf0]  ;;  %v20088_v63 = vld [vmem:[%s20702_s9 + $0x2bcc] sm:$0xf] }
 0x292   : > { %10486 = vmatpush.bf16.msrb.mxu1 %v16538_v5  ;;  %v18655_v5 = vld [vmem:[%s20702_s9 + $0x2f60] sm:$0xf0]  ;;  %v19988_v47 = vld [vmem:[%s20702_s9 + $0x28ac] sm:$0xf]  ;;  %v17815_v11 = vld [vmem:[%s20702_s9 + $0x28d0] sm:$0xf0] }
 0x293   : > { %10499 = vmatpush.bf16.msrb.mxu2 %v16858_v8  ;;  %v18338_v8 = vor.u32 %v20118_v52, %v18335_v57  ;;  %v18658_v14 = vor.u32 %v20198_v16, %v18655_v5  ;;  %v20008_v57 = vld [vmem:[%s20702_s9 + $0x294c] sm:$0xf]  ;;  %v18535_v16 = vld [vmem:[%s20702_s9 + $0x2e70] sm:$0xf0]  ;;  %v10192_v5 = vadd.f32 %v21988_v26, %v21982_v13 }
 0x294   : > { %10512 = vmatpush.bf16.msrb.mxu3 %v17178_v58  ;;  %v20028_v58 = vld [vmem:[%s20702_s9 + $0x29ec] sm:$0xf] }
 0x295   : > { %10474 = vmatpush.bf16.msrb.mxu0 %v16178_v25  ;;  %v18615_v25 = vld [vmem:[%s20702_s9 + $0x2f10] sm:$0xf0]  ;;  %v17978_v20 = vor.u32 %v20028_v58, %v17975_v12  ;;  %v17535_v58 = vld [vmem:[%s20702_s9 + $0x26a0] sm:$0xf0]  ;;  %v19998_v12 = vld [vmem:[%s20702_s9 + $0x28fc] sm:$0xf] }
 0x296   : > { %10487 = vmatpush.bf16.msrb.mxu1 %v16498_v29  ;;  %v19938_v29 = vld [vmem:[%s20702_s9 + $0x271c] sm:$0xf]  ;;  %v18618_v40 = vor.u32 %v20188_v17, %v18615_v25  ;;  %v17538_v26 = vor.u32 %v19918_v10, %v17535_v58  ;;  %v18495_v17 = vld [vmem:[%s20702_s9 + $0x2e20] sm:$0xf0]  ;;  %v10205_v25 = vadd.f32 %v21996_v46, %v10192_v5  ;;  %v19888_v58 = vld [vmem:[%s20702_s9 + $0x258c] sm:$0xf] }
 0x297   : > { %10500 = vmatpush.bf16.msrb.mxu2 %v16818_v18  ;;  %v17615_v18 = vld [vmem:[%s20702_s9 + $0x2740] sm:$0xf0] }
 0x298   : > { %10513 = vmatpush.bf16.msrb.mxu3 %v17138_v38  ;;  %v18255_v38 = vld [vmem:[%s20702_s9 + $0x2c40] sm:$0xf0]  ;;  %v17618_v0 = vor.u32 %v19938_v29, %v17615_v18  ;;  %v19908_v29 = vld [vmem:[%s20702_s9 + $0x262c] sm:$0xf]  ;;  %v17495_v18 = vld [vmem:[%s20702_s9 + $0x2650] sm:$0xf0] }
 0x299   : > { %10475 = vmatpush.bf16.msrb.mxu0 %v16138_v54  ;;  %v18258_v52 = vor.u32 %v20098_v33, %v18255_v38  ;;  %v17575_v54 = vld [vmem:[%s20702_s9 + $0x26f0] sm:$0xf0]  ;;  %v22122_v4 = vpop.f32.mrf.mxu0  ;;  %v20068_v33 = vld [vmem:[%s20702_s9 + $0x2b2c] sm:$0xf]  ;;  %v18415_v10 = vld [vmem:[%s20702_s9 + $0x2d80] sm:$0xf0] }
 0x29a   : > { %10488 = vmatpush.bf16.msrb.mxu1 %v16458_v62  ;;  %v18215_v62 = vld [vmem:[%s20702_s9 + $0x2bf0] sm:$0xf0]  ;;  %v22128_v9 = vpop.f32.mrf.mxu1 }
 0x29b   : > { %10501 = vmatpush.bf16.msrb.mxu2 %v16778_v1  ;;  %v18578_v1 = vor.u32 %v20178_v39, %v18575_v53  ;;  %v18135_v38 = vld [vmem:[%s20702_s9 + $0x2b50] sm:$0xf0]  ;;  %v17498_v53 = vor.u32 %v19908_v29, %v17495_v18  ;;  %v18844_v29 = vld [vmem:[%s20702_s9 + $0x4e4] sm:$0xf0]  ;;  %v13541_v18 = vld [vmem:[%s20702_s9 + $0x740] sm:$0xf] }
 0x29c   : > { %10514 = vmatpush.bf16.msrb.mxu3 %v17098_v30  ;;  %10476 = vmatmul.bf16.vlgmr.msrb.gmra.mxu0 %v20973_v43  ;;  %v18218_v30 = vor.u32 %v20088_v63, %v18215_v62  ;;  %v19978_v63 = vld [vmem:[%s20702_s9 + $0x285c] sm:$0xf] }
 0x29d   : > { %10520 = vmatpush.bf16.msra.mxu0 %v17698_v15  ;;  %10489 = vmatmul.bf16.vlgmr.msrb.gmra.mxu1 %v21042_v34  ;;  %v17578_v15 = vor.u32 %v19928_v59, %v17575_v54  ;;  %v18138_v54 = vor.u32 %v20068_v33, %v18135_v38  ;;  %v20128_v33 = vld [vmem:[%s20702_s9 + $0x2d0c] sm:$0xf]  ;;  %v18375_v38 = vld [vmem:[%s20702_s9 + $0x2d30] sm:$0xf0] }
 0x29e   : > { %10533 = vmatpush.bf16.msra.mxu1 %v18018_v3  ;;  %10502 = vmatmul.bf16.vlgmr.msrb.gmra.mxu2 %v21049_v44  ;;  %v20168_v3 = vld [vmem:[%s20702_s9 + $0x2e4c] sm:$0xf] }
 0x29f   : > { %10546 = vmatpush.bf16.msra.mxu2 %v18338_v8  ;;  %10515 = vmatmul.bf16.vlgmr.msrb.gmra.mxu3 %v21044_v35  ;;  %v17898_v8 = vor.u32 %v20008_v57, %v17895_v60  ;;  %v18538_v13 = vor.u32 %v20168_v3, %v18535_v16  ;;  %v19898_v57 = vld [vmem:[%s20702_s9 + $0x25dc] sm:$0xf]  ;;  %v17455_v60 = vld [vmem:[%s20702_s9 + $0x2600] sm:$0xf0] }
 0x2a0   : > { %10559 = vmatpush.bf16.msra.mxu3 %v18658_v14  ;;  %v18175_v14 = vld [vmem:[%s20702_s9 + $0x2ba0] sm:$0xf0] }
 0x2a1   : > { %10521 = vmatpush.bf16.msra.mxu0 %v17658_v41  ;;  %v20158_v41 = vld [vmem:[%s20702_s9 + $0x2dfc] sm:$0xf]  ;;  %v10271_v59 = vpop.f32.mrf.mxu0  ;;  %v18095_v3 = vld [vmem:[%s20702_s9 + $0x2b00] sm:$0xf0] }
 0x2a2   : > { %10534 = vmatpush.bf16.msra.mxu1 %v17978_v20  ;;  %v17858_v20 = vor.u32 %v19998_v12, %v17855_v19  ;;  %v18498_v46 = vor.u32 %v20158_v41, %v18495_v17  ;;  %v22148_v39 = vpop.f32.mrf.mxu3  ;;  %v10284_v62 = vpop.f32.mrf.mxu1  ;;  %v17415_v12 = vld [vmem:[%s20702_s9 + $0x25b0] sm:$0xf0]  ;;  %v12901_v17 = vld [vmem:[%s20702_s9 + $0x240] sm:$0xf] }
 0x2a3   : > { %10547 = vmatpush.bf16.msra.mxu2 %v18298_v23  ;;  %v18178_v23 = vor.u32 %v20078_v7, %v18175_v14  ;;  %v19968_v14 = vld [vmem:[%s20702_s9 + $0x280c] sm:$0xf]  ;;  %v18055_v41 = vld [vmem:[%s20702_s9 + $0x2ab0] sm:$0xf0]  ;;  %v12861_v62 = vld [vmem:[%s20702_s9 + $0x1f0] sm:$0xf] }
 0x2a4   : > { %10560 = vmatpush.bf16.msra.mxu3 %v18618_v40  ;;  %v10218_v40 = vadd.f32 %v22048_v31, %v10205_v25  ;;  %v17818_v31 = vor.u32 %v19988_v47, %v17815_v11  ;;  %v18764_v25 = vld [vmem:[%s20702_s9 + $0x264] sm:$0xf0]  ;;  %v17418_v47 = vor.u32 %v19888_v58, %v17415_v12 }
 0x2a5   : > { %10522 = vmatpush.bf16.msra.mxu0 %v17618_v0  ;;  %v22146_v0 = vpop.f32.mrf.mxu2  ;;  %v18924_v11 = vld [vmem:[%s20702_s9 + $0x764] sm:$0xf0] }
 0x2a6   : > { %10535 = vmatpush.bf16.msra.mxu1 %v17938_v32  ;;  %v20148_v32 = vld [vmem:[%s20702_s9 + $0x2dac] sm:$0xf]  ;;  %v10231_v16 = vadd.f32 %v22053_v24, %v10218_v40 }
 0x2a7   : > { %10548 = vmatpush.bf16.msra.mxu2 %v18258_v52  ;;  %v18455_v52 = vld [vmem:[%s20702_s9 + $0x2dd0] sm:$0xf0] }
 0x2a8   : > { %10561 = vmatpush.bf16.msra.mxu3 %v18578_v1  ;;  %v17775_v1 = vld [vmem:[%s20702_s9 + $0x2880] sm:$0xf0]  ;;  %v18458_v5 = vor.u32 %v20148_v32, %v18455_v52  ;;  %v10244_v19 = vadd.f32 %v22066_v2, %v10231_v16  ;;  %v12902_v52 = vor.u32 %v18764_v25, %v12901_v17  ;;  %v18914_v16 = vld [vmem:[%s20702_s9 + $0x714] sm:$0xf0]  ;;  %v13781_v25 = vld [vmem:[%s20702_s9 + $0x920] sm:$0xf] }
 0x2a9   : > { %10523 = vmatpush.bf16.msra.mxu0 %v17578_v15  ;;  %v20058_v15 = vld [vmem:[%s20702_s9 + $0x2adc] sm:$0xf]  ;;  %v17778_v24 = vor.u32 %v19978_v63, %v17775_v1  ;;  %v18378_v63 = vor.u32 %v20128_v33, %v18375_v38  ;;  %v13181_v1 = vld [vmem:[%s20702_s9 + $0x470] sm:$0xf]  ;;  %v18894_v33 = vld [vmem:[%s20702_s9 + $0x674] sm:$0xf0] }
 0x2aa   : > { %10536 = vmatpush.bf16.msra.mxu1 %v17898_v8  ;;  %v20138_v8 = vld [vmem:[%s20702_s9 + $0x2d5c] sm:$0xf]  ;;  %v18098_v7 = vor.u32 %v20058_v15, %v18095_v3  ;;  %v10310_v40 = vpop.f32.mrf.mxu3  ;;  %v18834_v15 = vld [vmem:[%s20702_s9 + $0x494] sm:$0xf0]  ;;  %v13501_v3 = vld [vmem:[%s20702_s9 + $0x6f0] sm:$0xf] }
 0x2ab   : > { %10549 = vmatpush.bf16.msra.mxu2 %v18218_v30  ;;  %v17458_v30 = vor.u32 %v19898_v57, %v17455_v60  ;;  %v13542_v60 = vor.u32 %v18924_v11, %v13541_v18  ;;  %v13182_v58 = vor.u32 %v18834_v15, %v13181_v1  ;;  %v13502_v12 = vor.u32 %v18914_v16, %v13501_v3  ;;  %v18734_v18 = vld [vmem:[%s20702_s9 + $0x174] sm:$0xf0]  ;;  %v13421_v11 = vld [vmem:[%s20702_s9 + $0x650] sm:$0xf]  ;;  %v13381_v1 = vld [vmem:[%s20702_s9 + $0x600] sm:$0xf] }
 0x2ac   : > { %10562 = vmatpush.bf16.msra.mxu3 %v18538_v13  ;;  %v17735_v13 = vld [vmem:[%s20702_s9 + $0x2830] sm:$0xf0]  ;;  %v18884_v15 = vld [vmem:[%s20702_s9 + $0x624] sm:$0xf0] }
 0x2ad   : > { %10524 = vmatpush.bf16.msra.mxu0 %v17538_v26  ;;  %v20048_v26 = vld [vmem:[%s20702_s9 + $0x2a8c] sm:$0xf]  ;;  %v10297_v2 = vpop.f32.mrf.mxu2 }
 0x2ae   : > { %10537 = vmatpush.bf16.msra.mxu1 %v17858_v20  ;;  %v18418_v20 = vor.u32 %v20138_v8, %v18415_v10  ;;  %v18058_v32 = vor.u32 %v20048_v26, %v18055_v41  ;;  %v13821_v8 = vld [vmem:[%s20702_s9 + $0x970] sm:$0xf]  ;;  %v18904_v26 = vld [vmem:[%s20702_s9 + $0x6c4] sm:$0xf0] }
 0x2af   : > { %10550 = vmatpush.bf16.msra.mxu2 %v18178_v23  ;;  %v13221_v23 = vld [vmem:[%s20702_s9 + $0x4c0] sm:$0xf]  ;;  %v13101_v2 = vld [vmem:[%s20702_s9 + $0x3d0] sm:$0xf] }
 0x2b0   : > { %10563 = vmatpush.bf16.msra.mxu3 %v18498_v46  ;;  %v10257_v46 = vadd.f32 %v22070_v6, %v10244_v19  ;;  %v13222_v59 = vor.u32 %v18844_v29, %v13221_v23  ;;  %v18754_v6 = vld [vmem:[%s20702_s9 + $0x214] sm:$0xf0]  ;;  %v12821_v19 = vld [vmem:[%s20702_s9 + $0x1a0] sm:$0xf] }
 0x2b1   : > { %10525 = vmatpush.bf16.msra.mxu0 %v17498_v53  ;;  %v17738_v53 = vor.u32 %v19968_v14, %v17735_v13  ;;  %v18824_v14 = vld [vmem:[%s20702_s9 + $0x444] sm:$0xf0]  ;;  %v13461_v13 = vld [vmem:[%s20702_s9 + $0x6a0] sm:$0xf] }
 0x2b2   : > { %10538 = vmatpush.bf16.msra.mxu1 %v17818_v31  ;;  %v13861_v31 = vld [vmem:[%s20702_s9 + $0x9c0] sm:$0xf]  ;;  %v10270_v57 = vadd.f32 %v22122_v4, %v10257_v46  ;;  %v12862_v4 = vor.u32 %v18754_v6, %v12861_v62  ;;  %v13462_v29 = vor.u32 %v18904_v26, %v13461_v13  ;;  %v379_v46 = vld [vmem:[#allocation2 + $0x18] sm:$0xff] }
 0x2b3   : > { %10551 = vmatpush.bf16.msra.mxu2 %v18138_v54  ;;  %v19004_v54 = vld [vmem:[%s20702_s9 + $0x9e4] sm:$0xf0] }
 0x2b4   : > { %10564 = vmatpush.bf16.msra.mxu3 %v18458_v5  ;;  %v13862_v5 = vor.u32 %v19004_v54, %v13861_v31  ;;  %v10283_v10 = vadd.f32 %v22128_v9, %v10270_v57  ;;  %v12741_v57 = vld [vmem:[%s20702_s9 + $0x100] sm:$0xf]  ;;  %v18804_v6 = vld [vmem:[%s20702_s9 + $0x3a4] sm:$0xf0] }
 0x2b5   : > { %10526 = vmatpush.bf16.msra.mxu0 %v17458_v30  ;;  %v18994_v30 = vld [vmem:[%s20702_s9 + $0x994] sm:$0xf0] }
 0x2b6   : > { %10539 = vmatpush.bf16.msra.mxu1 %v17778_v24  ;;  %v18744_v24 = vld [vmem:[%s20702_s9 + $0x1c4] sm:$0xf0]  ;;  %v10296_v9 = vadd.f32 %v22146_v0, %v10283_v10  ;;  %v13822_v41 = vor.u32 %v18994_v30, %v13821_v8  ;;  %v12781_v0 = vld [vmem:[%s20702_s9 + $0x150] sm:$0xf] }
 0x2b7   : > { %10552 = vmatpush.bf16.msra.mxu2 %v18098_v7  ;;  %v13141_v7 = vld [vmem:[%s20702_s9 + $0x420] sm:$0xf]  ;;  %v12822_v17 = vor.u32 %v18744_v24, %v12821_v19  ;;  %v18964_v8 = vld [vmem:[%s20702_s9 + $0x8a4] sm:$0xf0]  ;;  %v12701_v30 = vld [vmem:[%s20702_s9 + $0xb0] sm:$0xf] }
 0x2b8   : > { %10565 = vmatpush.bf16.msra.mxu3 %v18418_v20  ;;  %v18984_v20 = vld [vmem:[%s20702_s9 + $0x944] sm:$0xf0]  ;;  %v13142_v23 = vor.u32 %v18824_v14, %v13141_v7  ;;  %v10309_v38 = vadd.f32 %v22148_v39, %v10296_v9  ;;  %v13422_v39 = vor.u32 %v18894_v33, %v13421_v11  ;;  %v13021_v19 = vld [vmem:[%s20702_s9 + $0x330] sm:$0xf]  ;;  %v18794_v24 = vld [vmem:[%s20702_s9 + $0x354] sm:$0xf0] }
 0x2b9   : > { %10527 = vmatpush.bf16.msra.mxu0 %v17418_v47  ;;  %v18814_v47 = vld [vmem:[%s20702_s9 + $0x3f4] sm:$0xf0]  ;;  %v13782_v40 = vor.u32 %v18984_v20, %v13781_v25  ;;  %v13341_v7 = vld [vmem:[%s20702_s9 + $0x5b0] sm:$0xf]  ;;  %v18784_v33 = vld [vmem:[%s20702_s9 + $0x304] sm:$0xf0] }
 0x2ba   : > { %10540 = vmatpush.bf16.msra.mxu1 %v17738_v53  ;;  %v10321_v53 = vpop.f32.mrf.mxu0  ;;  %v13102_v54 = vor.u32 %v18814_v47, %v13101_v2  ;;  %v10334_v62 = vpop.f32.mrf.mxu1  ;;  %v18874_v14 = vld [vmem:[%s20702_s9 + $0x5d4] sm:$0xf0]  ;;  %v12981_v2 = vld [vmem:[%s20702_s9 + $0x2e0] sm:$0xf] }
 0x2bb   : > { %10553 = vmatpush.bf16.msra.mxu2 %v18058_v32  ;;  %v12782_v32 = vor.u32 %v18734_v18, %v12781_v0  ;;  %v10322_v31 = vadd.f32 %v10321_v53, %v10309_v38  ;;  %v12661_v0 = vld [vmem:[%s20702_s9 + $0x60] sm:$0xf]  ;;  %v18704_v18 = vld [vmem:[%s20702_s9 + $0x84] sm:$0xf0] }
 0x2bc   : > { %10566 = vmatpush.bf16.msra.mxu3 %v18378_v63  ;;  %10528 = vmatmul.bf16.vlgmr.msra.gmra.mxu0 %v21051_v45  ;;  %v13061_v63 = vld [vmem:[%s20702_s9 + $0x380] sm:$0xf] }
 0x2bd   : > { %10572 = vmatpush.bf16.msrb.mxu0 %v12902_v52  ;;  %10541 = vmatmul.bf16.vlgmr.msra.gmra.mxu1 %v21121_v49  ;;  %v13741_v52 = vld [vmem:[%s20702_s9 + $0x8d0] sm:$0xf]  ;;  %v12056_v3 = vadd.f32 %v10322_v31, %v379_v46  ;;  %v13062_v10 = vor.u32 %v18804_v6, %v13061_v63  ;;  %v13301_v38 = vld [vmem:[%s20702_s9 + $0x560] sm:$0xf]  ;;  %v18774_v63 = vld [vmem:[%s20702_s9 + $0x2b4] sm:$0xf0] }
 0x2be   : > { %10585 = vmatpush.bf16.msrb.mxu1 %v13222_v59  ;;  %10554 = vmatmul.bf16.vlgmr.msra.gmra.mxu2 %v21127_v56  ;;  %v18974_v59 = vld [vmem:[%s20702_s9 + $0x8f4] sm:$0xf0]  ;;  %v12621_v31 = vld [vmem:[%s20702_s9 + $0x10] sm:$0xf] }
 0x2bf   : > { %10598 = vmatpush.bf16.msrb.mxu2 %v13542_v60  ;;  %10567 = vmatmul.bf16.vlgmr.msra.gmra.mxu3 %v21123_v50  ;;  %v18724_v60 = vld [vmem:[%s20702_s9 + $0x124] sm:$0xf0]  ;;  %v13742_v16 = vor.u32 %v18974_v59, %v13741_v52  ;;  %12066 = vst [vmem:[#allocation2 + $0x18] sm:$0xff] %v12056_v3  ;;  %v12662_v52 = vor.u32 %v18704_v18, %v12661_v0  ;;  %v18854_v6 = vld [vmem:[%s20702_s9 + $0x534] sm:$0xf0] }
 0x2c0   : > { %10611 = vmatpush.bf16.msrb.mxu3 %v13862_v5  ;;  %v12742_v5 = vor.u32 %v18724_v60, %v12741_v57  ;;  %v18944_v59 = vld [vmem:[%s20702_s9 + $0x804] sm:$0xf0]  ;;  %v12941_v60 = vld [vmem:[%s20702_s9 + $0x290] sm:$0xf] }
 0x2c1   : > { %10573 = vmatpush.bf16.msrb.mxu0 %v12862_v4  ;;  %v13701_v4 = vld [vmem:[%s20702_s9 + $0x880] sm:$0xf]  ;;  %v10347_v26 = vpop.f32.mrf.mxu2  ;;  %v14781_v18 = vld [vmem:[%s20702_s9 + $0x10f0] sm:$0xf] }
 0x2c2   : > { %10586 = vmatpush.bf16.msrb.mxu1 %v13182_v58  ;;  %v13382_v58 = vor.u32 %v18884_v15, %v13381_v1  ;;  %v13702_v13 = vor.u32 %v18964_v8, %v13701_v4  ;;  %v10348_v25 = vadd.f32 %v10347_v26, %v10334_v62  ;;  %v10323_v20 = vpop.f32.mrf.mxu0  ;;  %v10360_v47 = vpop.f32.mrf.mxu3  ;;  %v13261_v62 = vld [vmem:[%s20702_s9 + $0x510] sm:$0xf]  ;;  %v14181_v1 = vld [vmem:[%s20702_s9 + $0xc40] sm:$0xf]  ;;  %v19084_v15 = vld [vmem:[%s20702_s9 + $0xc64] sm:$0xf0] }
 0x2c3   : > { %10599 = vmatpush.bf16.msrb.mxu2 %v13502_v12  ;;  %v18714_v12 = vld [vmem:[%s20702_s9 + $0xd4] sm:$0xf0]  ;;  %v10336_v11 = vpop.f32.mrf.mxu1  ;;  %v14821_v4 = vld [vmem:[%s20702_s9 + $0x1140] sm:$0xf]  ;;  %v14182_v26 = vor.u32 %v19084_v15, %v14181_v1 }
 0x2c4   : > { %10612 = vmatpush.bf16.msrb.mxu3 %v13822_v41  ;;  %v12702_v9 = vor.u32 %v18714_v12, %v12701_v30  ;;  %v13661_v41 = vld [vmem:[%s20702_s9 + $0x830] sm:$0xf]  ;;  %v22233_v46 = vadd.f32 %v10360_v47, %v10348_v25  ;;  %v18934_v12 = vld [vmem:[%s20702_s9 + $0x7b4] sm:$0xf0] }
 0x2c5   : > { %10574 = vmatpush.bf16.msrb.mxu0 %v12822_v17  ;;  %v18954_v17 = vld [vmem:[%s20702_s9 + $0x854] sm:$0xf0]  ;;  %v15101_v47 = vld [vmem:[%s20702_s9 + $0x1370] sm:$0xf] }
 0x2c6   : > { %10587 = vmatpush.bf16.msrb.mxu1 %v13142_v23  ;;  %v13022_v23 = vor.u32 %v18794_v24, %v13021_v19  ;;  %v13662_v53 = vor.u32 %v18954_v17, %v13661_v41  ;;  %v12942_v19 = vor.u32 %v18774_v63, %v12941_v60  ;;  %v13262_v24 = vor.u32 %v18854_v6, %v13261_v62  ;;  %v14141_v41 = vld [vmem:[%s20702_s9 + $0xbf0] sm:$0xf]  ;;  %v19074_v20 = vld [vmem:[%s20702_s9 + $0xc14] sm:$0xf0]  ;;  %v19304_v60 = vld [vmem:[%s20702_s9 + $0x1344] sm:$0xf0] }
 0x2c7   : > { %10600 = vmatpush.bf16.msrb.mxu2 %v13462_v29  ;;  %v13342_v29 = vor.u32 %v18874_v14, %v13341_v7  ;;  %v15141_v7 = vld [vmem:[%s20702_s9 + $0x13c0] sm:$0xf]  ;;  %v19324_v14 = vld [vmem:[%s20702_s9 + $0x13e4] sm:$0xf0]  ;;  %v19314_v11 = vld [vmem:[%s20702_s9 + $0x1394] sm:$0xf0] }
 0x2c8   : > { %10613 = vmatpush.bf16.msrb.mxu3 %v13782_v40  ;;  %v18864_v40 = vld [vmem:[%s20702_s9 + $0x584] sm:$0xf0]  ;;  %v15142_v0 = vor.u32 %v19324_v14, %v15141_v7  ;;  %v14061_v6 = vld [vmem:[%s20702_s9 + $0xb50] sm:$0xf]  ;;  %v19054_v15 = vld [vmem:[%s20702_s9 + $0xb74] sm:$0xf0] }
 0x2c9   : > { %10575 = vmatpush.bf16.msrb.mxu0 %v12782_v32  ;;  %v13621_v32 = vld [vmem:[%s20702_s9 + $0x7e0] sm:$0xf]  ;;  %v13302_v57 = vor.u32 %v18864_v40, %v13301_v38  ;;  %v10349_v8 = vpop.f32.mrf.mxu2 }
 0x2ca   : > { %10588 = vmatpush.bf16.msrb.mxu1 %v13102_v54  ;;  %v18694_v54 = vld [vmem:[%s20702_s9 + $0x34] sm:$0xf0]  ;;  %v13622_v3 = vor.u32 %v18944_v59, %v13621_v32  ;;  %v14101_v40 = vld [vmem:[%s20702_s9 + $0xba0] sm:$0xf]  ;;  %v19064_v32 = vld [vmem:[%s20702_s9 + $0xbc4] sm:$0xf0] }
 0x2cb   : > { %10601 = vmatpush.bf16.msrb.mxu2 %v13422_v39  ;;  %v12982_v39 = vor.u32 %v18784_v33, %v12981_v2  ;;  %v12622_v30 = vor.u32 %v18694_v54, %v12621_v31  ;;  %v19234_v2 = vld [vmem:[%s20702_s9 + $0x1114] sm:$0xf0]  ;;  %v14142_v33 = vor.u32 %v19074_v20, %v14141_v41  ;;  %v19144_v59 = vld [vmem:[%s20702_s9 + $0xe44] sm:$0xf0]  ;;  %v15102_v31 = vor.u32 %v19314_v11, %v15101_v47  ;;  %v14741_v54 = vld [vmem:[%s20702_s9 + $0x10a0] sm:$0xf] }
 0x2cc   : > { %10614 = vmatpush.bf16.msrb.mxu3 %v13742_v16  ;;  %v14501_v16 = vld [vmem:[%s20702_s9 + $0xec0] sm:$0xf]  ;;  %v14102_v63 = vor.u32 %v19064_v32, %v14101_v40  ;;  %v19214_v8 = vld [vmem:[%s20702_s9 + $0x1074] sm:$0xf0]  ;;  %v19124_v41 = vld [vmem:[%s20702_s9 + $0xda4] sm:$0xf0] }
 0x2cd   : > { %10576 = vmatpush.bf16.msrb.mxu0 %v12742_v5  ;;  %v19164_v5 = vld [vmem:[%s20702_s9 + $0xee4] sm:$0xf0]  ;;  %v14021_v7 = vld [vmem:[%s20702_s9 + $0xb00] sm:$0xf]  ;;  %v19034_v11 = vld [vmem:[%s20702_s9 + $0xad4] sm:$0xf0] }
 0x2ce   : > { %10589 = vmatpush.bf16.msrb.mxu1 %v13062_v10  ;;  %v19244_v10 = vld [vmem:[%s20702_s9 + $0x1164] sm:$0xf0]  ;;  %v14661_v20 = vld [vmem:[%s20702_s9 + $0x1000] sm:$0xf]  ;;  %v14621_v32 = vld [vmem:[%s20702_s9 + $0xfb0] sm:$0xf] }
 0x2cf   : > { %10602 = vmatpush.bf16.msrb.mxu2 %v13382_v58  ;;  %v13581_v58 = vld [vmem:[%s20702_s9 + $0x790] sm:$0xf]  ;;  %v14822_v17 = vor.u32 %v19244_v10, %v14821_v4 }
 0x2d0   : > { %10615 = vmatpush.bf16.msrb.mxu3 %v13702_v13  ;;  %v10362_v13 = vpop.f32.mrf.mxu3  ;;  %v13582_v25 = vor.u32 %v18934_v12, %v13581_v58  ;;  %v14701_v4 = vld [vmem:[%s20702_s9 + $0x1050] sm:$0xf]  ;;  %v19294_v58 = vld [vmem:[%s20702_s9 + $0x12f4] sm:$0xf0]  ;;  %v14062_v12 = vor.u32 %v19054_v15, %v14061_v6  ;;  %v19024_v15 = vld [vmem:[%s20702_s9 + $0xa84] sm:$0xf0] }
 0x2d1   : > { %10577 = vmatpush.bf16.msrb.mxu0 %v12702_v9  ;;  %v14502_v9 = vor.u32 %v19164_v5, %v14501_v16  ;;  %v19134_v16 = vld [vmem:[%s20702_s9 + $0xdf4] sm:$0xf0]  ;;  %v15021_v10 = vld [vmem:[%s20702_s9 + $0x12d0] sm:$0xf]  ;;  %v14702_v14 = vor.u32 %v19214_v8, %v14701_v4  ;;  %v14581_v8 = vld [vmem:[%s20702_s9 + $0xf60] sm:$0xf] }
 0x2d2   : > { %10590 = vmatpush.bf16.msrb.mxu1 %v13022_v23  ;;  %v14461_v23 = vld [vmem:[%s20702_s9 + $0xe70] sm:$0xf] }
 0x2d3   : > { %10603 = vmatpush.bf16.msrb.mxu2 %v13342_v29  ;;  %v19154_v29 = vld [vmem:[%s20702_s9 + $0xe94] sm:$0xf0] }
 0x2d4   : > { %10616 = vmatpush.bf16.msrb.mxu3 %v13662_v53  ;;  %v14462_v38 = vor.u32 %v19154_v29, %v14461_v23  ;;  %v14782_v53 = vor.u32 %v19234_v2, %v14781_v18  ;;  %v19204_v23 = vld [vmem:[%s20702_s9 + $0x1024] sm:$0xf0]  ;;  %v14981_v29 = vld [vmem:[%s20702_s9 + $0x1280] sm:$0xf]  ;;  %v13981_v2 = vld [vmem:[%s20702_s9 + $0xab0] sm:$0xf] }
 0x2d5   : > { %10578 = vmatpush.bf16.msrb.mxu0 %v12662_v52  ;;  %v14421_v52 = vld [vmem:[%s20702_s9 + $0xe20] sm:$0xf]  ;;  %v14662_v47 = vor.u32 %v19204_v23, %v14661_v20  ;;  %v19404_v20 = vld [vmem:[%s20702_s9 + $0x1664] sm:$0xf0] }
 0x2d6   : > { %10591 = vmatpush.bf16.msrb.mxu1 %v12982_v39  ;;  %v19224_v39 = vld [vmem:[%s20702_s9 + $0x10c4] sm:$0xf0]  ;;  %v14422_v62 = vor.u32 %v19144_v59, %v14421_v52  ;;  %v19194_v52 = vld [vmem:[%s20702_s9 + $0xfd4] sm:$0xf0]  ;;  %v15781_v23 = vld [vmem:[%s20702_s9 + $0x18c0] sm:$0xf] }
 0x2d7   : > { %10604 = vmatpush.bf16.msrb.mxu2 %v13302_v57  ;;  %v15061_v57 = vld [vmem:[%s20702_s9 + $0x1320] sm:$0xf]  ;;  %v14742_v1 = vor.u32 %v19224_v39, %v14741_v54  ;;  %v19274_v54 = vld [vmem:[%s20702_s9 + $0x1254] sm:$0xf0] }
 0x2d8   : > { %10617 = vmatpush.bf16.msrb.mxu3 %v13622_v3  ;;  %v14381_v3 = vld [vmem:[%s20702_s9 + $0xdd0] sm:$0xf]  ;;  %v15062_v5 = vor.u32 %v19304_v60, %v15061_v57  ;;  %v13982_v60 = vor.u32 %v19034_v11, %v13981_v2 }
 0x2d9   : > { %10579 = vmatpush.bf16.msrb.mxu0 %v12622_v30  ;;  %v10373_v30 = vpop.f32.mrf.mxu0  ;;  %v14861_v11 = vld [vmem:[%s20702_s9 + $0x1190] sm:$0xf] }
 0x2da   : > { %10592 = vmatpush.bf16.msrb.mxu1 %v12942_v19  ;;  %v14382_v19 = vor.u32 %v19134_v16, %v14381_v3  ;;  %v10386_v13 = vpop.f32.mrf.mxu1  ;;  %v14261_v3 = vld [vmem:[%s20702_s9 + $0xce0] sm:$0xf]  ;;  %v19104_v16 = vld [vmem:[%s20702_s9 + $0xd04] sm:$0xf0] }
 0x2db   : > { %10605 = vmatpush.bf16.msrb.mxu2 %v13262_v24  ;;  %v10374_v24 = vadd.f32 %v10373_v30, %v22233_v46  ;;  %v19284_v46 = vld [vmem:[%s20702_s9 + $0x12a4] sm:$0xf0] }
 0x2dc   : > { %10618 = vmatpush.bf16.msrb.mxu3 %v13582_v25  ;;  %10580 = vmatmul.bf16.vlgmr.msrb.gmra.mxu0 %v20829_v27  ;;  %v19184_v30 = vld [vmem:[%s20702_s9 + $0xf84] sm:$0xf0] }
 0x2dd   : > { %10624 = vmatpush.bf16.msra.mxu0 %v14182_v26  ;;  %10593 = vmatmul.bf16.vlgmr.msrb.gmra.mxu1 %v20831_v28  ;;  %v19044_v26 = vld [vmem:[%s20702_s9 + $0xb24] sm:$0xf0]  ;;  %v10387_v25 = vadd.f32 %v10386_v13, %v10374_v24  ;;  %v13901_v24 = vld [vmem:[%s20702_s9 + $0xa10] sm:$0xf]  ;;  %v14582_v13 = vor.u32 %v19184_v30, %v14581_v8  ;;  %v15381_v30 = vld [vmem:[%s20702_s9 + $0x15a0] sm:$0xf] }
 0x2de   : > { %10637 = vmatpush.bf16.msra.mxu1 %v14502_v9  ;;  %10606 = vmatmul.bf16.vlgmr.msrb.gmra.mxu2 %v20822_v21  ;;  %v14341_v9 = vld [vmem:[%s20702_s9 + $0xd80] sm:$0xf] }
 0x2df   : > { %10650 = vmatpush.bf16.msra.mxu2 %v14822_v17  ;;  %10619 = vmatmul.bf16.vlgmr.msrb.gmra.mxu3 %v20824_v22  ;;  %v15022_v17 = vor.u32 %v19294_v58, %v15021_v10  ;;  %v14342_v18 = vor.u32 %v19124_v41, %v14341_v9  ;;  %v14901_v10 = vld [vmem:[%s20702_s9 + $0x11e0] sm:$0xf]  ;;  %v19264_v58 = vld [vmem:[%s20702_s9 + $0x1204] sm:$0xf0]  ;;  %v14541_v9 = vld [vmem:[%s20702_s9 + $0xf10] sm:$0xf] }
 0x2e0   : > { %10663 = vmatpush.bf16.msra.mxu3 %v15142_v0  ;;  %v14022_v0 = vor.u32 %v19044_v26, %v14021_v7  ;;  %v19014_v7 = vld [vmem:[%s20702_s9 + $0xa34] sm:$0xf0] }
 0x2e1   : > { %10625 = vmatpush.bf16.msra.mxu0 %v14142_v33  ;;  %v14301_v33 = vld [vmem:[%s20702_s9 + $0xd30] sm:$0xf]  ;;  %v10399_v40 = vpop.f32.mrf.mxu2  ;;  %v10375_v39 = vpop.f32.mrf.mxu0  ;;  %v19094_v26 = vld [vmem:[%s20702_s9 + $0xcb4] sm:$0xf0]  ;;  %v13902_v2 = vor.u32 %v19014_v7, %v13901_v24  ;;  %v19544_v24 = vld [vmem:[%s20702_s9 + $0x1ac4] sm:$0xf0] }
 0x2e2   : > { %10638 = vmatpush.bf16.msra.mxu1 %v14462_v38  ;;  %v19114_v38 = vld [vmem:[%s20702_s9 + $0xd54] sm:$0xf0]  ;;  %v10400_v59 = vadd.f32 %v10399_v40, %v10387_v25  ;;  %v10412_v57 = vpop.f32.mrf.mxu3  ;;  %v15461_v25 = vld [vmem:[%s20702_s9 + $0x1640] sm:$0xf] }
 0x2e3   : > { %10651 = vmatpush.bf16.msra.mxu2 %v14782_v53  ;;  %v14982_v53 = vor.u32 %v19284_v46, %v14981_v29  ;;  %v19174_v41 = vld [vmem:[%s20702_s9 + $0xf34] sm:$0xf0]  ;;  %v19484_v46 = vld [vmem:[%s20702_s9 + $0x18e4] sm:$0xf0] }
 0x2e4   : > { %10664 = vmatpush.bf16.msra.mxu3 %v15102_v31  ;;  %v14941_v31 = vld [vmem:[%s20702_s9 + $0x1230] sm:$0xf]  ;;  %v22299_v6 = vadd.f32 %v10412_v57, %v10400_v59  ;;  %v14542_v40 = vor.u32 %v19174_v41, %v14541_v9  ;;  %v15782_v59 = vor.u32 %v19484_v46, %v15781_v23  ;;  %v19394_v39 = vld [vmem:[%s20702_s9 + $0x1614] sm:$0xf0] }
 0x2e5   : > { %10626 = vmatpush.bf16.msra.mxu0 %v14102_v63  ;;  %v14302_v63 = vor.u32 %v19114_v38, %v14301_v33  ;;  %v14942_v4 = vor.u32 %v19274_v54, %v14941_v31  ;;  %v19254_v33 = vld [vmem:[%s20702_s9 + $0x11b4] sm:$0xf0]  ;;  %v15421_v54 = vld [vmem:[%s20702_s9 + $0x15f0] sm:$0xf] }
 0x2e6   : > { %10639 = vmatpush.bf16.msra.mxu1 %v14422_v62  ;;  %v13941_v62 = vld [vmem:[%s20702_s9 + $0xa60] sm:$0xf]  ;;  %v15741_v57 = vld [vmem:[%s20702_s9 + $0x1870] sm:$0xf]  ;;  %v19454_v23 = vld [vmem:[%s20702_s9 + $0x17f4] sm:$0xf0] }
 0x2e7   : > { %10652 = vmatpush.bf16.msra.mxu2 %v14742_v1  ;;  %v14622_v1 = vor.u32 %v19194_v52, %v14621_v32  ;;  %v16421_v32 = vld [vmem:[%s20702_s9 + $0x1dc0] sm:$0xf]  ;;  %v19644_v52 = vld [vmem:[%s20702_s9 + $0x1de4] sm:$0xf0]  ;;  %v19534_v46 = vld [vmem:[%s20702_s9 + $0x1a74] sm:$0xf0] }
 0x2e8   : > { %10665 = vmatpush.bf16.msra.mxu3 %v15062_v5  ;;  %v10388_v5 = vpop.f32.mrf.mxu1 }
 0x2e9   : > { %10627 = vmatpush.bf16.msra.mxu0 %v14062_v12  ;;  %v13942_v12 = vor.u32 %v19024_v15, %v13941_v62  ;;  %v10401_v29 = vpop.f32.mrf.mxu2  ;;  %v16061_v62 = vld [vmem:[%s20702_s9 + $0x1af0] sm:$0xf]  ;;  %v16422_v15 = vor.u32 %v19644_v52, %v16421_v32  ;;  %v19634_v5 = vld [vmem:[%s20702_s9 + $0x1d94] sm:$0xf0]  ;;  %v19364_v32 = vld [vmem:[%s20702_s9 + $0x1524] sm:$0xf0] }
 0x2ea   : > { %10640 = vmatpush.bf16.msra.mxu1 %v14382_v19  ;;  %v14262_v19 = vor.u32 %v19104_v16, %v14261_v3  ;;  %v10414_v38 = vpop.f32.mrf.mxu3  ;;  %v15422_v3 = vor.u32 %v19394_v39, %v15421_v54  ;;  %v16381_v16 = vld [vmem:[%s20702_s9 + $0x1d70] sm:$0xf]  ;;  %v15621_v52 = vld [vmem:[%s20702_s9 + $0x1780] sm:$0xf]  ;;  %v19524_v54 = vld [vmem:[%s20702_s9 + $0x1a24] sm:$0xf0] }
 0x2eb   : > { %10653 = vmatpush.bf16.msra.mxu2 %v14702_v14  ;;  %v14221_v14 = vld [vmem:[%s20702_s9 + $0xc90] sm:$0xf]  ;;  %v16382_v7 = vor.u32 %v19634_v5, %v16381_v16  ;;  %v19434_v5 = vld [vmem:[%s20702_s9 + $0x1754] sm:$0xf0] }
 0x2ec   : > { %10666 = vmatpush.bf16.msra.mxu3 %v15022_v17  ;;  %v14902_v17 = vor.u32 %v19264_v58, %v14901_v10  ;;  %v19384_v10 = vld [vmem:[%s20702_s9 + $0x15c4] sm:$0xf0]  ;;  %v15701_v58 = vld [vmem:[%s20702_s9 + $0x1820] sm:$0xf]  ;;  %v15981_v29 = vld [vmem:[%s20702_s9 + $0x1a50] sm:$0xf] }
 0x2ed   : > { %10628 = vmatpush.bf16.msra.mxu0 %v14022_v0  ;;  %v16101_v0 = vld [vmem:[%s20702_s9 + $0x1b40] sm:$0xf]  ;;  %v15982_v38 = vor.u32 %v19534_v46, %v15981_v29  ;;  %v15581_v16 = vld [vmem:[%s20702_s9 + $0x1730] sm:$0xf] }
 0x2ee   : > { %10641 = vmatpush.bf16.msra.mxu1 %v14342_v18  ;;  %v19564_v18 = vld [vmem:[%s20702_s9 + $0x1b64] sm:$0xf0]  ;;  %v16181_v46 = vld [vmem:[%s20702_s9 + $0x1be0] sm:$0xf] }
 0x2ef   : > { %10654 = vmatpush.bf16.msra.mxu2 %v14662_v47  ;;  %v14222_v47 = vor.u32 %v19094_v26, %v14221_v14  ;;  %v16102_v31 = vor.u32 %v19564_v18, %v16101_v0  ;;  %v15382_v14 = vor.u32 %v19384_v10, %v15381_v30  ;;  %v19624_v26 = vld [vmem:[%s20702_s9 + $0x1d44] sm:$0xf0] }
 0x2f0   : > { %10667 = vmatpush.bf16.msra.mxu3 %v14982_v53  ;;  %v15462_v53 = vor.u32 %v19404_v20, %v15461_v25  ;;  %v19374_v25 = vld [vmem:[%s20702_s9 + $0x1574] sm:$0xf0]  ;;  %v15661_v20 = vld [vmem:[%s20702_s9 + $0x17d0] sm:$0xf] }
 0x2f1   : > { %10629 = vmatpush.bf16.msra.mxu0 %v13982_v60  ;;  %v14862_v60 = vor.u32 %v19254_v33, %v14861_v11  ;;  %v19614_v11 = vld [vmem:[%s20702_s9 + $0x1cf4] sm:$0xf0]  ;;  %v15662_v33 = vor.u32 %v19454_v23, %v15661_v20  ;;  %v15861_v20 = vld [vmem:[%s20702_s9 + $0x1960] sm:$0xf]  ;;  %v19504_v23 = vld [vmem:[%s20702_s9 + $0x1984] sm:$0xf0] }
 0x2f2   : > { %10642 = vmatpush.bf16.msra.mxu1 %v14302_v63  ;;  %v19474_v63 = vld [vmem:[%s20702_s9 + $0x1894] sm:$0xf0] }
 0x2f3   : > { %10655 = vmatpush.bf16.msra.mxu2 %v14622_v1  ;;  %v19554_v1 = vld [vmem:[%s20702_s9 + $0x1b14] sm:$0xf0] }
 0x2f4   : > { %10668 = vmatpush.bf16.msra.mxu3 %v14942_v4  ;;  %v15742_v4 = vor.u32 %v19474_v63, %v15741_v57  ;;  %v16062_v8 = vor.u32 %v19554_v1, %v16061_v62  ;;  %v19604_v63 = vld [vmem:[%s20702_s9 + $0x1ca4] sm:$0xf0] }
 0x2f5   : > { %10630 = vmatpush.bf16.msra.mxu0 %v13942_v12  ;;  %v19464_v12 = vld [vmem:[%s20702_s9 + $0x1844] sm:$0xf0] }
 0x2f6   : > { %10643 = vmatpush.bf16.msra.mxu1 %v14262_v19  ;;  %v16021_v19 = vld [vmem:[%s20702_s9 + $0x1aa0] sm:$0xf]  ;;  %v15702_v9 = vor.u32 %v19464_v12, %v15701_v58 }
 0x2f7   : > { %10656 = vmatpush.bf16.msra.mxu2 %v14582_v13  ;;  %v16341_v13 = vld [vmem:[%s20702_s9 + $0x1d20] sm:$0xf]  ;;  %v16022_v41 = vor.u32 %v19544_v24, %v16021_v19  ;;  %v16221_v19 = vld [vmem:[%s20702_s9 + $0x1c30] sm:$0xf]  ;;  %v19594_v24 = vld [vmem:[%s20702_s9 + $0x1c54] sm:$0xf0] }
 0x2f8   : > { %10669 = vmatpush.bf16.msra.mxu3 %v14902_v17  ;;  %v15341_v17 = vld [vmem:[%s20702_s9 + $0x1550] sm:$0xf]  ;;  %v16342_v0 = vor.u32 %v19624_v26, %v16341_v13  ;;  %v15221_v26 = vld [vmem:[%s20702_s9 + $0x1460] sm:$0xf]  ;;  %v16222_v29 = vor.u32 %v19594_v24, %v16221_v19  ;;  %v19964_v24 = vld [vmem:[%s20702_s9 + $0x27e4] sm:$0xf0] }
 0x2f9   : > { %10631 = vmatpush.bf16.msra.mxu0 %v13902_v2  ;;  %v22350_v18 = vpop.f32.mrf.mxu0  ;;  %v15342_v2 = vor.u32 %v19374_v25, %v15341_v17  ;;  %v19424_v25 = vld [vmem:[%s20702_s9 + $0x1704] sm:$0xf0]  ;;  %v17701_v19 = vld [vmem:[%s20702_s9 + $0x27c0] sm:$0xf] }
 0x2fa   : > { %10644 = vmatpush.bf16.msra.mxu1 %v14222_v47  ;;  %v16301_v47 = vld [vmem:[%s20702_s9 + $0x1cd0] sm:$0xf] }
 0x2fb   : > { %10657 = vmatpush.bf16.msra.mxu2 %v14542_v40  ;;  %v22354_v40 = vpop.f32.mrf.mxu1  ;;  %v16302_v39 = vor.u32 %v19614_v11, %v16301_v47  ;;  %v15181_v47 = vld [vmem:[%s20702_s9 + $0x1410] sm:$0xf]  ;;  %v19334_v11 = vld [vmem:[%s20702_s9 + $0x1434] sm:$0xf0] }
 0x2fc   : > { %10670 = vmatpush.bf16.msra.mxu3 %v14862_v60  ;;  %10632 = vmatmul.bf16.vlgmr.msra.gmra.mxu0 %v20889_v48  ;;  %v16261_v60 = vld [vmem:[%s20702_s9 + $0x1c80] sm:$0xf] }
 0x2fd   : > { %10676 = vmatpush.bf16.msrb.mxu0 %v15462_v53  ;;  %10645 = vmatmul.bf16.vlgmr.msra.gmra.mxu1 %v20895_v55  ;;  %v15301_v53 = vld [vmem:[%s20702_s9 + $0x1500] sm:$0xf]  ;;  %v16262_v10 = vor.u32 %v19604_v63, %v16261_v60  ;;  %v19804_v60 = vld [vmem:[%s20702_s9 + $0x22e4] sm:$0xf0] }
 0x2fe   : > { %10689 = vmatpush.bf16.msrb.mxu1 %v15782_v59  ;;  %10658 = vmatmul.bf16.vlgmr.msra.gmra.mxu2 %v20891_v51  ;;  %v19444_v59 = vld [vmem:[%s20702_s9 + $0x17a4] sm:$0xf0]  ;;  %v15302_v57 = vor.u32 %v19364_v32, %v15301_v53  ;;  %v15501_v53 = vld [vmem:[%s20702_s9 + $0x1690] sm:$0xf]  ;;  %v19414_v32 = vld [vmem:[%s20702_s9 + $0x16b4] sm:$0xf0] }
 0x2ff   : > { %10702 = vmatpush.bf16.msrb.mxu2 %v16102_v31  ;;  %10671 = vmatmul.bf16.vlgmr.msra.gmra.mxu3 %v20901_v61  ;;  %v15941_v31 = vld [vmem:[%s20702_s9 + $0x1a00] sm:$0xf]  ;;  %v15622_v62 = vor.u32 %v19444_v59, %v15621_v52  ;;  %v15821_v52 = vld [vmem:[%s20702_s9 + $0x1910] sm:$0xf]  ;;  %v19494_v59 = vld [vmem:[%s20702_s9 + $0x1934] sm:$0xf0] }
 0x300   : > { %10715 = vmatpush.bf16.msrb.mxu3 %v16422_v15  ;;  %v15942_v1 = vor.u32 %v19524_v54, %v15941_v31  ;;  %v15261_v15 = vld [vmem:[%s20702_s9 + $0x14b0] sm:$0xf]  ;;  %v16741_v31 = vld [vmem:[%s20702_s9 + $0x2040] sm:$0xf]  ;;  %v19724_v54 = vld [vmem:[%s20702_s9 + $0x2064] sm:$0xf0] }
 0x301   : > { %10677 = vmatpush.bf16.msrb.mxu0 %v15422_v3  ;;  %v19354_v3 = vld [vmem:[%s20702_s9 + $0x14d4] sm:$0xf0]  ;;  %v22370_v30 = vpop.f32.mrf.mxu2  ;;  %v17381_v63 = vld [vmem:[%s20702_s9 + $0x2540] sm:$0xf] }
 0x302   : > { %10690 = vmatpush.bf16.msrb.mxu1 %v15742_v4  ;;  %v15901_v4 = vld [vmem:[%s20702_s9 + $0x19b0] sm:$0xf]  ;;  %v22372_v58 = vpop.f32.mrf.mxu3  ;;  %v15262_v12 = vor.u32 %v19354_v3, %v15261_v15  ;;  %v19884_v15 = vld [vmem:[%s20702_s9 + $0x2564] sm:$0xf0] }
 0x303   : > { %10703 = vmatpush.bf16.msrb.mxu2 %v16062_v8  ;;  %v19514_v8 = vld [vmem:[%s20702_s9 + $0x19d4] sm:$0xf0]  ;;  %v10440_v17 = vpop.f32.mrf.mxu1  ;;  %v16141_v3 = vld [vmem:[%s20702_s9 + $0x1b90] sm:$0xf] }
 0x304   : > { %10716 = vmatpush.bf16.msrb.mxu3 %v16382_v7  ;;  %v10427_v7 = vpop.f32.mrf.mxu0  ;;  %v15902_v13 = vor.u32 %v19514_v8, %v15901_v4  ;;  %v15502_v4 = vor.u32 %v19414_v32, %v15501_v53  ;;  %v15822_v8 = vor.u32 %v19494_v59, %v15821_v52  ;;  %v17341_v17 = vld [vmem:[%s20702_s9 + $0x24f0] sm:$0xf]  ;;  %v17301_v53 = vld [vmem:[%s20702_s9 + $0x24a0] sm:$0xf]  ;;  %v19864_v32 = vld [vmem:[%s20702_s9 + $0x24c4] sm:$0xf0] }
 0x305   : > { %10678 = vmatpush.bf16.msrb.mxu0 %v15382_v14  ;;  %v15582_v14 = vor.u32 %v19434_v5, %v15581_v16  ;;  %v19574_v16 = vld [vmem:[%s20702_s9 + $0x1bb4] sm:$0xf0]  ;;  %v17382_v7 = vor.u32 %v19884_v15, %v17381_v63  ;;  %v17261_v15 = vld [vmem:[%s20702_s9 + $0x2450] sm:$0xf] }
 0x306   : > { %10691 = vmatpush.bf16.msrb.mxu1 %v15702_v9  ;;  %v19344_v9 = vld [vmem:[%s20702_s9 + $0x1484] sm:$0xf0]  ;;  %v19694_v63 = vld [vmem:[%s20702_s9 + $0x1f74] sm:$0xf0] }
 0x307   : > { %10704 = vmatpush.bf16.msrb.mxu2 %v16022_v41  ;;  %v15541_v41 = vld [vmem:[%s20702_s9 + $0x16e0] sm:$0xf] }
 0x308   : > { %10717 = vmatpush.bf16.msrb.mxu3 %v16342_v0  ;;  %v15222_v0 = vor.u32 %v19344_v9, %v15221_v26  ;;  %v19714_v26 = vld [vmem:[%s20702_s9 + $0x2014] sm:$0xf0]  ;;  %v17021_v9 = vld [vmem:[%s20702_s9 + $0x2270] sm:$0xf] }
 0x309   : > { %10679 = vmatpush.bf16.msrb.mxu0 %v15342_v2  ;;  %v19584_v2 = vld [vmem:[%s20702_s9 + $0x1c04] sm:$0xf0] }
 0x30a   : > { %10692 = vmatpush.bf16.msrb.mxu1 %v15662_v33  ;;  %v15542_v33 = vor.u32 %v19424_v25, %v15541_v41  ;;  %v10466_v5 = vpop.f32.mrf.mxu3  ;;  %v19794_v41 = vld [vmem:[%s20702_s9 + $0x2294] sm:$0xf0] }
 0x30b   : > { %10705 = vmatpush.bf16.msrb.mxu2 %v15982_v38  ;;  %v15862_v38 = vor.u32 %v19504_v23, %v15861_v20  ;;  %v19874_v25 = vld [vmem:[%s20702_s9 + $0x2514] sm:$0xf0]  ;;  %v17702_v20 = vor.u32 %v19964_v24, %v17701_v19 }
 0x30c   : > { %10718 = vmatpush.bf16.msrb.mxu3 %v16302_v39  ;;  %v16182_v39 = vor.u32 %v19584_v2, %v16181_v46  ;;  %v19954_v46 = vld [vmem:[%s20702_s9 + $0x2794] sm:$0xf0]  ;;  %v17342_v2 = vor.u32 %v19874_v25, %v17341_v17 }
 0x30d   : > { %10680 = vmatpush.bf16.msrb.mxu0 %v15302_v57  ;;  %v17061_v57 = vld [vmem:[%s20702_s9 + $0x22c0] sm:$0xf] }
 0x30e   : > { %10693 = vmatpush.bf16.msrb.mxu1 %v15622_v62  ;;  %v10453_v62 = vpop.f32.mrf.mxu2 }
 0x30f   : > { %10706 = vmatpush.bf16.msrb.mxu2 %v15942_v1  ;;  %v15182_v1 = vor.u32 %v19334_v11, %v15181_v47  ;;  %v16661_v47 = vld [vmem:[%s20702_s9 + $0x1fa0] sm:$0xf]  ;;  %v19704_v11 = vld [vmem:[%s20702_s9 + $0x1fc4] sm:$0xf0]  ;;  %v16941_v62 = vld [vmem:[%s20702_s9 + $0x21d0] sm:$0xf] }
 0x310   : > { %10719 = vmatpush.bf16.msrb.mxu3 %v16262_v10  ;;  %v16742_v10 = vor.u32 %v19724_v54, %v16741_v31  ;;  %v16662_v59 = vor.u32 %v19704_v11, %v16661_v47  ;;  %v17621_v31 = vld [vmem:[%s20702_s9 + $0x2720] sm:$0xf]  ;;  %v19944_v54 = vld [vmem:[%s20702_s9 + $0x2744] sm:$0xf0]  ;;  %v16861_v47 = vld [vmem:[%s20702_s9 + $0x2130] sm:$0xf] }
 0x311   : > { %10681 = vmatpush.bf16.msrb.mxu0 %v15262_v12  ;;  %v17062_v12 = vor.u32 %v19804_v60, %v17061_v57  ;;  %v17302_v57 = vor.u32 %v19864_v32, %v17301_v53  ;;  %v16621_v60 = vld [vmem:[%s20702_s9 + $0x1f50] sm:$0xf]  ;;  %v19834_v53 = vld [vmem:[%s20702_s9 + $0x23d4] sm:$0xf0]  ;;  %v10426_v32 = vadd.f32 %v22350_v18, %v22299_v6  ;;  %v16501_v6 = vld [vmem:[%s20702_s9 + $0x1e60] sm:$0xf] }
 0x312   : > { %10694 = vmatpush.bf16.msrb.mxu1 %v15582_v14  ;;  %v16142_v14 = vor.u32 %v19574_v16, %v16141_v3  ;;  %v19854_v3 = vld [vmem:[%s20702_s9 + $0x2474] sm:$0xf0]  ;;  %v17622_v16 = vor.u32 %v19944_v54, %v17621_v31  ;;  %v17501_v54 = vld [vmem:[%s20702_s9 + $0x2630] sm:$0xf]  ;;  %v19664_v18 = vld [vmem:[%s20702_s9 + $0x1e84] sm:$0xf0] }
 0x313   : > { %10707 = vmatpush.bf16.msrb.mxu2 %v15902_v13  ;;  %v16701_v13 = vld [vmem:[%s20702_s9 + $0x1ff0] sm:$0xf]  ;;  %v17262_v19 = vor.u32 %v19854_v3, %v17261_v15  ;;  %v19744_v15 = vld [vmem:[%s20702_s9 + $0x2104] sm:$0xf0]  ;;  %v17141_v3 = vld [vmem:[%s20702_s9 + $0x2360] sm:$0xf] }
 0x314   : > { %10720 = vmatpush.bf16.msrb.mxu3 %v16222_v29  ;;  %v16702_v23 = vor.u32 %v19714_v26, %v16701_v13  ;;  %v17661_v29 = vld [vmem:[%s20702_s9 + $0x2770] sm:$0xf]  ;;  %v16901_v13 = vld [vmem:[%s20702_s9 + $0x2180] sm:$0xf]  ;;  %v19764_v26 = vld [vmem:[%s20702_s9 + $0x21a4] sm:$0xf0] }
 0x315   : > { %10682 = vmatpush.bf16.msrb.mxu0 %v15222_v0  ;;  %v17022_v0 = vor.u32 %v19794_v41, %v17021_v9  ;;  %v17662_v52 = vor.u32 %v19954_v46, %v17661_v29  ;;  %v17221_v9 = vld [vmem:[%s20702_s9 + $0x2400] sm:$0xf]  ;;  %v19844_v41 = vld [vmem:[%s20702_s9 + $0x2424] sm:$0xf0]  ;;  %v16902_v29 = vor.u32 %v19764_v26, %v16901_v13 }
 0x316   : > { %10695 = vmatpush.bf16.msrb.mxu1 %v15542_v33  ;;  %v16981_v33 = vld [vmem:[%s20702_s9 + $0x2220] sm:$0xf]  ;;  %v17222_v46 = vor.u32 %v19844_v41, %v17221_v9  ;;  %v16781_v9 = vld [vmem:[%s20702_s9 + $0x2090] sm:$0xf]  ;;  %v19734_v41 = vld [vmem:[%s20702_s9 + $0x20b4] sm:$0xf0] }
 0x317   : > { %10708 = vmatpush.bf16.msrb.mxu2 %v15862_v38  ;;  %v19784_v38 = vld [vmem:[%s20702_s9 + $0x2244] sm:$0xf0] }
 0x318   : > { %10721 = vmatpush.bf16.msrb.mxu3 %v16182_v39  ;;  %v16982_v39 = vor.u32 %v19784_v38, %v16981_v33  ;;  %v19754_v33 = vld [vmem:[%s20702_s9 + $0x2154] sm:$0xf0]  ;;  %v17181_v38 = vld [vmem:[%s20702_s9 + $0x23b0] sm:$0xf] }
 0x319   : > { %10683 = vmatpush.bf16.msrb.mxu0 %v15182_v1  ;;  %v19774_v1 = vld [vmem:[%s20702_s9 + $0x21f4] sm:$0xf0]  ;;  %v22426_v5 = vpop.f32.mrf.mxu0 }
 0x31a   : > { %10696 = vmatpush.bf16.msrb.mxu1 %v15502_v4  ;;  %v16622_v4 = vor.u32 %v19694_v63, %v16621_v60  ;;  %v22430_v24 = vpop.f32.mrf.mxu1  ;;  %v16862_v60 = vor.u32 %v19754_v33, %v16861_v47  ;;  %v17182_v63 = vor.u32 %v19834_v53, %v17181_v38  ;;  %v20204_v33 = vld [vmem:[%s20702_s9 + $0x2f64] sm:$0xf0]  ;;  %v17421_v38 = vld [vmem:[%s20702_s9 + $0x2590] sm:$0xf]  ;;  %v19894_v53 = vld [vmem:[%s20702_s9 + $0x25b4] sm:$0xf0] }
 0x31b   : > { %10709 = vmatpush.bf16.msrb.mxu2 %v15822_v8  ;;  %v17581_v8 = vld [vmem:[%s20702_s9 + $0x26d0] sm:$0xf] }
 0x31c   : > { %10722 = vmatpush.bf16.msrb.mxu3 %v16142_v14  ;;  %10684 = vmatmul.bf16.vlgmr.msrb.gmra.mxu0 %v20964_v36  ;;  %v19684_v14 = vld [vmem:[%s20702_s9 + $0x1f24] sm:$0xf0] }
 0x31d   : > { %10728 = vmatpush.bf16.msra.mxu0 %v16742_v10  ;;  %10697 = vmatmul.bf16.vlgmr.msrb.gmra.mxu1 %v20971_v42  ;;  %v19934_v10 = vld [vmem:[%s20702_s9 + $0x26f4] sm:$0xf0] }
 0x31e   : > { %10741 = vmatpush.bf16.msra.mxu1 %v17062_v12  ;;  %10710 = vmatmul.bf16.vlgmr.msrb.gmra.mxu2 %v20966_v37  ;;  %v16942_v12 = vor.u32 %v19774_v1, %v16941_v62  ;;  %v17582_v17 = vor.u32 %v19934_v10, %v17581_v8  ;;  %v16821_v62 = vld [vmem:[%s20702_s9 + $0x20e0] sm:$0xf] }
 0x31f   : > { %10754 = vmatpush.bf16.msra.mxu2 %v17382_v7  ;;  %10723 = vmatmul.bf16.vlgmr.msrb.gmra.mxu3 %v20973_v43  ;;  %v16581_v7 = vld [vmem:[%s20702_s9 + $0x1f00] sm:$0xf] }
 0x320   : > { %10767 = vmatpush.bf16.msra.mxu3 %v17702_v20  ;;  %v16582_v25 = vor.u32 %v19684_v14, %v16581_v7  ;;  %v17541_v20 = vld [vmem:[%s20702_s9 + $0x2680] sm:$0xf]  ;;  %v16461_v7 = vld [vmem:[%s20702_s9 + $0x1e10] sm:$0xf]  ;;  %v19654_v14 = vld [vmem:[%s20702_s9 + $0x1e34] sm:$0xf0] }
 0x321   : > { %10729 = vmatpush.bf16.msra.mxu0 %v16702_v23  ;;  %v19924_v23 = vld [vmem:[%s20702_s9 + $0x26a4] sm:$0xf0]  ;;  %v22443_v11 = vpop.f32.mrf.mxu2  ;;  %v17461_v10 = vld [vmem:[%s20702_s9 + $0x25e0] sm:$0xf]  ;;  %v16462_v47 = vor.u32 %v19654_v14, %v16461_v7 }
 0x322   : > { %10742 = vmatpush.bf16.msra.mxu1 %v17022_v0  ;;  %v16541_v0 = vld [vmem:[%s20702_s9 + $0x1eb0] sm:$0xf]  ;;  %v10492_v1 = vpop.f32.mrf.mxu1 }
 0x323   : > { %10755 = vmatpush.bf16.msra.mxu2 %v17342_v2  ;;  %v19674_v2 = vld [vmem:[%s20702_s9 + $0x1ed4] sm:$0xf0]  ;;  %v17981_v1 = vld [vmem:[%s20702_s9 + $0x29f0] sm:$0xf] }
 0x324   : > { %10768 = vmatpush.bf16.msra.mxu3 %v17662_v52  ;;  %v17542_v52 = vor.u32 %v19924_v23, %v17541_v20  ;;  %v16542_v31 = vor.u32 %v19674_v2, %v16541_v0  ;;  %v18021_v20 = vld [vmem:[%s20702_s9 + $0x2a40] sm:$0xf]  ;;  %v20044_v23 = vld [vmem:[%s20702_s9 + $0x2a64] sm:$0xf0] }
 0x325   : > { %10730 = vmatpush.bf16.msra.mxu0 %v16662_v59  ;;  %v22450_v59 = vpop.f32.mrf.mxu3  ;;  %v18341_v0 = vld [vmem:[%s20702_s9 + $0x2cc0] sm:$0xf] }
 0x326   : > { %10743 = vmatpush.bf16.msra.mxu1 %v16982_v39  ;;  %v19914_v39 = vld [vmem:[%s20702_s9 + $0x2654] sm:$0xf0]  ;;  %v18661_v2 = vld [vmem:[%s20702_s9 + $0x2f40] sm:$0xf] }
 0x327   : > { %10756 = vmatpush.bf16.msra.mxu2 %v17302_v57  ;;  %v10479_v57 = vpop.f32.mrf.mxu0  ;;  %v17502_v8 = vor.u32 %v19914_v39, %v17501_v54  ;;  %v18022_v39 = vor.u32 %v20044_v23, %v18021_v20  ;;  %v18739_v23 = vld [vmem:[%s20702_s9 + $0x1a4] sm:$0xf] }
 0x328   : > { %10769 = vmatpush.bf16.msra.mxu3 %v17622_v16  ;;  %v19824_v16 = vld [vmem:[%s20702_s9 + $0x2384] sm:$0xf0] }
 0x329   : > { %10731 = vmatpush.bf16.msra.mxu0 %v16622_v4  ;;  %v10439_v4 = vadd.f32 %v22354_v40, %v10426_v32  ;;  %v16822_v40 = vor.u32 %v19744_v15, %v16821_v62  ;;  %v17142_v26 = vor.u32 %v19824_v16, %v17141_v3  ;;  %v17422_v62 = vor.u32 %v19894_v53, %v17421_v38  ;;  %v18301_v15 = vld [vmem:[%s20702_s9 + $0x2c70] sm:$0xf]  ;;  %v20114_v3 = vld [vmem:[%s20702_s9 + $0x2c94] sm:$0xf0] }
 0x32a   : > { %10744 = vmatpush.bf16.msra.mxu1 %v16942_v12  ;;  %v16502_v12 = vor.u32 %v19664_v18, %v16501_v6  ;;  %v18662_v18 = vor.u32 %v20204_v33, %v18661_v2  ;;  %v18621_v16 = vld [vmem:[%s20702_s9 + $0x2ef0] sm:$0xf]  ;;  %v18302_v7 = vor.u32 %v20114_v3, %v18301_v15  ;;  %v20174_v38 = vld [vmem:[%s20702_s9 + $0x2e74] sm:$0xf0]  ;;  %v20164_v15 = vld [vmem:[%s20702_s9 + $0x2e24] sm:$0xf0] }
 0x32b   : > { %10757 = vmatpush.bf16.msra.mxu2 %v17262_v19  ;;  %v19904_v19 = vld [vmem:[%s20702_s9 + $0x2604] sm:$0xf0]  ;;  %v10452_v13 = vadd.f32 %v22370_v30, %v10439_v4  ;;  %v20194_v4 = vld [vmem:[%s20702_s9 + $0x2f14] sm:$0xf0]  ;;  %v18221_v2 = vld [vmem:[%s20702_s9 + $0x2bd0] sm:$0xf] }
 0x32c   : > { %10770 = vmatpush.bf16.msra.mxu3 %v17582_v17  ;;  %v17101_v17 = vld [vmem:[%s20702_s9 + $0x2310] sm:$0xf]  ;;  %v20124_v30 = vld [vmem:[%s20702_s9 + $0x2ce4] sm:$0xf0]  ;;  %v18622_v14 = vor.u32 %v20194_v4, %v18621_v16  ;;  %v18719_v4 = vld [vmem:[%s20702_s9 + $0x104] sm:$0xf] }
 0x32d   : > { %10732 = vmatpush.bf16.msra.mxu0 %v16582_v25  ;;  %v19814_v25 = vld [vmem:[%s20702_s9 + $0x2334] sm:$0xf0]  ;;  %v10518_v32 = vpop.f32.mrf.mxu3  ;;  %v18342_v57 = vor.u32 %v20124_v30, %v18341_v0  ;;  %v18541_v33 = vld [vmem:[%s20702_s9 + $0x2e50] sm:$0xf] }
 0x32e   : > { %10745 = vmatpush.bf16.msra.mxu1 %v16902_v29  ;;  %v10505_v29 = vpop.f32.mrf.mxu2  ;;  %v17102_v54 = vor.u32 %v19814_v25, %v17101_v17  ;;  %v20184_v17 = vld [vmem:[%s20702_s9 + $0x2ec4] sm:$0xf0]  ;;  %v20014_v30 = vld [vmem:[%s20702_s9 + $0x2974] sm:$0xf0] }
 0x32f   : > { %10758 = vmatpush.bf16.msra.mxu2 %v17222_v46  ;;  %v17462_v46 = vor.u32 %v19904_v19, %v17461_v10  ;;  %v18749_v10 = vld [vmem:[%s20702_s9 + $0x1f4] sm:$0xf]  ;;  %v12823_v29 = vld [vmem:[%s20702_s9 + $0x1c8] sm:$0xf0] }
 0x330   : > { %10771 = vmatpush.bf16.msra.mxu3 %v17542_v52  ;;  %v10465_v52 = vadd.f32 %v22372_v58, %v10452_v13  ;;  %v20034_v58 = vld [vmem:[%s20702_s9 + $0x2a14] sm:$0xf0]  ;;  %v17941_v13 = vld [vmem:[%s20702_s9 + $0x29a0] sm:$0xf]  ;;  %v12826_v32 = vor.u32 %v18739_v23, %v12823_v29  ;;  %v18709_v23 = vld [vmem:[%s20702_s9 + $0xb4] sm:$0xf] }
 0x331   : > { %10733 = vmatpush.bf16.msra.mxu0 %v16542_v31  ;;  %v16782_v31 = vor.u32 %v19734_v41, %v16781_v9  ;;  %v20104_v9 = vld [vmem:[%s20702_s9 + $0x2c44] sm:$0xf0]  ;;  %v18581_v41 = vld [vmem:[%s20702_s9 + $0x2ea0] sm:$0xf]  ;;  %v12703_v29 = vld [vmem:[%s20702_s9 + $0xd8] sm:$0xf0] }
 0x332   : > { %10746 = vmatpush.bf16.msra.mxu1 %v16862_v60  ;;  %v18759_v60 = vld [vmem:[%s20702_s9 + $0x244] sm:$0xf]  ;;  %v10478_v6 = vadd.f32 %v22426_v5, %v10465_v52  ;;  %v17982_v5 = vor.u32 %v20034_v58, %v17981_v1  ;;  %v18582_v0 = vor.u32 %v20184_v17, %v18581_v41  ;;  %v20084_v1 = vld [vmem:[%s20702_s9 + $0x2ba4] sm:$0xf0]  ;;  %v18501_v58 = vld [vmem:[%s20702_s9 + $0x2e00] sm:$0xf] }
 0x333   : > { %10759 = vmatpush.bf16.msra.mxu2 %v17182_v63  ;;  %v12903_v63 = vld [vmem:[%s20702_s9 + $0x268] sm:$0xf0] }
 0x334   : > { %10772 = vmatpush.bf16.msra.mxu3 %v17502_v8  ;;  %v12906_v8 = vor.u32 %v18759_v60, %v12903_v63  ;;  %v10491_v19 = vadd.f32 %v22430_v24, %v10478_v6  ;;  %v18542_v63 = vor.u32 %v20174_v38, %v18541_v33  ;;  %v18101_v33 = vld [vmem:[%s20702_s9 + $0x2ae0] sm:$0xf] }
 0x335   : > { %10734 = vmatpush.bf16.msra.mxu0 %v16502_v12  ;;  %v12863_v12 = vld [vmem:[%s20702_s9 + $0x218] sm:$0xf0] }
 0x336   : > { %10747 = vmatpush.bf16.msra.mxu1 %v16822_v40  ;;  %v20024_v40 = vld [vmem:[%s20702_s9 + $0x29c4] sm:$0xf0]  ;;  %v10504_v24 = vadd.f32 %v22443_v11, %v10491_v19  ;;  %v12866_v25 = vor.u32 %v18749_v10, %v12863_v12  ;;  %v17901_v11 = vld [vmem:[%s20702_s9 + $0x2950] sm:$0xf]  ;;  %v18502_v12 = vor.u32 %v20164_v15, %v18501_v58  ;;  %v20134_v15 = vld [vmem:[%s20702_s9 + $0x2d34] sm:$0xf0] }
 0x337   : > { %10760 = vmatpush.bf16.msra.mxu2 %v17142_v26  ;;  %v18261_v26 = vld [vmem:[%s20702_s9 + $0x2c20] sm:$0xf]  ;;  %v17942_v20 = vor.u32 %v20024_v40, %v17941_v13  ;;  %v17821_v19 = vld [vmem:[%s20702_s9 + $0x28b0] sm:$0xf]  ;;  %v20074_v40 = vld [vmem:[%s20702_s9 + $0x2b54] sm:$0xf0] }
 0x338   : > { %10773 = vmatpush.bf16.msra.mxu3 %v17462_v46  ;;  %v18262_v46 = vor.u32 %v20104_v9, %v18261_v26  ;;  %v10517_v53 = vadd.f32 %v22450_v59, %v10504_v24  ;;  %v17861_v59 = vld [vmem:[%s20702_s9 + $0x2900] sm:$0xf]  ;;  %v18461_v26 = vld [vmem:[%s20702_s9 + $0x2db0] sm:$0xf]  ;;  %v20154_v9 = vld [vmem:[%s20702_s9 + $0x2dd4] sm:$0xf0] }
 0x339   : > { %10735 = vmatpush.bf16.msra.mxu0 %v16462_v47  ;;  %v20094_v47 = vld [vmem:[%s20702_s9 + $0x2bf4] sm:$0xf0]  ;;  %v10529_v52 = vpop.f32.mrf.mxu0  ;;  %v380_v24 = vld [vmem:[#allocation2 + $0x10] sm:$0xff]  ;;  %v18381_v58 = vld [vmem:[%s20702_s9 + $0x2d10] sm:$0xf] }
 0x33a   : > { %10748 = vmatpush.bf16.msra.mxu1 %v16782_v31  ;;  %v17902_v31 = vor.u32 %v20014_v30, %v17901_v11  ;;  %v18222_v60 = vor.u32 %v20094_v47, %v18221_v2  ;;  %v10542_v6 = vpop.f32.mrf.mxu1  ;;  %v18462_v30 = vor.u32 %v20154_v9, %v18461_v26  ;;  %v17781_v2 = vld [vmem:[%s20702_s9 + $0x2860] sm:$0xf]  ;;  %v19984_v47 = vld [vmem:[%s20702_s9 + $0x2884] sm:$0xf0]  ;;  %v18382_v9 = vor.u32 %v20134_v15, %v18381_v58  ;;  %v18809_v58 = vld [vmem:[%s20702_s9 + $0x3d4] sm:$0xf] }
 0x33b   : > { %10761 = vmatpush.bf16.msra.mxu2 %v17102_v54  ;;  %v18729_v54 = vld [vmem:[%s20702_s9 + $0x154] sm:$0xf] }
 0x33c   : > { %10774 = vmatpush.bf16.msra.mxu3 %v17422_v62  ;;  %10736 = vmatmul.bf16.vlgmr.msra.gmra.mxu0 %v21042_v34  ;;  %v18181_v62 = vld [vmem:[%s20702_s9 + $0x2b80] sm:$0xf] }
 0x33d   : > { %10780 = vmatpush.bf16.msrb.mxu0 %v18022_v39  ;;  %10749 = vmatmul.bf16.vlgmr.msra.gmra.mxu1 %v21049_v44  ;;  %v12783_v39 = vld [vmem:[%s20702_s9 + $0x178] sm:$0xf0]  ;;  %v18182_v10 = vor.u32 %v20084_v1, %v18181_v62  ;;  %v20054_v1 = vld [vmem:[%s20702_s9 + $0x2ab4] sm:$0xf0] }
 0x33e   : > { %10793 = vmatpush.bf16.msrb.mxu1 %v18342_v57  ;;  %10762 = vmatmul.bf16.vlgmr.msra.gmra.mxu2 %v21044_v35  ;;  %v10530_v57 = vadd.f32 %v10529_v52, %v10517_v53  ;;  %v12786_v3 = vor.u32 %v18729_v54, %v12783_v39  ;;  %v20064_v53 = vld [vmem:[%s20702_s9 + $0x2b04] sm:$0xf0]  ;;  %v12706_v54 = vor.u32 %v18709_v23, %v12703_v29  ;;  %v18699_v39 = vld [vmem:[%s20702_s9 + $0x64] sm:$0xf] }
 0x33f   : > { %10806 = vmatpush.bf16.msrb.mxu2 %v18662_v18  ;;  %10775 = vmatmul.bf16.vlgmr.msra.gmra.mxu3 %v21051_v45  ;;  %v20004_v18 = vld [vmem:[%s20702_s9 + $0x2924] sm:$0xf0] }
 0x340   : > { %10819 = vmatpush.bf16.msrb.mxu3 %v12906_v8  ;;  %v17862_v16 = vor.u32 %v20004_v18, %v17861_v59  ;;  %v12743_v8 = vld [vmem:[%s20702_s9 + $0x128] sm:$0xf0]  ;;  %v20144_v52 = vld [vmem:[%s20702_s9 + $0x2d84] sm:$0xf0]  ;;  %v18061_v59 = vld [vmem:[%s20702_s9 + $0x2a90] sm:$0xf]  ;;  %v18102_v18 = vor.u32 %v20064_v53, %v18101_v33 }
 0x341   : > { %10781 = vmatpush.bf16.msrb.mxu0 %v17982_v5  ;;  %v10543_v5 = vadd.f32 %v10542_v6, %v10530_v57  ;;  %v10555_v13 = vpop.f32.mrf.mxu2  ;;  %v12746_v17 = vor.u32 %v18719_v4, %v12743_v8  ;;  %v12663_v57 = vld [vmem:[%s20702_s9 + $0x88] sm:$0xf0]  ;;  %v19974_v6 = vld [vmem:[%s20702_s9 + $0x2834] sm:$0xf0]  ;;  %v18062_v26 = vor.u32 %v20054_v1, %v18061_v59  ;;  %v19069_v53 = vld [vmem:[%s20702_s9 + $0xbf4] sm:$0xf] }
 0x342   : > { %10794 = vmatpush.bf16.msrb.mxu1 %v18302_v7  ;;  %v19994_v7 = vld [vmem:[%s20702_s9 + $0x28d4] sm:$0xf0]  ;;  %v10544_v38 = vpop.f32.mrf.mxu1  ;;  %v12666_v8 = vor.u32 %v18699_v39, %v12663_v57  ;;  %v18899_v39 = vld [vmem:[%s20702_s9 + $0x6a4] sm:$0xf]  ;;  %v13463_v57 = vld [vmem:[%s20702_s9 + $0x6c8] sm:$0xf0] }
 0x343   : > { %10807 = vmatpush.bf16.msrb.mxu2 %v18622_v14  ;;  %v18141_v14 = vld [vmem:[%s20702_s9 + $0x2b30] sm:$0xf]  ;;  %v10556_v41 = vadd.f32 %v10555_v13, %v10543_v5  ;;  %v18919_v5 = vld [vmem:[%s20702_s9 + $0x744] sm:$0xf]  ;;  %v12623_v13 = vld [vmem:[%s20702_s9 + $0x38] sm:$0xf0] }
 0x344   : > { %10820 = vmatpush.bf16.msrb.mxu3 %v12866_v25  ;;  %v10568_v25 = vpop.f32.mrf.mxu3  ;;  %v18142_v11 = vor.u32 %v20074_v40, %v18141_v14  ;;  %v18689_v14 = vld [vmem:[%s20702_s9 + $0x14] sm:$0xf]  ;;  %v14103_v1 = vld [vmem:[%s20702_s9 + $0xbc8] sm:$0xf0] }
 0x345   : > { %10782 = vmatpush.bf16.msrb.mxu0 %v17942_v20  ;;  %v17822_v20 = vor.u32 %v19994_v7, %v17821_v19  ;;  %v13863_v7 = vld [vmem:[%s20702_s9 + $0x9e8] sm:$0xf0]  ;;  %v12626_v29 = vor.u32 %v18689_v14, %v12623_v13  ;;  %v14063_v14 = vld [vmem:[%s20702_s9 + $0xb78] sm:$0xf0]  ;;  %v18799_v13 = vld [vmem:[%s20702_s9 + $0x384] sm:$0xf] }
 0x346   : > { %10795 = vmatpush.bf16.msrb.mxu1 %v18262_v46  ;;  %v10531_v46 = vpop.f32.mrf.mxu0 }
 0x347   : > { %10808 = vmatpush.bf16.msrb.mxu2 %v18582_v0  ;;  %v10569_v0 = vadd.f32 %v10568_v25, %v10556_v41  ;;  %v14183_v25 = vld [vmem:[%s20702_s9 + $0xc68] sm:$0xf0]  ;;  %v13183_v46 = vld [vmem:[%s20702_s9 + $0x498] sm:$0xf0] }
 0x348   : > { %10821 = vmatpush.bf16.msrb.mxu3 %v12826_v32  ;;  %v18421_v32 = vld [vmem:[%s20702_s9 + $0x2d60] sm:$0xf] }
 0x349   : > { %10783 = vmatpush.bf16.msrb.mxu0 %v17902_v31  ;;  %v12057_v31 = vadd.f32 %v10569_v0, %v380_v24  ;;  %v18422_v62 = vor.u32 %v20144_v52, %v18421_v32  ;;  %v10557_v4 = vpop.f32.mrf.mxu2  ;;  %v19079_v24 = vld [vmem:[%s20702_s9 + $0xc44] sm:$0xf]  ;;  %v18909_v0 = vld [vmem:[%s20702_s9 + $0x6f4] sm:$0xf]  ;;  %v14143_v32 = vld [vmem:[%s20702_s9 + $0xc18] sm:$0xf0] }
 0x34a   : > { %10796 = vmatpush.bf16.msrb.mxu1 %v18222_v60  ;;  %v17782_v60 = vor.u32 %v19984_v47, %v17781_v2  ;;  %v13823_v2 = vld [vmem:[%s20702_s9 + $0x998] sm:$0xf0]  ;;  %v14186_v47 = vor.u32 %v19079_v24, %v14183_v25  ;;  %v18819_v52 = vld [vmem:[%s20702_s9 + $0x424] sm:$0xf] }
 0x34b   : > { %10809 = vmatpush.bf16.msrb.mxu2 %v18542_v63  ;;  %v17741_v63 = vld [vmem:[%s20702_s9 + $0x2810] sm:$0xf]  ;;  %12067 = vst [vmem:[#allocation2 + $0x10] sm:$0xff] %v12057_v31  ;;  %v13423_v4 = vld [vmem:[%s20702_s9 + $0x678] sm:$0xf0] }
 0x34c   : > { %10822 = vmatpush.bf16.msrb.mxu3 %v12786_v3  ;;  %v18839_v3 = vld [vmem:[%s20702_s9 + $0x4c4] sm:$0xf]  ;;  %v17742_v19 = vor.u32 %v19974_v6, %v17741_v63  ;;  %v10570_v40 = vpop.f32.mrf.mxu3  ;;  %v13783_v63 = vld [vmem:[%s20702_s9 + $0x948] sm:$0xf0]  ;;  %v14146_v6 = vor.u32 %v19069_v53, %v14143_v32  ;;  %v13343_v53 = vld [vmem:[%s20702_s9 + $0x5d8] sm:$0xf0] }
 0x34d   : > { %10784 = vmatpush.bf16.msrb.mxu0 %v17862_v16  ;;  %v13223_v16 = vld [vmem:[%s20702_s9 + $0x4e8] sm:$0xf0]  ;;  %v18959_v25 = vld [vmem:[%s20702_s9 + $0x884] sm:$0xf]  ;;  %v18949_v32 = vld [vmem:[%s20702_s9 + $0x834] sm:$0xf] }
 0x34e   : > { %10797 = vmatpush.bf16.msrb.mxu1 %v18182_v10  ;;  %v13543_v10 = vld [vmem:[%s20702_s9 + $0x768] sm:$0xf0]  ;;  %v13226_v41 = vor.u32 %v18839_v3, %v13223_v16  ;;  %v13103_v3 = vld [vmem:[%s20702_s9 + $0x3f8] sm:$0xf0]  ;;  %v18889_v16 = vld [vmem:[%s20702_s9 + $0x654] sm:$0xf] }
 0x34f   : > { %10810 = vmatpush.bf16.msrb.mxu2 %v18502_v12  ;;  %v18999_v12 = vld [vmem:[%s20702_s9 + $0x9c4] sm:$0xf] }
 0x350   : > { %10823 = vmatpush.bf16.msrb.mxu3 %v12746_v17  ;;  %v13546_v17 = vor.u32 %v18919_v5, %v13543_v10  ;;  %v13866_v23 = vor.u32 %v18999_v12, %v13863_v7  ;;  %v13743_v5 = vld [vmem:[%s20702_s9 + $0x8f8] sm:$0xf0]  ;;  %v13106_v12 = vor.u32 %v18809_v58, %v13103_v3  ;;  %v19049_v7 = vld [vmem:[%s20702_s9 + $0xb54] sm:$0xf]  ;;  %v13303_v58 = vld [vmem:[%s20702_s9 + $0x588] sm:$0xf0] }
 0x351   : > { %10785 = vmatpush.bf16.msrb.mxu0 %v17822_v20  ;;  %v18829_v20 = vld [vmem:[%s20702_s9 + $0x474] sm:$0xf] }
 0x352   : > { %10798 = vmatpush.bf16.msrb.mxu1 %v18142_v11  ;;  %v13503_v11 = vld [vmem:[%s20702_s9 + $0x718] sm:$0xf0]  ;;  %v13186_v33 = vor.u32 %v18829_v20, %v13183_v46  ;;  %v13703_v20 = vld [vmem:[%s20702_s9 + $0x8a8] sm:$0xf0] }
 0x353   : > { %10811 = vmatpush.bf16.msrb.mxu2 %v18462_v30  ;;  %v18989_v30 = vld [vmem:[%s20702_s9 + $0x974] sm:$0xf]  ;;  %v13506_v38 = vor.u32 %v18909_v0, %v13503_v11  ;;  %v19039_v11 = vld [vmem:[%s20702_s9 + $0xb04] sm:$0xf] }
 0x354   : > { %10824 = vmatpush.bf16.msrb.mxu3 %v12706_v54  ;;  %v13826_v31 = vor.u32 %v18989_v30, %v13823_v2  ;;  %v13143_v54 = vld [vmem:[%s20702_s9 + $0x448] sm:$0xf0]  ;;  %v18789_v2 = vld [vmem:[%s20702_s9 + $0x334] sm:$0xf] }
 0x355   : > { %10786 = vmatpush.bf16.msrb.mxu0 %v17782_v60  ;;  %v18979_v60 = vld [vmem:[%s20702_s9 + $0x924] sm:$0xf]  ;;  %v13146_v59 = vor.u32 %v18819_v52, %v13143_v54  ;;  %v14023_v30 = vld [vmem:[%s20702_s9 + $0xb28] sm:$0xf0]  ;;  %v13663_v52 = vld [vmem:[%s20702_s9 + $0x858] sm:$0xf0] }
 0x356   : > { %10799 = vmatpush.bf16.msrb.mxu1 %v18102_v18  ;;  %v13466_v18 = vor.u32 %v18899_v39, %v13463_v57  ;;  %v13786_v15 = vor.u32 %v18979_v60, %v13783_v63  ;;  %v14026_v54 = vor.u32 %v19039_v11, %v14023_v30  ;;  %v19029_v63 = vld [vmem:[%s20702_s9 + $0xab4] sm:$0xf]  ;;  %v19319_v11 = vld [vmem:[%s20702_s9 + $0x13c4] sm:$0xf]  ;;  %v15143_v30 = vld [vmem:[%s20702_s9 + $0x13e8] sm:$0xf0] }
 0x357   : > { %10812 = vmatpush.bf16.msrb.mxu2 %v18422_v62  ;;  %v19059_v62 = vld [vmem:[%s20702_s9 + $0xba4] sm:$0xf] }
 0x358   : > { %10825 = vmatpush.bf16.msrb.mxu3 %v12666_v8  ;;  %v18969_v8 = vld [vmem:[%s20702_s9 + $0x8d4] sm:$0xf]  ;;  %v14106_v10 = vor.u32 %v19059_v62, %v14103_v1  ;;  %v12983_v62 = vld [vmem:[%s20702_s9 + $0x308] sm:$0xf0]  ;;  %v18859_v1 = vld [vmem:[%s20702_s9 + $0x564] sm:$0xf] }
 0x359   : > { %10787 = vmatpush.bf16.msrb.mxu0 %v17742_v19  ;;  %v13426_v19 = vor.u32 %v18889_v16, %v13423_v4  ;;  %v13746_v40 = vor.u32 %v18969_v8, %v13743_v5  ;;  %v18939_v16 = vld [vmem:[%s20702_s9 + $0x7e4] sm:$0xf]  ;;  %v13623_v4 = vld [vmem:[%s20702_s9 + $0x808] sm:$0xf0] }
 0x35a   : > { %10800 = vmatpush.bf16.msrb.mxu1 %v18062_v26  ;;  %v13063_v26 = vld [vmem:[%s20702_s9 + $0x3a8] sm:$0xf0]  ;;  %v10594_v24 = vpop.f32.mrf.mxu1 }
 0x35b   : > { %10813 = vmatpush.bf16.msrb.mxu2 %v18382_v9  ;;  %v18879_v9 = vld [vmem:[%s20702_s9 + $0x604] sm:$0xf]  ;;  %v13066_v46 = vor.u32 %v18799_v13, %v13063_v26  ;;  %v18769_v13 = vld [vmem:[%s20702_s9 + $0x294] sm:$0xf] }
 0x35c   : > { %10826 = vmatpush.bf16.msrb.mxu3 %v12626_v29  ;;  %10788 = vmatmul.bf16.vlgmr.msrb.gmra.mxu0 %v21121_v49  ;;  %v14066_v29 = vor.u32 %v19049_v7, %v14063_v14  ;;  %v13306_v14 = vor.u32 %v18859_v1, %v13303_v58  ;;  %v18849_v26 = vld [vmem:[%s20702_s9 + $0x514] sm:$0xf]  ;;  %v15103_v1 = vld [vmem:[%s20702_s9 + $0x1398] sm:$0xf0] }
 0x35d   : > { %10832 = vmatpush.bf16.msra.mxu0 %v13226_v41  ;;  %10801 = vmatmul.bf16.vlgmr.msrb.gmra.mxu1 %v21127_v56  ;;  %v13383_v41 = vld [vmem:[%s20702_s9 + $0x628] sm:$0xf0] }
 0x35e   : > { %10845 = vmatpush.bf16.msra.mxu1 %v13546_v17  ;;  %10814 = vmatmul.bf16.vlgmr.msrb.gmra.mxu2 %v21123_v50  ;;  %v10581_v17 = vpop.f32.mrf.mxu0  ;;  %v13386_v0 = vor.u32 %v18879_v9, %v13383_v41  ;;  %v13626_v9 = vor.u32 %v18939_v16, %v13623_v4  ;;  %v13263_v41 = vld [vmem:[%s20702_s9 + $0x538] sm:$0xf0] }
 0x35f   : > { %10858 = vmatpush.bf16.msra.mxu2 %v13866_v23  ;;  %10827 = vmatmul.bf16.vlgmr.msrb.gmra.mxu3 %v20829_v27  ;;  %v10595_v23 = vadd.f32 %v10594_v24, %v10581_v17  ;;  %v18929_v17 = vld [vmem:[%s20702_s9 + $0x794] sm:$0xf]  ;;  %v13583_v24 = vld [vmem:[%s20702_s9 + $0x7b8] sm:$0xf0] }
 0x360   : > { %10871 = vmatpush.bf16.msra.mxu3 %v14186_v47  ;;  %v13706_v47 = vor.u32 %v18959_v25, %v13703_v20  ;;  %v19159_v25 = vld [vmem:[%s20702_s9 + $0xec4] sm:$0xf]  ;;  %v14503_v20 = vld [vmem:[%s20702_s9 + $0xee8] sm:$0xf0]  ;;  %v15423_v16 = vld [vmem:[%s20702_s9 + $0x1618] sm:$0xf0] }
 0x361   : > { %10833 = vmatpush.bf16.msra.mxu0 %v13186_v33  ;;  %v13023_v33 = vld [vmem:[%s20702_s9 + $0x358] sm:$0xf0] }
 0x362   : > { %10846 = vmatpush.bf16.msra.mxu1 %v13506_v38  ;;  %v18869_v38 = vld [vmem:[%s20702_s9 + $0x5b4] sm:$0xf]  ;;  %v13026_v57 = vor.u32 %v18789_v2, %v13023_v33  ;;  %v10596_v5 = vpop.f32.mrf.mxu1 }
 0x363   : > { %10859 = vmatpush.bf16.msra.mxu2 %v13826_v31  ;;  %v10607_v31 = vpop.f32.mrf.mxu2  ;;  %v13346_v60 = vor.u32 %v18869_v38, %v13343_v53  ;;  %v19009_v33 = vld [vmem:[%s20702_s9 + $0xa14] sm:$0xf]  ;;  %v13903_v38 = vld [vmem:[%s20702_s9 + $0xa38] sm:$0xf0]  ;;  %v13586_v53 = vor.u32 %v18929_v17, %v13583_v24 }
 0x364   : > { %10872 = vmatpush.bf16.msra.mxu3 %v14146_v6  ;;  %v10608_v39 = vadd.f32 %v10607_v31, %v10595_v23  ;;  %v13983_v6 = vld [vmem:[%s20702_s9 + $0xad8] sm:$0xf0]  ;;  %v19239_v23 = vld [vmem:[%s20702_s9 + $0x1144] sm:$0xf]  ;;  %v15463_v31 = vld [vmem:[%s20702_s9 + $0x1668] sm:$0xf0] }
 0x365   : > { %10834 = vmatpush.bf16.msra.mxu0 %v13146_v59  ;;  %v18779_v59 = vld [vmem:[%s20702_s9 + $0x2e4] sm:$0xf] }
 0x366   : > { %10847 = vmatpush.bf16.msra.mxu1 %v13466_v18  ;;  %v13666_v18 = vor.u32 %v18949_v32, %v13663_v52  ;;  %v10583_v3 = vpop.f32.mrf.mxu0  ;;  %v12986_v7 = vor.u32 %v18779_v59, %v12983_v62  ;;  %v14506_v32 = vor.u32 %v19159_v25, %v14503_v20  ;;  %v19399_v52 = vld [vmem:[%s20702_s9 + $0x1644] sm:$0xf]  ;;  %v13906_v59 = vor.u32 %v19009_v33, %v13903_v38  ;;  %v19309_v62 = vld [vmem:[%s20702_s9 + $0x1374] sm:$0xf]  ;;  %v14383_v20 = vld [vmem:[%s20702_s9 + $0xdf8] sm:$0xf0] }
 0x367   : > { %10860 = vmatpush.bf16.msra.mxu2 %v13786_v15  ;;  %v10620_v15 = vpop.f32.mrf.mxu3  ;;  %v15466_v58 = vor.u32 %v19399_v52, %v15463_v31  ;;  %v19389_v3 = vld [vmem:[%s20702_s9 + $0x15f4] sm:$0xf]  ;;  %v15106_v5 = vor.u32 %v19309_v62, %v15103_v1  ;;  %v19119_v52 = vld [vmem:[%s20702_s9 + $0xd84] sm:$0xf]  ;;  %v14343_v31 = vld [vmem:[%s20702_s9 + $0xda8] sm:$0xf0] }
 0x368   : > { %10873 = vmatpush.bf16.msra.mxu3 %v14106_v10  ;;  %v22603_v8 = vadd.f32 %v10620_v15, %v10608_v39  ;;  %v13986_v10 = vor.u32 %v19029_v63, %v13983_v6  ;;  %v14463_v63 = vld [vmem:[%s20702_s9 + $0xe98] sm:$0xf0]  ;;  %v19229_v6 = vld [vmem:[%s20702_s9 + $0x10f4] sm:$0xf]  ;;  %v19359_v62 = vld [vmem:[%s20702_s9 + $0x1504] sm:$0xf] }
 0x369   : > { %10835 = vmatpush.bf16.msra.mxu0 %v13106_v12  ;;  %v19019_v12 = vld [vmem:[%s20702_s9 + $0xa64] sm:$0xf]  ;;  %v19129_v25 = vld [vmem:[%s20702_s9 + $0xdd4] sm:$0xf] }
 0x36a   : > { %10848 = vmatpush.bf16.msra.mxu1 %v13426_v19  ;;  %v13943_v19 = vld [vmem:[%s20702_s9 + $0xa88] sm:$0xf0] }
 0x36b   : > { %10861 = vmatpush.bf16.msra.mxu2 %v13746_v40  ;;  %v12943_v40 = vld [vmem:[%s20702_s9 + $0x2b8] sm:$0xf0] }
 0x36c   : > { %10874 = vmatpush.bf16.msra.mxu3 %v14066_v29  ;;  %v10609_v29 = vpop.f32.mrf.mxu2  ;;  %v12946_v2 = vor.u32 %v18769_v13, %v12943_v40  ;;  %v15063_v13 = vld [vmem:[%s20702_s9 + $0x1348] sm:$0xf0]  ;;  %v15426_v40 = vor.u32 %v19389_v3, %v15423_v16  ;;  %v14303_v3 = vld [vmem:[%s20702_s9 + $0xd58] sm:$0xf0]  ;;  %v19189_v16 = vld [vmem:[%s20702_s9 + $0xfb4] sm:$0xf] }
 0x36d   : > { %10836 = vmatpush.bf16.msra.mxu0 %v13066_v46  ;;  %v13946_v46 = vor.u32 %v19019_v12, %v13943_v19  ;;  %v14423_v12 = vld [vmem:[%s20702_s9 + $0xe48] sm:$0xf0]  ;;  %v19219_v19 = vld [vmem:[%s20702_s9 + $0x10a4] sm:$0xf]  ;;  %v14703_v29 = vld [vmem:[%s20702_s9 + $0x1078] sm:$0xf0] }
 0x36e   : > { %10849 = vmatpush.bf16.msra.mxu1 %v13386_v0  ;;  %v14823_v0 = vld [vmem:[%s20702_s9 + $0x1168] sm:$0xf0] }
 0x36f   : > { %10862 = vmatpush.bf16.msra.mxu2 %v13706_v47  ;;  %v13266_v47 = vor.u32 %v18849_v26, %v13263_v41  ;;  %v14826_v39 = vor.u32 %v19239_v23, %v14823_v0  ;;  %v15383_v41 = vld [vmem:[%s20702_s9 + $0x15c8] sm:$0xf0]  ;;  %v19209_v23 = vld [vmem:[%s20702_s9 + $0x1054] sm:$0xf]  ;;  %v15023_v0 = vld [vmem:[%s20702_s9 + $0x12f8] sm:$0xf0] }
 0x370   : > { %10875 = vmatpush.bf16.msra.mxu3 %v14026_v54  ;;  %v10622_v54 = vpop.f32.mrf.mxu3  ;;  %v14706_v38 = vor.u32 %v19209_v23, %v14703_v29  ;;  %v14583_v23 = vld [vmem:[%s20702_s9 + $0xf88] sm:$0xf0]  ;;  %v19259_v29 = vld [vmem:[%s20702_s9 + $0x11e4] sm:$0xf] }
 0x371   : > { %10837 = vmatpush.bf16.msra.mxu0 %v13026_v57  ;;  %v15146_v57 = vor.u32 %v19319_v11, %v15143_v30  ;;  %v14386_v30 = vor.u32 %v19129_v25, %v14383_v20  ;;  %v19199_v54 = vld [vmem:[%s20702_s9 + $0x1004] sm:$0xf] }
 0x372   : > { %10850 = vmatpush.bf16.msra.mxu1 %v13346_v60  ;;  %v19149_v60 = vld [vmem:[%s20702_s9 + $0xe74] sm:$0xf]  ;;  %v19179_v25 = vld [vmem:[%s20702_s9 + $0xf64] sm:$0xf] }
 0x373   : > { %10863 = vmatpush.bf16.msra.mxu2 %v13666_v18  ;;  %v14783_v18 = vld [vmem:[%s20702_s9 + $0x1118] sm:$0xf0]  ;;  %v14466_v15 = vor.u32 %v19149_v60, %v14463_v63  ;;  %v14983_v60 = vld [vmem:[%s20702_s9 + $0x12a8] sm:$0xf0] }
 0x374   : > { %10876 = vmatpush.bf16.msra.mxu3 %v13986_v10  ;;  %v14786_v4 = vor.u32 %v19229_v6, %v14783_v18  ;;  %v19139_v10 = vld [vmem:[%s20702_s9 + $0xe24] sm:$0xf]  ;;  %v14346_v18 = vor.u32 %v19119_v52, %v14343_v31  ;;  %v19169_v31 = vld [vmem:[%s20702_s9 + $0xf14] sm:$0xf] }
 0x375   : > { %10838 = vmatpush.bf16.msra.mxu0 %v12986_v7  ;;  %v14743_v7 = vld [vmem:[%s20702_s9 + $0x10c8] sm:$0xf0]  ;;  %v14426_v26 = vor.u32 %v19139_v10, %v14423_v12  ;;  %v14943_v10 = vld [vmem:[%s20702_s9 + $0x1258] sm:$0xf0] }
 0x376   : > { %10851 = vmatpush.bf16.msra.mxu1 %v13306_v14  ;;  %v19299_v14 = vld [vmem:[%s20702_s9 + $0x1324] sm:$0xf]  ;;  %v14746_v17 = vor.u32 %v19219_v19, %v14743_v7 }
 0x377   : > { %10864 = vmatpush.bf16.msra.mxu2 %v13626_v9  ;;  %v19379_v9 = vld [vmem:[%s20702_s9 + $0x15a4] sm:$0xf]  ;;  %v15066_v24 = vor.u32 %v19299_v14, %v15063_v13  ;;  %v19349_v13 = vld [vmem:[%s20702_s9 + $0x14b4] sm:$0xf] }
 0x378   : > { %10877 = vmatpush.bf16.msra.mxu3 %v13946_v46  ;;  %v19289_v46 = vld [vmem:[%s20702_s9 + $0x12d4] sm:$0xf]  ;;  %v15386_v11 = vor.u32 %v19379_v9, %v15383_v41 }
 0x379   : > { %10839 = vmatpush.bf16.msra.mxu0 %v12946_v2  ;;  %v19369_v2 = vld [vmem:[%s20702_s9 + $0x1554] sm:$0xf]  ;;  %v10633_v33 = vpop.f32.mrf.mxu0 }
 0x37a   : > { %10852 = vmatpush.bf16.msra.mxu1 %v13266_v47  ;;  %v15343_v47 = vld [vmem:[%s20702_s9 + $0x1578] sm:$0xf0]  ;;  %v10646_v63 = vpop.f32.mrf.mxu1 }
 0x37b   : > { %10865 = vmatpush.bf16.msra.mxu2 %v13586_v53  ;;  %v15026_v53 = vor.u32 %v19289_v46, %v15023_v0  ;;  %v15346_v6 = vor.u32 %v19369_v2, %v15343_v47  ;;  %v14903_v46 = vld [vmem:[%s20702_s9 + $0x1208] sm:$0xf0]  ;;  %v19339_v2 = vld [vmem:[%s20702_s9 + $0x1464] sm:$0xf] }
 0x37c   : > { %10878 = vmatpush.bf16.msra.mxu3 %v13906_v59  ;;  %10840 = vmatmul.bf16.vlgmr.msra.gmra.mxu0 %v20831_v28  ;;  %v14906_v52 = vor.u32 %v19259_v29, %v14903_v46 }
 0x37d   : > { %10884 = vmatpush.bf16.msrb.mxu0 %v14506_v32  ;;  %10853 = vmatmul.bf16.vlgmr.msra.gmra.mxu1 %v20822_v21  ;;  %v10634_v32 = vadd.f32 %v10633_v33, %v22603_v8  ;;  %v15303_v8 = vld [vmem:[%s20702_s9 + $0x1528] sm:$0xf0] }
 0x37e   : > { %10897 = vmatpush.bf16.msrb.mxu1 %v14826_v39  ;;  %10866 = vmatmul.bf16.vlgmr.msra.gmra.mxu2 %v20824_v22  ;;  %v14663_v39 = vld [vmem:[%s20702_s9 + $0x1028] sm:$0xf0]  ;;  %v15306_v12 = vor.u32 %v19359_v62, %v15303_v8  ;;  %v19639_v62 = vld [vmem:[%s20702_s9 + $0x1dc4] sm:$0xf] }
 0x37f   : > { %10910 = vmatpush.bf16.msrb.mxu2 %v15146_v57  ;;  %10879 = vmatmul.bf16.vlgmr.msra.gmra.mxu3 %v20889_v48  ;;  %v19279_v57 = vld [vmem:[%s20702_s9 + $0x1284] sm:$0xf]  ;;  %v10647_v59 = vadd.f32 %v10646_v63, %v10634_v32  ;;  %v14666_v1 = vor.u32 %v19199_v54, %v14663_v39  ;;  %v15223_v33 = vld [vmem:[%s20702_s9 + $0x1488] sm:$0xf0]  ;;  %v14586_v32 = vor.u32 %v19179_v25, %v14583_v23  ;;  %v14543_v54 = vld [vmem:[%s20702_s9 + $0xf38] sm:$0xf0] }
 0x380   : > { %10923 = vmatpush.bf16.msrb.mxu3 %v15466_v58  ;;  %v14986_v58 = vor.u32 %v19279_v57, %v14983_v60  ;;  %v19249_v39 = vld [vmem:[%s20702_s9 + $0x1194] sm:$0xf]  ;;  %v14863_v57 = vld [vmem:[%s20702_s9 + $0x11b8] sm:$0xf0]  ;;  %v19479_v60 = vld [vmem:[%s20702_s9 + $0x18c4] sm:$0xf] }
 0x381   : > { %10885 = vmatpush.bf16.msrb.mxu0 %v14466_v15  ;;  %v19109_v15 = vld [vmem:[%s20702_s9 + $0xd34] sm:$0xf]  ;;  %v10659_v19 = vpop.f32.mrf.mxu2  ;;  %v15783_v63 = vld [vmem:[%s20702_s9 + $0x18e8] sm:$0xf0]  ;;  %v16383_v25 = vld [vmem:[%s20702_s9 + $0x1d98] sm:$0xf0] }
 0x382   : > { %10898 = vmatpush.bf16.msrb.mxu1 %v14786_v4  ;;  %v14623_v4 = vld [vmem:[%s20702_s9 + $0xfd8] sm:$0xf0]  ;;  %v10660_v7 = vadd.f32 %v10659_v19, %v10647_v59  ;;  %v14306_v14 = vor.u32 %v19109_v15, %v14303_v3  ;;  %v10672_v20 = vpop.f32.mrf.mxu3  ;;  %v10648_v0 = vpop.f32.mrf.mxu1  ;;  %v19559_v59 = vld [vmem:[%s20702_s9 + $0x1b44] sm:$0xf]  ;;  %v19329_v15 = vld [vmem:[%s20702_s9 + $0x1414] sm:$0xf] }
 0x383   : > { %10911 = vmatpush.bf16.msrb.mxu2 %v15106_v5  ;;  %v19269_v5 = vld [vmem:[%s20702_s9 + $0x1234] sm:$0xf]  ;;  %v14626_v9 = vor.u32 %v19189_v16, %v14623_v4  ;;  %v15183_v3 = vld [vmem:[%s20702_s9 + $0x1438] sm:$0xf0]  ;;  %v14546_v16 = vor.u32 %v19169_v31, %v14543_v54  ;;  %v14866_v4 = vor.u32 %v19249_v39, %v14863_v57  ;;  %v19459_v0 = vld [vmem:[%s20702_s9 + $0x1824] sm:$0xf] }
 0x384   : > { %10924 = vmatpush.bf16.msrb.mxu3 %v15426_v40  ;;  %v15263_v40 = vld [vmem:[%s20702_s9 + $0x14d8] sm:$0xf0]  ;;  %v14946_v41 = vor.u32 %v19269_v5, %v14943_v10  ;;  %v19719_v5 = vld [vmem:[%s20702_s9 + $0x2044] sm:$0xf]  ;;  %v16743_v10 = vld [vmem:[%s20702_s9 + $0x2068] sm:$0xf0] }
 0x385   : > { %10886 = vmatpush.bf16.msrb.mxu0 %v14426_v26  ;;  %v10635_v26 = vpop.f32.mrf.mxu0  ;;  %v16703_v23 = vld [vmem:[%s20702_s9 + $0x2018] sm:$0xf0]  ;;  %v16663_v31 = vld [vmem:[%s20702_s9 + $0x1fc8] sm:$0xf0]  ;;  %v19449_v57 = vld [vmem:[%s20702_s9 + $0x17d4] sm:$0xf] }
 0x386   : > { %10899 = vmatpush.bf16.msrb.mxu1 %v14746_v17  ;;  %v19099_v17 = vld [vmem:[%s20702_s9 + $0xce4] sm:$0xf]  ;;  %v15743_v26 = vld [vmem:[%s20702_s9 + $0x1898] sm:$0xf0] }
 0x387   : > { %10912 = vmatpush.bf16.msrb.mxu2 %v15066_v24  ;;  %v14263_v24 = vld [vmem:[%s20702_s9 + $0xd08] sm:$0xf0] }
 0x388   : > { %10925 = vmatpush.bf16.msrb.mxu3 %v15386_v11  ;;  %v22674_v11 = vadd.f32 %v10672_v20, %v10660_v7  ;;  %v14266_v47 = vor.u32 %v19099_v17, %v14263_v24  ;;  %v19469_v7 = vld [vmem:[%s20702_s9 + $0x1874] sm:$0xf]  ;;  %v16746_v17 = vor.u32 %v19719_v5, %v16743_v10 }
 0x389   : > { %10887 = vmatpush.bf16.msrb.mxu0 %v14386_v30  ;;  %v15266_v30 = vor.u32 %v19349_v13, %v15263_v40  ;;  %v10661_v8 = vpop.f32.mrf.mxu2  ;;  %v15186_v40 = vor.u32 %v19329_v15, %v15183_v3  ;;  %v19629_v24 = vld [vmem:[%s20702_s9 + $0x1d74] sm:$0xf]  ;;  %v15746_v29 = vor.u32 %v19469_v7, %v15743_v26  ;;  %v15943_v7 = vld [vmem:[%s20702_s9 + $0x1a28] sm:$0xf0]  ;;  %v19679_v26 = vld [vmem:[%s20702_s9 + $0x1f04] sm:$0xf] }
 0x38a   : > { %10900 = vmatpush.bf16.msrb.mxu1 %v14706_v38  ;;  %v19089_v38 = vld [vmem:[%s20702_s9 + $0xc94] sm:$0xf]  ;;  %v16303_v8 = vld [vmem:[%s20702_s9 + $0x1cf8] sm:$0xf0] }
 0x38b   : > { %10913 = vmatpush.bf16.msrb.mxu2 %v15026_v53  ;;  %v14223_v53 = vld [vmem:[%s20702_s9 + $0xcb8] sm:$0xf0]  ;;  %v19709_v20 = vld [vmem:[%s20702_s9 + $0x1ff4] sm:$0xf] }
 0x38c   : > { %10926 = vmatpush.bf16.msrb.mxu3 %v15346_v6  ;;  %v15226_v6 = vor.u32 %v19339_v2, %v15223_v33  ;;  %v15703_v2 = vld [vmem:[%s20702_s9 + $0x1848] sm:$0xf0] }
 0x38d   : > { %10888 = vmatpush.bf16.msrb.mxu0 %v14346_v18  ;;  %v16103_v18 = vld [vmem:[%s20702_s9 + $0x1b68] sm:$0xf0]  ;;  %v15706_v54 = vor.u32 %v19459_v0, %v15703_v2  ;;  %v16223_v2 = vld [vmem:[%s20702_s9 + $0x1c58] sm:$0xf0] }
 0x38e   : > { %10901 = vmatpush.bf16.msrb.mxu1 %v14666_v1  ;;  %v14226_v1 = vor.u32 %v19089_v38, %v14223_v53  ;;  %v16106_v19 = vor.u32 %v19559_v59, %v16103_v18  ;;  %v16023_v33 = vld [vmem:[%s20702_s9 + $0x1ac8] sm:$0xf0]  ;;  %v16706_v38 = vor.u32 %v19709_v20, %v16703_v23  ;;  %v19619_v53 = vld [vmem:[%s20702_s9 + $0x1d24] sm:$0xf]  ;;  %v15983_v59 = vld [vmem:[%s20702_s9 + $0x1a78] sm:$0xf0] }
 0x38f   : > { %10914 = vmatpush.bf16.msrb.mxu2 %v14986_v58  ;;  %v16423_v58 = vld [vmem:[%s20702_s9 + $0x1de8] sm:$0xf0]  ;;  %v15583_v20 = vld [vmem:[%s20702_s9 + $0x1758] sm:$0xf0]  ;;  %v19509_v23 = vld [vmem:[%s20702_s9 + $0x19b4] sm:$0xf] }
 0x390   : > { %10927 = vmatpush.bf16.msrb.mxu3 %v15306_v12  ;;  %v15786_v12 = vor.u32 %v19479_v60, %v15783_v63  ;;  %v16426_v13 = vor.u32 %v19639_v62, %v16423_v58  ;;  %v15663_v63 = vld [vmem:[%s20702_s9 + $0x17f8] sm:$0xf0]  ;;  %v19609_v62 = vld [vmem:[%s20702_s9 + $0x1cd4] sm:$0xf] }
 0x391   : > { %10889 = vmatpush.bf16.msrb.mxu0 %v14306_v14  ;;  %v10674_v14 = vpop.f32.mrf.mxu3  ;;  %v16623_v58 = vld [vmem:[%s20702_s9 + $0x1f78] sm:$0xf0]  ;;  %v15666_v3 = vor.u32 %v19449_v57, %v15663_v63  ;;  %v16306_v5 = vor.u32 %v19609_v62, %v16303_v8  ;;  %v19499_v57 = vld [vmem:[%s20702_s9 + $0x1964] sm:$0xf]  ;;  %v16503_v8 = vld [vmem:[%s20702_s9 + $0x1e88] sm:$0xf0] }
 0x392   : > { %10902 = vmatpush.bf16.msrb.mxu1 %v14626_v9  ;;  %v19549_v9 = vld [vmem:[%s20702_s9 + $0x1af4] sm:$0xf]  ;;  %v19659_v62 = vld [vmem:[%s20702_s9 + $0x1e64] sm:$0xf] }
 0x393   : > { %10915 = vmatpush.bf16.msrb.mxu2 %v14946_v41  ;;  %v16063_v41 = vld [vmem:[%s20702_s9 + $0x1b18] sm:$0xf0] }
 0x394   : > { %10928 = vmatpush.bf16.msrb.mxu3 %v15266_v30  ;;  %v16066_v46 = vor.u32 %v19549_v9, %v16063_v41  ;;  %v16386_v30 = vor.u32 %v19629_v24, %v16383_v25  ;;  %v16583_v9 = vld [vmem:[%s20702_s9 + $0x1f28] sm:$0xf0]  ;;  %v19429_v24 = vld [vmem:[%s20702_s9 + $0x1734] sm:$0xf] }
 0x395   : > { %10890 = vmatpush.bf16.msrb.mxu0 %v14266_v47  ;;  %v19539_v47 = vld [vmem:[%s20702_s9 + $0x1aa4] sm:$0xf]  ;;  %v16586_v0 = vor.u32 %v19679_v26, %v16583_v9 }
 0x396   : > { %10903 = vmatpush.bf16.msrb.mxu1 %v14586_v32  ;;  %v16343_v32 = vld [vmem:[%s20702_s9 + $0x1d48] sm:$0xf0]  ;;  %v16026_v39 = vor.u32 %v19539_v47, %v16023_v33  ;;  %v19669_v47 = vld [vmem:[%s20702_s9 + $0x1eb4] sm:$0xf]  ;;  %v16543_v33 = vld [vmem:[%s20702_s9 + $0x1ed8] sm:$0xf0] }
 0x397   : > { %10916 = vmatpush.bf16.msrb.mxu2 %v14906_v52  ;;  %v19699_v52 = vld [vmem:[%s20702_s9 + $0x1fa4] sm:$0xf]  ;;  %v16346_v60 = vor.u32 %v19619_v53, %v16343_v32  ;;  %v15586_v53 = vor.u32 %v19429_v24, %v15583_v20  ;;  %v17703_v24 = vld [vmem:[%s20702_s9 + $0x27e8] sm:$0xf0] }
 0x398   : > { %10929 = vmatpush.bf16.msrb.mxu3 %v15226_v6  ;;  %v19529_v6 = vld [vmem:[%s20702_s9 + $0x1a54] sm:$0xf]  ;;  %v16666_v18 = vor.u32 %v19699_v52, %v16663_v31  ;;  %v19419_v52 = vld [vmem:[%s20702_s9 + $0x16e4] sm:$0xf] }
 0x399   : > { %10891 = vmatpush.bf16.msrb.mxu0 %v14226_v1  ;;  %v19689_v1 = vld [vmem:[%s20702_s9 + $0x1f54] sm:$0xf]  ;;  %v22722_v15 = vpop.f32.mrf.mxu0  ;;  %v19879_v26 = vld [vmem:[%s20702_s9 + $0x2544] sm:$0xf] }
 0x39a   : > { %10904 = vmatpush.bf16.msrb.mxu1 %v14546_v16  ;;  %v15986_v16 = vor.u32 %v19529_v6, %v15983_v59  ;;  %v22725_v10 = vpop.f32.mrf.mxu1  ;;  %v16626_v14 = vor.u32 %v19689_v1, %v16623_v58  ;;  %v16546_v6 = vor.u32 %v19669_v47, %v16543_v33  ;;  %v19579_v59 = vld [vmem:[%s20702_s9 + $0x1be4] sm:$0xf]  ;;  %v18023_v33 = vld [vmem:[%s20702_s9 + $0x2a68] sm:$0xf0] }
 0x39b   : > { %10917 = vmatpush.bf16.msrb.mxu2 %v14866_v4  ;;  %v19439_v4 = vld [vmem:[%s20702_s9 + $0x1784] sm:$0xf] }
 0x39c   : > { %10930 = vmatpush.bf16.msrb.mxu3 %v15186_v40  ;;  %10892 = vmatmul.bf16.vlgmr.msrb.gmra.mxu0 %v20895_v55  ;;  %v16263_v40 = vld [vmem:[%s20702_s9 + $0x1ca8] sm:$0xf0]  ;;  %v20039_v47 = vld [vmem:[%s20702_s9 + $0x2a44] sm:$0xf] }
 0x39d   : > { %10936 = vmatpush.bf16.msra.mxu0 %v15786_v12  ;;  %10905 = vmatmul.bf16.vlgmr.msrb.gmra.mxu1 %v20891_v51  ;;  %v15623_v12 = vld [vmem:[%s20702_s9 + $0x17a8] sm:$0xf0] }
 0x39e   : > { %10949 = vmatpush.bf16.msra.mxu1 %v16106_v19  ;;  %10918 = vmatmul.bf16.vlgmr.msrb.gmra.mxu2 %v20901_v61  ;;  %v19519_v19 = vld [vmem:[%s20702_s9 + $0x1a04] sm:$0xf]  ;;  %v15626_v41 = vor.u32 %v19439_v4, %v15623_v12  ;;  %v19489_v4 = vld [vmem:[%s20702_s9 + $0x1914] sm:$0xf]  ;;  %v15823_v12 = vld [vmem:[%s20702_s9 + $0x1938] sm:$0xf0] }
 0x39f   : > { %10962 = vmatpush.bf16.msra.mxu2 %v16426_v13  ;;  %10931 = vmatmul.bf16.vlgmr.msrb.gmra.mxu3 %v20964_v36  ;;  %v19599_v13 = vld [vmem:[%s20702_s9 + $0x1c84] sm:$0xf]  ;;  %v15826_v20 = vor.u32 %v19489_v4, %v15823_v12  ;;  %v17303_v4 = vld [vmem:[%s20702_s9 + $0x24c8] sm:$0xf0] }
 0x3a0   : > { %10975 = vmatpush.bf16.msra.mxu3 %v16746_v17  ;;  %v15946_v17 = vor.u32 %v19519_v19, %v15943_v7  ;;  %v16266_v25 = vor.u32 %v19599_v13, %v16263_v40  ;;  %v19569_v19 = vld [vmem:[%s20702_s9 + $0x1b94] sm:$0xf]  ;;  %v16143_v7 = vld [vmem:[%s20702_s9 + $0x1bb8] sm:$0xf0]  ;;  %v19799_v13 = vld [vmem:[%s20702_s9 + $0x22c4] sm:$0xf] }
 0x3a1   : > { %10937 = vmatpush.bf16.msra.mxu0 %v15746_v29  ;;  %v15903_v29 = vld [vmem:[%s20702_s9 + $0x19d8] sm:$0xf0]  ;;  %v10687_v31 = vpop.f32.mrf.mxu0  ;;  %v17063_v40 = vld [vmem:[%s20702_s9 + $0x22e8] sm:$0xf0]  ;;  %v19939_v12 = vld [vmem:[%s20702_s9 + $0x2724] sm:$0xf] }
 0x3a2   : > { %10950 = vmatpush.bf16.msra.mxu1 %v16066_v46  ;;  %v22738_v46 = vpop.f32.mrf.mxu2  ;;  %v15906_v32 = vor.u32 %v19509_v23, %v15903_v29  ;;  %v10700_v63 = vpop.f32.mrf.mxu1  ;;  %v19649_v23 = vld [vmem:[%s20702_s9 + $0x1e14] sm:$0xf]  ;;  %v16463_v29 = vld [vmem:[%s20702_s9 + $0x1e38] sm:$0xf0] }
 0x3a3   : > { %10963 = vmatpush.bf16.msra.mxu2 %v16386_v30  ;;  %v19589_v30 = vld [vmem:[%s20702_s9 + $0x1c34] sm:$0xf]  ;;  %v17023_v31 = vld [vmem:[%s20702_s9 + $0x2298] sm:$0xf0] }
 0x3a4   : > { %10976 = vmatpush.bf16.msra.mxu3 %v16706_v38  ;;  %v22744_v38 = vpop.f32.mrf.mxu3  ;;  %v19949_v63 = vld [vmem:[%s20702_s9 + $0x2774] sm:$0xf] }
 0x3a5   : > { %10938 = vmatpush.bf16.msra.mxu0 %v15706_v54  ;;  %v16226_v54 = vor.u32 %v19589_v30, %v16223_v2  ;;  %v16146_v30 = vor.u32 %v19569_v19, %v16143_v7  ;;  %v17066_v2 = vor.u32 %v19799_v13, %v17063_v40  ;;  %v17623_v19 = vld [vmem:[%s20702_s9 + $0x2748] sm:$0xf0] }
 0x3a6   : > { %10951 = vmatpush.bf16.msra.mxu1 %v16026_v39  ;;  %v15543_v39 = vld [vmem:[%s20702_s9 + $0x1708] sm:$0xf0] }
 0x3a7   : > { %10964 = vmatpush.bf16.msra.mxu2 %v16346_v60  ;;  %v15863_v60 = vld [vmem:[%s20702_s9 + $0x1988] sm:$0xf0]  ;;  %v15546_v1 = vor.u32 %v19419_v52, %v15543_v39  ;;  %v19789_v52 = vld [vmem:[%s20702_s9 + $0x2274] sm:$0xf] }
 0x3a8   : > { %10977 = vmatpush.bf16.msra.mxu3 %v16666_v18  ;;  %v16183_v18 = vld [vmem:[%s20702_s9 + $0x1c08] sm:$0xf0]  ;;  %v15866_v58 = vor.u32 %v19499_v57, %v15863_v60  ;;  %v19869_v39 = vld [vmem:[%s20702_s9 + $0x24f4] sm:$0xf]  ;;  %v17343_v57 = vld [vmem:[%s20702_s9 + $0x2518] sm:$0xf0]  ;;  %v18026_v60 = vor.u32 %v20039_v47, %v18023_v33 }
 0x3a9   : > { %10939 = vmatpush.bf16.msra.mxu0 %v15666_v3  ;;  %v19409_v3 = vld [vmem:[%s20702_s9 + $0x1694] sm:$0xf]  ;;  %v17943_v13 = vld [vmem:[%s20702_s9 + $0x29c8] sm:$0xf0]  ;;  %v19759_v33 = vld [vmem:[%s20702_s9 + $0x2184] sm:$0xf] }
 0x3aa   : > { %10952 = vmatpush.bf16.msra.mxu1 %v15986_v16  ;;  %v15503_v16 = vld [vmem:[%s20702_s9 + $0x16b8] sm:$0xf0]  ;;  %v10713_v9 = vpop.f32.mrf.mxu2 }
 0x3ab   : > { %10965 = vmatpush.bf16.msra.mxu2 %v16306_v5  ;;  %v16186_v5 = vor.u32 %v19579_v59, %v16183_v18  ;;  %v17026_v59 = vor.u32 %v19789_v52, %v17023_v31  ;;  %v20029_v18 = vld [vmem:[%s20702_s9 + $0x29f4] sm:$0xf]  ;;  %v16943_v9 = vld [vmem:[%s20702_s9 + $0x21f8] sm:$0xf0]  ;;  %v19839_v31 = vld [vmem:[%s20702_s9 + $0x2404] sm:$0xf] }
 0x3ac   : > { %10978 = vmatpush.bf16.msra.mxu3 %v16626_v14  ;;  %v16506_v14 = vor.u32 %v19659_v62, %v16503_v8  ;;  %v17983_v62 = vld [vmem:[%s20702_s9 + $0x2a18] sm:$0xf0]  ;;  %v17346_v8 = vor.u32 %v19869_v39, %v17343_v57  ;;  %v19919_v57 = vld [vmem:[%s20702_s9 + $0x2684] sm:$0xf] }
 0x3ad   : > { %10940 = vmatpush.bf16.msra.mxu0 %v15626_v41  ;;  %v17383_v41 = vld [vmem:[%s20702_s9 + $0x2568] sm:$0xf0] }
 0x3ae   : > { %10953 = vmatpush.bf16.msra.mxu1 %v15946_v17  ;;  %v19959_v17 = vld [vmem:[%s20702_s9 + $0x27c4] sm:$0xf] }
 0x3af   : > { %10966 = vmatpush.bf16.msra.mxu2 %v16266_v25  ;;  %v15506_v25 = vor.u32 %v19409_v3, %v15503_v16  ;;  %v19859_v16 = vld [vmem:[%s20702_s9 + $0x24a4] sm:$0xf] }
 0x3b0   : > { %10979 = vmatpush.bf16.msra.mxu3 %v16586_v0  ;;  %v10726_v0 = vpop.f32.mrf.mxu3  ;;  %v17306_v40 = vor.u32 %v19859_v16, %v17303_v4 }
 0x3b1   : > { %10941 = vmatpush.bf16.msra.mxu0 %v15586_v53  ;;  %v17386_v53 = vor.u32 %v19879_v26, %v17383_v41  ;;  %v19769_v26 = vld [vmem:[%s20702_s9 + $0x21d4] sm:$0xf]  ;;  %v17626_v41 = vor.u32 %v19939_v12, %v17623_v19  ;;  %v17503_v12 = vld [vmem:[%s20702_s9 + $0x2658] sm:$0xf0]  ;;  %v10686_v19 = vadd.f32 %v22722_v15, %v22674_v11  ;;  %v19819_v11 = vld [vmem:[%s20702_s9 + $0x2364] sm:$0xf] }
 0x3b2   : > { %10954 = vmatpush.bf16.msra.mxu1 %v15906_v32  ;;  %v17706_v32 = vor.u32 %v19959_v17, %v17703_v24  ;;  %v19849_v17 = vld [vmem:[%s20702_s9 + $0x2454] sm:$0xf]  ;;  %v17263_v24 = vld [vmem:[%s20702_s9 + $0x2478] sm:$0xf0]  ;;  %v17143_v15 = vld [vmem:[%s20702_s9 + $0x2388] sm:$0xf0] }
 0x3b3   : > { %10967 = vmatpush.bf16.msra.mxu2 %v16226_v54  ;;  %v16466_v54 = vor.u32 %v19649_v23, %v16463_v29  ;;  %v17583_v23 = vld [vmem:[%s20702_s9 + $0x26f8] sm:$0xf0]  ;;  %v16946_v29 = vor.u32 %v19769_v26, %v16943_v9  ;;  %v20009_v0 = vld [vmem:[%s20702_s9 + $0x2954] sm:$0xf]  ;;  %v17266_v47 = vor.u32 %v19849_v17, %v17263_v24  ;;  %v19739_v9 = vld [vmem:[%s20702_s9 + $0x20e4] sm:$0xf] }
 0x3b4   : > { %10980 = vmatpush.bf16.msra.mxu3 %v16546_v6  ;;  %v17663_v6 = vld [vmem:[%s20702_s9 + $0x2798] sm:$0xf0] }
 0x3b5   : > { %10942 = vmatpush.bf16.msra.mxu0 %v15546_v1  ;;  %v19779_v1 = vld [vmem:[%s20702_s9 + $0x2224] sm:$0xf]  ;;  %v17666_v3 = vor.u32 %v19949_v63, %v17663_v6 }
 0x3b6   : > { %10955 = vmatpush.bf16.msra.mxu1 %v15866_v58  ;;  %v16983_v58 = vld [vmem:[%s20702_s9 + $0x2248] sm:$0xf0]  ;;  %v19999_v6 = vld [vmem:[%s20702_s9 + $0x2904] sm:$0xf] }
 0x3b7   : > { %10968 = vmatpush.bf16.msra.mxu2 %v16186_v5  ;;  %v17986_v5 = vor.u32 %v20029_v18, %v17983_v62  ;;  %v16986_v7 = vor.u32 %v19779_v1, %v16983_v58  ;;  %v19749_v62 = vld [vmem:[%s20702_s9 + $0x2134] sm:$0xf] }
 0x3b8   : > { %10981 = vmatpush.bf16.msra.mxu3 %v16506_v14  ;;  %v20019_v14 = vld [vmem:[%s20702_s9 + $0x29a4] sm:$0xf]  ;;  %v19829_v58 = vld [vmem:[%s20702_s9 + $0x23b4] sm:$0xf] }
 0x3b9   : > { %10943 = vmatpush.bf16.msra.mxu0 %v15506_v25  ;;  %v17946_v25 = vor.u32 %v20019_v14, %v17943_v13  ;;  %v19989_v14 = vld [vmem:[%s20702_s9 + $0x28b4] sm:$0xf]  ;;  %v17823_v13 = vld [vmem:[%s20702_s9 + $0x28d8] sm:$0xf0] }
 0x3ba   : > { %10956 = vmatpush.bf16.msra.mxu1 %v15826_v20  ;;  %v19929_v20 = vld [vmem:[%s20702_s9 + $0x26d4] sm:$0xf]  ;;  %v22802_v52 = vpop.f32.mrf.mxu1 }
 0x3bb   : > { %10969 = vmatpush.bf16.msra.mxu2 %v16146_v30  ;;  %v17903_v30 = vld [vmem:[%s20702_s9 + $0x2978] sm:$0xf0] }
 0x3bc   : > { %10982 = vmatpush.bf16.msra.mxu3 %v16466_v54  ;;  %10944 = vmatmul.bf16.vlgmr.msra.gmra.mxu0 %v20971_v42  ;;  %v17223_v54 = vld [vmem:[%s20702_s9 + $0x2428] sm:$0xf0]  ;;  %v17906_v39 = vor.u32 %v20009_v0, %v17903_v30  ;;  %v19979_v0 = vld [vmem:[%s20702_s9 + $0x2864] sm:$0xf]  ;;  %v10699_v30 = vadd.f32 %v22725_v10, %v10686_v19 }
 0x3bd   : > { %10988 = vmatpush.bf16.msrb.mxu0 %v17066_v2  ;;  %10957 = vmatmul.bf16.vlgmr.msra.gmra.mxu1 %v20966_v37  ;;  %v22798_v2 = vpop.f32.mrf.mxu0  ;;  %v17226_v18 = vor.u32 %v19839_v31, %v17223_v54  ;;  %v17146_v31 = vor.u32 %v19819_v11, %v17143_v15  ;;  %v19809_v54 = vld [vmem:[%s20702_s9 + $0x2314] sm:$0xf]  ;;  %v18303_v15 = vld [vmem:[%s20702_s9 + $0x2c98] sm:$0xf0] }
 0x3be   : > { %11001 = vmatpush.bf16.msrb.mxu1 %v17386_v53  ;;  %10970 = vmatmul.bf16.vlgmr.msra.gmra.mxu2 %v20973_v43  ;;  %v16903_v53 = vld [vmem:[%s20702_s9 + $0x21a8] sm:$0xf0]  ;;  %v20109_v11 = vld [vmem:[%s20702_s9 + $0x2c74] sm:$0xf] }
 0x3bf   : > { %11014 = vmatpush.bf16.msrb.mxu2 %v17706_v32  ;;  %10983 = vmatmul.bf16.vlgmr.msra.gmra.mxu3 %v21042_v34  ;;  %v17586_v32 = vor.u32 %v19929_v20, %v17583_v23  ;;  %v16906_v63 = vor.u32 %v19759_v33, %v16903_v53  ;;  %v17826_v20 = vor.u32 %v19989_v14, %v17823_v13  ;;  %v19899_v23 = vld [vmem:[%s20702_s9 + $0x25e4] sm:$0xf]  ;;  %v17783_v33 = vld [vmem:[%s20702_s9 + $0x2888] sm:$0xf0]  ;;  %v19729_v53 = vld [vmem:[%s20702_s9 + $0x2094] sm:$0xf] }
 0x3c0   : > { %11027 = vmatpush.bf16.msrb.mxu3 %v18026_v60  ;;  %v17543_v60 = vld [vmem:[%s20702_s9 + $0x26a8] sm:$0xf0]  ;;  %v18845_v14 = vld [vmem:[%s20702_s9 + $0x4ec] sm:$0xf0] }
 0x3c1   : > { %10989 = vmatpush.bf16.msrb.mxu0 %v17026_v59  ;;  %v17863_v59 = vld [vmem:[%s20702_s9 + $0x2928] sm:$0xf0]  ;;  %v17546_v1 = vor.u32 %v19919_v57, %v17543_v60  ;;  %v22814_v16 = vpop.f32.mrf.mxu2  ;;  %v19889_v57 = vld [vmem:[%s20702_s9 + $0x2594] sm:$0xf]  ;;  %v10712_v60 = vadd.f32 %v22738_v46, %v10699_v30  ;;  %v17743_v46 = vld [vmem:[%s20702_s9 + $0x2838] sm:$0xf0] }
 0x3c2   : > { %11002 = vmatpush.bf16.msrb.mxu1 %v17346_v8  ;;  %v16863_v8 = vld [vmem:[%s20702_s9 + $0x2158] sm:$0xf0]  ;;  %v17866_v4 = vor.u32 %v19999_v6, %v17863_v59  ;;  %v20119_v6 = vld [vmem:[%s20702_s9 + $0x2cc4] sm:$0xf]  ;;  %v18343_v59 = vld [vmem:[%s20702_s9 + $0x2ce8] sm:$0xf0] }
 0x3c3   : > { %11015 = vmatpush.bf16.msrb.mxu2 %v17666_v3  ;;  %v17183_v3 = vld [vmem:[%s20702_s9 + $0x23d8] sm:$0xf0]  ;;  %v18346_v19 = vor.u32 %v20119_v6, %v18343_v59  ;;  %v13189_v30 = vld [vmem:[%s20702_s9 + $0x478] sm:$0xf]  ;;  %v13149_v6 = vld [vmem:[%s20702_s9 + $0x428] sm:$0xf] }
 0x3c4   : > { %11028 = vmatpush.bf16.msrb.mxu3 %v17986_v5  ;;  %v19909_v5 = vld [vmem:[%s20702_s9 + $0x2634] sm:$0xf]  ;;  %v17186_v26 = vor.u32 %v19829_v58, %v17183_v3  ;;  %v18825_v59 = vld [vmem:[%s20702_s9 + $0x44c] sm:$0xf0] }
 0x3c5   : > { %10990 = vmatpush.bf16.msrb.mxu0 %v16986_v7  ;;  %v16866_v7 = vor.u32 %v19749_v62, %v16863_v8  ;;  %v10739_v17 = vpop.f32.mrf.mxu0  ;;  %v17506_v24 = vor.u32 %v19909_v5, %v17503_v12  ;;  %v20199_v62 = vld [vmem:[%s20702_s9 + $0x2f44] sm:$0xf]  ;;  %v18663_v8 = vld [vmem:[%s20702_s9 + $0x2f68] sm:$0xf0]  ;;  %v19969_v5 = vld [vmem:[%s20702_s9 + $0x2814] sm:$0xf] }
 0x3c6   : > { %11003 = vmatpush.bf16.msrb.mxu1 %v17306_v40  ;;  %v22822_v40 = vpop.f32.mrf.mxu3 }
 0x3c7   : > { %11016 = vmatpush.bf16.msrb.mxu2 %v17626_v41  ;;  %v16823_v41 = vld [vmem:[%s20702_s9 + $0x2108] sm:$0xf0] }
 0x3c8   : > { %11029 = vmatpush.bf16.msrb.mxu3 %v17946_v25  ;;  %v10752_v25 = vpop.f32.mrf.mxu1 }
 0x3c9   : > { %10991 = vmatpush.bf16.msrb.mxu0 %v16946_v29  ;;  %v17463_v29 = vld [vmem:[%s20702_s9 + $0x2608] sm:$0xf0]  ;;  %v10765_v58 = vpop.f32.mrf.mxu2  ;;  %v20189_v25 = vld [vmem:[%s20702_s9 + $0x2ef4] sm:$0xf] }
 0x3ca   : > { %11004 = vmatpush.bf16.msrb.mxu1 %v17266_v47  ;;  %v16826_v47 = vor.u32 %v19739_v9, %v16823_v41  ;;  %v17466_v10 = vor.u32 %v19899_v23, %v17463_v29  ;;  %v18666_v41 = vor.u32 %v20199_v62, %v18663_v8  ;;  %v18623_v29 = vld [vmem:[%s20702_s9 + $0x2f18] sm:$0xf0] }
 0x3cb   : > { %11017 = vmatpush.bf16.msrb.mxu2 %v17586_v32  ;;  %v16783_v32 = vld [vmem:[%s20702_s9 + $0x20b8] sm:$0xf0] }
 0x3cc   : > { %11030 = vmatpush.bf16.msrb.mxu3 %v17906_v39  ;;  %v17103_v39 = vld [vmem:[%s20702_s9 + $0x2338] sm:$0xf0]  ;;  %v16786_v3 = vor.u32 %v19729_v53, %v16783_v32  ;;  %v20099_v32 = vld [vmem:[%s20702_s9 + $0x2c24] sm:$0xf] }
 0x3cd   : > { %10992 = vmatpush.bf16.msrb.mxu0 %v16906_v63  ;;  %v17423_v63 = vld [vmem:[%s20702_s9 + $0x25b8] sm:$0xf0]  ;;  %v17106_v12 = vor.u32 %v19809_v54, %v17103_v39  ;;  %v20179_v54 = vld [vmem:[%s20702_s9 + $0x2ea4] sm:$0xf] }
 0x3ce   : > { %11005 = vmatpush.bf16.msrb.mxu1 %v17226_v18  ;;  %v17786_v18 = vor.u32 %v19979_v0, %v17783_v33  ;;  %v10778_v13 = vpop.f32.mrf.mxu3  ;;  %v17426_v9 = vor.u32 %v19889_v57, %v17423_v63  ;;  %v18755_v0 = vld [vmem:[%s20702_s9 + $0x21c] sm:$0xf0]  ;;  %v18306_v33 = vor.u32 %v20109_v11, %v18303_v15  ;;  %v18745_v63 = vld [vmem:[%s20702_s9 + $0x1cc] sm:$0xf0]  ;;  %v18223_v58 = vld [vmem:[%s20702_s9 + $0x2bf8] sm:$0xf0] }
 0x3cf   : > { %11018 = vmatpush.bf16.msrb.mxu2 %v17546_v1  ;;  %v12909_v1 = vld [vmem:[%s20702_s9 + $0x248] sm:$0xf] }
 0x3d0   : > { %11031 = vmatpush.bf16.msrb.mxu3 %v17866_v4  ;;  %v18765_v4 = vld [vmem:[%s20702_s9 + $0x26c] sm:$0xf0] }
 0x3d1   : > { %10993 = vmatpush.bf16.msrb.mxu0 %v16866_v7  ;;  %v13229_v7 = vld [vmem:[%s20702_s9 + $0x4c8] sm:$0xf]  ;;  %v12910_v17 = vor.u32 %v18765_v4, %v12909_v1  ;;  %v20089_v1 = vld [vmem:[%s20702_s9 + $0x2bd4] sm:$0xf]  ;;  %v13150_v4 = vor.u32 %v18825_v59, %v13149_v6  ;;  %v18795_v6 = vld [vmem:[%s20702_s9 + $0x35c] sm:$0xf0] }
 0x3d2   : > { %11006 = vmatpush.bf16.msrb.mxu1 %v17186_v26  ;;  %v10725_v26 = vadd.f32 %v22744_v38, %v10712_v60  ;;  %v13230_v23 = vor.u32 %v18845_v14, %v13229_v7  ;;  %v12869_v38 = vld [vmem:[%s20702_s9 + $0x1f8] sm:$0xf]  ;;  %v18583_v60 = vld [vmem:[%s20702_s9 + $0x2ec8] sm:$0xf0]  ;;  %v18226_v14 = vor.u32 %v20089_v1, %v18223_v58  ;;  %v20139_v58 = vld [vmem:[%s20702_s9 + $0x2d64] sm:$0xf] }
 0x3d3   : > { %11019 = vmatpush.bf16.msrb.mxu2 %v17506_v24  ;;  %v17746_v24 = vor.u32 %v19969_v5, %v17743_v46  ;;  %v12870_v53 = vor.u32 %v18755_v0, %v12869_v38  ;;  %v18586_v62 = vor.u32 %v20179_v54, %v18583_v60  ;;  %v18543_v5 = vld [vmem:[%s20702_s9 + $0x2e78] sm:$0xf0]  ;;  %v18735_v46 = vld [vmem:[%s20702_s9 + $0x17c] sm:$0xf0]  ;;  %v18805_v38 = vld [vmem:[%s20702_s9 + $0x3ac] sm:$0xf0] }
 0x3d4   : > { %11032 = vmatpush.bf16.msrb.mxu3 %v17826_v20  ;;  %v10738_v20 = vadd.f32 %v22798_v2, %v10725_v26  ;;  %v18626_v2 = vor.u32 %v20189_v25, %v18623_v29  ;;  %v18503_v25 = vld [vmem:[%s20702_s9 + $0x2e28] sm:$0xf0]  ;;  %v13069_v29 = vld [vmem:[%s20702_s9 + $0x388] sm:$0xf]  ;;  %v18463_v54 = vld [vmem:[%s20702_s9 + $0x2dd8] sm:$0xf0] }
 0x3d5   : > { %10994 = vmatpush.bf16.msrb.mxu0 %v16826_v47  ;;  %v18835_v47 = vld [vmem:[%s20702_s9 + $0x49c] sm:$0xf0]  ;;  %v381_v60 = vld [vmem:[#allocation2 + $0x48] sm:$0xff]  ;;  %v18103_v1 = vld [vmem:[%s20702_s9 + $0x2b08] sm:$0xf0] }
 0x3d6   : > { %11007 = vmatpush.bf16.msrb.mxu1 %v17146_v31  ;;  %v18263_v31 = vld [vmem:[%s20702_s9 + $0x2c48] sm:$0xf0]  ;;  %v10751_v39 = vadd.f32 %v22802_v52, %v10738_v20  ;;  %v13190_v57 = vor.u32 %v18835_v47, %v13189_v30  ;;  %v12749_v20 = vld [vmem:[%s20702_s9 + $0x108] sm:$0xf] }
 0x3d7   : > { %11020 = vmatpush.bf16.msrb.mxu2 %v17466_v10  ;;  %v12829_v10 = vld [vmem:[%s20702_s9 + $0x1a8] sm:$0xf] }
 0x3d8   : > { %11033 = vmatpush.bf16.msrb.mxu3 %v17786_v18  ;;  %v10764_v52 = vadd.f32 %v22814_v16, %v10751_v39  ;;  %v18266_v18 = vor.u32 %v20099_v32, %v18263_v31  ;;  %v12830_v8 = vor.u32 %v18745_v63, %v12829_v10  ;;  %v12789_v16 = vld [vmem:[%s20702_s9 + $0x158] sm:$0xf]  ;;  %v13070_v31 = vor.u32 %v18805_v38, %v13069_v29  ;;  %v18925_v29 = vld [vmem:[%s20702_s9 + $0x76c] sm:$0xf0]  ;;  %v13869_v38 = vld [vmem:[%s20702_s9 + $0x9c8] sm:$0xf] }
 0x3d9   : > { %10995 = vmatpush.bf16.msrb.mxu0 %v16786_v3  ;;  %v20169_v3 = vld [vmem:[%s20702_s9 + $0x2e54] sm:$0xf]  ;;  %v10789_v13 = vpop.f32.mrf.mxu0  ;;  %v12709_v39 = vld [vmem:[%s20702_s9 + $0xb8] sm:$0xf] }
 0x3da   : > { %11008 = vmatpush.bf16.msrb.mxu1 %v17106_v12  ;;  %v13109_v12 = vld [vmem:[%s20702_s9 + $0x3d8] sm:$0xf]  ;;  %v10777_v7 = vadd.f32 %v22822_v40, %v10764_v52  ;;  %v18546_v26 = vor.u32 %v20169_v3, %v18543_v5  ;;  %v10802_v40 = vpop.f32.mrf.mxu1 }
 0x3db   : > { %11021 = vmatpush.bf16.msrb.mxu2 %v17426_v9  ;;  %v12790_v9 = vor.u32 %v18735_v46, %v12789_v16  ;;  %v13029_v63 = vld [vmem:[%s20702_s9 + $0x338] sm:$0xf]  ;;  %v18423_v16 = vld [vmem:[%s20702_s9 + $0x2d88] sm:$0xf0]  ;;  %v12669_v46 = vld [vmem:[%s20702_s9 + $0x68] sm:$0xf] }
 0x3dc   : > { %11034 = vmatpush.bf16.msrb.mxu3 %v17746_v24  ;;  %10996 = vmatmul.bf16.vlgmr.msrb.gmra.mxu0 %v21049_v44  ;;  %v20159_v24 = vld [vmem:[%s20702_s9 + $0x2e04] sm:$0xf]  ;;  %v10790_v11 = vadd.f32 %v10789_v13, %v10777_v7  ;;  %v13030_v5 = vor.u32 %v18795_v6, %v13029_v63  ;;  %v18785_v13 = vld [vmem:[%s20702_s9 + $0x30c] sm:$0xf0]  ;;  %v13509_v63 = vld [vmem:[%s20702_s9 + $0x6f8] sm:$0xf] }
 0x3dd   : > { %11040 = vmatpush.bf16.msra.mxu0 %v18346_v19  ;;  %11009 = vmatmul.bf16.vlgmr.msrb.gmra.mxu1 %v21044_v35  ;;  %v18815_v19 = vld [vmem:[%s20702_s9 + $0x3fc] sm:$0xf0]  ;;  %v18506_v30 = vor.u32 %v20159_v24, %v18503_v25 }
 0x3de   : > { %11053 = vmatpush.bf16.msra.mxu1 %v18666_v41  ;;  %11022 = vmatmul.bf16.vlgmr.msrb.gmra.mxu2 %v21051_v45  ;;  %v20079_v41 = vld [vmem:[%s20702_s9 + $0x2b84] sm:$0xf]  ;;  %v13110_v15 = vor.u32 %v18815_v19, %v13109_v12  ;;  %v10803_v32 = vadd.f32 %v10802_v40, %v10790_v11  ;;  %v18705_v12 = vld [vmem:[%s20702_s9 + $0x8c] sm:$0xf0]  ;;  %v20129_v11 = vld [vmem:[%s20702_s9 + $0x2d14] sm:$0xf] }
 0x3df   : > { %11066 = vmatpush.bf16.msra.mxu2 %v12910_v17  ;;  %11035 = vmatmul.bf16.vlgmr.msrb.gmra.mxu3 %v21121_v49  ;;  %v18183_v17 = vld [vmem:[%s20702_s9 + $0x2ba8] sm:$0xf0]  ;;  %v12670_v24 = vor.u32 %v18705_v12, %v12669_v46  ;;  %v18383_v40 = vld [vmem:[%s20702_s9 + $0x2d38] sm:$0xf0]  ;;  %v13469_v12 = vld [vmem:[%s20702_s9 + $0x6a8] sm:$0xf] }
 0x3e0   : > { %11079 = vmatpush.bf16.msra.mxu3 %v13230_v23  ;;  %v18725_v23 = vld [vmem:[%s20702_s9 + $0x12c] sm:$0xf0]  ;;  %v18186_v0 = vor.u32 %v20079_v41, %v18183_v17  ;;  %v18063_v41 = vld [vmem:[%s20702_s9 + $0x2ab8] sm:$0xf0]  ;;  %v18426_v17 = vor.u32 %v20139_v58, %v18423_v16  ;;  %v14149_v58 = vld [vmem:[%s20702_s9 + $0xbf8] sm:$0xf] }
 0x3e1   : > { %11041 = vmatpush.bf16.msra.mxu0 %v18306_v33  ;;  %v12750_v47 = vor.u32 %v18725_v23, %v12749_v20  ;;  %v20069_v33 = vld [vmem:[%s20702_s9 + $0x2b34] sm:$0xf]  ;;  %v10815_v10 = vpop.f32.mrf.mxu2  ;;  %v10791_v3 = vpop.f32.mrf.mxu0  ;;  %v18695_v20 = vld [vmem:[%s20702_s9 + $0x3c] sm:$0xf0]  ;;  %v13549_v23 = vld [vmem:[%s20702_s9 + $0x748] sm:$0xf] }
 0x3e2   : > { %11054 = vmatpush.bf16.msra.mxu1 %v18626_v2  ;;  %v18143_v2 = vld [vmem:[%s20702_s9 + $0x2b58] sm:$0xf0]  ;;  %v10816_v59 = vadd.f32 %v10815_v10, %v10803_v32  ;;  %v10804_v19 = vpop.f32.mrf.mxu1  ;;  %v22905_v7 = vpop.f32.mrf.mxu3  ;;  %v18775_v32 = vld [vmem:[%s20702_s9 + $0x2bc] sm:$0xf0] }
 0x3e3   : > { %11067 = vmatpush.bf16.msra.mxu2 %v12870_v53  ;;  %v20149_v53 = vld [vmem:[%s20702_s9 + $0x2db4] sm:$0xf]  ;;  %v18146_v52 = vor.u32 %v20069_v33, %v18143_v2  ;;  %v19085_v2 = vld [vmem:[%s20702_s9 + $0xc6c] sm:$0xf0]  ;;  %v19075_v3 = vld [vmem:[%s20702_s9 + $0xc1c] sm:$0xf0] }
 0x3e4   : > { %11080 = vmatpush.bf16.msra.mxu3 %v13190_v57  ;;  %v18715_v57 = vld [vmem:[%s20702_s9 + $0xdc] sm:$0xf0]  ;;  %v14150_v19 = vor.u32 %v19075_v3, %v14149_v58 }
 0x3e5   : > { %11042 = vmatpush.bf16.msra.mxu0 %v18266_v18  ;;  %v18466_v18 = vor.u32 %v20149_v53, %v18463_v54  ;;  %v12949_v53 = vld [vmem:[%s20702_s9 + $0x298] sm:$0xf] }
 0x3e6   : > { %11055 = vmatpush.bf16.msra.mxu1 %v18586_v62  ;;  %v12710_v62 = vor.u32 %v18715_v57, %v12709_v39  ;;  %v14509_v39 = vld [vmem:[%s20702_s9 + $0xec8] sm:$0xf]  ;;  %v19165_v57 = vld [vmem:[%s20702_s9 + $0xeec] sm:$0xf0] }
 0x3e7   : > { %11068 = vmatpush.bf16.msra.mxu2 %v12830_v8  ;;  %v20059_v8 = vld [vmem:[%s20702_s9 + $0x2ae4] sm:$0xf] }
 0x3e8   : > { %11081 = vmatpush.bf16.msra.mxu3 %v13150_v4  ;;  %v12058_v4 = vadd.f32 %v10816_v59, %v381_v60  ;;  %v13550_v60 = vor.u32 %v18925_v29, %v13549_v23  ;;  %v18895_v23 = vld [vmem:[%s20702_s9 + $0x67c] sm:$0xf0]  ;;  %v13749_v29 = vld [vmem:[%s20702_s9 + $0x8d8] sm:$0xf] }
 0x3e9   : > { %11043 = vmatpush.bf16.msra.mxu0 %v18226_v14  ;;  %v12989_v14 = vld [vmem:[%s20702_s9 + $0x2e8] sm:$0xf] }
 0x3ea   : > { %11056 = vmatpush.bf16.msra.mxu1 %v18546_v26  ;;  %12068 = vst [vmem:[#allocation2 + $0x48] sm:$0xff] %v12058_v4  ;;  %v18106_v26 = vor.u32 %v20059_v8, %v18103_v1  ;;  %v12990_v25 = vor.u32 %v18785_v13, %v12989_v14  ;;  %v10830_v6 = vpop.f32.mrf.mxu3  ;;  %v18995_v8 = vld [vmem:[%s20702_s9 + $0x99c] sm:$0xf0]  ;;  %v14510_v1 = vor.u32 %v19165_v57, %v14509_v39  ;;  %v14469_v4 = vld [vmem:[%s20702_s9 + $0xe78] sm:$0xf] }
 0x3eb   : > { %11069 = vmatpush.bf16.msra.mxu2 %v12790_v9  ;;  %v20049_v9 = vld [vmem:[%s20702_s9 + $0x2a94] sm:$0xf]  ;;  %v18905_v14 = vld [vmem:[%s20702_s9 + $0x6cc] sm:$0xf0]  ;;  %v13789_v13 = vld [vmem:[%s20702_s9 + $0x928] sm:$0xf] }
 0x3ec   : > { %11082 = vmatpush.bf16.msra.mxu3 %v13110_v15  ;;  %v12629_v15 = vld [vmem:[%s20702_s9 + $0x18] sm:$0xf]  ;;  %v18066_v33 = vor.u32 %v20049_v9, %v18063_v41  ;;  %v14109_v41 = vld [vmem:[%s20702_s9 + $0xba8] sm:$0xf]  ;;  %v18885_v57 = vld [vmem:[%s20702_s9 + $0x62c] sm:$0xf0] }
 0x3ed   : > { %11044 = vmatpush.bf16.msra.mxu0 %v18186_v0  ;;  %v19005_v0 = vld [vmem:[%s20702_s9 + $0x9ec] sm:$0xf0]  ;;  %v12630_v54 = vor.u32 %v18695_v20, %v12629_v15 }
 0x3ee   : > { %11057 = vmatpush.bf16.msra.mxu1 %v18506_v30  ;;  %v14189_v30 = vld [vmem:[%s20702_s9 + $0xc48] sm:$0xf]  ;;  %v13870_v10 = vor.u32 %v19005_v0, %v13869_v38  ;;  %v18975_v38 = vld [vmem:[%s20702_s9 + $0x8fc] sm:$0xf0] }
 0x3ef   : > { %11070 = vmatpush.bf16.msra.mxu2 %v12750_v47  ;;  %v10817_v47 = vpop.f32.mrf.mxu2  ;;  %v14190_v59 = vor.u32 %v19085_v2, %v14189_v30  ;;  %v14069_v30 = vld [vmem:[%s20702_s9 + $0xb58] sm:$0xf]  ;;  %v19135_v2 = vld [vmem:[%s20702_s9 + $0xdfc] sm:$0xf0] }
 0x3f0   : > { %11083 = vmatpush.bf16.msra.mxu3 %v13070_v31  ;;  %v18386_v31 = vor.u32 %v20129_v11, %v18383_v40  ;;  %v19145_v11 = vld [vmem:[%s20702_s9 + $0xe4c] sm:$0xf0]  ;;  %v13470_v40 = vor.u32 %v18905_v14, %v13469_v12  ;;  %v19055_v47 = vld [vmem:[%s20702_s9 + $0xb7c] sm:$0xf0] }
 0x3f1   : > { %11045 = vmatpush.bf16.msra.mxu0 %v18146_v52  ;;  %v12950_v52 = vor.u32 %v18775_v32, %v12949_v53  ;;  %v13750_v32 = vor.u32 %v18975_v38, %v13749_v29  ;;  %v14070_v39 = vor.u32 %v19055_v47, %v14069_v30  ;;  %v19035_v14 = vld [vmem:[%s20702_s9 + $0xadc] sm:$0xf0]  ;;  %v13949_v38 = vld [vmem:[%s20702_s9 + $0xa68] sm:$0xf] }
 0x3f2   : > { %11058 = vmatpush.bf16.msra.mxu1 %v18466_v18  ;;  %v18915_v18 = vld [vmem:[%s20702_s9 + $0x71c] sm:$0xf0] }
 0x3f3   : > { %11071 = vmatpush.bf16.msra.mxu2 %v12710_v62  ;;  %v13829_v62 = vld [vmem:[%s20702_s9 + $0x978] sm:$0xf]  ;;  %v13510_v16 = vor.u32 %v18915_v18, %v13509_v63 }
 0x3f4   : > { %11084 = vmatpush.bf16.msra.mxu3 %v13030_v5  ;;  %v19155_v5 = vld [vmem:[%s20702_s9 + $0xe9c] sm:$0xf0]  ;;  %v13830_v46 = vor.u32 %v18995_v8, %v13829_v62  ;;  %v14349_v62 = vld [vmem:[%s20702_s9 + $0xd88] sm:$0xf]  ;;  %v19125_v8 = vld [vmem:[%s20702_s9 + $0xdac] sm:$0xf0] }
 0x3f5   : > { %11046 = vmatpush.bf16.msra.mxu0 %v18106_v26  ;;  %v18985_v26 = vld [vmem:[%s20702_s9 + $0x94c] sm:$0xf0]  ;;  %v14470_v9 = vor.u32 %v19155_v5, %v14469_v4  ;;  %v18875_v5 = vld [vmem:[%s20702_s9 + $0x5dc] sm:$0xf0]  ;;  %v14350_v12 = vor.u32 %v19125_v8, %v14349_v62  ;;  %v15149_v62 = vld [vmem:[%s20702_s9 + $0x13c8] sm:$0xf] }
 0x3f6   : > { %11059 = vmatpush.bf16.msra.mxu1 %v18426_v17  ;;  %v19065_v17 = vld [vmem:[%s20702_s9 + $0xbcc] sm:$0xf0]  ;;  %v13790_v15 = vor.u32 %v18985_v26, %v13789_v13  ;;  %v14309_v13 = vld [vmem:[%s20702_s9 + $0xd38] sm:$0xf]  ;;  %v19115_v26 = vld [vmem:[%s20702_s9 + $0xd5c] sm:$0xf0] }
 0x3f7   : > { %11072 = vmatpush.bf16.msra.mxu2 %v12670_v24  ;;  %v14429_v24 = vld [vmem:[%s20702_s9 + $0xe28] sm:$0xf]  ;;  %v14110_v20 = vor.u32 %v19065_v17, %v14109_v41  ;;  %v14310_v29 = vor.u32 %v19115_v26, %v14309_v13  ;;  %v19325_v8 = vld [vmem:[%s20702_s9 + $0x13ec] sm:$0xf0] }
 0x3f8   : > { %11085 = vmatpush.bf16.msra.mxu3 %v12990_v25  ;;  %v13429_v25 = vld [vmem:[%s20702_s9 + $0x658] sm:$0xf]  ;;  %v14430_v0 = vor.u32 %v19145_v11, %v14429_v24  ;;  %v13309_v24 = vld [vmem:[%s20702_s9 + $0x568] sm:$0xf]  ;;  %v15150_v13 = vor.u32 %v19325_v8, %v15149_v62  ;;  %v19295_v62 = vld [vmem:[%s20702_s9 + $0x12fc] sm:$0xf0] }
 0x3f9   : > { %11047 = vmatpush.bf16.msra.mxu0 %v18066_v33  ;;  %v14389_v33 = vld [vmem:[%s20702_s9 + $0xdd8] sm:$0xf]  ;;  %v13430_v53 = vor.u32 %v18895_v23, %v13429_v25  ;;  %v18865_v25 = vld [vmem:[%s20702_s9 + $0x58c] sm:$0xf0] }
 0x3fa   : > { %11060 = vmatpush.bf16.msra.mxu1 %v18386_v31  ;;  %v13389_v31 = vld [vmem:[%s20702_s9 + $0x608] sm:$0xf]  ;;  %v14390_v6 = vor.u32 %v19135_v2, %v14389_v33  ;;  %v10854_v18 = vpop.f32.mrf.mxu1  ;;  %v18945_v23 = vld [vmem:[%s20702_s9 + $0x80c] sm:$0xf0]  ;;  %v15349_v8 = vld [vmem:[%s20702_s9 + $0x1558] sm:$0xf] }
 0x3fb   : > { %11073 = vmatpush.bf16.msra.mxu2 %v12630_v54  ;;  %v10841_v54 = vpop.f32.mrf.mxu0  ;;  %v13390_v58 = vor.u32 %v18885_v57, %v13389_v31  ;;  %v14269_v33 = vld [vmem:[%s20702_s9 + $0xce8] sm:$0xf]  ;;  %v19105_v2 = vld [vmem:[%s20702_s9 + $0xd0c] sm:$0xf0]  ;;  %v13589_v57 = vld [vmem:[%s20702_s9 + $0x798] sm:$0xf] }
 0x3fc   : > { %11086 = vmatpush.bf16.msra.mxu3 %v12950_v52  ;;  %11048 = vmatmul.bf16.vlgmr.msra.gmra.mxu0 %v21127_v56  ;;  %v10842_v63 = vadd.f32 %v10841_v54, %v22905_v7  ;;  %v19045_v52 = vld [vmem:[%s20702_s9 + $0xb2c] sm:$0xf0]  ;;  %v13349_v7 = vld [vmem:[%s20702_s9 + $0x5b8] sm:$0xf] }
 0x3fd   : > { %11092 = vmatpush.bf16.msrb.mxu0 %v13550_v60  ;;  %11061 = vmatmul.bf16.vlgmr.msra.gmra.mxu1 %v21123_v50  ;;  %v13709_v60 = vld [vmem:[%s20702_s9 + $0x888] sm:$0xf]  ;;  %v13350_v41 = vor.u32 %v18875_v5, %v13349_v7  ;;  %v13269_v54 = vld [vmem:[%s20702_s9 + $0x518] sm:$0xf] }
 0x3fe   : > { %11105 = vmatpush.bf16.msrb.mxu1 %v13870_v10  ;;  %11074 = vmatmul.bf16.vlgmr.msra.gmra.mxu2 %v20829_v27  ;;  %v18965_v10 = vld [vmem:[%s20702_s9 + $0x8ac] sm:$0xf0]  ;;  %v14229_v5 = vld [vmem:[%s20702_s9 + $0xc98] sm:$0xf] }
 0x3ff   : > { %11118 = vmatpush.bf16.msrb.mxu2 %v14190_v59  ;;  %11087 = vmatmul.bf16.vlgmr.msra.gmra.mxu3 %v20831_v28  ;;  %v14029_v59 = vld [vmem:[%s20702_s9 + $0xb08] sm:$0xf]  ;;  %v13710_v3 = vor.u32 %v18965_v10, %v13709_v60  ;;  %v18935_v10 = vld [vmem:[%s20702_s9 + $0x7bc] sm:$0xf0] }
 0x400   : > { %11131 = vmatpush.bf16.msrb.mxu3 %v14510_v1  ;;  %v10855_v1 = vadd.f32 %v10854_v18, %v10842_v63  ;;  %v14030_v4 = vor.u32 %v19045_v52, %v14029_v59  ;;  %v13909_v63 = vld [vmem:[%s20702_s9 + $0xa18] sm:$0xf]  ;;  %v14270_v59 = vor.u32 %v19105_v2, %v14269_v33  ;;  %v14829_v52 = vld [vmem:[%s20702_s9 + $0x1148] sm:$0xf]  ;;  %v19245_v18 = vld [vmem:[%s20702_s9 + $0x116c] sm:$0xf0] }
 0x401   : > { %11093 = vmatpush.bf16.msrb.mxu0 %v13510_v16  ;;  %v13669_v16 = vld [vmem:[%s20702_s9 + $0x838] sm:$0xf]  ;;  %v19225_v33 = vld [vmem:[%s20702_s9 + $0x10cc] sm:$0xf0]  ;;  %v15069_v2 = vld [vmem:[%s20702_s9 + $0x1328] sm:$0xf] }
 0x402   : > { %11106 = vmatpush.bf16.msrb.mxu1 %v13830_v46  ;;  %v18955_v46 = vld [vmem:[%s20702_s9 + $0x85c] sm:$0xf0]  ;;  %v10880_v30 = vpop.f32.mrf.mxu3  ;;  %v10856_v47 = vpop.f32.mrf.mxu1 }
 0x403   : > { %11119 = vmatpush.bf16.msrb.mxu2 %v14150_v19  ;;  %v13989_v19 = vld [vmem:[%s20702_s9 + $0xab8] sm:$0xf]  ;;  %v13670_v17 = vor.u32 %v18955_v46, %v13669_v16  ;;  %v19095_v16 = vld [vmem:[%s20702_s9 + $0xcbc] sm:$0xf0]  ;;  %v14749_v47 = vld [vmem:[%s20702_s9 + $0x10a8] sm:$0xf] }
 0x404   : > { %11132 = vmatpush.bf16.msrb.mxu3 %v14470_v9  ;;  %v10867_v9 = vpop.f32.mrf.mxu2 }
 0x405   : > { %11094 = vmatpush.bf16.msrb.mxu0 %v13470_v40  ;;  %v10868_v11 = vadd.f32 %v10867_v9, %v10855_v1  ;;  %v10843_v40 = vpop.f32.mrf.mxu0  ;;  %v15469_v1 = vld [vmem:[%s20702_s9 + $0x1648] sm:$0xf]  ;;  %v14789_v9 = vld [vmem:[%s20702_s9 + $0x10f8] sm:$0xf] }
 0x406   : > { %11107 = vmatpush.bf16.msrb.mxu1 %v13790_v15  ;;  %v13990_v15 = vor.u32 %v19035_v14, %v13989_v19  ;;  %v15789_v19 = vld [vmem:[%s20702_s9 + $0x18c8] sm:$0xf]  ;;  %v19485_v14 = vld [vmem:[%s20702_s9 + $0x18ec] sm:$0xf0]  ;;  %v19315_v40 = vld [vmem:[%s20702_s9 + $0x139c] sm:$0xf0] }
 0x407   : > { %11120 = vmatpush.bf16.msrb.mxu2 %v14110_v20  ;;  %v13629_v20 = vld [vmem:[%s20702_s9 + $0x7e8] sm:$0xf] }
 0x408   : > { %11133 = vmatpush.bf16.msrb.mxu3 %v14430_v0  ;;  %v19025_v0 = vld [vmem:[%s20702_s9 + $0xa8c] sm:$0xf0]  ;;  %v13630_v31 = vor.u32 %v18945_v23, %v13629_v20  ;;  %v15790_v20 = vor.u32 %v19485_v14, %v15789_v19  ;;  %v14989_v19 = vld [vmem:[%s20702_s9 + $0x1288] sm:$0xf] }
 0x409   : > { %11095 = vmatpush.bf16.msrb.mxu0 %v13430_v53  ;;  %v22978_v53 = vadd.f32 %v10880_v30, %v10868_v11  ;;  %v13950_v60 = vor.u32 %v19025_v0, %v13949_v38  ;;  %v14230_v11 = vor.u32 %v19095_v16, %v14229_v5  ;;  %v19475_v38 = vld [vmem:[%s20702_s9 + $0x189c] sm:$0xf0] }
 0x40a   : > { %11108 = vmatpush.bf16.msrb.mxu1 %v13750_v32  ;;  %v13310_v32 = vor.u32 %v18865_v25, %v13309_v24  ;;  %v10882_v24 = vpop.f32.mrf.mxu3  ;;  %v19395_v25 = vld [vmem:[%s20702_s9 + $0x161c] sm:$0xf0] }
 0x40b   : > { %11121 = vmatpush.bf16.msrb.mxu2 %v14070_v39  ;;  %v18855_v39 = vld [vmem:[%s20702_s9 + $0x53c] sm:$0xf0] }
 0x40c   : > { %11134 = vmatpush.bf16.msrb.mxu3 %v14390_v6  ;;  %v19015_v6 = vld [vmem:[%s20702_s9 + $0xa3c] sm:$0xf0]  ;;  %v13270_v7 = vor.u32 %v18855_v39, %v13269_v54  ;;  %v19385_v54 = vld [vmem:[%s20702_s9 + $0x15cc] sm:$0xf0] }
 0x40d   : > { %11096 = vmatpush.bf16.msrb.mxu0 %v13390_v58  ;;  %v19405_v58 = vld [vmem:[%s20702_s9 + $0x166c] sm:$0xf0]  ;;  %v13910_v46 = vor.u32 %v19015_v6, %v13909_v63 }
 0x40e   : > { %11109 = vmatpush.bf16.msrb.mxu1 %v13710_v3  ;;  %v10869_v3 = vpop.f32.mrf.mxu2  ;;  %v15470_v26 = vor.u32 %v19405_v58, %v15469_v1  ;;  %v19375_v1 = vld [vmem:[%s20702_s9 + $0x157c] sm:$0xf0] }
 0x40f   : > { %11122 = vmatpush.bf16.msrb.mxu2 %v14030_v4  ;;  %v13590_v4 = vor.u32 %v18935_v10, %v13589_v57  ;;  %v14750_v57 = vor.u32 %v19225_v33, %v14749_v47  ;;  %v19465_v10 = vld [vmem:[%s20702_s9 + $0x184c] sm:$0xf0]  ;;  %v15350_v16 = vor.u32 %v19375_v1, %v15349_v8  ;;  %v19355_v47 = vld [vmem:[%s20702_s9 + $0x14dc] sm:$0xf0]  ;;  %v15549_v1 = vld [vmem:[%s20702_s9 + $0x16e8] sm:$0xf] }
 0x410   : > { %11135 = vmatpush.bf16.msrb.mxu3 %v14350_v12  ;;  %v14830_v12 = vor.u32 %v19245_v18, %v14829_v52  ;;  %v19215_v52 = vld [vmem:[%s20702_s9 + $0x107c] sm:$0xf0]  ;;  %v15029_v18 = vld [vmem:[%s20702_s9 + $0x12d8] sm:$0xf] }
 0x411   : > { %11097 = vmatpush.bf16.msrb.mxu0 %v13350_v41  ;;  %v19235_v41 = vld [vmem:[%s20702_s9 + $0x111c] sm:$0xf0]  ;;  %v15030_v5 = vor.u32 %v19295_v62, %v15029_v18  ;;  %v19345_v18 = vld [vmem:[%s20702_s9 + $0x148c] sm:$0xf0] }
 0x412   : > { %11110 = vmatpush.bf16.msrb.mxu1 %v13670_v17  ;;  %v15109_v17 = vld [vmem:[%s20702_s9 + $0x1378] sm:$0xf]  ;;  %v14790_v23 = vor.u32 %v19235_v41, %v14789_v9  ;;  %v19365_v9 = vld [vmem:[%s20702_s9 + $0x152c] sm:$0xf0] }
 0x413   : > { %11123 = vmatpush.bf16.msrb.mxu2 %v13990_v15  ;;  %v15429_v15 = vld [vmem:[%s20702_s9 + $0x15f8] sm:$0xf]  ;;  %v15110_v0 = vor.u32 %v19315_v40, %v15109_v17  ;;  %v15629_v40 = vld [vmem:[%s20702_s9 + $0x1788] sm:$0xf] }
 0x414   : > { %11136 = vmatpush.bf16.msrb.mxu3 %v14310_v29  ;;  %v15749_v29 = vld [vmem:[%s20702_s9 + $0x1878] sm:$0xf]  ;;  %v15430_v30 = vor.u32 %v19395_v25, %v15429_v15  ;;  %v19445_v15 = vld [vmem:[%s20702_s9 + $0x17ac] sm:$0xf0] }
 0x415   : > { %11098 = vmatpush.bf16.msrb.mxu0 %v13310_v32  ;;  %v19305_v32 = vld [vmem:[%s20702_s9 + $0x134c] sm:$0xf0]  ;;  %v15750_v39 = vor.u32 %v19475_v38, %v15749_v29  ;;  %v14629_v29 = vld [vmem:[%s20702_s9 + $0xfb8] sm:$0xf]  ;;  %v19195_v38 = vld [vmem:[%s20702_s9 + $0xfdc] sm:$0xf0]  ;;  %v15630_v33 = vor.u32 %v19445_v15, %v15629_v40 }
 0x416   : > { %11111 = vmatpush.bf16.msrb.mxu1 %v13630_v31  ;;  %v15389_v31 = vld [vmem:[%s20702_s9 + $0x15a8] sm:$0xf]  ;;  %v15070_v63 = vor.u32 %v19305_v32, %v15069_v2  ;;  %v14630_v32 = vor.u32 %v19195_v38, %v14629_v29  ;;  %v19415_v29 = vld [vmem:[%s20702_s9 + $0x16bc] sm:$0xf0] }
 0x417   : > { %11124 = vmatpush.bf16.msrb.mxu2 %v13950_v60  ;;  %v15709_v60 = vld [vmem:[%s20702_s9 + $0x1828] sm:$0xf]  ;;  %v15390_v6 = vor.u32 %v19385_v54, %v15389_v31  ;;  %v15589_v31 = vld [vmem:[%s20702_s9 + $0x1738] sm:$0xf]  ;;  %v19435_v54 = vld [vmem:[%s20702_s9 + $0x175c] sm:$0xf0] }
 0x418   : > { %11137 = vmatpush.bf16.msrb.mxu3 %v14270_v59  ;;  %v14709_v59 = vld [vmem:[%s20702_s9 + $0x1058] sm:$0xf]  ;;  %v15710_v58 = vor.u32 %v19465_v10, %v15709_v60  ;;  %v14589_v60 = vld [vmem:[%s20702_s9 + $0xf68] sm:$0xf]  ;;  %v19185_v10 = vld [vmem:[%s20702_s9 + $0xf8c] sm:$0xf0]  ;;  %v15590_v8 = vor.u32 %v19435_v54, %v15589_v31 }
 0x419   : > { %11099 = vmatpush.bf16.msrb.mxu0 %v13270_v7  ;;  %v14710_v3 = vor.u32 %v19215_v52, %v14709_v59  ;;  %v15669_v7 = vld [vmem:[%s20702_s9 + $0x17d8] sm:$0xf]  ;;  %v10893_v14 = vpop.f32.mrf.mxu0  ;;  %v19265_v59 = vld [vmem:[%s20702_s9 + $0x120c] sm:$0xf0]  ;;  %v15229_v52 = vld [vmem:[%s20702_s9 + $0x1468] sm:$0xf] }
 0x41a   : > { %11112 = vmatpush.bf16.msrb.mxu1 %v13590_v4  ;;  %v19455_v4 = vld [vmem:[%s20702_s9 + $0x17fc] sm:$0xf0]  ;;  %v10906_v41 = vpop.f32.mrf.mxu1  ;;  %v10894_v24 = vadd.f32 %v10893_v14, %v22978_v53  ;;  %v15269_v53 = vld [vmem:[%s20702_s9 + $0x14b8] sm:$0xf] }
 0x41b   : > { %11125 = vmatpush.bf16.msrb.mxu2 %v13910_v46  ;;  %v14669_v46 = vld [vmem:[%s20702_s9 + $0x1008] sm:$0xf]  ;;  %v15670_v17 = vor.u32 %v19455_v4, %v15669_v7  ;;  %v19425_v7 = vld [vmem:[%s20702_s9 + $0x170c] sm:$0xf0]  ;;  %v14549_v4 = vld [vmem:[%s20702_s9 + $0xf18] sm:$0xf] }
 0x41c   : > { %11138 = vmatpush.bf16.msrb.mxu3 %v14230_v11  ;;  %11100 = vmatmul.bf16.vlgmr.msrb.gmra.mxu0 %v20822_v21  ;;  %v15189_v14 = vld [vmem:[%s20702_s9 + $0x1418] sm:$0xf] }
 0x41d   : > { %11144 = vmatpush.bf16.msra.mxu0 %v14830_v12  ;;  %11113 = vmatmul.bf16.vlgmr.msrb.gmra.mxu1 %v20824_v22  ;;  %v19205_v12 = vld [vmem:[%s20702_s9 + $0x102c] sm:$0xf0] }
 0x41e   : > { %11157 = vmatpush.bf16.msra.mxu1 %v15150_v13  ;;  %11126 = vmatmul.bf16.vlgmr.msrb.gmra.mxu2 %v20889_v48  ;;  %v19285_v13 = vld [vmem:[%s20702_s9 + $0x12ac] sm:$0xf0]  ;;  %v14670_v11 = vor.u32 %v19205_v12, %v14669_v46  ;;  %v15230_v46 = vor.u32 %v19345_v18, %v15229_v52  ;;  %v14869_v12 = vld [vmem:[%s20702_s9 + $0x1198] sm:$0xf]  ;;  %v19715_v52 = vld [vmem:[%s20702_s9 + $0x201c] sm:$0xf0] }
 0x41f   : > { %11170 = vmatpush.bf16.msra.mxu2 %v15470_v26  ;;  %11139 = vmatmul.bf16.vlgmr.msrb.gmra.mxu3 %v20895_v55  ;;  %v15309_v26 = vld [vmem:[%s20702_s9 + $0x1508] sm:$0xf]  ;;  %v14990_v25 = vor.u32 %v19285_v13, %v14989_v19  ;;  %v19255_v19 = vld [vmem:[%s20702_s9 + $0x11bc] sm:$0xf0]  ;;  %v17029_v18 = vld [vmem:[%s20702_s9 + $0x2278] sm:$0xf] }
 0x420   : > { %11183 = vmatpush.bf16.msra.mxu3 %v15790_v20  ;;  %v15310_v20 = vor.u32 %v19365_v9, %v15309_v26  ;;  %v19335_v13 = vld [vmem:[%s20702_s9 + $0x143c] sm:$0xf0]  ;;  %v16109_v26 = vld [vmem:[%s20702_s9 + $0x1b48] sm:$0xf]  ;;  %v19565_v9 = vld [vmem:[%s20702_s9 + $0x1b6c] sm:$0xf0]  ;;  %v14870_v38 = vor.u32 %v19255_v19, %v14869_v12 }
 0x421   : > { %11145 = vmatpush.bf16.msra.mxu0 %v14790_v23  ;;  %v23033_v23 = vadd.f32 %v10906_v41, %v10894_v24  ;;  %v23041_v2 = vpop.f32.mrf.mxu2  ;;  %v10895_v62 = vpop.f32.mrf.mxu0  ;;  %v15550_v41 = vor.u32 %v19425_v7, %v15549_v1  ;;  %v19645_v24 = vld [vmem:[%s20702_s9 + $0x1dec] sm:$0xf0]  ;;  %v16989_v19 = vld [vmem:[%s20702_s9 + $0x2228] sm:$0xf] }
 0x422   : > { %11158 = vmatpush.bf16.msra.mxu1 %v15110_v0  ;;  %v14949_v0 = vld [vmem:[%s20702_s9 + $0x1238] sm:$0xf]  ;;  %v19795_v62 = vld [vmem:[%s20702_s9 + $0x229c] sm:$0xf0]  ;;  %v19545_v7 = vld [vmem:[%s20702_s9 + $0x1acc] sm:$0xf0] }
 0x423   : > { %11171 = vmatpush.bf16.msra.mxu2 %v15430_v30  ;;  %v19275_v30 = vld [vmem:[%s20702_s9 + $0x125c] sm:$0xf0]  ;;  %v19705_v12 = vld [vmem:[%s20702_s9 + $0x1fcc] sm:$0xf0] }
 0x424   : > { %11184 = vmatpush.bf16.msra.mxu3 %v15750_v39  ;;  %v14950_v39 = vor.u32 %v19275_v30, %v14949_v0  ;;  %v15190_v0 = vor.u32 %v19335_v13, %v15189_v14  ;;  %v17069_v30 = vld [vmem:[%s20702_s9 + $0x22c8] sm:$0xf]  ;;  %v19785_v14 = vld [vmem:[%s20702_s9 + $0x224c] sm:$0xf0] }
 0x425   : > { %11146 = vmatpush.bf16.msra.mxu0 %v14750_v57  ;;  %v15270_v57 = vor.u32 %v19355_v47, %v15269_v53  ;;  %v19805_v53 = vld [vmem:[%s20702_s9 + $0x22ec] sm:$0xf0]  ;;  %v16110_v47 = vor.u32 %v19565_v9, %v16109_v26  ;;  %v15989_v9 = vld [vmem:[%s20702_s9 + $0x1a58] sm:$0xf] }
 0x426   : > { %11159 = vmatpush.bf16.msra.mxu1 %v15070_v63  ;;  %v14909_v63 = vld [vmem:[%s20702_s9 + $0x11e8] sm:$0xf] }
 0x427   : > { %11172 = vmatpush.bf16.msra.mxu2 %v15390_v6  ;;  %v23048_v6 = vpop.f32.mrf.mxu3 }
 0x428   : > { %11185 = vmatpush.bf16.msra.mxu3 %v15710_v58  ;;  %v10908_v58 = vpop.f32.mrf.mxu1 }
 0x429   : > { %11147 = vmatpush.bf16.msra.mxu0 %v14710_v3  ;;  %v14590_v3 = vor.u32 %v19185_v10, %v14589_v60  ;;  %v10921_v40 = vpop.f32.mrf.mxu2  ;;  %v16389_v60 = vld [vmem:[%s20702_s9 + $0x1d78] sm:$0xf]  ;;  %v19635_v10 = vld [vmem:[%s20702_s9 + $0x1d9c] sm:$0xf0]  ;;  %v16029_v58 = vld [vmem:[%s20702_s9 + $0x1aa8] sm:$0xf] }
 0x42a   : > { %11160 = vmatpush.bf16.msra.mxu1 %v15030_v5  ;;  %v19175_v5 = vld [vmem:[%s20702_s9 + $0xf3c] sm:$0xf0]  ;;  %v16390_v1 = vor.u32 %v19635_v10, %v16389_v60  ;;  %v16030_v13 = vor.u32 %v19545_v7, %v16029_v58  ;;  %v16990_v40 = vor.u32 %v19785_v14, %v16989_v19  ;;  %v19685_v60 = vld [vmem:[%s20702_s9 + $0x1f2c] sm:$0xf0]  ;;  %v16909_v10 = vld [vmem:[%s20702_s9 + $0x2188] sm:$0xf] }
 0x42b   : > { %11173 = vmatpush.bf16.msra.mxu2 %v15350_v16  ;;  %v14910_v16 = vor.u32 %v19265_v59, %v14909_v63  ;;  %v14550_v15 = vor.u32 %v19175_v5, %v14549_v4  ;;  %v17070_v63 = vor.u32 %v19805_v53, %v17069_v30  ;;  %v16709_v59 = vld [vmem:[%s20702_s9 + $0x1ff8] sm:$0xf]  ;;  %v16349_v4 = vld [vmem:[%s20702_s9 + $0x1d28] sm:$0xf]  ;;  %v19625_v5 = vld [vmem:[%s20702_s9 + $0x1d4c] sm:$0xf0] }
 0x42c   : > { %11186 = vmatpush.bf16.msra.mxu3 %v15670_v17  ;;  %v16429_v17 = vld [vmem:[%s20702_s9 + $0x1dc8] sm:$0xf]  ;;  %v16350_v26 = vor.u32 %v19625_v5, %v16349_v4  ;;  %v19595_v58 = vld [vmem:[%s20702_s9 + $0x1c5c] sm:$0xf0]  ;;  %v16549_v7 = vld [vmem:[%s20702_s9 + $0x1eb8] sm:$0xf] }
 0x42d   : > { %11148 = vmatpush.bf16.msra.mxu0 %v14670_v11  ;;  %v16749_v11 = vld [vmem:[%s20702_s9 + $0x2048] sm:$0xf]  ;;  %v19675_v4 = vld [vmem:[%s20702_s9 + $0x1edc] sm:$0xf0] }
 0x42e   : > { %11161 = vmatpush.bf16.msra.mxu1 %v14990_v25  ;;  %v19725_v25 = vld [vmem:[%s20702_s9 + $0x206c] sm:$0xf0]  ;;  %v15949_v53 = vld [vmem:[%s20702_s9 + $0x1a08] sm:$0xf] }
 0x42f   : > { %11174 = vmatpush.bf16.msra.mxu2 %v15310_v20  ;;  %v15509_v20 = vld [vmem:[%s20702_s9 + $0x1698] sm:$0xf]  ;;  %v10934_v31 = vpop.f32.mrf.mxu3  ;;  %v16750_v54 = vor.u32 %v19725_v25, %v16749_v11  ;;  %v19615_v11 = vld [vmem:[%s20702_s9 + $0x1cfc] sm:$0xf0]  ;;  %v15869_v14 = vld [vmem:[%s20702_s9 + $0x1968] sm:$0xf] }
 0x430   : > { %11187 = vmatpush.bf16.msra.mxu3 %v15630_v33  ;;  %v16430_v33 = vor.u32 %v19645_v24, %v16429_v17  ;;  %v19535_v17 = vld [vmem:[%s20702_s9 + $0x1a7c] sm:$0xf0]  ;;  %v16309_v24 = vld [vmem:[%s20702_s9 + $0x1cd8] sm:$0xf]  ;;  %v19605_v31 = vld [vmem:[%s20702_s9 + $0x1cac] sm:$0xf0] }
 0x431   : > { %11149 = vmatpush.bf16.msra.mxu0 %v14630_v32  ;;  %v16069_v32 = vld [vmem:[%s20702_s9 + $0x1af8] sm:$0xf]  ;;  %v19695_v25 = vld [vmem:[%s20702_s9 + $0x1f7c] sm:$0xf0]  ;;  %v16310_v30 = vor.u32 %v19615_v11, %v16309_v24  ;;  %v19585_v24 = vld [vmem:[%s20702_s9 + $0x1c0c] sm:$0xf0] }
 0x432   : > { %11162 = vmatpush.bf16.msra.mxu1 %v14950_v39  ;;  %v15510_v39 = vor.u32 %v19415_v29, %v15509_v20  ;;  %v16949_v20 = vld [vmem:[%s20702_s9 + $0x21d8] sm:$0xf]  ;;  %v19775_v29 = vld [vmem:[%s20702_s9 + $0x21fc] sm:$0xf0] }
 0x433   : > { %11175 = vmatpush.bf16.msra.mxu2 %v15270_v57  ;;  %v19555_v57 = vld [vmem:[%s20702_s9 + $0x1b1c] sm:$0xf0] }
 0x434   : > { %11188 = vmatpush.bf16.msra.mxu3 %v15590_v8  ;;  %v16070_v8 = vor.u32 %v19555_v57, %v16069_v32  ;;  %v16269_v32 = vld [vmem:[%s20702_s9 + $0x1c88] sm:$0xf] }
 0x435   : > { %11150 = vmatpush.bf16.msra.mxu0 %v14590_v3  ;;  %v16710_v3 = vor.u32 %v19715_v52, %v16709_v59  ;;  %v16589_v57 = vld [vmem:[%s20702_s9 + $0x1f08] sm:$0xf]  ;;  %v16270_v52 = vor.u32 %v19605_v31, %v16269_v32  ;;  %v19575_v31 = vld [vmem:[%s20702_s9 + $0x1bbc] sm:$0xf0] }
 0x436   : > { %11163 = vmatpush.bf16.msra.mxu1 %v14910_v16  ;;  %v17030_v16 = vor.u32 %v19795_v62, %v17029_v18  ;;  %v15909_v18 = vld [vmem:[%s20702_s9 + $0x19b8] sm:$0xf]  ;;  %v16590_v62 = vor.u32 %v19685_v60, %v16589_v57  ;;  %v19655_v57 = vld [vmem:[%s20702_s9 + $0x1e3c] sm:$0xf0] }
 0x437   : > { %11176 = vmatpush.bf16.msra.mxu2 %v15230_v46  ;;  %v16669_v46 = vld [vmem:[%s20702_s9 + $0x1fa8] sm:$0xf] }
 0x438   : > { %11189 = vmatpush.bf16.msra.mxu3 %v15550_v41  ;;  %v16670_v41 = vor.u32 %v19705_v12, %v16669_v46  ;;  %v19755_v46 = vld [vmem:[%s20702_s9 + $0x215c] sm:$0xf0] }
 0x439   : > { %11151 = vmatpush.bf16.msra.mxu0 %v14550_v15  ;;  %v16629_v15 = vld [vmem:[%s20702_s9 + $0x1f58] sm:$0xf] }
 0x43a   : > { %11164 = vmatpush.bf16.msra.mxu1 %v14870_v38  ;;  %v23099_v38 = vpop.f32.mrf.mxu0 }
 0x43b   : > { %11177 = vmatpush.bf16.msra.mxu2 %v15190_v0  ;;  %v15990_v0 = vor.u32 %v19535_v17, %v15989_v9  ;;  %v16550_v9 = vor.u32 %v19675_v4, %v16549_v7  ;;  %v16189_v17 = vld [vmem:[%s20702_s9 + $0x1be8] sm:$0xf]  ;;  %v19735_v7 = vld [vmem:[%s20702_s9 + $0x20bc] sm:$0xf0] }
 0x43c   : > { %11190 = vmatpush.bf16.msra.mxu3 %v15510_v39  ;;  %11152 = vmatmul.bf16.vlgmr.msra.gmra.mxu0 %v20891_v51  ;;  %v16950_v39 = vor.u32 %v19775_v29, %v16949_v20  ;;  %v16829_v20 = vld [vmem:[%s20702_s9 + $0x20e8] sm:$0xf]  ;;  %v19745_v29 = vld [vmem:[%s20702_s9 + $0x210c] sm:$0xf0] }
 0x43d   : > { %11196 = vmatpush.bf16.msrb.mxu0 %v16110_v47  ;;  %11165 = vmatmul.bf16.vlgmr.msra.gmra.mxu1 %v20901_v61  ;;  %v16630_v47 = vor.u32 %v19695_v25, %v16629_v15  ;;  %v19665_v15 = vld [vmem:[%s20702_s9 + $0x1e8c] sm:$0xf0]  ;;  %v16830_v60 = vor.u32 %v19745_v29, %v16829_v20  ;;  %v18309_v29 = vld [vmem:[%s20702_s9 + $0x2c78] sm:$0xf] }
 0x43e   : > { %11209 = vmatpush.bf16.msrb.mxu1 %v16430_v33  ;;  %11178 = vmatmul.bf16.vlgmr.msra.gmra.mxu2 %v20964_v36  ;;  %v19525_v33 = vld [vmem:[%s20702_s9 + $0x1a2c] sm:$0xf0] }
 0x43f   : > { %11222 = vmatpush.bf16.msrb.mxu2 %v16750_v54  ;;  %11191 = vmatmul.bf16.vlgmr.msra.gmra.mxu3 %v20971_v42  ;;  %v23105_v54 = vpop.f32.mrf.mxu1  ;;  %v15950_v59 = vor.u32 %v19525_v33, %v15949_v53  ;;  %v15829_v53 = vld [vmem:[%s20702_s9 + $0x1918] sm:$0xf] }
 0x440   : > { %11235 = vmatpush.bf16.msrb.mxu3 %v17070_v63  ;;  %v19765_v63 = vld [vmem:[%s20702_s9 + $0x21ac] sm:$0xf0]  ;;  %v16149_v33 = vld [vmem:[%s20702_s9 + $0x1b98] sm:$0xf] }
 0x441   : > { %11197 = vmatpush.bf16.msrb.mxu0 %v16070_v8  ;;  %v19515_v8 = vld [vmem:[%s20702_s9 + $0x19dc] sm:$0xf0]  ;;  %v23117_v5 = vpop.f32.mrf.mxu2 }
 0x442   : > { %11210 = vmatpush.bf16.msrb.mxu1 %v16390_v1  ;;  %v16229_v1 = vld [vmem:[%s20702_s9 + $0x1c38] sm:$0xf]  ;;  %v15910_v12 = vor.u32 %v19515_v8, %v15909_v18  ;;  %v18029_v18 = vld [vmem:[%s20702_s9 + $0x2a48] sm:$0xf] }
 0x443   : > { %11223 = vmatpush.bf16.msrb.mxu2 %v16710_v3  ;;  %v16910_v3 = vor.u32 %v19765_v63, %v16909_v10  ;;  %v16230_v19 = vor.u32 %v19595_v58, %v16229_v1  ;;  %v17389_v10 = vld [vmem:[%s20702_s9 + $0x2548] sm:$0xf]  ;;  %v19885_v63 = vld [vmem:[%s20702_s9 + $0x256c] sm:$0xf0]  ;;  %v16150_v58 = vor.u32 %v19575_v31, %v16149_v33 }
 0x444   : > { %11236 = vmatpush.bf16.msrb.mxu3 %v17030_v16  ;;  %v16869_v16 = vld [vmem:[%s20702_s9 + $0x2138] sm:$0xf]  ;;  %v19945_v31 = vld [vmem:[%s20702_s9 + $0x274c] sm:$0xf0] }
 0x445   : > { %11198 = vmatpush.bf16.msrb.mxu0 %v16030_v13  ;;  %v10947_v13 = vpop.f32.mrf.mxu0  ;;  %v16870_v11 = vor.u32 %v19755_v46, %v16869_v16  ;;  %v17390_v16 = vor.u32 %v19885_v63, %v17389_v10  ;;  %v18349_v46 = vld [vmem:[%s20702_s9 + $0x2cc8] sm:$0xf] }
 0x446   : > { %11211 = vmatpush.bf16.msrb.mxu1 %v16350_v26  ;;  %v23122_v26 = vpop.f32.mrf.mxu3  ;;  %v18269_v63 = vld [vmem:[%s20702_s9 + $0x2c28] sm:$0xf] }
 0x447   : > { %11224 = vmatpush.bf16.msrb.mxu2 %v16670_v41  ;;  %v19505_v41 = vld [vmem:[%s20702_s9 + $0x198c] sm:$0xf0]  ;;  %v10960_v25 = vpop.f32.mrf.mxu1 }
 0x448   : > { %11237 = vmatpush.bf16.msrb.mxu3 %v16990_v40  ;;  %v16509_v40 = vld [vmem:[%s20702_s9 + $0x1e68] sm:$0xf]  ;;  %v20035_v25 = vld [vmem:[%s20702_s9 + $0x2a1c] sm:$0xf0] }
 0x449   : > { %11199 = vmatpush.bf16.msrb.mxu0 %v15990_v0  ;;  %v15870_v0 = vor.u32 %v19505_v41, %v15869_v14  ;;  %v16510_v32 = vor.u32 %v19665_v15, %v16509_v40  ;;  %v10973_v8 = vpop.f32.mrf.mxu2  ;;  %v19875_v41 = vld [vmem:[%s20702_s9 + $0x251c] sm:$0xf0]  ;;  %v17989_v15 = vld [vmem:[%s20702_s9 + $0x29f8] sm:$0xf] }
 0x44a   : > { %11212 = vmatpush.bf16.msrb.mxu1 %v16310_v30  ;;  %v16190_v30 = vor.u32 %v19585_v24, %v16189_v17  ;;  %v17669_v24 = vld [vmem:[%s20702_s9 + $0x2778] sm:$0xf]  ;;  %v17990_v33 = vor.u32 %v20035_v25, %v17989_v15  ;;  %v17869_v25 = vld [vmem:[%s20702_s9 + $0x2908] sm:$0xf] }
 0x44b   : > { %11225 = vmatpush.bf16.msrb.mxu2 %v16630_v47  ;;  %v19495_v47 = vld [vmem:[%s20702_s9 + $0x193c] sm:$0xf0] }
 0x44c   : > { %11238 = vmatpush.bf16.msrb.mxu3 %v16950_v39  ;;  %v16469_v39 = vld [vmem:[%s20702_s9 + $0x1e18] sm:$0xf]  ;;  %v15830_v1 = vor.u32 %v19495_v47, %v15829_v53  ;;  %v17309_v53 = vld [vmem:[%s20702_s9 + $0x24a8] sm:$0xf]  ;;  %v19865_v47 = vld [vmem:[%s20702_s9 + $0x24cc] sm:$0xf0] }
 0x44d   : > { %11200 = vmatpush.bf16.msrb.mxu0 %v15950_v59  ;;  %v17709_v59 = vld [vmem:[%s20702_s9 + $0x27c8] sm:$0xf]  ;;  %v16470_v4 = vor.u32 %v19655_v57, %v16469_v39  ;;  %v17310_v10 = vor.u32 %v19865_v47, %v17309_v53  ;;  %v19835_v53 = vld [vmem:[%s20702_s9 + $0x23dc] sm:$0xf0] }
 0x44e   : > { %11213 = vmatpush.bf16.msrb.mxu1 %v16270_v52  ;;  %v19965_v52 = vld [vmem:[%s20702_s9 + $0x27ec] sm:$0xf0]  ;;  %v17949_v57 = vld [vmem:[%s20702_s9 + $0x29a8] sm:$0xf] }
 0x44f   : > { %11226 = vmatpush.bf16.msrb.mxu2 %v16590_v62  ;;  %v20045_v62 = vld [vmem:[%s20702_s9 + $0x2a6c] sm:$0xf0]  ;;  %v17710_v14 = vor.u32 %v19965_v52, %v17709_v59 }
 0x450   : > { %11239 = vmatpush.bf16.msrb.mxu3 %v16910_v3  ;;  %v16789_v3 = vld [vmem:[%s20702_s9 + $0x2098] sm:$0xf]  ;;  %v18030_v13 = vor.u32 %v20045_v62, %v18029_v18  ;;  %v20105_v59 = vld [vmem:[%s20702_s9 + $0x2c4c] sm:$0xf0]  ;;  %v19855_v62 = vld [vmem:[%s20702_s9 + $0x247c] sm:$0xf0] }
 0x451   : > { %11201 = vmatpush.bf16.msrb.mxu0 %v15910_v12  ;;  %v20125_v12 = vld [vmem:[%s20702_s9 + $0x2cec] sm:$0xf0]  ;;  %v16790_v17 = vor.u32 %v19735_v7, %v16789_v3  ;;  %v17269_v18 = vld [vmem:[%s20702_s9 + $0x2458] sm:$0xf]  ;;  %v18270_v3 = vor.u32 %v20105_v59, %v18269_v63 }
 0x452   : > { %11214 = vmatpush.bf16.msrb.mxu1 %v16230_v19  ;;  %v10986_v19 = vpop.f32.mrf.mxu3  ;;  %v18350_v40 = vor.u32 %v20125_v12, %v18349_v46  ;;  %v17909_v7 = vld [vmem:[%s20702_s9 + $0x2958] sm:$0xf]  ;;  %v20095_v12 = vld [vmem:[%s20702_s9 + $0x2bfc] sm:$0xf0] }
 0x453   : > { %11227 = vmatpush.bf16.msrb.mxu2 %v16550_v9  ;;  %v17349_v9 = vld [vmem:[%s20702_s9 + $0x24f8] sm:$0xf] }
 0x454   : > { %11240 = vmatpush.bf16.msrb.mxu3 %v16870_v11  ;;  %v19955_v11 = vld [vmem:[%s20702_s9 + $0x279c] sm:$0xf0]  ;;  %v17350_v20 = vor.u32 %v19875_v41, %v17349_v9  ;;  %v18229_v46 = vld [vmem:[%s20702_s9 + $0x2bd8] sm:$0xf]  ;;  %v19845_v9 = vld [vmem:[%s20702_s9 + $0x242c] sm:$0xf0]  ;;  %v10920_v41 = vadd.f32 %v23041_v2, %v23033_v23 }
 0x455   : > { %11202 = vmatpush.bf16.msrb.mxu0 %v15870_v0  ;;  %v20115_v0 = vld [vmem:[%s20702_s9 + $0x2c9c] sm:$0xf0]  ;;  %v18230_v15 = vor.u32 %v20095_v12, %v18229_v46  ;;  %v20085_v23 = vld [vmem:[%s20702_s9 + $0x2bac] sm:$0xf0]  ;;  %v17789_v46 = vld [vmem:[%s20702_s9 + $0x2868] sm:$0xf] }
 0x456   : > { %11215 = vmatpush.bf16.msrb.mxu1 %v16190_v30  ;;  %v17670_v30 = vor.u32 %v19955_v11, %v17669_v24  ;;  %v18310_v39 = vor.u32 %v20115_v0, %v18309_v29  ;;  %v17549_v11 = vld [vmem:[%s20702_s9 + $0x2688] sm:$0xf]  ;;  %v10933_v47 = vadd.f32 %v23048_v6, %v10920_v41  ;;  %v18149_v6 = vld [vmem:[%s20702_s9 + $0x2b38] sm:$0xf]  ;;  %v19985_v12 = vld [vmem:[%s20702_s9 + $0x288c] sm:$0xf0] }
 0x457   : > { %11228 = vmatpush.bf16.msrb.mxu2 %v16510_v32  ;;  %v17629_v32 = vld [vmem:[%s20702_s9 + $0x2728] sm:$0xf]  ;;  %v20065_v41 = vld [vmem:[%s20702_s9 + $0x2b0c] sm:$0xf0] }
 0x458   : > { %11241 = vmatpush.bf16.msrb.mxu3 %v16830_v60  ;;  %v20025_v60 = vld [vmem:[%s20702_s9 + $0x29cc] sm:$0xf0]  ;;  %v17630_v52 = vor.u32 %v19945_v31, %v17629_v32  ;;  %v18189_v0 = vld [vmem:[%s20702_s9 + $0x2b88] sm:$0xf]  ;;  %v17509_v32 = vld [vmem:[%s20702_s9 + $0x2638] sm:$0xf] }
 0x459   : > { %11203 = vmatpush.bf16.msrb.mxu0 %v15830_v1  ;;  %v17950_v8 = vor.u32 %v20025_v60, %v17949_v57  ;;  %v17589_v1 = vld [vmem:[%s20702_s9 + $0x26d8] sm:$0xf]  ;;  %v23175_v19 = vpop.f32.mrf.mxu0  ;;  %v19915_v31 = vld [vmem:[%s20702_s9 + $0x265c] sm:$0xf0] }
 0x45a   : > { %11216 = vmatpush.bf16.msrb.mxu1 %v16150_v58  ;;  %v19935_v58 = vld [vmem:[%s20702_s9 + $0x26fc] sm:$0xf0]  ;;  %v23181_v24 = vpop.f32.mrf.mxu1  ;;  %v17829_v57 = vld [vmem:[%s20702_s9 + $0x28b8] sm:$0xf] }
 0x45b   : > { %11229 = vmatpush.bf16.msrb.mxu2 %v16470_v4  ;;  %v20015_v4 = vld [vmem:[%s20702_s9 + $0x297c] sm:$0xf0] }
 0x45c   : > { %11242 = vmatpush.bf16.msrb.mxu3 %v16790_v17  ;;  %11204 = vmatmul.bf16.vlgmr.msrb.gmra.mxu0 %v20966_v37  ;;  %v17910_v17 = vor.u32 %v20015_v4, %v17909_v7  ;;  %v19995_v60 = vld [vmem:[%s20702_s9 + $0x28dc] sm:$0xf0]  ;;  %v19905_v7 = vld [vmem:[%s20702_s9 + $0x260c] sm:$0xf0] }
 0x45d   : > { %11248 = vmatpush.bf16.msra.mxu0 %v17390_v16  ;;  %11217 = vmatmul.bf16.vlgmr.msrb.gmra.mxu1 %v20973_v43  ;;  %v17270_v16 = vor.u32 %v19855_v62, %v17269_v18  ;;  %v17510_v62 = vor.u32 %v19915_v31, %v17509_v32  ;;  %v13231_v31 = vld [vmem:[%s20702_s9 + $0x4f0] sm:$0xf0] }
 0x45e   : > { %11261 = vmatpush.bf16.msra.mxu1 %v17710_v14  ;;  %11230 = vmatmul.bf16.vlgmr.msrb.gmra.mxu2 %v21042_v34  ;;  %v17590_v14 = vor.u32 %v19935_v58, %v17589_v1  ;;  %v19825_v1 = vld [vmem:[%s20702_s9 + $0x238c] sm:$0xf0] }
 0x45f   : > { %11274 = vmatpush.bf16.msra.mxu2 %v18030_v13  ;;  %11243 = vmatmul.bf16.vlgmr.msrb.gmra.mxu3 %v21049_v44  ;;  %v17229_v13 = vld [vmem:[%s20702_s9 + $0x2408] sm:$0xf] }
 0x460   : > { %11287 = vmatpush.bf16.msra.mxu3 %v18350_v40  ;;  %v19925_v40 = vld [vmem:[%s20702_s9 + $0x26ac] sm:$0xf0]  ;;  %v17230_v29 = vor.u32 %v19845_v9, %v17229_v13 }
 0x461   : > { %11249 = vmatpush.bf16.msra.mxu0 %v17350_v20  ;;  %v20005_v20 = vld [vmem:[%s20702_s9 + $0x292c] sm:$0xf0]  ;;  %v17550_v2 = vor.u32 %v19925_v40, %v17549_v11  ;;  %v23197_v63 = vpop.f32.mrf.mxu2  ;;  %v10999_v58 = vpop.f32.mrf.mxu0  ;;  %v19815_v11 = vld [vmem:[%s20702_s9 + $0x233c] sm:$0xf0] }
 0x462   : > { %11262 = vmatpush.bf16.msra.mxu1 %v17670_v30  ;;  %v17189_v30 = vld [vmem:[%s20702_s9 + $0x23b8] sm:$0xf]  ;;  %v23201_v18 = vpop.f32.mrf.mxu3  ;;  %v11012_v4 = vpop.f32.mrf.mxu1 }
 0x463   : > { %11275 = vmatpush.bf16.msra.mxu2 %v17990_v33  ;;  %v17870_v33 = vor.u32 %v20005_v20, %v17869_v25  ;;  %v17190_v59 = vor.u32 %v19835_v53, %v17189_v30  ;;  %v19895_v25 = vld [vmem:[%s20702_s9 + $0x25bc] sm:$0xf0]  ;;  %v17749_v20 = vld [vmem:[%s20702_s9 + $0x2818] sm:$0xf]  ;;  %v18760_v53 = vld [vmem:[%s20702_s9 + $0x24c] sm:$0xf] }
 0x464   : > { %11288 = vmatpush.bf16.msra.mxu3 %v18310_v39  ;;  %v18190_v39 = vor.u32 %v20085_v23, %v18189_v0  ;;  %v19975_v0 = vld [vmem:[%s20702_s9 + $0x283c] sm:$0xf0]  ;;  %v18669_v23 = vld [vmem:[%s20702_s9 + $0x2f48] sm:$0xf]  ;;  %v18750_v4 = vld [vmem:[%s20702_s9 + $0x1fc] sm:$0xf] }
 0x465   : > { %11250 = vmatpush.bf16.msra.mxu0 %v17310_v10  ;;  %v10946_v10 = vadd.f32 %v23099_v38, %v10933_v47  ;;  %v17830_v38 = vor.u32 %v19995_v60, %v17829_v57  ;;  %v12911_v47 = vld [vmem:[%s20702_s9 + $0x270] sm:$0xf0]  ;;  %v20055_v57 = vld [vmem:[%s20702_s9 + $0x2abc] sm:$0xf0] }
 0x466   : > { %11263 = vmatpush.bf16.msra.mxu1 %v17630_v52  ;;  %v20075_v52 = vld [vmem:[%s20702_s9 + $0x2b5c] sm:$0xf0] }
 0x467   : > { %11276 = vmatpush.bf16.msra.mxu2 %v17950_v8  ;;  %v17149_v8 = vld [vmem:[%s20702_s9 + $0x2368] sm:$0xf]  ;;  %v10959_v13 = vadd.f32 %v23105_v54, %v10946_v10  ;;  %v17790_v54 = vor.u32 %v19985_v12, %v17789_v46  ;;  %v12871_v12 = vld [vmem:[%s20702_s9 + $0x220] sm:$0xf0] }
 0x468   : > { %11289 = vmatpush.bf16.msra.mxu3 %v18270_v3  ;;  %v17469_v3 = vld [vmem:[%s20702_s9 + $0x25e8] sm:$0xf]  ;;  %v17150_v9 = vor.u32 %v19825_v1, %v17149_v8  ;;  %v17750_v8 = vor.u32 %v19975_v0, %v17749_v20  ;;  %v12914_v1 = vor.u32 %v18760_v53, %v12911_v47  ;;  %v13151_v0 = vld [vmem:[%s20702_s9 + $0x450] sm:$0xf0] }
 0x469   : > { %11251 = vmatpush.bf16.msra.mxu0 %v17270_v16  ;;  %v18150_v16 = vor.u32 %v20075_v52, %v18149_v6  ;;  %v17470_v40 = vor.u32 %v19905_v7, %v17469_v3  ;;  %v13551_v6 = vld [vmem:[%s20702_s9 + $0x770] sm:$0xf0]  ;;  %v18629_v3 = vld [vmem:[%s20702_s9 + $0x2ef8] sm:$0xf]  ;;  %v20195_v7 = vld [vmem:[%s20702_s9 + $0x2f1c] sm:$0xf0] }
 0x46a   : > { %11264 = vmatpush.bf16.msra.mxu1 %v17590_v14  ;;  %v18109_v14 = vld [vmem:[%s20702_s9 + $0x2ae8] sm:$0xf]  ;;  %v11038_v52 = vpop.f32.mrf.mxu3 }
 0x46b   : > { %11277 = vmatpush.bf16.msra.mxu2 %v17910_v17  ;;  %v17109_v17 = vld [vmem:[%s20702_s9 + $0x2318] sm:$0xf]  ;;  %v18110_v30 = vor.u32 %v20065_v41, %v18109_v14  ;;  %v13191_v14 = vld [vmem:[%s20702_s9 + $0x4a0] sm:$0xf0]  ;;  %v18630_v41 = vor.u32 %v20195_v7, %v18629_v3 }
 0x46c   : > { %11290 = vmatpush.bf16.msra.mxu3 %v18230_v15  ;;  %v17429_v15 = vld [vmem:[%s20702_s9 + $0x2598] sm:$0xf]  ;;  %v17110_v32 = vor.u32 %v19815_v11, %v17109_v17  ;;  %v18589_v11 = vld [vmem:[%s20702_s9 + $0x2ea8] sm:$0xf] }
 0x46d   : > { %11252 = vmatpush.bf16.msra.mxu0 %v17230_v29  ;;  %v10972_v29 = vadd.f32 %v23117_v5, %v10959_v13  ;;  %v11025_v5 = vpop.f32.mrf.mxu2  ;;  %v17430_v60 = vor.u32 %v19895_v25, %v17429_v15  ;;  %v18910_v13 = vld [vmem:[%s20702_s9 + $0x6fc] sm:$0xf]  ;;  %v18740_v15 = vld [vmem:[%s20702_s9 + $0x1ac] sm:$0xf] }
 0x46e   : > { %11265 = vmatpush.bf16.msra.mxu1 %v17550_v2  ;;  %v20205_v2 = vld [vmem:[%s20702_s9 + $0x2f6c] sm:$0xf0]  ;;  %v13111_v5 = vld [vmem:[%s20702_s9 + $0x400] sm:$0xf0] }
 0x46f   : > { %11278 = vmatpush.bf16.msra.mxu2 %v17870_v33  ;;  %v18840_v33 = vld [vmem:[%s20702_s9 + $0x4cc] sm:$0xf]  ;;  %v18670_v10 = vor.u32 %v20205_v2, %v18669_v23  ;;  %v13471_v2 = vld [vmem:[%s20702_s9 + $0x6d0] sm:$0xf0] }
 0x470   : > { %11291 = vmatpush.bf16.msra.mxu3 %v18190_v39  ;;  %v18069_v39 = vld [vmem:[%s20702_s9 + $0x2a98] sm:$0xf]  ;;  %v13234_v58 = vor.u32 %v18840_v33, %v13231_v31  ;;  %v18900_v23 = vld [vmem:[%s20702_s9 + $0x6ac] sm:$0xf]  ;;  %v18730_v31 = vld [vmem:[%s20702_s9 + $0x15c] sm:$0xf] }
 0x471   : > { %11253 = vmatpush.bf16.msra.mxu0 %v17190_v59  ;;  %v18920_v59 = vld [vmem:[%s20702_s9 + $0x74c] sm:$0xf]  ;;  %v18549_v33 = vld [vmem:[%s20702_s9 + $0x2e58] sm:$0xf] }
 0x472   : > { %11266 = vmatpush.bf16.msra.mxu1 %v17510_v62  ;;  %v10985_v62 = vadd.f32 %v23122_v26, %v10972_v29  ;;  %v13554_v46 = vor.u32 %v18920_v59, %v13551_v6  ;;  %v18830_v26 = vld [vmem:[%s20702_s9 + $0x47c] sm:$0xf]  ;;  %v12831_v29 = vld [vmem:[%s20702_s9 + $0x1d0] sm:$0xf0] }
 0x473   : > { %11279 = vmatpush.bf16.msra.mxu2 %v17830_v38  ;;  %v18070_v38 = vor.u32 %v20055_v57, %v18069_v39  ;;  %v13194_v17 = vor.u32 %v18830_v26, %v13191_v14  ;;  %v12834_v53 = vor.u32 %v18740_v15, %v12831_v29  ;;  %v13474_v39 = vor.u32 %v18900_v23, %v13471_v2  ;;  %v12791_v57 = vld [vmem:[%s20702_s9 + $0x180] sm:$0xf0]  ;;  %v18880_v26 = vld [vmem:[%s20702_s9 + $0x60c] sm:$0xf]  ;;  %v13391_v14 = vld [vmem:[%s20702_s9 + $0x630] sm:$0xf0] }
 0x474   : > { %11292 = vmatpush.bf16.msra.mxu3 %v18150_v16  ;;  %v10998_v16 = vadd.f32 %v23175_v19, %v10985_v62  ;;  %v12874_v19 = vor.u32 %v18750_v4, %v12871_v12  ;;  %v12794_v62 = vor.u32 %v18730_v31, %v12791_v57  ;;  %v12751_v4 = vld [vmem:[%s20702_s9 + $0x130] sm:$0xf0]  ;;  %v382_v12 = vld [vmem:[#allocation2 + $0x28] sm:$0xff]  ;;  %v13351_v23 = vld [vmem:[%s20702_s9 + $0x5e0] sm:$0xf0] }
 0x475   : > { %11254 = vmatpush.bf16.msra.mxu0 %v17150_v9  ;;  %v13511_v9 = vld [vmem:[%s20702_s9 + $0x720] sm:$0xf0]  ;;  %v18790_v29 = vld [vmem:[%s20702_s9 + $0x33c] sm:$0xf]  ;;  %v12671_v57 = vld [vmem:[%s20702_s9 + $0x90] sm:$0xf0] }
 0x476   : > { %11267 = vmatpush.bf16.msra.mxu1 %v17470_v40  ;;  %v20185_v40 = vld [vmem:[%s20702_s9 + $0x2ecc] sm:$0xf0]  ;;  %v11011_v25 = vadd.f32 %v23181_v24, %v10998_v16  ;;  %v13514_v20 = vor.u32 %v18910_v13, %v13511_v9  ;;  %v18800_v16 = vld [vmem:[%s20702_s9 + $0x38c] sm:$0xf] }
 0x477   : > { %11280 = vmatpush.bf16.msra.mxu2 %v17790_v54  ;;  %v18820_v54 = vld [vmem:[%s20702_s9 + $0x42c] sm:$0xf] }
 0x478   : > { %11293 = vmatpush.bf16.msra.mxu3 %v18110_v30  ;;  %v11024_v24 = vadd.f32 %v23197_v63, %v11011_v25  ;;  %v18590_v30 = vor.u32 %v20185_v40, %v18589_v11  ;;  %v13154_v47 = vor.u32 %v18820_v54, %v13151_v0  ;;  %v18810_v63 = vld [vmem:[%s20702_s9 + $0x3dc] sm:$0xf]  ;;  %v20155_v11 = vld [vmem:[%s20702_s9 + $0x2ddc] sm:$0xf0]  ;;  %v13394_v25 = vor.u32 %v18880_v26, %v13391_v14  ;;  %v13031_v54 = vld [vmem:[%s20702_s9 + $0x360] sm:$0xf0] }
 0x479   : > { %11255 = vmatpush.bf16.msra.mxu0 %v17110_v32  ;;  %v20175_v32 = vld [vmem:[%s20702_s9 + $0x2e7c] sm:$0xf0]  ;;  %v11049_v52 = vpop.f32.mrf.mxu0  ;;  %v18710_v40 = vld [vmem:[%s20702_s9 + $0xbc] sm:$0xf]  ;;  %v19080_v26 = vld [vmem:[%s20702_s9 + $0xc4c] sm:$0xf] }
 0x47a   : > { %11268 = vmatpush.bf16.msra.mxu1 %v17430_v60  ;;  %v18890_v60 = vld [vmem:[%s20702_s9 + $0x65c] sm:$0xf]  ;;  %v11037_v59 = vadd.f32 %v23201_v18, %v11024_v24  ;;  %v18550_v6 = vor.u32 %v20175_v32, %v18549_v33  ;;  %v11062_v7 = vpop.f32.mrf.mxu1  ;;  %v20145_v33 = vld [vmem:[%s20702_s9 + $0x2d8c] sm:$0xf0]  ;;  %v18700_v32 = vld [vmem:[%s20702_s9 + $0x6c] sm:$0xf] }
 0x47b   : > { %11281 = vmatpush.bf16.msra.mxu2 %v17750_v8  ;;  %v13114_v8 = vor.u32 %v18810_v63, %v13111_v5  ;;  %v18870_v0 = vld [vmem:[%s20702_s9 + $0x5bc] sm:$0xf]  ;;  %v18780_v63 = vld [vmem:[%s20702_s9 + $0x2ec] sm:$0xf]  ;;  %v12991_v5 = vld [vmem:[%s20702_s9 + $0x310] sm:$0xf0] }
 0x47c   : > { %11294 = vmatpush.bf16.msra.mxu3 %v18070_v38  ;;  %11256 = vmatmul.bf16.vlgmr.msra.gmra.mxu0 %v21044_v35  ;;  %v18720_v38 = vld [vmem:[%s20702_s9 + $0x10c] sm:$0xf]  ;;  %v11050_v3 = vadd.f32 %v11049_v52, %v11037_v59  ;;  %v14191_v14 = vld [vmem:[%s20702_s9 + $0xc70] sm:$0xf0] }
 0x47d   : > { %11300 = vmatpush.bf16.msrb.mxu0 %v18670_v10  ;;  %11269 = vmatmul.bf16.vlgmr.msra.gmra.mxu1 %v21051_v45  ;;  %v13431_v10 = vld [vmem:[%s20702_s9 + $0x680] sm:$0xf0]  ;;  %v18860_v59 = vld [vmem:[%s20702_s9 + $0x56c] sm:$0xf] }
 0x47e   : > { %11313 = vmatpush.bf16.msrb.mxu1 %v12914_v1  ;;  %11282 = vmatmul.bf16.vlgmr.msra.gmra.mxu2 %v21121_v49  ;;  %v18509_v1 = vld [vmem:[%s20702_s9 + $0x2e08] sm:$0xf]  ;;  %v13434_v18 = vor.u32 %v18890_v60, %v13431_v10  ;;  %v11063_v13 = vadd.f32 %v11062_v7, %v11050_v3  ;;  %v18690_v3 = vld [vmem:[%s20702_s9 + $0x1c] sm:$0xf]  ;;  %v12631_v7 = vld [vmem:[%s20702_s9 + $0x40] sm:$0xf0] }
 0x47f   : > { %11326 = vmatpush.bf16.msrb.mxu2 %v13234_v58  ;;  %11295 = vmatmul.bf16.vlgmr.msra.gmra.mxu3 %v21127_v56  ;;  %v20165_v58 = vld [vmem:[%s20702_s9 + $0x2e2c] sm:$0xf0] }
 0x480   : > { %11339 = vmatpush.bf16.msrb.mxu3 %v13554_v46  ;;  %v13071_v46 = vld [vmem:[%s20702_s9 + $0x3b0] sm:$0xf0]  ;;  %v18510_v9 = vor.u32 %v20165_v58, %v18509_v1  ;;  %v12059_v15 = vadd.f32 %v11063_v13, %v382_v12  ;;  %v20135_v1 = vld [vmem:[%s20702_s9 + $0x2d3c] sm:$0xf0]  ;;  %v12674_v58 = vor.u32 %v18700_v32, %v12671_v57  ;;  %v19160_v13 = vld [vmem:[%s20702_s9 + $0xecc] sm:$0xf] }
 0x481   : > { %11301 = vmatpush.bf16.msrb.mxu0 %v18630_v41  ;;  %v12754_v41 = vor.u32 %v18720_v38, %v12751_v4  ;;  %v11075_v24 = vpop.f32.mrf.mxu2  ;;  %v11051_v31 = vpop.f32.mrf.mxu0  ;;  %v12994_v38 = vor.u32 %v18780_v63, %v12991_v5  ;;  %v13871_v12 = vld [vmem:[%s20702_s9 + $0x9f0] sm:$0xf0]  ;;  %v19150_v32 = vld [vmem:[%s20702_s9 + $0xe7c] sm:$0xf]  ;;  %v14791_v57 = vld [vmem:[%s20702_s9 + $0x1120] sm:$0xf0] }
 0x482   : > { %11314 = vmatpush.bf16.msrb.mxu1 %v12874_v19  ;;  %v13074_v19 = vor.u32 %v18800_v16, %v13071_v46  ;;  %12069 = vst [vmem:[#allocation2 + $0x28] sm:$0xff] %v12059_v15  ;;  %v11064_v60 = vpop.f32.mrf.mxu1  ;;  %v11088_v10 = vpop.f32.mrf.mxu3  ;;  %v12951_v16 = vld [vmem:[%s20702_s9 + $0x2c0] sm:$0xf0]  ;;  %v19000_v46 = vld [vmem:[%s20702_s9 + $0x9cc] sm:$0xf] }
 0x483   : > { %11327 = vmatpush.bf16.msrb.mxu2 %v13194_v17  ;;  %v18469_v17 = vld [vmem:[%s20702_s9 + $0x2db8] sm:$0xf]  ;;  %v23286_v52 = vadd.f32 %v11088_v10, %v11075_v24  ;;  %v14471_v31 = vld [vmem:[%s20702_s9 + $0xea0] sm:$0xf0]  ;;  %v18980_v60 = vld [vmem:[%s20702_s9 + $0x92c] sm:$0xf] }
 0x484   : > { %11340 = vmatpush.bf16.msrb.mxu3 %v13514_v20  ;;  %v12711_v20 = vld [vmem:[%s20702_s9 + $0xe0] sm:$0xf0]  ;;  %v18470_v2 = vor.u32 %v20155_v11, %v18469_v17  ;;  %v14474_v10 = vor.u32 %v19150_v32, %v14471_v31 }
 0x485   : > { %11302 = vmatpush.bf16.msrb.mxu0 %v18590_v30  ;;  %v12714_v30 = vor.u32 %v18710_v40, %v12711_v20  ;;  %v13271_v17 = vld [vmem:[%s20702_s9 + $0x540] sm:$0xf0]  ;;  %v12634_v40 = vor.u32 %v18690_v3, %v12631_v7  ;;  %v14831_v20 = vld [vmem:[%s20702_s9 + $0x1170] sm:$0xf0] }
 0x486   : > { %11315 = vmatpush.bf16.msrb.mxu1 %v12834_v53  ;;  %v13034_v53 = vor.u32 %v18790_v29, %v13031_v54  ;;  %v13874_v29 = vor.u32 %v19000_v46, %v13871_v12  ;;  %v14194_v54 = vor.u32 %v19080_v26, %v14191_v14  ;;  %v14751_v3 = vld [vmem:[%s20702_s9 + $0x10d0] sm:$0xf0]  ;;  %v13751_v46 = vld [vmem:[%s20702_s9 + $0x900] sm:$0xf0]  ;;  %v19050_v12 = vld [vmem:[%s20702_s9 + $0xb5c] sm:$0xf] }
 0x487   : > { %11328 = vmatpush.bf16.msrb.mxu2 %v13154_v47  ;;  %v18429_v47 = vld [vmem:[%s20702_s9 + $0x2d68] sm:$0xf]  ;;  %v14071_v26 = vld [vmem:[%s20702_s9 + $0xb80] sm:$0xf0] }
 0x488   : > { %11341 = vmatpush.bf16.msrb.mxu3 %v13474_v39  ;;  %v13354_v39 = vor.u32 %v18870_v0, %v13351_v23  ;;  %v18990_v0 = vld [vmem:[%s20702_s9 + $0x97c] sm:$0xf] }
 0x489   : > { %11303 = vmatpush.bf16.msrb.mxu0 %v18550_v6  ;;  %v13311_v6 = vld [vmem:[%s20702_s9 + $0x590] sm:$0xf0]  ;;  %v11077_v11 = vpop.f32.mrf.mxu2 }
 0x48a   : > { %11316 = vmatpush.bf16.msrb.mxu1 %v12794_v62  ;;  %v18430_v62 = vor.u32 %v20145_v33, %v18429_v47  ;;  %v13314_v4 = vor.u32 %v18860_v59, %v13311_v6  ;;  %v11090_v23 = vpop.f32.mrf.mxu3  ;;  %v14151_v47 = vld [vmem:[%s20702_s9 + $0xc20] sm:$0xf0]  ;;  %v13791_v59 = vld [vmem:[%s20702_s9 + $0x950] sm:$0xf0]  ;;  %v19060_v6 = vld [vmem:[%s20702_s9 + $0xbac] sm:$0xf]  ;;  %v14074_v11 = vor.u32 %v19050_v12, %v14071_v26 }
 0x48b   : > { %11329 = vmatpush.bf16.msrb.mxu2 %v13114_v8  ;;  %v18389_v8 = vld [vmem:[%s20702_s9 + $0x2d18] sm:$0xf]  ;;  %v13794_v7 = vor.u32 %v18980_v60, %v13791_v59  ;;  %v14311_v59 = vld [vmem:[%s20702_s9 + $0xd60] sm:$0xf0]  ;;  %v19100_v26 = vld [vmem:[%s20702_s9 + $0xcec] sm:$0xf] }
 0x48c   : > { %11342 = vmatpush.bf16.msrb.mxu3 %v13434_v18  ;;  %v18770_v18 = vld [vmem:[%s20702_s9 + $0x29c] sm:$0xf] }
 0x48d   : > { %11304 = vmatpush.bf16.msrb.mxu0 %v18510_v9  ;;  %v18390_v9 = vor.u32 %v20135_v1, %v18389_v8  ;;  %v12954_v15 = vor.u32 %v18770_v18, %v12951_v16  ;;  %v19140_v1 = vld [vmem:[%s20702_s9 + $0xe2c] sm:$0xf] }
 0x48e   : > { %11317 = vmatpush.bf16.msrb.mxu1 %v12754_v41  ;;  %v14511_v41 = vld [vmem:[%s20702_s9 + $0xef0] sm:$0xf0] }
 0x48f   : > { %11330 = vmatpush.bf16.msrb.mxu2 %v13074_v19  ;;  %v18850_v19 = vld [vmem:[%s20702_s9 + $0x51c] sm:$0xf] }
 0x490   : > { %11343 = vmatpush.bf16.msrb.mxu3 %v13394_v25  ;;  %v19240_v25 = vld [vmem:[%s20702_s9 + $0x114c] sm:$0xf]  ;;  %v13274_v24 = vor.u32 %v18850_v19, %v13271_v17  ;;  %v14711_v19 = vld [vmem:[%s20702_s9 + $0x1080] sm:$0xf0] }
 0x491   : > { %11305 = vmatpush.bf16.msrb.mxu0 %v18470_v2  ;;  %v14514_v2 = vor.u32 %v19160_v13, %v14511_v41  ;;  %v14834_v33 = vor.u32 %v19240_v25, %v14831_v20  ;;  %v19130_v13 = vld [vmem:[%s20702_s9 + $0xddc] sm:$0xf]  ;;  %v13711_v20 = vld [vmem:[%s20702_s9 + $0x8b0] sm:$0xf0] }
 0x492   : > { %11318 = vmatpush.bf16.msrb.mxu1 %v12714_v30  ;;  %v13831_v30 = vld [vmem:[%s20702_s9 + $0x9a0] sm:$0xf0]  ;;  %v19210_v41 = vld [vmem:[%s20702_s9 + $0x105c] sm:$0xf] }
 0x493   : > { %11331 = vmatpush.bf16.msrb.mxu2 %v13034_v53  ;;  %v19070_v53 = vld [vmem:[%s20702_s9 + $0xbfc] sm:$0xf]  ;;  %v13834_v63 = vor.u32 %v18990_v0, %v13831_v30  ;;  %v14714_v23 = vor.u32 %v19210_v41, %v14711_v19  ;;  %v19180_v41 = vld [vmem:[%s20702_s9 + $0xf6c] sm:$0xf]  ;;  %v14591_v19 = vld [vmem:[%s20702_s9 + $0xf90] sm:$0xf0] }
 0x494   : > { %11344 = vmatpush.bf16.msrb.mxu3 %v13354_v39  ;;  %v19230_v39 = vld [vmem:[%s20702_s9 + $0x10fc] sm:$0xf]  ;;  %v14154_v5 = vor.u32 %v19070_v53, %v14151_v47  ;;  %v19200_v53 = vld [vmem:[%s20702_s9 + $0x100c] sm:$0xf]  ;;  %v14671_v47 = vld [vmem:[%s20702_s9 + $0x1030] sm:$0xf0] }
 0x495   : > { %11306 = vmatpush.bf16.msrb.mxu0 %v18430_v62  ;;  %v14111_v62 = vld [vmem:[%s20702_s9 + $0xbd0] sm:$0xf0]  ;;  %v14794_v8 = vor.u32 %v19230_v39, %v14791_v57  ;;  %v13671_v57 = vld [vmem:[%s20702_s9 + $0x860] sm:$0xf0]  ;;  %v14674_v60 = vor.u32 %v19200_v53, %v14671_v47  ;;  %v19400_v53 = vld [vmem:[%s20702_s9 + $0x164c] sm:$0xf] }
 0x496   : > { %11319 = vmatpush.bf16.msrb.mxu1 %v12674_v58  ;;  %v14431_v58 = vld [vmem:[%s20702_s9 + $0xe50] sm:$0xf0]  ;;  %v14114_v18 = vor.u32 %v19060_v6, %v14111_v62  ;;  %v19190_v6 = vld [vmem:[%s20702_s9 + $0xfbc] sm:$0xf]  ;;  %v14631_v62 = vld [vmem:[%s20702_s9 + $0xfe0] sm:$0xf0] }
 0x497   : > { %11332 = vmatpush.bf16.msrb.mxu2 %v12994_v38  ;;  %v19220_v38 = vld [vmem:[%s20702_s9 + $0x10ac] sm:$0xf]  ;;  %v14434_v16 = vor.u32 %v19140_v1, %v14431_v58  ;;  %v14634_v12 = vor.u32 %v19190_v6, %v14631_v62  ;;  %v15471_v47 = vld [vmem:[%s20702_s9 + $0x1670] sm:$0xf0] }
 0x498   : > { %11345 = vmatpush.bf16.msrb.mxu3 %v13314_v4  ;;  %v18970_v4 = vld [vmem:[%s20702_s9 + $0x8dc] sm:$0xf]  ;;  %v14754_v14 = vor.u32 %v19220_v38, %v14751_v3  ;;  %v18940_v38 = vld [vmem:[%s20702_s9 + $0x7ec] sm:$0xf]  ;;  %v15474_v6 = vor.u32 %v19400_v53, %v15471_v47  ;;  %v15351_v53 = vld [vmem:[%s20702_s9 + $0x1580] sm:$0xf0] }
 0x499   : > { %11307 = vmatpush.bf16.msrb.mxu0 %v18390_v9  ;;  %v14391_v9 = vld [vmem:[%s20702_s9 + $0xe00] sm:$0xf0]  ;;  %v13754_v17 = vor.u32 %v18970_v4, %v13751_v46  ;;  %v13631_v4 = vld [vmem:[%s20702_s9 + $0x810] sm:$0xf0] }
 0x49a   : > { %11320 = vmatpush.bf16.msrb.mxu1 %v12634_v40  ;;  %v18960_v40 = vld [vmem:[%s20702_s9 + $0x88c] sm:$0xf]  ;;  %v14394_v25 = vor.u32 %v19130_v13, %v14391_v9  ;;  %v11114_v30 = vpop.f32.mrf.mxu1  ;;  %v13951_v46 = vld [vmem:[%s20702_s9 + $0xa90] sm:$0xf0] }
 0x49b   : > { %11333 = vmatpush.bf16.msrb.mxu2 %v12954_v15  ;;  %v11101_v15 = vpop.f32.mrf.mxu0  ;;  %v13714_v32 = vor.u32 %v18960_v40, %v13711_v20  ;;  %v19010_v20 = vld [vmem:[%s20702_s9 + $0xa1c] sm:$0xf] }
 0x49c   : > { %11346 = vmatpush.bf16.msrb.mxu3 %v13274_v24  ;;  %11308 = vmatmul.bf16.vlgmr.msrb.gmra.mxu0 %v21123_v50  ;;  %v11102_v0 = vadd.f32 %v11101_v15, %v23286_v52  ;;  %v14351_v24 = vld [vmem:[%s20702_s9 + $0xdb0] sm:$0xf0]  ;;  %v18950_v52 = vld [vmem:[%s20702_s9 + $0x83c] sm:$0xf] }
 0x49d   : > { %11352 = vmatpush.bf16.msra.mxu0 %v13874_v29  ;;  %11321 = vmatmul.bf16.vlgmr.msrb.gmra.mxu1 %v20829_v27  ;;  %v19040_v29 = vld [vmem:[%s20702_s9 + $0xb0c] sm:$0xf]  ;;  %v13674_v1 = vor.u32 %v18950_v52, %v13671_v57  ;;  %v18930_v15 = vld [vmem:[%s20702_s9 + $0x79c] sm:$0xf] }
 0x49e   : > { %11365 = vmatpush.bf16.msra.mxu1 %v14194_v54  ;;  %11334 = vmatmul.bf16.vlgmr.msrb.gmra.mxu2 %v20831_v28  ;;  %v14031_v54 = vld [vmem:[%s20702_s9 + $0xb30] sm:$0xf0]  ;;  %v19170_v57 = vld [vmem:[%s20702_s9 + $0xf1c] sm:$0xf] }
 0x49f   : > { %11378 = vmatpush.bf16.msra.mxu2 %v14514_v2  ;;  %11347 = vmatmul.bf16.vlgmr.msrb.gmra.mxu3 %v20822_v21  ;;  %v19120_v2 = vld [vmem:[%s20702_s9 + $0xd8c] sm:$0xf]  ;;  %v14034_v31 = vor.u32 %v19040_v29, %v14031_v54  ;;  %v13911_v54 = vld [vmem:[%s20702_s9 + $0xa40] sm:$0xf0] }
 0x4a0   : > { %11391 = vmatpush.bf16.msra.mxu3 %v14834_v33  ;;  %v11115_v33 = vadd.f32 %v11114_v30, %v11102_v0  ;;  %v14354_v39 = vor.u32 %v19120_v2, %v14351_v24  ;;  %v19090_v0 = vld [vmem:[%s20702_s9 + $0xc9c] sm:$0xf]  ;;  %v14594_v2 = vor.u32 %v19180_v41, %v14591_v19  ;;  %v19320_v24 = vld [vmem:[%s20702_s9 + $0x13cc] sm:$0xf]  ;;  %v15151_v30 = vld [vmem:[%s20702_s9 + $0x13f0] sm:$0xf0] }
 0x4a1   : > { %11353 = vmatpush.bf16.msra.mxu0 %v13834_v63  ;;  %v19030_v63 = vld [vmem:[%s20702_s9 + $0xabc] sm:$0xf]  ;;  %v19380_v19 = vld [vmem:[%s20702_s9 + $0x15ac] sm:$0xf] }
 0x4a2   : > { %11366 = vmatpush.bf16.msra.mxu1 %v14154_v5  ;;  %v13991_v5 = vld [vmem:[%s20702_s9 + $0xae0] sm:$0xf0]  ;;  %v11140_v13 = vpop.f32.mrf.mxu3  ;;  %v11116_v9 = vpop.f32.mrf.mxu1 }
 0x4a3   : > { %11379 = vmatpush.bf16.msra.mxu2 %v14474_v10  ;;  %v19110_v10 = vld [vmem:[%s20702_s9 + $0xd3c] sm:$0xf]  ;;  %v13994_v58 = vor.u32 %v19030_v63, %v13991_v5  ;;  %v14551_v63 = vld [vmem:[%s20702_s9 + $0xf40] sm:$0xf0]  ;;  %v15071_v9 = vld [vmem:[%s20702_s9 + $0x1350] sm:$0xf0] }
 0x4a4   : > { %11392 = vmatpush.bf16.msra.mxu3 %v14794_v8  ;;  %v11127_v8 = vpop.f32.mrf.mxu2 }
 0x4a5   : > { %11354 = vmatpush.bf16.msra.mxu0 %v13794_v7  ;;  %v11128_v3 = vadd.f32 %v11127_v8, %v11115_v33  ;;  %v11103_v7 = vpop.f32.mrf.mxu0  ;;  %v19480_v33 = vld [vmem:[%s20702_s9 + $0x18cc] sm:$0xf]  ;;  %v19310_v8 = vld [vmem:[%s20702_s9 + $0x137c] sm:$0xf] }
 0x4a6   : > { %11367 = vmatpush.bf16.msra.mxu1 %v14114_v18  ;;  %v14314_v18 = vor.u32 %v19110_v10, %v14311_v59  ;;  %v19560_v10 = vld [vmem:[%s20702_s9 + $0x1b4c] sm:$0xf]  ;;  %v16111_v59 = vld [vmem:[%s20702_s9 + $0x1b70] sm:$0xf0]  ;;  %v15431_v7 = vld [vmem:[%s20702_s9 + $0x1620] sm:$0xf0] }
 0x4a7   : > { %11380 = vmatpush.bf16.msra.mxu2 %v14434_v16  ;;  %v19020_v16 = vld [vmem:[%s20702_s9 + $0xa6c] sm:$0xf] }
 0x4a8   : > { %11393 = vmatpush.bf16.msra.mxu3 %v14754_v14  ;;  %v14271_v14 = vld [vmem:[%s20702_s9 + $0xd10] sm:$0xf0]  ;;  %v13954_v40 = vor.u32 %v19020_v16, %v13951_v46  ;;  %v15751_v16 = vld [vmem:[%s20702_s9 + $0x18a0] sm:$0xf0] }
 0x4a9   : > { %11355 = vmatpush.bf16.msra.mxu0 %v13754_v17  ;;  %v23357_v17 = vadd.f32 %v11140_v13, %v11128_v3  ;;  %v14274_v29 = vor.u32 %v19100_v26, %v14271_v14  ;;  %v19390_v3 = vld [vmem:[%s20702_s9 + $0x15fc] sm:$0xf]  ;;  %v16071_v26 = vld [vmem:[%s20702_s9 + $0x1b20] sm:$0xf0]  ;;  %v19300_v13 = vld [vmem:[%s20702_s9 + $0x132c] sm:$0xf] }
 0x4aa   : > { %11368 = vmatpush.bf16.msra.mxu1 %v14074_v11  ;;  %v13634_v11 = vor.u32 %v18940_v38, %v13631_v4  ;;  %v14554_v38 = vor.u32 %v19170_v57, %v14551_v63  ;;  %v19470_v4 = vld [vmem:[%s20702_s9 + $0x187c] sm:$0xf]  ;;  %v15434_v14 = vor.u32 %v19390_v3, %v15431_v7  ;;  %v19280_v63 = vld [vmem:[%s20702_s9 + $0x128c] sm:$0xf] }
 0x4ab   : > { %11381 = vmatpush.bf16.msra.mxu2 %v14394_v25  ;;  %v13591_v25 = vld [vmem:[%s20702_s9 + $0x7c0] sm:$0xf0]  ;;  %v15754_v41 = vor.u32 %v19470_v4, %v15751_v16  ;;  %v19520_v7 = vld [vmem:[%s20702_s9 + $0x1a0c] sm:$0xf] }
 0x4ac   : > { %11394 = vmatpush.bf16.msra.mxu3 %v14714_v23  ;;  %v14231_v23 = vld [vmem:[%s20702_s9 + $0xcc0] sm:$0xf0]  ;;  %v13594_v52 = vor.u32 %v18930_v15, %v13591_v25  ;;  %v19460_v15 = vld [vmem:[%s20702_s9 + $0x182c] sm:$0xf]  ;;  %v15711_v25 = vld [vmem:[%s20702_s9 + $0x1850] sm:$0xf0] }
 0x4ad   : > { %11356 = vmatpush.bf16.msra.mxu0 %v13714_v32  ;;  %v15791_v32 = vld [vmem:[%s20702_s9 + $0x18f0] sm:$0xf0]  ;;  %v14234_v5 = vor.u32 %v19090_v0, %v14231_v23  ;;  %v19290_v23 = vld [vmem:[%s20702_s9 + $0x12dc] sm:$0xf] }
 0x4ae   : > { %11369 = vmatpush.bf16.msra.mxu1 %v14034_v31  ;;  %v11129_v31 = vpop.f32.mrf.mxu2  ;;  %v15794_v62 = vor.u32 %v19480_v33, %v15791_v32  ;;  %v19450_v33 = vld [vmem:[%s20702_s9 + $0x17dc] sm:$0xf]  ;;  %v15671_v32 = vld [vmem:[%s20702_s9 + $0x1800] sm:$0xf0] }
 0x4af   : > { %11382 = vmatpush.bf16.msra.mxu2 %v14354_v39  ;;  %v13914_v39 = vor.u32 %v19010_v20, %v13911_v54  ;;  %v15074_v20 = vor.u32 %v19300_v13, %v15071_v9  ;;  %v16031_v54 = vld [vmem:[%s20702_s9 + $0x1ad0] sm:$0xf0] }
 0x4b0   : > { %11395 = vmatpush.bf16.msra.mxu3 %v14674_v60  ;;  %v15154_v60 = vor.u32 %v19320_v24, %v15151_v30  ;;  %v15714_v24 = vor.u32 %v19460_v15, %v15711_v25  ;;  %v19370_v30 = vld [vmem:[%s20702_s9 + $0x155c] sm:$0xf]  ;;  %v15911_v15 = vld [vmem:[%s20702_s9 + $0x19e0] sm:$0xf0] }
 0x4b1   : > { %11357 = vmatpush.bf16.msra.mxu0 %v13674_v1  ;;  %v15111_v1 = vld [vmem:[%s20702_s9 + $0x13a0] sm:$0xf0]  ;;  %v15354_v57 = vor.u32 %v19370_v30, %v15351_v53  ;;  %v19420_v53 = vld [vmem:[%s20702_s9 + $0x16ec] sm:$0xf] }
 0x4b2   : > { %11370 = vmatpush.bf16.msra.mxu1 %v13994_v58  ;;  %v11142_v58 = vpop.f32.mrf.mxu3  ;;  %v15114_v46 = vor.u32 %v19310_v8, %v15111_v1 }
 0x4b3   : > { %11383 = vmatpush.bf16.msra.mxu2 %v14314_v18  ;;  %v16114_v18 = vor.u32 %v19560_v10, %v16111_v59  ;;  %v19360_v59 = vld [vmem:[%s20702_s9 + $0x150c] sm:$0xf] }
 0x4b4   : > { %11396 = vmatpush.bf16.msra.mxu3 %v14634_v12  ;;  %v19550_v12 = vld [vmem:[%s20702_s9 + $0x1afc] sm:$0xf]  ;;  %v19440_v58 = vld [vmem:[%s20702_s9 + $0x178c] sm:$0xf] }
 0x4b5   : > { %11358 = vmatpush.bf16.msra.mxu0 %v13634_v11  ;;  %v15391_v11 = vld [vmem:[%s20702_s9 + $0x15d0] sm:$0xf0] }
 0x4b6   : > { %11371 = vmatpush.bf16.msra.mxu1 %v13954_v40  ;;  %v16074_v40 = vor.u32 %v19550_v12, %v16071_v26  ;;  %v15394_v0 = vor.u32 %v19380_v19, %v15391_v11  ;;  %v14951_v12 = vld [vmem:[%s20702_s9 + $0x1260] sm:$0xf0]  ;;  %v19350_v26 = vld [vmem:[%s20702_s9 + $0x14bc] sm:$0xf] }
 0x4b7   : > { %11384 = vmatpush.bf16.msra.mxu2 %v14274_v29  ;;  %v19540_v29 = vld [vmem:[%s20702_s9 + $0x1aac] sm:$0xf]  ;;  %v15591_v19 = vld [vmem:[%s20702_s9 + $0x1760] sm:$0xf0] }
 0x4b8   : > { %11397 = vmatpush.bf16.msra.mxu3 %v14594_v2  ;;  %v15031_v2 = vld [vmem:[%s20702_s9 + $0x1300] sm:$0xf0]  ;;  %v16034_v47 = vor.u32 %v19540_v29, %v16031_v54  ;;  %v14911_v29 = vld [vmem:[%s20702_s9 + $0x1210] sm:$0xf0] }
 0x4b9   : > { %11359 = vmatpush.bf16.msra.mxu0 %v13594_v52  ;;  %v15034_v31 = vor.u32 %v19290_v23, %v15031_v2  ;;  %v19530_v52 = vld [vmem:[%s20702_s9 + $0x1a5c] sm:$0xf]  ;;  %v11153_v10 = vpop.f32.mrf.mxu0  ;;  %v19340_v23 = vld [vmem:[%s20702_s9 + $0x146c] sm:$0xf]  ;;  %v15231_v2 = vld [vmem:[%s20702_s9 + $0x1490] sm:$0xf0] }
 0x4ba   : > { %11372 = vmatpush.bf16.msra.mxu1 %v13914_v39  ;;  %v15991_v39 = vld [vmem:[%s20702_s9 + $0x1a80] sm:$0xf0]  ;;  %v11154_v1 = vadd.f32 %v11153_v10, %v23357_v17  ;;  %v19410_v10 = vld [vmem:[%s20702_s9 + $0x169c] sm:$0xf] }
 0x4bb   : > { %11385 = vmatpush.bf16.msra.mxu2 %v14234_v5  ;;  %v14991_v5 = vld [vmem:[%s20702_s9 + $0x12b0] sm:$0xf0]  ;;  %v15994_v8 = vor.u32 %v19530_v52, %v15991_v39  ;;  %v19250_v39 = vld [vmem:[%s20702_s9 + $0x119c] sm:$0xf] }
 0x4bc   : > { %11398 = vmatpush.bf16.msra.mxu3 %v14554_v38  ;;  %11360 = vmatmul.bf16.vlgmr.msra.gmra.mxu0 %v20824_v22  ;;  %v15631_v38 = vld [vmem:[%s20702_s9 + $0x17b0] sm:$0xf0]  ;;  %v14994_v3 = vor.u32 %v19280_v63, %v14991_v5  ;;  %v15234_v63 = vor.u32 %v19340_v23, %v15231_v2  ;;  %v19330_v5 = vld [vmem:[%s20702_s9 + $0x141c] sm:$0xf]  ;;  %v16711_v23 = vld [vmem:[%s20702_s9 + $0x2020] sm:$0xf0] }
 0x4bd   : > { %11404 = vmatpush.bf16.msrb.mxu0 %v15154_v60  ;;  %11373 = vmatmul.bf16.vlgmr.msra.gmra.mxu1 %v20889_v48  ;;  %v15674_v60 = vor.u32 %v19450_v33, %v15671_v32  ;;  %v15634_v17 = vor.u32 %v19440_v58, %v15631_v38  ;;  %v19500_v33 = vld [vmem:[%s20702_s9 + $0x196c] sm:$0xf]  ;;  %v15871_v52 = vld [vmem:[%s20702_s9 + $0x1990] sm:$0xf0]  ;;  %v19790_v2 = vld [vmem:[%s20702_s9 + $0x227c] sm:$0xf] }
 0x4be   : > { %11417 = vmatpush.bf16.msrb.mxu1 %v15474_v6  ;;  %11386 = vmatmul.bf16.vlgmr.msra.gmra.mxu2 %v20895_v55  ;;  %v15311_v6 = vld [vmem:[%s20702_s9 + $0x1530] sm:$0xf0]  ;;  %v19720_v58 = vld [vmem:[%s20702_s9 + $0x204c] sm:$0xf] }
 0x4bf   : > { %11430 = vmatpush.bf16.msrb.mxu2 %v15794_v62  ;;  %11399 = vmatmul.bf16.vlgmr.msra.gmra.mxu3 %v20891_v51  ;;  %v11166_v62 = vpop.f32.mrf.mxu1  ;;  %v15314_v4 = vor.u32 %v19360_v59, %v15311_v6  ;;  %v15511_v6 = vld [vmem:[%s20702_s9 + $0x16c0] sm:$0xf0]  ;;  %v16751_v38 = vld [vmem:[%s20702_s9 + $0x2070] sm:$0xf0] }
 0x4c0   : > { %11443 = vmatpush.bf16.msrb.mxu3 %v16114_v18  ;;  %v15951_v18 = vld [vmem:[%s20702_s9 + $0x1a30] sm:$0xf0]  ;;  %v23412_v16 = vadd.f32 %v11166_v62, %v11154_v1  ;;  %v19640_v62 = vld [vmem:[%s20702_s9 + $0x1dcc] sm:$0xf]  ;;  %v15874_v1 = vor.u32 %v19500_v33, %v15871_v52 }
 0x4c1   : > { %11405 = vmatpush.bf16.msrb.mxu0 %v15114_v46  ;;  %v19270_v46 = vld [vmem:[%s20702_s9 + $0x123c] sm:$0xf]  ;;  %v15954_v13 = vor.u32 %v19520_v7, %v15951_v18  ;;  %v23418_v9 = vpop.f32.mrf.mxu2  ;;  %v16351_v52 = vld [vmem:[%s20702_s9 + $0x1d50] sm:$0xf0] }
 0x4c2   : > { %11418 = vmatpush.bf16.msrb.mxu1 %v15434_v14  ;;  %v15271_v14 = vld [vmem:[%s20702_s9 + $0x14e0] sm:$0xf0]  ;;  %v14954_v11 = vor.u32 %v19270_v46, %v14951_v12  ;;  %v19490_v46 = vld [vmem:[%s20702_s9 + $0x191c] sm:$0xf] }
 0x4c3   : > { %11431 = vmatpush.bf16.msrb.mxu2 %v15754_v41  ;;  %v19430_v41 = vld [vmem:[%s20702_s9 + $0x173c] sm:$0xf]  ;;  %v15274_v25 = vor.u32 %v19350_v26, %v15271_v14  ;;  %v15831_v12 = vld [vmem:[%s20702_s9 + $0x1940] sm:$0xf0]  ;;  %v19880_v14 = vld [vmem:[%s20702_s9 + $0x254c] sm:$0xf] }
 0x4c4   : > { %11444 = vmatpush.bf16.msrb.mxu3 %v16074_v40  ;;  %v19510_v40 = vld [vmem:[%s20702_s9 + $0x19bc] sm:$0xf]  ;;  %v15594_v54 = vor.u32 %v19430_v41, %v15591_v19  ;;  %v15514_v41 = vor.u32 %v19410_v10, %v15511_v6  ;;  %v16754_v19 = vor.u32 %v19720_v58, %v16751_v38  ;;  %v19860_v10 = vld [vmem:[%s20702_s9 + $0x24ac] sm:$0xf]  ;;  %v16311_v58 = vld [vmem:[%s20702_s9 + $0x1d00] sm:$0xf0] }
 0x4c5   : > { %11406 = vmatpush.bf16.msrb.mxu0 %v15074_v20  ;;  %v19260_v20 = vld [vmem:[%s20702_s9 + $0x11ec] sm:$0xf]  ;;  %v15914_v30 = vor.u32 %v19510_v40, %v15911_v15  ;;  %v15834_v15 = vor.u32 %v19490_v46, %v15831_v12  ;;  %v19690_v38 = vld [vmem:[%s20702_s9 + $0x1f5c] sm:$0xf]  ;;  %v17271_v12 = vld [vmem:[%s20702_s9 + $0x2480] sm:$0xf0] }
 0x4c6   : > { %11419 = vmatpush.bf16.msrb.mxu1 %v15394_v0  ;;  %v23426_v0 = vpop.f32.mrf.mxu3  ;;  %v19850_v46 = vld [vmem:[%s20702_s9 + $0x245c] sm:$0xf] }
 0x4c7   : > { %11432 = vmatpush.bf16.msrb.mxu2 %v15714_v24  ;;  %v11155_v24 = vpop.f32.mrf.mxu0  ;;  %v11168_v32 = vpop.f32.mrf.mxu1 }
 0x4c8   : > { %11445 = vmatpush.bf16.msrb.mxu3 %v16034_v47  ;;  %v15551_v47 = vld [vmem:[%s20702_s9 + $0x1710] sm:$0xf0]  ;;  %v17031_v24 = vld [vmem:[%s20702_s9 + $0x22a0] sm:$0xf0] }
 0x4c9   : > { %11407 = vmatpush.bf16.msrb.mxu0 %v15034_v31  ;;  %v14914_v31 = vor.u32 %v19260_v20, %v14911_v29  ;;  %v15554_v59 = vor.u32 %v19420_v53, %v15551_v47  ;;  %v11181_v7 = vpop.f32.mrf.mxu2  ;;  %v16391_v20 = vld [vmem:[%s20702_s9 + $0x1da0] sm:$0xf0]  ;;  %v19710_v29 = vld [vmem:[%s20702_s9 + $0x1ffc] sm:$0xf]  ;;  %v17034_v32 = vor.u32 %v19790_v2, %v17031_v24 }
 0x4ca   : > { %11420 = vmatpush.bf16.msrb.mxu1 %v15354_v57  ;;  %v14871_v57 = vld [vmem:[%s20702_s9 + $0x11c0] sm:$0xf0]  ;;  %v16714_v33 = vor.u32 %v19710_v29, %v16711_v23  ;;  %v16911_v29 = vld [vmem:[%s20702_s9 + $0x21b0] sm:$0xf0] }
 0x4cb   : > { %11433 = vmatpush.bf16.msrb.mxu2 %v15674_v60  ;;  %v15191_v60 = vld [vmem:[%s20702_s9 + $0x1440] sm:$0xf0]  ;;  %v14874_v18 = vor.u32 %v19250_v39, %v14871_v57  ;;  %v19700_v39 = vld [vmem:[%s20702_s9 + $0x1fac] sm:$0xf]  ;;  %v17231_v23 = vld [vmem:[%s20702_s9 + $0x2430] sm:$0xf0] }
 0x4cc   : > { %11446 = vmatpush.bf16.msrb.mxu3 %v15994_v8  ;;  %v16431_v8 = vld [vmem:[%s20702_s9 + $0x1df0] sm:$0xf0]  ;;  %v17351_v53 = vld [vmem:[%s20702_s9 + $0x2520] sm:$0xf0] }
 0x4cd   : > { %11408 = vmatpush.bf16.msrb.mxu0 %v14994_v3  ;;  %v19800_v3 = vld [vmem:[%s20702_s9 + $0x22cc] sm:$0xf]  ;;  %v16434_v26 = vor.u32 %v19640_v62, %v16431_v8  ;;  %v16631_v7 = vld [vmem:[%s20702_s9 + $0x1f80] sm:$0xf0] }
 0x4ce   : > { %11421 = vmatpush.bf16.msrb.mxu1 %v15314_v4  ;;  %v17071_v4 = vld [vmem:[%s20702_s9 + $0x22f0] sm:$0xf0] }
 0x4cf   : > { %11434 = vmatpush.bf16.msrb.mxu2 %v15634_v17  ;;  %v15194_v17 = vor.u32 %v19330_v5, %v15191_v60  ;;  %v17074_v40 = vor.u32 %v19800_v3, %v17071_v4  ;;  %v19780_v5 = vld [vmem:[%s20702_s9 + $0x222c] sm:$0xf]  ;;  %v16991_v60 = vld [vmem:[%s20702_s9 + $0x2250] sm:$0xf0]  ;;  %v16951_v4 = vld [vmem:[%s20702_s9 + $0x2200] sm:$0xf0] }
 0x4d0   : > { %11447 = vmatpush.bf16.msrb.mxu3 %v15954_v13  ;;  %v17391_v13 = vld [vmem:[%s20702_s9 + $0x2570] sm:$0xf0]  ;;  %v16994_v8 = vor.u32 %v19780_v5, %v16991_v60  ;;  %v17191_v5 = vld [vmem:[%s20702_s9 + $0x23e0] sm:$0xf0] }
 0x4d1   : > { %11409 = vmatpush.bf16.msrb.mxu0 %v14954_v11  ;;  %v11194_v11 = vpop.f32.mrf.mxu3 }
 0x4d2   : > { %11422 = vmatpush.bf16.msrb.mxu1 %v15274_v25  ;;  %v19630_v25 = vld [vmem:[%s20702_s9 + $0x1d7c] sm:$0xf]  ;;  %v19680_v11 = vld [vmem:[%s20702_s9 + $0x1f0c] sm:$0xf] }
 0x4d3   : > { %11435 = vmatpush.bf16.msrb.mxu2 %v15594_v54  ;;  %v17394_v54 = vor.u32 %v19880_v14, %v17391_v13  ;;  %v16394_v47 = vor.u32 %v19630_v25, %v16391_v20  ;;  %v16634_v14 = vor.u32 %v19690_v38, %v16631_v7  ;;  %v16591_v25 = vld [vmem:[%s20702_s9 + $0x1f30] sm:$0xf0]  ;;  %v19760_v20 = vld [vmem:[%s20702_s9 + $0x218c] sm:$0xf] }
 0x4d4   : > { %11448 = vmatpush.bf16.msrb.mxu3 %v15914_v30  ;;  %v19870_v30 = vld [vmem:[%s20702_s9 + $0x24fc] sm:$0xf]  ;;  %v16594_v24 = vor.u32 %v19680_v11, %v16591_v25  ;;  %v19740_v7 = vld [vmem:[%s20702_s9 + $0x20ec] sm:$0xf] }
 0x4d5   : > { %11410 = vmatpush.bf16.msrb.mxu0 %v14914_v31  ;;  %v19620_v31 = vld [vmem:[%s20702_s9 + $0x1d2c] sm:$0xf]  ;;  %v17354_v57 = vor.u32 %v19870_v30, %v17351_v53  ;;  %v16914_v30 = vor.u32 %v19760_v20, %v16911_v29  ;;  %v19590_v53 = vld [vmem:[%s20702_s9 + $0x1c3c] sm:$0xf]  ;;  %v16791_v29 = vld [vmem:[%s20702_s9 + $0x20c0] sm:$0xf0] }
 0x4d6   : > { %11423 = vmatpush.bf16.msrb.mxu1 %v15234_v63  ;;  %v16671_v63 = vld [vmem:[%s20702_s9 + $0x1fd0] sm:$0xf0]  ;;  %v16354_v6 = vor.u32 %v19620_v31, %v16351_v52  ;;  %v16551_v31 = vld [vmem:[%s20702_s9 + $0x1ee0] sm:$0xf0]  ;;  %v19750_v52 = vld [vmem:[%s20702_s9 + $0x213c] sm:$0xf] }
 0x4d7   : > { %11436 = vmatpush.bf16.msrb.mxu2 %v15554_v59  ;;  %v17311_v59 = vld [vmem:[%s20702_s9 + $0x24d0] sm:$0xf0]  ;;  %v16674_v62 = vor.u32 %v19700_v39, %v16671_v63  ;;  %v16871_v39 = vld [vmem:[%s20702_s9 + $0x2160] sm:$0xf0]  ;;  %v19830_v63 = vld [vmem:[%s20702_s9 + $0x23bc] sm:$0xf] }
 0x4d8   : > { %11449 = vmatpush.bf16.msrb.mxu3 %v15874_v1  ;;  %v19610_v1 = vld [vmem:[%s20702_s9 + $0x1cdc] sm:$0xf]  ;;  %v17314_v3 = vor.u32 %v19860_v10, %v17311_v59  ;;  %v17194_v38 = vor.u32 %v19830_v63, %v17191_v5 }
 0x4d9   : > { %11411 = vmatpush.bf16.msrb.mxu0 %v14874_v18  ;;  %v19770_v18 = vld [vmem:[%s20702_s9 + $0x21dc] sm:$0xf] }
 0x4da   : > { %11424 = vmatpush.bf16.msrb.mxu1 %v15194_v17  ;;  %v23478_v17 = vpop.f32.mrf.mxu0  ;;  %v16954_v13 = vor.u32 %v19770_v18, %v16951_v4  ;;  %v16831_v18 = vld [vmem:[%s20702_s9 + $0x2110] sm:$0xf0]  ;;  %v19650_v11 = vld [vmem:[%s20702_s9 + $0x1e1c] sm:$0xf] }
 0x4db   : > { %11437 = vmatpush.bf16.msrb.mxu2 %v15514_v41  ;;  %v19600_v41 = vld [vmem:[%s20702_s9 + $0x1c8c] sm:$0xf]  ;;  %v19730_v25 = vld [vmem:[%s20702_s9 + $0x209c] sm:$0xf] }
 0x4dc   : > { %11450 = vmatpush.bf16.msrb.mxu3 %v15834_v15  ;;  %11412 = vmatmul.bf16.vlgmr.msrb.gmra.mxu0 %v20901_v61  ;;  %v17274_v15 = vor.u32 %v19850_v46, %v17271_v12  ;;  %v19820_v46 = vld [vmem:[%s20702_s9 + $0x236c] sm:$0xf]  ;;  %v17151_v12 = vld [vmem:[%s20702_s9 + $0x2390] sm:$0xf0] }
 0x4dd   : > { %11456 = vmatpush.bf16.msra.mxu0 %v16434_v26  ;;  %11425 = vmatmul.bf16.vlgmr.msrb.gmra.mxu1 %v20964_v36  ;;  %v16314_v26 = vor.u32 %v19610_v1, %v16311_v58  ;;  %v16191_v1 = vld [vmem:[%s20702_s9 + $0x1c10] sm:$0xf0]  ;;  %v19660_v58 = vld [vmem:[%s20702_s9 + $0x1e6c] sm:$0xf]  ;;  %v17154_v20 = vor.u32 %v19820_v46, %v17151_v12  ;;  %v20190_v12 = vld [vmem:[%s20702_s9 + $0x2efc] sm:$0xf] }
 0x4de   : > { %11469 = vmatpush.bf16.msra.mxu1 %v16754_v19  ;;  %11438 = vmatmul.bf16.vlgmr.msrb.gmra.mxu2 %v20971_v42  ;;  %v16271_v19 = vld [vmem:[%s20702_s9 + $0x1cb0] sm:$0xf0] }
 0x4df   : > { %11482 = vmatpush.bf16.msra.mxu2 %v17074_v40  ;;  %11451 = vmatmul.bf16.vlgmr.msrb.gmra.mxu3 %v20966_v37  ;;  %v23483_v40 = vpop.f32.mrf.mxu1  ;;  %v16274_v2 = vor.u32 %v19600_v41, %v16271_v19  ;;  %v16834_v19 = vor.u32 %v19740_v7, %v16831_v18  ;;  %v20110_v7 = vld [vmem:[%s20702_s9 + $0x2c7c] sm:$0xf]  ;;  %v18311_v18 = vld [vmem:[%s20702_s9 + $0x2ca0] sm:$0xf0] }
 0x4e0   : > { %11495 = vmatpush.bf16.msra.mxu3 %v17394_v54  ;;  %v19840_v54 = vld [vmem:[%s20702_s9 + $0x240c] sm:$0xf] }
 0x4e1   : > { %11457 = vmatpush.bf16.msra.mxu0 %v16394_v47  ;;  %v16231_v47 = vld [vmem:[%s20702_s9 + $0x1c60] sm:$0xf0] }
 0x4e2   : > { %11470 = vmatpush.bf16.msra.mxu1 %v16714_v33  ;;  %v19670_v33 = vld [vmem:[%s20702_s9 + $0x1ebc] sm:$0xf]  ;;  %v16234_v60 = vor.u32 %v19590_v53, %v16231_v47  ;;  %v11207_v10 = vpop.f32.mrf.mxu0  ;;  %v23500_v59 = vpop.f32.mrf.mxu3 }
 0x4e3   : > { %11483 = vmatpush.bf16.msra.mxu2 %v17034_v32  ;;  %v17234_v32 = vor.u32 %v19840_v54, %v17231_v23  ;;  %v19960_v54 = vld [vmem:[%s20702_s9 + $0x27cc] sm:$0xf]  ;;  %v17711_v23 = vld [vmem:[%s20702_s9 + $0x27f0] sm:$0xf0] }
 0x4e4   : > { %11496 = vmatpush.bf16.msra.mxu3 %v17354_v57  ;;  %v23496_v57 = vpop.f32.mrf.mxu2  ;;  %v17714_v5 = vor.u32 %v19960_v54, %v17711_v23  ;;  %v20200_v10 = vld [vmem:[%s20702_s9 + $0x2f4c] sm:$0xf] }
 0x4e5   : > { %11458 = vmatpush.bf16.msra.mxu0 %v16354_v6  ;;  %v16554_v6 = vor.u32 %v19670_v33, %v16551_v31  ;;  %v18351_v33 = vld [vmem:[%s20702_s9 + $0x2cf0] sm:$0xf0]  ;;  %v17111_v31 = vld [vmem:[%s20702_s9 + $0x2340] sm:$0xf0]  ;;  %v20180_v23 = vld [vmem:[%s20702_s9 + $0x2eac] sm:$0xf] }
 0x4e6   : > { %11471 = vmatpush.bf16.msra.mxu1 %v16674_v62  ;;  %v16874_v62 = vor.u32 %v19750_v52, %v16871_v39  ;;  %v16794_v39 = vor.u32 %v19730_v25, %v16791_v29  ;;  %v20100_v25 = vld [vmem:[%s20702_s9 + $0x2c2c] sm:$0xf] }
 0x4e7   : > { %11484 = vmatpush.bf16.msra.mxu2 %v16994_v8  ;;  %v19580_v8 = vld [vmem:[%s20702_s9 + $0x1bec] sm:$0xf]  ;;  %v11220_v4 = vpop.f32.mrf.mxu1 }
 0x4e8   : > { %11497 = vmatpush.bf16.msra.mxu3 %v17314_v3  ;;  %v16511_v3 = vld [vmem:[%s20702_s9 + $0x1e90] sm:$0xf0] }
 0x4e9   : > { %11459 = vmatpush.bf16.msra.mxu0 %v16314_v26  ;;  %v16194_v26 = vor.u32 %v19580_v8, %v16191_v1  ;;  %v16514_v41 = vor.u32 %v19660_v58, %v16511_v3  ;;  %v19950_v1 = vld [vmem:[%s20702_s9 + $0x277c] sm:$0xf]  ;;  %v17671_v58 = vld [vmem:[%s20702_s9 + $0x27a0] sm:$0xf0] }
 0x4ea   : > { %11472 = vmatpush.bf16.msra.mxu1 %v16634_v14  ;;  %v19570_v14 = vld [vmem:[%s20702_s9 + $0x1b9c] sm:$0xf]  ;;  %v11246_v63 = vpop.f32.mrf.mxu3  ;;  %v17991_v3 = vld [vmem:[%s20702_s9 + $0x2a20] sm:$0xf0]  ;;  %v17674_v46 = vor.u32 %v19950_v1, %v17671_v58  ;;  %v19920_v58 = vld [vmem:[%s20702_s9 + $0x268c] sm:$0xf] }
 0x4eb   : > { %11485 = vmatpush.bf16.msra.mxu2 %v16954_v13  ;;  %v16151_v13 = vld [vmem:[%s20702_s9 + $0x1bc0] sm:$0xf0] }
 0x4ec   : > { %11498 = vmatpush.bf16.msra.mxu3 %v17274_v15  ;;  %v16471_v15 = vld [vmem:[%s20702_s9 + $0x1e40] sm:$0xf0]  ;;  %v11233_v53 = vpop.f32.mrf.mxu2  ;;  %v16154_v47 = vor.u32 %v19570_v14, %v16151_v13  ;;  %v18314_v13 = vor.u32 %v20110_v7, %v18311_v18  ;;  %v17871_v7 = vld [vmem:[%s20702_s9 + $0x2930] sm:$0xf0]  ;;  %v20080_v18 = vld [vmem:[%s20702_s9 + $0x2b8c] sm:$0xf] }
 0x4ed   : > { %11460 = vmatpush.bf16.msra.mxu0 %v16274_v2  ;;  %v20040_v2 = vld [vmem:[%s20702_s9 + $0x2a4c] sm:$0xf]  ;;  %v16474_v52 = vor.u32 %v19650_v11, %v16471_v15  ;;  %v17951_v15 = vld [vmem:[%s20702_s9 + $0x29d0] sm:$0xf0]  ;;  %v19930_v53 = vld [vmem:[%s20702_s9 + $0x26dc] sm:$0xf] }
 0x4ee   : > { %11473 = vmatpush.bf16.msra.mxu1 %v16594_v24  ;;  %v18031_v24 = vld [vmem:[%s20702_s9 + $0x2a70] sm:$0xf0]  ;;  %v20020_v11 = vld [vmem:[%s20702_s9 + $0x29ac] sm:$0xf] }
 0x4ef   : > { %11486 = vmatpush.bf16.msra.mxu2 %v16914_v30  ;;  %v20120_v30 = vld [vmem:[%s20702_s9 + $0x2ccc] sm:$0xf] }
 0x4f0   : > { %11499 = vmatpush.bf16.msra.mxu3 %v17234_v32  ;;  %v19810_v32 = vld [vmem:[%s20702_s9 + $0x231c] sm:$0xf] }
 0x4f1   : > { %11461 = vmatpush.bf16.msra.mxu0 %v16234_v60  ;;  %v18034_v60 = vor.u32 %v20040_v2, %v18031_v24  ;;  %v17114_v8 = vor.u32 %v19810_v32, %v17111_v31  ;;  %v18591_v2 = vld [vmem:[%s20702_s9 + $0x2ed0] sm:$0xf0]  ;;  %v17954_v24 = vor.u32 %v20020_v11, %v17951_v15  ;;  %v17911_v32 = vld [vmem:[%s20702_s9 + $0x2980] sm:$0xf0]  ;;  %v20090_v31 = vld [vmem:[%s20702_s9 + $0x2bdc] sm:$0xf] }
 0x4f2   : > { %11474 = vmatpush.bf16.msra.mxu1 %v16554_v6  ;;  %v18671_v6 = vld [vmem:[%s20702_s9 + $0x2f70] sm:$0xf0]  ;;  %v19990_v11 = vld [vmem:[%s20702_s9 + $0x28bc] sm:$0xf]  ;;  %v17831_v15 = vld [vmem:[%s20702_s9 + $0x28e0] sm:$0xf0] }
 0x4f3   : > { %11487 = vmatpush.bf16.msra.mxu2 %v16874_v62  ;;  %v18354_v62 = vor.u32 %v20120_v30, %v18351_v33  ;;  %v18674_v4 = vor.u32 %v20200_v10, %v18671_v6  ;;  %v20010_v33 = vld [vmem:[%s20702_s9 + $0x295c] sm:$0xf]  ;;  %v18551_v10 = vld [vmem:[%s20702_s9 + $0x2e80] sm:$0xf0]  ;;  %v11180_v6 = vadd.f32 %v23418_v9, %v23412_v16 }
 0x4f4   : > { %11500 = vmatpush.bf16.msra.mxu3 %v17194_v38  ;;  %v20030_v38 = vld [vmem:[%s20702_s9 + $0x29fc] sm:$0xf] }
 0x4f5   : > { %11462 = vmatpush.bf16.msra.mxu0 %v16194_v26  ;;  %v18631_v26 = vld [vmem:[%s20702_s9 + $0x2f20] sm:$0xf0]  ;;  %v17994_v14 = vor.u32 %v20030_v38, %v17991_v3  ;;  %v17551_v38 = vld [vmem:[%s20702_s9 + $0x26b0] sm:$0xf0]  ;;  %v20000_v3 = vld [vmem:[%s20702_s9 + $0x290c] sm:$0xf] }
 0x4f6   : > { %11475 = vmatpush.bf16.msra.mxu1 %v16514_v41  ;;  %v19940_v41 = vld [vmem:[%s20702_s9 + $0x272c] sm:$0xf]  ;;  %v18634_v29 = vor.u32 %v20190_v12, %v18631_v26  ;;  %v17554_v9 = vor.u32 %v19920_v58, %v17551_v38  ;;  %v18511_v12 = vld [vmem:[%s20702_s9 + $0x2e30] sm:$0xf0]  ;;  %v11193_v26 = vadd.f32 %v23426_v0, %v11180_v6  ;;  %v19890_v38 = vld [vmem:[%s20702_s9 + $0x259c] sm:$0xf] }
 0x4f7   : > { %11488 = vmatpush.bf16.msra.mxu2 %v16834_v19  ;;  %v17631_v19 = vld [vmem:[%s20702_s9 + $0x2750] sm:$0xf0] }
 0x4f8   : > { %11501 = vmatpush.bf16.msra.mxu3 %v17154_v20  ;;  %v18271_v20 = vld [vmem:[%s20702_s9 + $0x2c50] sm:$0xf0]  ;;  %v17634_v54 = vor.u32 %v19940_v41, %v17631_v19  ;;  %v19910_v41 = vld [vmem:[%s20702_s9 + $0x263c] sm:$0xf]  ;;  %v17511_v19 = vld [vmem:[%s20702_s9 + $0x2660] sm:$0xf0] }
 0x4f9   : > { %11463 = vmatpush.bf16.msra.mxu0 %v16154_v47  ;;  %v18274_v30 = vor.u32 %v20100_v25, %v18271_v20  ;;  %v17591_v47 = vld [vmem:[%s20702_s9 + $0x2700] sm:$0xf0]  ;;  %v23552_v63 = vpop.f32.mrf.mxu0  ;;  %v20070_v25 = vld [vmem:[%s20702_s9 + $0x2b3c] sm:$0xf]  ;;  %v18431_v58 = vld [vmem:[%s20702_s9 + $0x2d90] sm:$0xf0] }
 0x4fa   : > { %11476 = vmatpush.bf16.msra.mxu1 %v16474_v52  ;;  %v18231_v52 = vld [vmem:[%s20702_s9 + $0x2c00] sm:$0xf0]  ;;  %v23558_v1 = vpop.f32.mrf.mxu1 }
 0x4fb   : > { %11489 = vmatpush.bf16.msra.mxu2 %v16794_v39  ;;  %v18594_v39 = vor.u32 %v20180_v23, %v18591_v2  ;;  %v18151_v20 = vld [vmem:[%s20702_s9 + $0x2b60] sm:$0xf0]  ;;  %v17514_v2 = vor.u32 %v19910_v41, %v17511_v19  ;;  %v18846_v41 = vld [vmem:[%s20702_s9 + $0x4f4] sm:$0xf0]  ;;  %v13557_v19 = vld [vmem:[%s20702_s9 + $0x750] sm:$0xf] }
 0x4fc   : > { %11502 = vmatpush.bf16.msra.mxu3 %v17114_v8  ;;  %11464 = vmatmul.bf16.vlgmr.msra.gmra.mxu0 %v20973_v43  ;;  %v18234_v8 = vor.u32 %v20090_v31, %v18231_v52  ;;  %v19980_v31 = vld [vmem:[%s20702_s9 + $0x286c] sm:$0xf] }
 0x4fd   : > { %11508 = vmatpush.bf16.msrb.mxu0 %v17714_v5  ;;  %11477 = vmatmul.bf16.vlgmr.msra.gmra.mxu1 %v21042_v34  ;;  %v17594_v5 = vor.u32 %v19930_v53, %v17591_v47  ;;  %v18154_v47 = vor.u32 %v20070_v25, %v18151_v20  ;;  %v20130_v25 = vld [vmem:[%s20702_s9 + $0x2d1c] sm:$0xf]  ;;  %v18391_v20 = vld [vmem:[%s20702_s9 + $0x2d40] sm:$0xf0] }
 0x4fe   : > { %11521 = vmatpush.bf16.msrb.mxu1 %v18034_v60  ;;  %11490 = vmatmul.bf16.vlgmr.msra.gmra.mxu2 %v21049_v44  ;;  %v20170_v60 = vld [vmem:[%s20702_s9 + $0x2e5c] sm:$0xf] }
 0x4ff   : > { %11534 = vmatpush.bf16.msrb.mxu2 %v18354_v62  ;;  %11503 = vmatmul.bf16.vlgmr.msra.gmra.mxu3 %v21044_v35  ;;  %v17914_v62 = vor.u32 %v20010_v33, %v17911_v32  ;;  %v18554_v16 = vor.u32 %v20170_v60, %v18551_v10  ;;  %v19900_v33 = vld [vmem:[%s20702_s9 + $0x25ec] sm:$0xf]  ;;  %v17471_v32 = vld [vmem:[%s20702_s9 + $0x2610] sm:$0xf0] }
 0x500   : > { %11547 = vmatpush.bf16.msrb.mxu3 %v18674_v4  ;;  %v18191_v4 = vld [vmem:[%s20702_s9 + $0x2bb0] sm:$0xf0] }
 0x501   : > { %11509 = vmatpush.bf16.msrb.mxu0 %v17674_v46  ;;  %v20160_v46 = vld [vmem:[%s20702_s9 + $0x2e0c] sm:$0xf]  ;;  %v11259_v53 = vpop.f32.mrf.mxu0  ;;  %v18111_v60 = vld [vmem:[%s20702_s9 + $0x2b10] sm:$0xf0] }
 0x502   : > { %11522 = vmatpush.bf16.msrb.mxu1 %v17994_v14  ;;  %v17874_v14 = vor.u32 %v20000_v3, %v17871_v7  ;;  %v18514_v0 = vor.u32 %v20160_v46, %v18511_v12  ;;  %v23578_v23 = vpop.f32.mrf.mxu3  ;;  %v11272_v52 = vpop.f32.mrf.mxu1  ;;  %v17431_v3 = vld [vmem:[%s20702_s9 + $0x25c0] sm:$0xf0]  ;;  %v12917_v12 = vld [vmem:[%s20702_s9 + $0x250] sm:$0xf] }
 0x503   : > { %11535 = vmatpush.bf16.msrb.mxu2 %v18314_v13  ;;  %v18194_v13 = vor.u32 %v20080_v18, %v18191_v4  ;;  %v19970_v4 = vld [vmem:[%s20702_s9 + $0x281c] sm:$0xf]  ;;  %v18071_v46 = vld [vmem:[%s20702_s9 + $0x2ac0] sm:$0xf0]  ;;  %v12877_v52 = vld [vmem:[%s20702_s9 + $0x200] sm:$0xf] }
 0x504   : > { %11548 = vmatpush.bf16.msrb.mxu3 %v18634_v29  ;;  %v11206_v29 = vadd.f32 %v23478_v17, %v11193_v26  ;;  %v17834_v17 = vor.u32 %v19990_v11, %v17831_v15  ;;  %v18766_v26 = vld [vmem:[%s20702_s9 + $0x274] sm:$0xf0]  ;;  %v17434_v11 = vor.u32 %v19890_v38, %v17431_v3 }
 0x505   : > { %11510 = vmatpush.bf16.msrb.mxu0 %v17634_v54  ;;  %v23576_v54 = vpop.f32.mrf.mxu2  ;;  %v18926_v15 = vld [vmem:[%s20702_s9 + $0x774] sm:$0xf0] }
 0x506   : > { %11523 = vmatpush.bf16.msrb.mxu1 %v17954_v24  ;;  %v20150_v24 = vld [vmem:[%s20702_s9 + $0x2dbc] sm:$0xf]  ;;  %v11219_v10 = vadd.f32 %v23483_v40, %v11206_v29 }
 0x507   : > { %11536 = vmatpush.bf16.msrb.mxu2 %v18274_v30  ;;  %v18471_v30 = vld [vmem:[%s20702_s9 + $0x2de0] sm:$0xf0] }
 0x508   : > { %11549 = vmatpush.bf16.msrb.mxu3 %v18594_v39  ;;  %v17791_v39 = vld [vmem:[%s20702_s9 + $0x2890] sm:$0xf0]  ;;  %v18474_v6 = vor.u32 %v20150_v24, %v18471_v30  ;;  %v11232_v7 = vadd.f32 %v23496_v57, %v11219_v10  ;;  %v12918_v30 = vor.u32 %v18766_v26, %v12917_v12  ;;  %v18916_v10 = vld [vmem:[%s20702_s9 + $0x724] sm:$0xf0]  ;;  %v13797_v26 = vld [vmem:[%s20702_s9 + $0x930] sm:$0xf] }
 0x509   : > { %11511 = vmatpush.bf16.msrb.mxu0 %v17594_v5  ;;  %v20060_v5 = vld [vmem:[%s20702_s9 + $0x2aec] sm:$0xf]  ;;  %v17794_v40 = vor.u32 %v19980_v31, %v17791_v39  ;;  %v18394_v31 = vor.u32 %v20130_v25, %v18391_v20  ;;  %v13197_v39 = vld [vmem:[%s20702_s9 + $0x480] sm:$0xf]  ;;  %v18896_v25 = vld [vmem:[%s20702_s9 + $0x684] sm:$0xf0] }
 0x50a   : > { %11524 = vmatpush.bf16.msrb.mxu1 %v17914_v62  ;;  %v20140_v62 = vld [vmem:[%s20702_s9 + $0x2d6c] sm:$0xf]  ;;  %v18114_v18 = vor.u32 %v20060_v5, %v18111_v60  ;;  %v11298_v29 = vpop.f32.mrf.mxu3  ;;  %v18836_v5 = vld [vmem:[%s20702_s9 + $0x4a4] sm:$0xf0]  ;;  %v13517_v60 = vld [vmem:[%s20702_s9 + $0x700] sm:$0xf] }
 0x50b   : > { %11537 = vmatpush.bf16.msrb.mxu2 %v18234_v8  ;;  %v17474_v8 = vor.u32 %v19900_v33, %v17471_v32  ;;  %v13558_v32 = vor.u32 %v18926_v15, %v13557_v19  ;;  %v13198_v38 = vor.u32 %v18836_v5, %v13197_v39  ;;  %v13518_v3 = vor.u32 %v18916_v10, %v13517_v60  ;;  %v18736_v19 = vld [vmem:[%s20702_s9 + $0x184] sm:$0xf0]  ;;  %v13437_v15 = vld [vmem:[%s20702_s9 + $0x660] sm:$0xf]  ;;  %v13397_v39 = vld [vmem:[%s20702_s9 + $0x610] sm:$0xf] }
 0x50c   : > { %11550 = vmatpush.bf16.msrb.mxu3 %v18554_v16  ;;  %v17751_v16 = vld [vmem:[%s20702_s9 + $0x2840] sm:$0xf0]  ;;  %v18886_v5 = vld [vmem:[%s20702_s9 + $0x634] sm:$0xf0] }
 0x50d   : > { %11512 = vmatpush.bf16.msrb.mxu0 %v17554_v9  ;;  %v20050_v9 = vld [vmem:[%s20702_s9 + $0x2a9c] sm:$0xf]  ;;  %v11285_v57 = vpop.f32.mrf.mxu2 }
 0x50e   : > { %11525 = vmatpush.bf16.msrb.mxu1 %v17874_v14  ;;  %v18434_v14 = vor.u32 %v20140_v62, %v18431_v58  ;;  %v18074_v24 = vor.u32 %v20050_v9, %v18071_v46  ;;  %v13837_v62 = vld [vmem:[%s20702_s9 + $0x980] sm:$0xf]  ;;  %v18906_v9 = vld [vmem:[%s20702_s9 + $0x6d4] sm:$0xf0] }
 0x50f   : > { %11538 = vmatpush.bf16.msrb.mxu2 %v18194_v13  ;;  %v13237_v13 = vld [vmem:[%s20702_s9 + $0x4d0] sm:$0xf]  ;;  %v13117_v57 = vld [vmem:[%s20702_s9 + $0x3e0] sm:$0xf] }
 0x510   : > { %11551 = vmatpush.bf16.msrb.mxu3 %v18514_v0  ;;  %v11245_v0 = vadd.f32 %v23500_v59, %v11232_v7  ;;  %v13238_v53 = vor.u32 %v18846_v41, %v13237_v13  ;;  %v18756_v59 = vld [vmem:[%s20702_s9 + $0x224] sm:$0xf0]  ;;  %v12837_v7 = vld [vmem:[%s20702_s9 + $0x1b0] sm:$0xf] }
 0x511   : > { %11513 = vmatpush.bf16.msrb.mxu0 %v17514_v2  ;;  %v17754_v2 = vor.u32 %v19970_v4, %v17751_v16  ;;  %v18826_v4 = vld [vmem:[%s20702_s9 + $0x454] sm:$0xf0]  ;;  %v13477_v16 = vld [vmem:[%s20702_s9 + $0x6b0] sm:$0xf] }
 0x512   : > { %11526 = vmatpush.bf16.msrb.mxu1 %v17834_v17  ;;  %v13877_v17 = vld [vmem:[%s20702_s9 + $0x9d0] sm:$0xf]  ;;  %v11258_v33 = vadd.f32 %v23552_v63, %v11245_v0  ;;  %v12878_v63 = vor.u32 %v18756_v59, %v12877_v52  ;;  %v13478_v41 = vor.u32 %v18906_v9, %v13477_v16  ;;  %v383_v0 = vld [vmem:[#allocation2 + $0x8] sm:$0xff] }
 0x513   : > { %11539 = vmatpush.bf16.msrb.mxu2 %v18154_v47  ;;  %v19006_v47 = vld [vmem:[%s20702_s9 + $0x9f4] sm:$0xf0] }
 0x514   : > { %11552 = vmatpush.bf16.msrb.mxu3 %v18474_v6  ;;  %v13878_v6 = vor.u32 %v19006_v47, %v13877_v17  ;;  %v11271_v58 = vadd.f32 %v23558_v1, %v11258_v33  ;;  %v12757_v33 = vld [vmem:[%s20702_s9 + $0x110] sm:$0xf]  ;;  %v18806_v59 = vld [vmem:[%s20702_s9 + $0x3b4] sm:$0xf0] }
 0x515   : > { %11514 = vmatpush.bf16.msrb.mxu0 %v17474_v8  ;;  %v18996_v8 = vld [vmem:[%s20702_s9 + $0x9a4] sm:$0xf0] }
 0x516   : > { %11527 = vmatpush.bf16.msrb.mxu1 %v17794_v40  ;;  %v18746_v40 = vld [vmem:[%s20702_s9 + $0x1d4] sm:$0xf0]  ;;  %v11284_v1 = vadd.f32 %v23576_v54, %v11271_v58  ;;  %v13838_v46 = vor.u32 %v18996_v8, %v13837_v62  ;;  %v12797_v54 = vld [vmem:[%s20702_s9 + $0x160] sm:$0xf] }
 0x517   : > { %11540 = vmatpush.bf16.msrb.mxu2 %v18114_v18  ;;  %v13157_v18 = vld [vmem:[%s20702_s9 + $0x430] sm:$0xf]  ;;  %v12838_v12 = vor.u32 %v18746_v40, %v12837_v7  ;;  %v18966_v62 = vld [vmem:[%s20702_s9 + $0x8b4] sm:$0xf0]  ;;  %v12717_v8 = vld [vmem:[%s20702_s9 + $0xc0] sm:$0xf] }
 0x518   : > { %11553 = vmatpush.bf16.msrb.mxu3 %v18434_v14  ;;  %v18986_v14 = vld [vmem:[%s20702_s9 + $0x954] sm:$0xf0]  ;;  %v13158_v13 = vor.u32 %v18826_v4, %v13157_v18  ;;  %v11297_v20 = vadd.f32 %v23578_v23, %v11284_v1  ;;  %v13438_v23 = vor.u32 %v18896_v25, %v13437_v15  ;;  %v13037_v7 = vld [vmem:[%s20702_s9 + $0x340] sm:$0xf]  ;;  %v18796_v40 = vld [vmem:[%s20702_s9 + $0x364] sm:$0xf0] }
 0x519   : > { %11515 = vmatpush.bf16.msrb.mxu0 %v17434_v11  ;;  %v18816_v11 = vld [vmem:[%s20702_s9 + $0x404] sm:$0xf0]  ;;  %v13798_v29 = vor.u32 %v18986_v14, %v13797_v26  ;;  %v13357_v18 = vld [vmem:[%s20702_s9 + $0x5c0] sm:$0xf]  ;;  %v18786_v25 = vld [vmem:[%s20702_s9 + $0x314] sm:$0xf0] }
 0x51a   : > { %11528 = vmatpush.bf16.msrb.mxu1 %v17754_v2  ;;  %v11309_v2 = vpop.f32.mrf.mxu0  ;;  %v13118_v47 = vor.u32 %v18816_v11, %v13117_v57  ;;  %v11322_v52 = vpop.f32.mrf.mxu1  ;;  %v18876_v4 = vld [vmem:[%s20702_s9 + $0x5e4] sm:$0xf0]  ;;  %v12997_v57 = vld [vmem:[%s20702_s9 + $0x2f0] sm:$0xf] }
 0x51b   : > { %11541 = vmatpush.bf16.msrb.mxu2 %v18074_v24  ;;  %v12798_v24 = vor.u32 %v18736_v19, %v12797_v54  ;;  %v11310_v17 = vadd.f32 %v11309_v2, %v11297_v20  ;;  %v12677_v54 = vld [vmem:[%s20702_s9 + $0x70] sm:$0xf]  ;;  %v18706_v19 = vld [vmem:[%s20702_s9 + $0x94] sm:$0xf0] }
 0x51c   : > { %11554 = vmatpush.bf16.msrb.mxu3 %v18394_v31  ;;  %11516 = vmatmul.bf16.vlgmr.msrb.gmra.mxu0 %v21051_v45  ;;  %v13077_v31 = vld [vmem:[%s20702_s9 + $0x390] sm:$0xf] }
 0x51d   : > { %11560 = vmatpush.bf16.msra.mxu0 %v12918_v30  ;;  %11529 = vmatmul.bf16.vlgmr.msrb.gmra.mxu1 %v21121_v49  ;;  %v13757_v30 = vld [vmem:[%s20702_s9 + $0x8e0] sm:$0xf]  ;;  %v12060_v60 = vadd.f32 %v11310_v17, %v383_v0  ;;  %v13078_v58 = vor.u32 %v18806_v59, %v13077_v31  ;;  %v13317_v20 = vld [vmem:[%s20702_s9 + $0x570] sm:$0xf]  ;;  %v18776_v31 = vld [vmem:[%s20702_s9 + $0x2c4] sm:$0xf0] }
 0x51e   : > { %11573 = vmatpush.bf16.msra.mxu1 %v13238_v53  ;;  %11542 = vmatmul.bf16.vlgmr.msrb.gmra.mxu2 %v21127_v56  ;;  %v18976_v53 = vld [vmem:[%s20702_s9 + $0x904] sm:$0xf0]  ;;  %v12637_v17 = vld [vmem:[%s20702_s9 + $0x20] sm:$0xf] }
 0x51f   : > { %11586 = vmatpush.bf16.msra.mxu2 %v13558_v32  ;;  %11555 = vmatmul.bf16.vlgmr.msrb.gmra.mxu3 %v21123_v50  ;;  %v18726_v32 = vld [vmem:[%s20702_s9 + $0x134] sm:$0xf0]  ;;  %v13758_v10 = vor.u32 %v18976_v53, %v13757_v30  ;;  %12070 = vst [vmem:[#allocation2 + $0x8] sm:$0xff] %v12060_v60  ;;  %v12678_v30 = vor.u32 %v18706_v19, %v12677_v54  ;;  %v18856_v59 = vld [vmem:[%s20702_s9 + $0x544] sm:$0xf0] }
 0x520   : > { %11599 = vmatpush.bf16.msra.mxu3 %v13878_v6  ;;  %v12758_v6 = vor.u32 %v18726_v32, %v12757_v33  ;;  %v18946_v53 = vld [vmem:[%s20702_s9 + $0x814] sm:$0xf0]  ;;  %v12957_v32 = vld [vmem:[%s20702_s9 + $0x2a0] sm:$0xf] }
 0x521   : > { %11561 = vmatpush.bf16.msra.mxu0 %v12878_v63  ;;  %v13717_v63 = vld [vmem:[%s20702_s9 + $0x890] sm:$0xf]  ;;  %v11335_v9 = vpop.f32.mrf.mxu2  ;;  %v14797_v19 = vld [vmem:[%s20702_s9 + $0x1100] sm:$0xf] }
 0x522   : > { %11574 = vmatpush.bf16.msra.mxu1 %v13198_v38  ;;  %v13398_v38 = vor.u32 %v18886_v5, %v13397_v39  ;;  %v13718_v16 = vor.u32 %v18966_v62, %v13717_v63  ;;  %v11336_v26 = vadd.f32 %v11335_v9, %v11322_v52  ;;  %v11311_v14 = vpop.f32.mrf.mxu0  ;;  %v11348_v11 = vpop.f32.mrf.mxu3  ;;  %v13277_v52 = vld [vmem:[%s20702_s9 + $0x520] sm:$0xf]  ;;  %v14197_v39 = vld [vmem:[%s20702_s9 + $0xc50] sm:$0xf]  ;;  %v19086_v5 = vld [vmem:[%s20702_s9 + $0xc74] sm:$0xf0] }
 0x523   : > { %11587 = vmatpush.bf16.msra.mxu2 %v13518_v3  ;;  %v18716_v3 = vld [vmem:[%s20702_s9 + $0xe4] sm:$0xf0]  ;;  %v11324_v15 = vpop.f32.mrf.mxu1  ;;  %v14837_v63 = vld [vmem:[%s20702_s9 + $0x1150] sm:$0xf]  ;;  %v14198_v9 = vor.u32 %v19086_v5, %v14197_v39 }
 0x524   : > { %11600 = vmatpush.bf16.msra.mxu3 %v13838_v46  ;;  %v12718_v1 = vor.u32 %v18716_v3, %v12717_v8  ;;  %v13677_v46 = vld [vmem:[%s20702_s9 + $0x840] sm:$0xf]  ;;  %v23663_v0 = vadd.f32 %v11348_v11, %v11336_v26  ;;  %v18936_v3 = vld [vmem:[%s20702_s9 + $0x7c4] sm:$0xf0] }
 0x525   : > { %11562 = vmatpush.bf16.msra.mxu0 %v12838_v12  ;;  %v18956_v12 = vld [vmem:[%s20702_s9 + $0x864] sm:$0xf0]  ;;  %v15117_v11 = vld [vmem:[%s20702_s9 + $0x1380] sm:$0xf] }
 0x526   : > { %11575 = vmatpush.bf16.msra.mxu1 %v13158_v13  ;;  %v13038_v13 = vor.u32 %v18796_v40, %v13037_v7  ;;  %v13678_v2 = vor.u32 %v18956_v12, %v13677_v46  ;;  %v12958_v7 = vor.u32 %v18776_v31, %v12957_v32  ;;  %v13278_v40 = vor.u32 %v18856_v59, %v13277_v52  ;;  %v14157_v46 = vld [vmem:[%s20702_s9 + $0xc00] sm:$0xf]  ;;  %v19076_v14 = vld [vmem:[%s20702_s9 + $0xc24] sm:$0xf0]  ;;  %v19306_v32 = vld [vmem:[%s20702_s9 + $0x1354] sm:$0xf0] }
 0x527   : > { %11588 = vmatpush.bf16.msra.mxu2 %v13478_v41  ;;  %v13358_v41 = vor.u32 %v18876_v4, %v13357_v18  ;;  %v15157_v18 = vld [vmem:[%s20702_s9 + $0x13d0] sm:$0xf]  ;;  %v19326_v4 = vld [vmem:[%s20702_s9 + $0x13f4] sm:$0xf0]  ;;  %v19316_v15 = vld [vmem:[%s20702_s9 + $0x13a4] sm:$0xf0] }
 0x528   : > { %11601 = vmatpush.bf16.msra.mxu3 %v13798_v29  ;;  %v18866_v29 = vld [vmem:[%s20702_s9 + $0x594] sm:$0xf0]  ;;  %v15158_v54 = vor.u32 %v19326_v4, %v15157_v18  ;;  %v14077_v59 = vld [vmem:[%s20702_s9 + $0xb60] sm:$0xf]  ;;  %v19056_v5 = vld [vmem:[%s20702_s9 + $0xb84] sm:$0xf0] }
 0x529   : > { %11563 = vmatpush.bf16.msra.mxu0 %v12798_v24  ;;  %v13637_v24 = vld [vmem:[%s20702_s9 + $0x7f0] sm:$0xf]  ;;  %v13318_v33 = vor.u32 %v18866_v29, %v13317_v20  ;;  %v11337_v62 = vpop.f32.mrf.mxu2 }
 0x52a   : > { %11576 = vmatpush.bf16.msra.mxu1 %v13118_v47  ;;  %v18696_v47 = vld [vmem:[%s20702_s9 + $0x44] sm:$0xf0]  ;;  %v13638_v60 = vor.u32 %v18946_v53, %v13637_v24  ;;  %v14117_v29 = vld [vmem:[%s20702_s9 + $0xbb0] sm:$0xf]  ;;  %v19066_v24 = vld [vmem:[%s20702_s9 + $0xbd4] sm:$0xf0] }
 0x52b   : > { %11589 = vmatpush.bf16.msra.mxu2 %v13438_v23  ;;  %v12998_v23 = vor.u32 %v18786_v25, %v12997_v57  ;;  %v12638_v8 = vor.u32 %v18696_v47, %v12637_v17  ;;  %v19236_v57 = vld [vmem:[%s20702_s9 + $0x1124] sm:$0xf0]  ;;  %v14158_v25 = vor.u32 %v19076_v14, %v14157_v46  ;;  %v19146_v53 = vld [vmem:[%s20702_s9 + $0xe54] sm:$0xf0]  ;;  %v15118_v17 = vor.u32 %v19316_v15, %v15117_v11  ;;  %v14757_v47 = vld [vmem:[%s20702_s9 + $0x10b0] sm:$0xf] }
 0x52c   : > { %11602 = vmatpush.bf16.msra.mxu3 %v13758_v10  ;;  %v14517_v10 = vld [vmem:[%s20702_s9 + $0xed0] sm:$0xf]  ;;  %v14118_v31 = vor.u32 %v19066_v24, %v14117_v29  ;;  %v19216_v62 = vld [vmem:[%s20702_s9 + $0x1084] sm:$0xf0]  ;;  %v19126_v46 = vld [vmem:[%s20702_s9 + $0xdb4] sm:$0xf0] }
 0x52d   : > { %11564 = vmatpush.bf16.msra.mxu0 %v12758_v6  ;;  %v19166_v6 = vld [vmem:[%s20702_s9 + $0xef4] sm:$0xf0]  ;;  %v14037_v18 = vld [vmem:[%s20702_s9 + $0xb10] sm:$0xf]  ;;  %v19036_v15 = vld [vmem:[%s20702_s9 + $0xae4] sm:$0xf0] }
 0x52e   : > { %11577 = vmatpush.bf16.msra.mxu1 %v13078_v58  ;;  %v19246_v58 = vld [vmem:[%s20702_s9 + $0x1174] sm:$0xf0]  ;;  %v14677_v14 = vld [vmem:[%s20702_s9 + $0x1010] sm:$0xf]  ;;  %v14637_v24 = vld [vmem:[%s20702_s9 + $0xfc0] sm:$0xf] }
 0x52f   : > { %11590 = vmatpush.bf16.msra.mxu2 %v13398_v38  ;;  %v13597_v38 = vld [vmem:[%s20702_s9 + $0x7a0] sm:$0xf]  ;;  %v14838_v12 = vor.u32 %v19246_v58, %v14837_v63 }
 0x530   : > { %11603 = vmatpush.bf16.msra.mxu3 %v13718_v16  ;;  %v11350_v16 = vpop.f32.mrf.mxu3  ;;  %v13598_v26 = vor.u32 %v18936_v3, %v13597_v38  ;;  %v14717_v63 = vld [vmem:[%s20702_s9 + $0x1060] sm:$0xf]  ;;  %v19296_v38 = vld [vmem:[%s20702_s9 + $0x1304] sm:$0xf0]  ;;  %v14078_v3 = vor.u32 %v19056_v5, %v14077_v59  ;;  %v19026_v5 = vld [vmem:[%s20702_s9 + $0xa94] sm:$0xf0] }
 0x531   : > { %11565 = vmatpush.bf16.msra.mxu0 %v12718_v1  ;;  %v14518_v1 = vor.u32 %v19166_v6, %v14517_v10  ;;  %v19136_v10 = vld [vmem:[%s20702_s9 + $0xe04] sm:$0xf0]  ;;  %v15037_v58 = vld [vmem:[%s20702_s9 + $0x12e0] sm:$0xf]  ;;  %v14718_v4 = vor.u32 %v19216_v62, %v14717_v63  ;;  %v14597_v62 = vld [vmem:[%s20702_s9 + $0xf70] sm:$0xf] }
 0x532   : > { %11578 = vmatpush.bf16.msra.mxu1 %v13038_v13  ;;  %v14477_v13 = vld [vmem:[%s20702_s9 + $0xe80] sm:$0xf] }
 0x533   : > { %11591 = vmatpush.bf16.msra.mxu2 %v13358_v41  ;;  %v19156_v41 = vld [vmem:[%s20702_s9 + $0xea4] sm:$0xf0] }
 0x534   : > { %11604 = vmatpush.bf16.msra.mxu3 %v13678_v2  ;;  %v14478_v20 = vor.u32 %v19156_v41, %v14477_v13  ;;  %v14798_v2 = vor.u32 %v19236_v57, %v14797_v19  ;;  %v19206_v13 = vld [vmem:[%s20702_s9 + $0x1034] sm:$0xf0]  ;;  %v14997_v41 = vld [vmem:[%s20702_s9 + $0x1290] sm:$0xf]  ;;  %v13997_v57 = vld [vmem:[%s20702_s9 + $0xac0] sm:$0xf] }
 0x535   : > { %11566 = vmatpush.bf16.msra.mxu0 %v12678_v30  ;;  %v14437_v30 = vld [vmem:[%s20702_s9 + $0xe30] sm:$0xf]  ;;  %v14678_v11 = vor.u32 %v19206_v13, %v14677_v14  ;;  %v19406_v14 = vld [vmem:[%s20702_s9 + $0x1674] sm:$0xf0] }
 0x536   : > { %11579 = vmatpush.bf16.msra.mxu1 %v12998_v23  ;;  %v19226_v23 = vld [vmem:[%s20702_s9 + $0x10d4] sm:$0xf0]  ;;  %v14438_v52 = vor.u32 %v19146_v53, %v14437_v30  ;;  %v19196_v30 = vld [vmem:[%s20702_s9 + $0xfe4] sm:$0xf0]  ;;  %v15797_v13 = vld [vmem:[%s20702_s9 + $0x18d0] sm:$0xf] }
 0x537   : > { %11592 = vmatpush.bf16.msra.mxu2 %v13318_v33  ;;  %v15077_v33 = vld [vmem:[%s20702_s9 + $0x1330] sm:$0xf]  ;;  %v14758_v39 = vor.u32 %v19226_v23, %v14757_v47  ;;  %v19276_v47 = vld [vmem:[%s20702_s9 + $0x1264] sm:$0xf0] }
 0x538   : > { %11605 = vmatpush.bf16.msra.mxu3 %v13638_v60  ;;  %v14397_v60 = vld [vmem:[%s20702_s9 + $0xde0] sm:$0xf]  ;;  %v15078_v6 = vor.u32 %v19306_v32, %v15077_v33  ;;  %v13998_v32 = vor.u32 %v19036_v15, %v13997_v57 }
 0x539   : > { %11567 = vmatpush.bf16.msra.mxu0 %v12638_v8  ;;  %v11361_v8 = vpop.f32.mrf.mxu0  ;;  %v14877_v15 = vld [vmem:[%s20702_s9 + $0x11a0] sm:$0xf] }
 0x53a   : > { %11580 = vmatpush.bf16.msra.mxu1 %v12958_v7  ;;  %v14398_v7 = vor.u32 %v19136_v10, %v14397_v60  ;;  %v11374_v16 = vpop.f32.mrf.mxu1  ;;  %v14277_v60 = vld [vmem:[%s20702_s9 + $0xcf0] sm:$0xf]  ;;  %v19106_v10 = vld [vmem:[%s20702_s9 + $0xd14] sm:$0xf0] }
 0x53b   : > { %11593 = vmatpush.bf16.msra.mxu2 %v13278_v40  ;;  %v11362_v40 = vadd.f32 %v11361_v8, %v23663_v0  ;;  %v19286_v0 = vld [vmem:[%s20702_s9 + $0x12b4] sm:$0xf0] }
 0x53c   : > { %11606 = vmatpush.bf16.msra.mxu3 %v13598_v26  ;;  %11568 = vmatmul.bf16.vlgmr.msra.gmra.mxu0 %v20829_v27  ;;  %v19186_v8 = vld [vmem:[%s20702_s9 + $0xf94] sm:$0xf0] }
 0x53d   : > { %11612 = vmatpush.bf16.msrb.mxu0 %v14198_v9  ;;  %11581 = vmatmul.bf16.vlgmr.msra.gmra.mxu1 %v20831_v28  ;;  %v19046_v9 = vld [vmem:[%s20702_s9 + $0xb34] sm:$0xf0]  ;;  %v11375_v26 = vadd.f32 %v11374_v16, %v11362_v40  ;;  %v13917_v40 = vld [vmem:[%s20702_s9 + $0xa20] sm:$0xf]  ;;  %v14598_v16 = vor.u32 %v19186_v8, %v14597_v62  ;;  %v15397_v8 = vld [vmem:[%s20702_s9 + $0x15b0] sm:$0xf] }
 0x53e   : > { %11625 = vmatpush.bf16.msrb.mxu1 %v14518_v1  ;;  %11594 = vmatmul.bf16.vlgmr.msra.gmra.mxu2 %v20822_v21  ;;  %v14357_v1 = vld [vmem:[%s20702_s9 + $0xd90] sm:$0xf] }
 0x53f   : > { %11638 = vmatpush.bf16.msrb.mxu2 %v14838_v12  ;;  %11607 = vmatmul.bf16.vlgmr.msra.gmra.mxu3 %v20824_v22  ;;  %v15038_v12 = vor.u32 %v19296_v38, %v15037_v58  ;;  %v14358_v19 = vor.u32 %v19126_v46, %v14357_v1  ;;  %v14917_v58 = vld [vmem:[%s20702_s9 + $0x11f0] sm:$0xf]  ;;  %v19266_v38 = vld [vmem:[%s20702_s9 + $0x1214] sm:$0xf0]  ;;  %v14557_v1 = vld [vmem:[%s20702_s9 + $0xf20] sm:$0xf] }
 0x540   : > { %11651 = vmatpush.bf16.msrb.mxu3 %v15158_v54  ;;  %v14038_v54 = vor.u32 %v19046_v9, %v14037_v18  ;;  %v19016_v18 = vld [vmem:[%s20702_s9 + $0xa44] sm:$0xf0] }
 0x541   : > { %11613 = vmatpush.bf16.msrb.mxu0 %v14158_v25  ;;  %v14317_v25 = vld [vmem:[%s20702_s9 + $0xd40] sm:$0xf]  ;;  %v11387_v29 = vpop.f32.mrf.mxu2  ;;  %v11363_v23 = vpop.f32.mrf.mxu0  ;;  %v19096_v9 = vld [vmem:[%s20702_s9 + $0xcc4] sm:$0xf0]  ;;  %v13918_v57 = vor.u32 %v19016_v18, %v13917_v40  ;;  %v19546_v40 = vld [vmem:[%s20702_s9 + $0x1ad4] sm:$0xf0] }
 0x542   : > { %11626 = vmatpush.bf16.msrb.mxu1 %v14478_v20  ;;  %v19116_v20 = vld [vmem:[%s20702_s9 + $0xd64] sm:$0xf0]  ;;  %v11388_v53 = vadd.f32 %v11387_v29, %v11375_v26  ;;  %v11400_v33 = vpop.f32.mrf.mxu3  ;;  %v15477_v26 = vld [vmem:[%s20702_s9 + $0x1650] sm:$0xf] }
 0x543   : > { %11639 = vmatpush.bf16.msrb.mxu2 %v14798_v2  ;;  %v14998_v2 = vor.u32 %v19286_v0, %v14997_v41  ;;  %v19176_v46 = vld [vmem:[%s20702_s9 + $0xf44] sm:$0xf0]  ;;  %v19486_v0 = vld [vmem:[%s20702_s9 + $0x18f4] sm:$0xf0] }
 0x544   : > { %11652 = vmatpush.bf16.msrb.mxu3 %v15118_v17  ;;  %v14957_v17 = vld [vmem:[%s20702_s9 + $0x1240] sm:$0xf]  ;;  %v23729_v59 = vadd.f32 %v11400_v33, %v11388_v53  ;;  %v14558_v29 = vor.u32 %v19176_v46, %v14557_v1  ;;  %v15798_v53 = vor.u32 %v19486_v0, %v15797_v13  ;;  %v19396_v23 = vld [vmem:[%s20702_s9 + $0x1624] sm:$0xf0] }
 0x545   : > { %11614 = vmatpush.bf16.msrb.mxu0 %v14118_v31  ;;  %v14318_v31 = vor.u32 %v19116_v20, %v14317_v25  ;;  %v14958_v63 = vor.u32 %v19276_v47, %v14957_v17  ;;  %v19256_v25 = vld [vmem:[%s20702_s9 + $0x11c4] sm:$0xf0]  ;;  %v15437_v47 = vld [vmem:[%s20702_s9 + $0x1600] sm:$0xf] }
 0x546   : > { %11627 = vmatpush.bf16.msrb.mxu1 %v14438_v52  ;;  %v13957_v52 = vld [vmem:[%s20702_s9 + $0xa70] sm:$0xf]  ;;  %v15757_v33 = vld [vmem:[%s20702_s9 + $0x1880] sm:$0xf]  ;;  %v19456_v13 = vld [vmem:[%s20702_s9 + $0x1804] sm:$0xf0] }
 0x547   : > { %11640 = vmatpush.bf16.msrb.mxu2 %v14758_v39  ;;  %v14638_v39 = vor.u32 %v19196_v30, %v14637_v24  ;;  %v16437_v24 = vld [vmem:[%s20702_s9 + $0x1dd0] sm:$0xf]  ;;  %v19646_v30 = vld [vmem:[%s20702_s9 + $0x1df4] sm:$0xf0]  ;;  %v19536_v0 = vld [vmem:[%s20702_s9 + $0x1a84] sm:$0xf0] }
 0x548   : > { %11653 = vmatpush.bf16.msrb.mxu3 %v15078_v6  ;;  %v11376_v6 = vpop.f32.mrf.mxu1 }
 0x549   : > { %11615 = vmatpush.bf16.msrb.mxu0 %v14078_v3  ;;  %v13958_v3 = vor.u32 %v19026_v5, %v13957_v52  ;;  %v11389_v41 = vpop.f32.mrf.mxu2  ;;  %v16077_v52 = vld [vmem:[%s20702_s9 + $0x1b00] sm:$0xf]  ;;  %v16438_v5 = vor.u32 %v19646_v30, %v16437_v24  ;;  %v19636_v6 = vld [vmem:[%s20702_s9 + $0x1da4] sm:$0xf0]  ;;  %v19366_v24 = vld [vmem:[%s20702_s9 + $0x1534] sm:$0xf0] }
 0x54a   : > { %11628 = vmatpush.bf16.msrb.mxu1 %v14398_v7  ;;  %v14278_v7 = vor.u32 %v19106_v10, %v14277_v60  ;;  %v11402_v20 = vpop.f32.mrf.mxu3  ;;  %v15438_v60 = vor.u32 %v19396_v23, %v15437_v47  ;;  %v16397_v10 = vld [vmem:[%s20702_s9 + $0x1d80] sm:$0xf]  ;;  %v15637_v30 = vld [vmem:[%s20702_s9 + $0x1790] sm:$0xf]  ;;  %v19526_v47 = vld [vmem:[%s20702_s9 + $0x1a34] sm:$0xf0] }
 0x54b   : > { %11641 = vmatpush.bf16.msrb.mxu2 %v14718_v4  ;;  %v14237_v4 = vld [vmem:[%s20702_s9 + $0xca0] sm:$0xf]  ;;  %v16398_v18 = vor.u32 %v19636_v6, %v16397_v10  ;;  %v19436_v6 = vld [vmem:[%s20702_s9 + $0x1764] sm:$0xf0] }
 0x54c   : > { %11654 = vmatpush.bf16.msrb.mxu3 %v15038_v12  ;;  %v14918_v12 = vor.u32 %v19266_v38, %v14917_v58  ;;  %v19386_v58 = vld [vmem:[%s20702_s9 + $0x15d4] sm:$0xf0]  ;;  %v15717_v38 = vld [vmem:[%s20702_s9 + $0x1830] sm:$0xf]  ;;  %v15997_v41 = vld [vmem:[%s20702_s9 + $0x1a60] sm:$0xf] }
 0x54d   : > { %11616 = vmatpush.bf16.msrb.mxu0 %v14038_v54  ;;  %v16117_v54 = vld [vmem:[%s20702_s9 + $0x1b50] sm:$0xf]  ;;  %v15998_v20 = vor.u32 %v19536_v0, %v15997_v41  ;;  %v15597_v10 = vld [vmem:[%s20702_s9 + $0x1740] sm:$0xf] }
 0x54e   : > { %11629 = vmatpush.bf16.msrb.mxu1 %v14358_v19  ;;  %v19566_v19 = vld [vmem:[%s20702_s9 + $0x1b74] sm:$0xf0]  ;;  %v16197_v0 = vld [vmem:[%s20702_s9 + $0x1bf0] sm:$0xf] }
 0x54f   : > { %11642 = vmatpush.bf16.msrb.mxu2 %v14678_v11  ;;  %v14238_v11 = vor.u32 %v19096_v9, %v14237_v4  ;;  %v16118_v17 = vor.u32 %v19566_v19, %v16117_v54  ;;  %v15398_v4 = vor.u32 %v19386_v58, %v15397_v8  ;;  %v19626_v9 = vld [vmem:[%s20702_s9 + $0x1d54] sm:$0xf0] }
 0x550   : > { %11655 = vmatpush.bf16.msrb.mxu3 %v14998_v2  ;;  %v15478_v2 = vor.u32 %v19406_v14, %v15477_v26  ;;  %v19376_v26 = vld [vmem:[%s20702_s9 + $0x1584] sm:$0xf0]  ;;  %v15677_v14 = vld [vmem:[%s20702_s9 + $0x17e0] sm:$0xf] }
 0x551   : > { %11617 = vmatpush.bf16.msrb.mxu0 %v13998_v32  ;;  %v14878_v32 = vor.u32 %v19256_v25, %v14877_v15  ;;  %v19616_v15 = vld [vmem:[%s20702_s9 + $0x1d04] sm:$0xf0]  ;;  %v15678_v25 = vor.u32 %v19456_v13, %v15677_v14  ;;  %v15877_v14 = vld [vmem:[%s20702_s9 + $0x1970] sm:$0xf]  ;;  %v19506_v13 = vld [vmem:[%s20702_s9 + $0x1994] sm:$0xf0] }
 0x552   : > { %11630 = vmatpush.bf16.msrb.mxu1 %v14318_v31  ;;  %v19476_v31 = vld [vmem:[%s20702_s9 + $0x18a4] sm:$0xf0] }
 0x553   : > { %11643 = vmatpush.bf16.msrb.mxu2 %v14638_v39  ;;  %v19556_v39 = vld [vmem:[%s20702_s9 + $0x1b24] sm:$0xf0] }
 0x554   : > { %11656 = vmatpush.bf16.msrb.mxu3 %v14958_v63  ;;  %v15758_v63 = vor.u32 %v19476_v31, %v15757_v33  ;;  %v16078_v62 = vor.u32 %v19556_v39, %v16077_v52  ;;  %v19606_v31 = vld [vmem:[%s20702_s9 + $0x1cb4] sm:$0xf0] }
 0x555   : > { %11618 = vmatpush.bf16.msrb.mxu0 %v13958_v3  ;;  %v19466_v3 = vld [vmem:[%s20702_s9 + $0x1854] sm:$0xf0] }
 0x556   : > { %11631 = vmatpush.bf16.msrb.mxu1 %v14278_v7  ;;  %v16037_v7 = vld [vmem:[%s20702_s9 + $0x1ab0] sm:$0xf]  ;;  %v15718_v1 = vor.u32 %v19466_v3, %v15717_v38 }
 0x557   : > { %11644 = vmatpush.bf16.msrb.mxu2 %v14598_v16  ;;  %v16357_v16 = vld [vmem:[%s20702_s9 + $0x1d30] sm:$0xf]  ;;  %v16038_v46 = vor.u32 %v19546_v40, %v16037_v7  ;;  %v16237_v7 = vld [vmem:[%s20702_s9 + $0x1c40] sm:$0xf]  ;;  %v19596_v40 = vld [vmem:[%s20702_s9 + $0x1c64] sm:$0xf0] }
 0x558   : > { %11657 = vmatpush.bf16.msrb.mxu3 %v14918_v12  ;;  %v15357_v12 = vld [vmem:[%s20702_s9 + $0x1560] sm:$0xf]  ;;  %v16358_v54 = vor.u32 %v19626_v9, %v16357_v16  ;;  %v15237_v9 = vld [vmem:[%s20702_s9 + $0x1470] sm:$0xf]  ;;  %v16238_v41 = vor.u32 %v19596_v40, %v16237_v7  ;;  %v19966_v40 = vld [vmem:[%s20702_s9 + $0x27f4] sm:$0xf0] }
 0x559   : > { %11619 = vmatpush.bf16.msrb.mxu0 %v13918_v57  ;;  %v23780_v19 = vpop.f32.mrf.mxu0  ;;  %v15358_v57 = vor.u32 %v19376_v26, %v15357_v12  ;;  %v19426_v26 = vld [vmem:[%s20702_s9 + $0x1714] sm:$0xf0]  ;;  %v17717_v7 = vld [vmem:[%s20702_s9 + $0x27d0] sm:$0xf] }
 0x55a   : > { %11632 = vmatpush.bf16.msrb.mxu1 %v14238_v11  ;;  %v16317_v11 = vld [vmem:[%s20702_s9 + $0x1ce0] sm:$0xf] }
 0x55b   : > { %11645 = vmatpush.bf16.msrb.mxu2 %v14558_v29  ;;  %v23784_v29 = vpop.f32.mrf.mxu1  ;;  %v16318_v23 = vor.u32 %v19616_v15, %v16317_v11  ;;  %v15197_v11 = vld [vmem:[%s20702_s9 + $0x1420] sm:$0xf]  ;;  %v19336_v15 = vld [vmem:[%s20702_s9 + $0x1444] sm:$0xf0] }
 0x55c   : > { %11658 = vmatpush.bf16.msrb.mxu3 %v14878_v32  ;;  %11620 = vmatmul.bf16.vlgmr.msrb.gmra.mxu0 %v20889_v48  ;;  %v16277_v32 = vld [vmem:[%s20702_s9 + $0x1c90] sm:$0xf] }
 0x55d   : > { %11664 = vmatpush.bf16.msra.mxu0 %v15478_v2  ;;  %11633 = vmatmul.bf16.vlgmr.msrb.gmra.mxu1 %v20895_v55  ;;  %v15317_v2 = vld [vmem:[%s20702_s9 + $0x1510] sm:$0xf]  ;;  %v16278_v58 = vor.u32 %v19606_v31, %v16277_v32  ;;  %v19806_v32 = vld [vmem:[%s20702_s9 + $0x22f4] sm:$0xf0] }
 0x55e   : > { %11677 = vmatpush.bf16.msra.mxu1 %v15798_v53  ;;  %11646 = vmatmul.bf16.vlgmr.msrb.gmra.mxu2 %v20891_v51  ;;  %v19446_v53 = vld [vmem:[%s20702_s9 + $0x17b4] sm:$0xf0]  ;;  %v15318_v33 = vor.u32 %v19366_v24, %v15317_v2  ;;  %v15517_v2 = vld [vmem:[%s20702_s9 + $0x16a0] sm:$0xf]  ;;  %v19416_v24 = vld [vmem:[%s20702_s9 + $0x16c4] sm:$0xf0] }
 0x55f   : > { %11690 = vmatpush.bf16.msra.mxu2 %v16118_v17  ;;  %11659 = vmatmul.bf16.vlgmr.msrb.gmra.mxu3 %v20901_v61  ;;  %v15957_v17 = vld [vmem:[%s20702_s9 + $0x1a10] sm:$0xf]  ;;  %v15638_v52 = vor.u32 %v19446_v53, %v15637_v30  ;;  %v15837_v30 = vld [vmem:[%s20702_s9 + $0x1920] sm:$0xf]  ;;  %v19496_v53 = vld [vmem:[%s20702_s9 + $0x1944] sm:$0xf0] }
 0x560   : > { %11703 = vmatpush.bf16.msra.mxu3 %v16438_v5  ;;  %v15958_v39 = vor.u32 %v19526_v47, %v15957_v17  ;;  %v15277_v5 = vld [vmem:[%s20702_s9 + $0x14c0] sm:$0xf]  ;;  %v16757_v17 = vld [vmem:[%s20702_s9 + $0x2050] sm:$0xf]  ;;  %v19726_v47 = vld [vmem:[%s20702_s9 + $0x2074] sm:$0xf0] }
 0x561   : > { %11665 = vmatpush.bf16.msra.mxu0 %v15438_v60  ;;  %v19356_v60 = vld [vmem:[%s20702_s9 + $0x14e4] sm:$0xf0]  ;;  %v23800_v8 = vpop.f32.mrf.mxu2  ;;  %v17397_v31 = vld [vmem:[%s20702_s9 + $0x2550] sm:$0xf] }
 0x562   : > { %11678 = vmatpush.bf16.msra.mxu1 %v15758_v63  ;;  %v15917_v63 = vld [vmem:[%s20702_s9 + $0x19c0] sm:$0xf]  ;;  %v23802_v38 = vpop.f32.mrf.mxu3  ;;  %v15278_v3 = vor.u32 %v19356_v60, %v15277_v5  ;;  %v19886_v5 = vld [vmem:[%s20702_s9 + $0x2574] sm:$0xf0] }
 0x563   : > { %11691 = vmatpush.bf16.msra.mxu2 %v16078_v62  ;;  %v19516_v62 = vld [vmem:[%s20702_s9 + $0x19e4] sm:$0xf0]  ;;  %v11428_v12 = vpop.f32.mrf.mxu1  ;;  %v16157_v60 = vld [vmem:[%s20702_s9 + $0x1ba0] sm:$0xf] }
 0x564   : > { %11704 = vmatpush.bf16.msra.mxu3 %v16398_v18  ;;  %v11415_v18 = vpop.f32.mrf.mxu0  ;;  %v15918_v16 = vor.u32 %v19516_v62, %v15917_v63  ;;  %v15518_v63 = vor.u32 %v19416_v24, %v15517_v2  ;;  %v15838_v62 = vor.u32 %v19496_v53, %v15837_v30  ;;  %v17357_v12 = vld [vmem:[%s20702_s9 + $0x2500] sm:$0xf]  ;;  %v17317_v2 = vld [vmem:[%s20702_s9 + $0x24b0] sm:$0xf]  ;;  %v19866_v24 = vld [vmem:[%s20702_s9 + $0x24d4] sm:$0xf0] }
 0x565   : > { %11666 = vmatpush.bf16.msra.mxu0 %v15398_v4  ;;  %v15598_v4 = vor.u32 %v19436_v6, %v15597_v10  ;;  %v19576_v10 = vld [vmem:[%s20702_s9 + $0x1bc4] sm:$0xf0]  ;;  %v17398_v18 = vor.u32 %v19886_v5, %v17397_v31  ;;  %v17277_v5 = vld [vmem:[%s20702_s9 + $0x2460] sm:$0xf] }
 0x566   : > { %11679 = vmatpush.bf16.msra.mxu1 %v15718_v1  ;;  %v19346_v1 = vld [vmem:[%s20702_s9 + $0x1494] sm:$0xf0]  ;;  %v19696_v31 = vld [vmem:[%s20702_s9 + $0x1f84] sm:$0xf0] }
 0x567   : > { %11692 = vmatpush.bf16.msra.mxu2 %v16038_v46  ;;  %v15557_v46 = vld [vmem:[%s20702_s9 + $0x16f0] sm:$0xf] }
 0x568   : > { %11705 = vmatpush.bf16.msra.mxu3 %v16358_v54  ;;  %v15238_v54 = vor.u32 %v19346_v1, %v15237_v9  ;;  %v19716_v9 = vld [vmem:[%s20702_s9 + $0x2024] sm:$0xf0]  ;;  %v17037_v1 = vld [vmem:[%s20702_s9 + $0x2280] sm:$0xf] }
 0x569   : > { %11667 = vmatpush.bf16.msra.mxu0 %v15358_v57  ;;  %v19586_v57 = vld [vmem:[%s20702_s9 + $0x1c14] sm:$0xf0] }
 0x56a   : > { %11680 = vmatpush.bf16.msra.mxu1 %v15678_v25  ;;  %v15558_v25 = vor.u32 %v19426_v26, %v15557_v46  ;;  %v11454_v6 = vpop.f32.mrf.mxu3  ;;  %v19796_v46 = vld [vmem:[%s20702_s9 + $0x22a4] sm:$0xf0] }
 0x56b   : > { %11693 = vmatpush.bf16.msra.mxu2 %v15998_v20  ;;  %v15878_v20 = vor.u32 %v19506_v13, %v15877_v14  ;;  %v19876_v26 = vld [vmem:[%s20702_s9 + $0x2524] sm:$0xf0]  ;;  %v17718_v14 = vor.u32 %v19966_v40, %v17717_v7 }
 0x56c   : > { %11706 = vmatpush.bf16.msra.mxu3 %v16318_v23  ;;  %v16198_v23 = vor.u32 %v19586_v57, %v16197_v0  ;;  %v19956_v0 = vld [vmem:[%s20702_s9 + $0x27a4] sm:$0xf0]  ;;  %v17358_v57 = vor.u32 %v19876_v26, %v17357_v12 }
 0x56d   : > { %11668 = vmatpush.bf16.msra.mxu0 %v15318_v33  ;;  %v17077_v33 = vld [vmem:[%s20702_s9 + $0x22d0] sm:$0xf] }
 0x56e   : > { %11681 = vmatpush.bf16.msra.mxu1 %v15638_v52  ;;  %v11441_v52 = vpop.f32.mrf.mxu2 }
 0x56f   : > { %11694 = vmatpush.bf16.msra.mxu2 %v15958_v39  ;;  %v15198_v39 = vor.u32 %v19336_v15, %v15197_v11  ;;  %v16677_v11 = vld [vmem:[%s20702_s9 + $0x1fb0] sm:$0xf]  ;;  %v19706_v15 = vld [vmem:[%s20702_s9 + $0x1fd4] sm:$0xf0]  ;;  %v16957_v52 = vld [vmem:[%s20702_s9 + $0x21e0] sm:$0xf] }
 0x570   : > { %11707 = vmatpush.bf16.msra.mxu3 %v16278_v58  ;;  %v16758_v58 = vor.u32 %v19726_v47, %v16757_v17  ;;  %v16678_v53 = vor.u32 %v19706_v15, %v16677_v11  ;;  %v17637_v17 = vld [vmem:[%s20702_s9 + $0x2730] sm:$0xf]  ;;  %v19946_v47 = vld [vmem:[%s20702_s9 + $0x2754] sm:$0xf0]  ;;  %v16877_v11 = vld [vmem:[%s20702_s9 + $0x2140] sm:$0xf] }
 0x571   : > { %11669 = vmatpush.bf16.msra.mxu0 %v15278_v3  ;;  %v17078_v3 = vor.u32 %v19806_v32, %v17077_v33  ;;  %v17318_v33 = vor.u32 %v19866_v24, %v17317_v2  ;;  %v16637_v32 = vld [vmem:[%s20702_s9 + $0x1f60] sm:$0xf]  ;;  %v19836_v2 = vld [vmem:[%s20702_s9 + $0x23e4] sm:$0xf0]  ;;  %v11414_v24 = vadd.f32 %v23780_v19, %v23729_v59  ;;  %v16517_v59 = vld [vmem:[%s20702_s9 + $0x1e70] sm:$0xf] }
 0x572   : > { %11682 = vmatpush.bf16.msra.mxu1 %v15598_v4  ;;  %v16158_v4 = vor.u32 %v19576_v10, %v16157_v60  ;;  %v19856_v60 = vld [vmem:[%s20702_s9 + $0x2484] sm:$0xf0]  ;;  %v17638_v10 = vor.u32 %v19946_v47, %v17637_v17  ;;  %v17517_v47 = vld [vmem:[%s20702_s9 + $0x2640] sm:$0xf]  ;;  %v19666_v19 = vld [vmem:[%s20702_s9 + $0x1e94] sm:$0xf0] }
 0x573   : > { %11695 = vmatpush.bf16.msra.mxu2 %v15918_v16  ;;  %v16717_v16 = vld [vmem:[%s20702_s9 + $0x2000] sm:$0xf]  ;;  %v17278_v7 = vor.u32 %v19856_v60, %v17277_v5  ;;  %v19746_v5 = vld [vmem:[%s20702_s9 + $0x2114] sm:$0xf0]  ;;  %v17157_v60 = vld [vmem:[%s20702_s9 + $0x2370] sm:$0xf] }
 0x574   : > { %11708 = vmatpush.bf16.msra.mxu3 %v16238_v41  ;;  %v16718_v13 = vor.u32 %v19716_v9, %v16717_v16  ;;  %v17677_v41 = vld [vmem:[%s20702_s9 + $0x2780] sm:$0xf]  ;;  %v16917_v16 = vld [vmem:[%s20702_s9 + $0x2190] sm:$0xf]  ;;  %v19766_v9 = vld [vmem:[%s20702_s9 + $0x21b4] sm:$0xf0] }
 0x575   : > { %11670 = vmatpush.bf16.msra.mxu0 %v15238_v54  ;;  %v17038_v54 = vor.u32 %v19796_v46, %v17037_v1  ;;  %v17678_v30 = vor.u32 %v19956_v0, %v17677_v41  ;;  %v17237_v1 = vld [vmem:[%s20702_s9 + $0x2410] sm:$0xf]  ;;  %v19846_v46 = vld [vmem:[%s20702_s9 + $0x2434] sm:$0xf0]  ;;  %v16918_v41 = vor.u32 %v19766_v9, %v16917_v16 }
 0x576   : > { %11683 = vmatpush.bf16.msra.mxu1 %v15558_v25  ;;  %v16997_v25 = vld [vmem:[%s20702_s9 + $0x2230] sm:$0xf]  ;;  %v17238_v0 = vor.u32 %v19846_v46, %v17237_v1  ;;  %v16797_v1 = vld [vmem:[%s20702_s9 + $0x20a0] sm:$0xf]  ;;  %v19736_v46 = vld [vmem:[%s20702_s9 + $0x20c4] sm:$0xf0] }
 0x577   : > { %11696 = vmatpush.bf16.msra.mxu2 %v15878_v20  ;;  %v19786_v20 = vld [vmem:[%s20702_s9 + $0x2254] sm:$0xf0] }
 0x578   : > { %11709 = vmatpush.bf16.msra.mxu3 %v16198_v23  ;;  %v16998_v23 = vor.u32 %v19786_v20, %v16997_v25  ;;  %v19756_v25 = vld [vmem:[%s20702_s9 + $0x2164] sm:$0xf0]  ;;  %v17197_v20 = vld [vmem:[%s20702_s9 + $0x23c0] sm:$0xf] }
 0x579   : > { %11671 = vmatpush.bf16.msra.mxu0 %v15198_v39  ;;  %v19776_v39 = vld [vmem:[%s20702_s9 + $0x2204] sm:$0xf0]  ;;  %v23856_v6 = vpop.f32.mrf.mxu0 }
 0x57a   : > { %11684 = vmatpush.bf16.msra.mxu1 %v15518_v63  ;;  %v16638_v63 = vor.u32 %v19696_v31, %v16637_v32  ;;  %v23860_v40 = vpop.f32.mrf.mxu1  ;;  %v16878_v32 = vor.u32 %v19756_v25, %v16877_v11  ;;  %v17198_v31 = vor.u32 %v19836_v2, %v17197_v20  ;;  %v20206_v25 = vld [vmem:[%s20702_s9 + $0x2f74] sm:$0xf0]  ;;  %v17437_v20 = vld [vmem:[%s20702_s9 + $0x25a0] sm:$0xf]  ;;  %v19896_v2 = vld [vmem:[%s20702_s9 + $0x25c4] sm:$0xf0] }
 0x57b   : > { %11697 = vmatpush.bf16.msra.mxu2 %v15838_v62  ;;  %v17597_v62 = vld [vmem:[%s20702_s9 + $0x26e0] sm:$0xf] }
 0x57c   : > { %11710 = vmatpush.bf16.msra.mxu3 %v16158_v4  ;;  %11672 = vmatmul.bf16.vlgmr.msra.gmra.mxu0 %v20964_v36  ;;  %v19686_v4 = vld [vmem:[%s20702_s9 + $0x1f34] sm:$0xf0] }
 0x57d   : > { %11716 = vmatpush.bf16.msrb.mxu0 %v16758_v58  ;;  %11685 = vmatmul.bf16.vlgmr.msra.gmra.mxu1 %v20971_v42  ;;  %v19936_v58 = vld [vmem:[%s20702_s9 + $0x2704] sm:$0xf0] }
 0x57e   : > { %11729 = vmatpush.bf16.msrb.mxu1 %v17078_v3  ;;  %11698 = vmatmul.bf16.vlgmr.msra.gmra.mxu2 %v20966_v37  ;;  %v16958_v3 = vor.u32 %v19776_v39, %v16957_v52  ;;  %v17598_v12 = vor.u32 %v19936_v58, %v17597_v62  ;;  %v16837_v52 = vld [vmem:[%s20702_s9 + $0x20f0] sm:$0xf] }
 0x57f   : > { %11742 = vmatpush.bf16.msrb.mxu2 %v17398_v18  ;;  %11711 = vmatmul.bf16.vlgmr.msra.gmra.mxu3 %v20973_v43  ;;  %v16597_v18 = vld [vmem:[%s20702_s9 + $0x1f10] sm:$0xf] }
 0x580   : > { %11755 = vmatpush.bf16.msrb.mxu3 %v17718_v14  ;;  %v16598_v26 = vor.u32 %v19686_v4, %v16597_v18  ;;  %v17557_v14 = vld [vmem:[%s20702_s9 + $0x2690] sm:$0xf]  ;;  %v16477_v18 = vld [vmem:[%s20702_s9 + $0x1e20] sm:$0xf]  ;;  %v19656_v4 = vld [vmem:[%s20702_s9 + $0x1e44] sm:$0xf0] }
 0x581   : > { %11717 = vmatpush.bf16.msrb.mxu0 %v16718_v13  ;;  %v19926_v13 = vld [vmem:[%s20702_s9 + $0x26b4] sm:$0xf0]  ;;  %v23873_v15 = vpop.f32.mrf.mxu2  ;;  %v17477_v58 = vld [vmem:[%s20702_s9 + $0x25f0] sm:$0xf]  ;;  %v16478_v11 = vor.u32 %v19656_v4, %v16477_v18 }
 0x582   : > { %11730 = vmatpush.bf16.msrb.mxu1 %v17038_v54  ;;  %v16557_v54 = vld [vmem:[%s20702_s9 + $0x1ec0] sm:$0xf]  ;;  %v11480_v39 = vpop.f32.mrf.mxu1 }
 0x583   : > { %11743 = vmatpush.bf16.msrb.mxu2 %v17358_v57  ;;  %v19676_v57 = vld [vmem:[%s20702_s9 + $0x1ee4] sm:$0xf0]  ;;  %v17997_v39 = vld [vmem:[%s20702_s9 + $0x2a00] sm:$0xf] }
 0x584   : > { %11756 = vmatpush.bf16.msrb.mxu3 %v17678_v30  ;;  %v17558_v30 = vor.u32 %v19926_v13, %v17557_v14  ;;  %v16558_v17 = vor.u32 %v19676_v57, %v16557_v54  ;;  %v18037_v14 = vld [vmem:[%s20702_s9 + $0x2a50] sm:$0xf]  ;;  %v20046_v13 = vld [vmem:[%s20702_s9 + $0x2a74] sm:$0xf0] }
 0x585   : > { %11718 = vmatpush.bf16.msrb.mxu0 %v16678_v53  ;;  %v23880_v53 = vpop.f32.mrf.mxu3  ;;  %v18357_v54 = vld [vmem:[%s20702_s9 + $0x2cd0] sm:$0xf] }
 0x586   : > { %11731 = vmatpush.bf16.msrb.mxu1 %v16998_v23  ;;  %v19916_v23 = vld [vmem:[%s20702_s9 + $0x2664] sm:$0xf0]  ;;  %v18677_v57 = vld [vmem:[%s20702_s9 + $0x2f50] sm:$0xf] }
 0x587   : > { %11744 = vmatpush.bf16.msrb.mxu2 %v17318_v33  ;;  %v11467_v33 = vpop.f32.mrf.mxu0  ;;  %v17518_v62 = vor.u32 %v19916_v23, %v17517_v47  ;;  %v18038_v23 = vor.u32 %v20046_v13, %v18037_v14  ;;  %v18741_v13 = vld [vmem:[%s20702_s9 + $0x1b4] sm:$0xf] }
 0x588   : > { %11757 = vmatpush.bf16.msrb.mxu3 %v17638_v10  ;;  %v19826_v10 = vld [vmem:[%s20702_s9 + $0x2394] sm:$0xf0] }
 0x589   : > { %11719 = vmatpush.bf16.msrb.mxu0 %v16638_v63  ;;  %v11427_v63 = vadd.f32 %v23784_v29, %v11414_v24  ;;  %v16838_v29 = vor.u32 %v19746_v5, %v16837_v52  ;;  %v17158_v9 = vor.u32 %v19826_v10, %v17157_v60  ;;  %v17438_v52 = vor.u32 %v19896_v2, %v17437_v20  ;;  %v18317_v5 = vld [vmem:[%s20702_s9 + $0x2c80] sm:$0xf]  ;;  %v20116_v60 = vld [vmem:[%s20702_s9 + $0x2ca4] sm:$0xf0] }
 0x58a   : > { %11732 = vmatpush.bf16.msrb.mxu1 %v16958_v3  ;;  %v16518_v3 = vor.u32 %v19666_v19, %v16517_v59  ;;  %v18678_v19 = vor.u32 %v20206_v25, %v18677_v57  ;;  %v18637_v10 = vld [vmem:[%s20702_s9 + $0x2f00] sm:$0xf]  ;;  %v18318_v18 = vor.u32 %v20116_v60, %v18317_v5  ;;  %v20176_v20 = vld [vmem:[%s20702_s9 + $0x2e84] sm:$0xf0]  ;;  %v20166_v5 = vld [vmem:[%s20702_s9 + $0x2e34] sm:$0xf0] }
 0x58b   : > { %11745 = vmatpush.bf16.msrb.mxu2 %v17278_v7  ;;  %v19906_v7 = vld [vmem:[%s20702_s9 + $0x2614] sm:$0xf0]  ;;  %v11440_v16 = vadd.f32 %v23800_v8, %v11427_v63  ;;  %v20196_v63 = vld [vmem:[%s20702_s9 + $0x2f24] sm:$0xf0]  ;;  %v18237_v57 = vld [vmem:[%s20702_s9 + $0x2be0] sm:$0xf] }
 0x58c   : > { %11758 = vmatpush.bf16.msrb.mxu3 %v17598_v12  ;;  %v17117_v12 = vld [vmem:[%s20702_s9 + $0x2320] sm:$0xf]  ;;  %v20126_v8 = vld [vmem:[%s20702_s9 + $0x2cf4] sm:$0xf0]  ;;  %v18638_v4 = vor.u32 %v20196_v63, %v18637_v10  ;;  %v18721_v63 = vld [vmem:[%s20702_s9 + $0x114] sm:$0xf] }
 0x58d   : > { %11720 = vmatpush.bf16.msrb.mxu0 %v16598_v26  ;;  %v19816_v26 = vld [vmem:[%s20702_s9 + $0x2344] sm:$0xf0]  ;;  %v11506_v24 = vpop.f32.mrf.mxu3  ;;  %v18358_v33 = vor.u32 %v20126_v8, %v18357_v54  ;;  %v18557_v25 = vld [vmem:[%s20702_s9 + $0x2e60] sm:$0xf] }
 0x58e   : > { %11733 = vmatpush.bf16.msrb.mxu1 %v16918_v41  ;;  %v11493_v41 = vpop.f32.mrf.mxu2  ;;  %v17118_v47 = vor.u32 %v19816_v26, %v17117_v12  ;;  %v20186_v12 = vld [vmem:[%s20702_s9 + $0x2ed4] sm:$0xf0]  ;;  %v20016_v8 = vld [vmem:[%s20702_s9 + $0x2984] sm:$0xf0] }
 0x58f   : > { %11746 = vmatpush.bf16.msrb.mxu2 %v17238_v0  ;;  %v17478_v0 = vor.u32 %v19906_v7, %v17477_v58  ;;  %v18751_v58 = vld [vmem:[%s20702_s9 + $0x204] sm:$0xf]  ;;  %v12839_v41 = vld [vmem:[%s20702_s9 + $0x1d8] sm:$0xf0] }
 0x590   : > { %11759 = vmatpush.bf16.msrb.mxu3 %v17558_v30  ;;  %v11453_v30 = vadd.f32 %v23802_v38, %v11440_v16  ;;  %v20036_v38 = vld [vmem:[%s20702_s9 + $0x2a24] sm:$0xf0]  ;;  %v17957_v16 = vld [vmem:[%s20702_s9 + $0x29b0] sm:$0xf]  ;;  %v12842_v24 = vor.u32 %v18741_v13, %v12839_v41  ;;  %v18711_v13 = vld [vmem:[%s20702_s9 + $0xc4] sm:$0xf] }
 0x591   : > { %11721 = vmatpush.bf16.msrb.mxu0 %v16558_v17  ;;  %v16798_v17 = vor.u32 %v19736_v46, %v16797_v1  ;;  %v20106_v1 = vld [vmem:[%s20702_s9 + $0x2c54] sm:$0xf0]  ;;  %v18597_v46 = vld [vmem:[%s20702_s9 + $0x2eb0] sm:$0xf]  ;;  %v12719_v41 = vld [vmem:[%s20702_s9 + $0xe8] sm:$0xf0] }
 0x592   : > { %11734 = vmatpush.bf16.msrb.mxu1 %v16878_v32  ;;  %v18761_v32 = vld [vmem:[%s20702_s9 + $0x254] sm:$0xf]  ;;  %v11466_v59 = vadd.f32 %v23856_v6, %v11453_v30  ;;  %v17998_v6 = vor.u32 %v20036_v38, %v17997_v39  ;;  %v18598_v54 = vor.u32 %v20186_v12, %v18597_v46  ;;  %v20086_v39 = vld [vmem:[%s20702_s9 + $0x2bb4] sm:$0xf0]  ;;  %v18517_v38 = vld [vmem:[%s20702_s9 + $0x2e10] sm:$0xf] }
 0x593   : > { %11747 = vmatpush.bf16.msrb.mxu2 %v17198_v31  ;;  %v12919_v31 = vld [vmem:[%s20702_s9 + $0x278] sm:$0xf0] }
 0x594   : > { %11760 = vmatpush.bf16.msrb.mxu3 %v17518_v62  ;;  %v12922_v62 = vor.u32 %v18761_v32, %v12919_v31  ;;  %v11479_v7 = vadd.f32 %v23860_v40, %v11466_v59  ;;  %v18558_v31 = vor.u32 %v20176_v20, %v18557_v25  ;;  %v18117_v25 = vld [vmem:[%s20702_s9 + $0x2af0] sm:$0xf] }
 0x595   : > { %11722 = vmatpush.bf16.msrb.mxu0 %v16518_v3  ;;  %v12879_v3 = vld [vmem:[%s20702_s9 + $0x228] sm:$0xf0] }
 0x596   : > { %11735 = vmatpush.bf16.msrb.mxu1 %v16838_v29  ;;  %v20026_v29 = vld [vmem:[%s20702_s9 + $0x29d4] sm:$0xf0]  ;;  %v11492_v40 = vadd.f32 %v23873_v15, %v11479_v7  ;;  %v12882_v26 = vor.u32 %v18751_v58, %v12879_v3  ;;  %v17917_v15 = vld [vmem:[%s20702_s9 + $0x2960] sm:$0xf]  ;;  %v18518_v3 = vor.u32 %v20166_v5, %v18517_v38  ;;  %v20136_v5 = vld [vmem:[%s20702_s9 + $0x2d44] sm:$0xf0] }
 0x597   : > { %11748 = vmatpush.bf16.msrb.mxu2 %v17158_v9  ;;  %v18277_v9 = vld [vmem:[%s20702_s9 + $0x2c30] sm:$0xf]  ;;  %v17958_v14 = vor.u32 %v20026_v29, %v17957_v16  ;;  %v17837_v7 = vld [vmem:[%s20702_s9 + $0x28c0] sm:$0xf]  ;;  %v20076_v29 = vld [vmem:[%s20702_s9 + $0x2b64] sm:$0xf0] }
 0x598   : > { %11761 = vmatpush.bf16.msrb.mxu3 %v17478_v0  ;;  %v18278_v0 = vor.u32 %v20106_v1, %v18277_v9  ;;  %v11505_v2 = vadd.f32 %v23880_v53, %v11492_v40  ;;  %v17877_v53 = vld [vmem:[%s20702_s9 + $0x2910] sm:$0xf]  ;;  %v18477_v9 = vld [vmem:[%s20702_s9 + $0x2dc0] sm:$0xf]  ;;  %v20156_v1 = vld [vmem:[%s20702_s9 + $0x2de4] sm:$0xf0] }
 0x599   : > { %11723 = vmatpush.bf16.msrb.mxu0 %v16478_v11  ;;  %v20096_v11 = vld [vmem:[%s20702_s9 + $0x2c04] sm:$0xf0]  ;;  %v11517_v30 = vpop.f32.mrf.mxu0  ;;  %v384_v40 = vld [vmem:[#allocation2 + $0x20] sm:$0xff]  ;;  %v18397_v38 = vld [vmem:[%s20702_s9 + $0x2d20] sm:$0xf] }
 0x59a   : > { %11736 = vmatpush.bf16.msrb.mxu1 %v16798_v17  ;;  %v17918_v17 = vor.u32 %v20016_v8, %v17917_v15  ;;  %v18238_v32 = vor.u32 %v20096_v11, %v18237_v57  ;;  %v11530_v59 = vpop.f32.mrf.mxu1  ;;  %v18478_v8 = vor.u32 %v20156_v1, %v18477_v9  ;;  %v17797_v57 = vld [vmem:[%s20702_s9 + $0x2870] sm:$0xf]  ;;  %v19986_v11 = vld [vmem:[%s20702_s9 + $0x2894] sm:$0xf0]  ;;  %v18398_v1 = vor.u32 %v20136_v5, %v18397_v38  ;;  %v18811_v38 = vld [vmem:[%s20702_s9 + $0x3e4] sm:$0xf] }
 0x59b   : > { %11749 = vmatpush.bf16.msrb.mxu2 %v17118_v47  ;;  %v18731_v47 = vld [vmem:[%s20702_s9 + $0x164] sm:$0xf] }
 0x59c   : > { %11762 = vmatpush.bf16.msrb.mxu3 %v17438_v52  ;;  %11724 = vmatmul.bf16.vlgmr.msrb.gmra.mxu0 %v21042_v34  ;;  %v18197_v52 = vld [vmem:[%s20702_s9 + $0x2b90] sm:$0xf] }
 0x59d   : > { %11768 = vmatpush.bf16.msra.mxu0 %v18038_v23  ;;  %11737 = vmatmul.bf16.vlgmr.msrb.gmra.mxu1 %v21049_v44  ;;  %v12799_v23 = vld [vmem:[%s20702_s9 + $0x188] sm:$0xf0]  ;;  %v18198_v58 = vor.u32 %v20086_v39, %v18197_v52  ;;  %v20056_v39 = vld [vmem:[%s20702_s9 + $0x2ac4] sm:$0xf0] }
 0x59e   : > { %11781 = vmatpush.bf16.msra.mxu1 %v18358_v33  ;;  %11750 = vmatmul.bf16.vlgmr.msrb.gmra.mxu2 %v21044_v35  ;;  %v11518_v33 = vadd.f32 %v11517_v30, %v11505_v2  ;;  %v12802_v60 = vor.u32 %v18731_v47, %v12799_v23  ;;  %v20066_v2 = vld [vmem:[%s20702_s9 + $0x2b14] sm:$0xf0]  ;;  %v12722_v47 = vor.u32 %v18711_v13, %v12719_v41  ;;  %v18701_v23 = vld [vmem:[%s20702_s9 + $0x74] sm:$0xf] }
 0x59f   : > { %11794 = vmatpush.bf16.msra.mxu2 %v18678_v19  ;;  %11763 = vmatmul.bf16.vlgmr.msrb.gmra.mxu3 %v21051_v45  ;;  %v20006_v19 = vld [vmem:[%s20702_s9 + $0x2934] sm:$0xf0] }
 0x5a0   : > { %11807 = vmatpush.bf16.msra.mxu3 %v12922_v62  ;;  %v17878_v10 = vor.u32 %v20006_v19, %v17877_v53  ;;  %v12759_v62 = vld [vmem:[%s20702_s9 + $0x138] sm:$0xf0]  ;;  %v20146_v30 = vld [vmem:[%s20702_s9 + $0x2d94] sm:$0xf0]  ;;  %v18077_v53 = vld [vmem:[%s20702_s9 + $0x2aa0] sm:$0xf]  ;;  %v18118_v19 = vor.u32 %v20066_v2, %v18117_v25 }
 0x5a1   : > { %11769 = vmatpush.bf16.msra.mxu0 %v17998_v6  ;;  %v11531_v6 = vadd.f32 %v11530_v59, %v11518_v33  ;;  %v11543_v16 = vpop.f32.mrf.mxu2  ;;  %v12762_v12 = vor.u32 %v18721_v63, %v12759_v62  ;;  %v12679_v33 = vld [vmem:[%s20702_s9 + $0x98] sm:$0xf0]  ;;  %v19976_v59 = vld [vmem:[%s20702_s9 + $0x2844] sm:$0xf0]  ;;  %v18078_v9 = vor.u32 %v20056_v39, %v18077_v53  ;;  %v19071_v2 = vld [vmem:[%s20702_s9 + $0xc04] sm:$0xf] }
 0x5a2   : > { %11782 = vmatpush.bf16.msra.mxu1 %v18318_v18  ;;  %v19996_v18 = vld [vmem:[%s20702_s9 + $0x28e4] sm:$0xf0]  ;;  %v11532_v20 = vpop.f32.mrf.mxu1  ;;  %v12682_v62 = vor.u32 %v18701_v23, %v12679_v33  ;;  %v18901_v23 = vld [vmem:[%s20702_s9 + $0x6b4] sm:$0xf]  ;;  %v13479_v33 = vld [vmem:[%s20702_s9 + $0x6d8] sm:$0xf0] }
 0x5a3   : > { %11795 = vmatpush.bf16.msra.mxu2 %v18638_v4  ;;  %v18157_v4 = vld [vmem:[%s20702_s9 + $0x2b40] sm:$0xf]  ;;  %v11544_v46 = vadd.f32 %v11543_v16, %v11531_v6  ;;  %v18921_v6 = vld [vmem:[%s20702_s9 + $0x754] sm:$0xf]  ;;  %v12639_v16 = vld [vmem:[%s20702_s9 + $0x48] sm:$0xf0] }
 0x5a4   : > { %11808 = vmatpush.bf16.msra.mxu3 %v12882_v26  ;;  %v11556_v26 = vpop.f32.mrf.mxu3  ;;  %v18158_v15 = vor.u32 %v20076_v29, %v18157_v4  ;;  %v18691_v4 = vld [vmem:[%s20702_s9 + $0x24] sm:$0xf]  ;;  %v14119_v39 = vld [vmem:[%s20702_s9 + $0xbd8] sm:$0xf0] }
 0x5a5   : > { %11770 = vmatpush.bf16.msra.mxu0 %v17958_v14  ;;  %v17838_v14 = vor.u32 %v19996_v18, %v17837_v7  ;;  %v13879_v18 = vld [vmem:[%s20702_s9 + $0x9f8] sm:$0xf0]  ;;  %v12642_v41 = vor.u32 %v18691_v4, %v12639_v16  ;;  %v14079_v4 = vld [vmem:[%s20702_s9 + $0xb88] sm:$0xf0]  ;;  %v18801_v16 = vld [vmem:[%s20702_s9 + $0x394] sm:$0xf] }
 0x5a6   : > { %11783 = vmatpush.bf16.msra.mxu1 %v18278_v0  ;;  %v11519_v0 = vpop.f32.mrf.mxu0 }
 0x5a7   : > { %11796 = vmatpush.bf16.msra.mxu2 %v18598_v54  ;;  %v11557_v54 = vadd.f32 %v11556_v26, %v11544_v46  ;;  %v14199_v26 = vld [vmem:[%s20702_s9 + $0xc78] sm:$0xf0]  ;;  %v13199_v0 = vld [vmem:[%s20702_s9 + $0x4a8] sm:$0xf0] }
 0x5a8   : > { %11809 = vmatpush.bf16.msra.mxu3 %v12842_v24  ;;  %v18437_v24 = vld [vmem:[%s20702_s9 + $0x2d70] sm:$0xf] }
 0x5a9   : > { %11771 = vmatpush.bf16.msra.mxu0 %v17918_v17  ;;  %v12061_v17 = vadd.f32 %v11557_v54, %v384_v40  ;;  %v18438_v52 = vor.u32 %v20146_v30, %v18437_v24  ;;  %v11545_v63 = vpop.f32.mrf.mxu2  ;;  %v19081_v40 = vld [vmem:[%s20702_s9 + $0xc54] sm:$0xf]  ;;  %v18911_v54 = vld [vmem:[%s20702_s9 + $0x704] sm:$0xf]  ;;  %v14159_v24 = vld [vmem:[%s20702_s9 + $0xc28] sm:$0xf0] }
 0x5aa   : > { %11784 = vmatpush.bf16.msra.mxu1 %v18238_v32  ;;  %v17798_v32 = vor.u32 %v19986_v11, %v17797_v57  ;;  %v13839_v57 = vld [vmem:[%s20702_s9 + $0x9a8] sm:$0xf0]  ;;  %v14202_v11 = vor.u32 %v19081_v40, %v14199_v26  ;;  %v18821_v30 = vld [vmem:[%s20702_s9 + $0x434] sm:$0xf]  ;;  %v13719_v26 = vld [vmem:[%s20702_s9 + $0x8b8] sm:$0xf0] }
 0x5ab   : > { %11797 = vmatpush.bf16.msra.mxu2 %v18558_v31  ;;  %v17757_v31 = vld [vmem:[%s20702_s9 + $0x2820] sm:$0xf]  ;;  %12071 = vst [vmem:[#allocation2 + $0x20] sm:$0xff] %v12061_v17  ;;  %v13439_v63 = vld [vmem:[%s20702_s9 + $0x688] sm:$0xf0] }
 0x5ac   : > { %11810 = vmatpush.bf16.msra.mxu3 %v12802_v60  ;;  %v18841_v60 = vld [vmem:[%s20702_s9 + $0x4d4] sm:$0xf]  ;;  %v17758_v7 = vor.u32 %v19976_v59, %v17757_v31  ;;  %v11558_v29 = vpop.f32.mrf.mxu3  ;;  %v13799_v31 = vld [vmem:[%s20702_s9 + $0x958] sm:$0xf0]  ;;  %v14162_v59 = vor.u32 %v19071_v2, %v14159_v24  ;;  %v18951_v2 = vld [vmem:[%s20702_s9 + $0x844] sm:$0xf] }
 0x5ad   : > { %11772 = vmatpush.bf16.msra.mxu0 %v17878_v10  ;;  %v13239_v10 = vld [vmem:[%s20702_s9 + $0x4f8] sm:$0xf0]  ;;  %v18961_v40 = vld [vmem:[%s20702_s9 + $0x894] sm:$0xf]  ;;  %v13679_v24 = vld [vmem:[%s20702_s9 + $0x868] sm:$0xf0] }
 0x5ae   : > { %11785 = vmatpush.bf16.msra.mxu1 %v18198_v58  ;;  %v13559_v58 = vld [vmem:[%s20702_s9 + $0x778] sm:$0xf0]  ;;  %v13242_v46 = vor.u32 %v18841_v60, %v13239_v10  ;;  %v13119_v60 = vld [vmem:[%s20702_s9 + $0x408] sm:$0xf0]  ;;  %v18891_v10 = vld [vmem:[%s20702_s9 + $0x664] sm:$0xf] }
 0x5af   : > { %11798 = vmatpush.bf16.msra.mxu2 %v18518_v3  ;;  %v19001_v3 = vld [vmem:[%s20702_s9 + $0x9d4] sm:$0xf] }
 0x5b0   : > { %11811 = vmatpush.bf16.msra.mxu3 %v12762_v12  ;;  %v13562_v12 = vor.u32 %v18921_v6, %v13559_v58  ;;  %v13882_v13 = vor.u32 %v19001_v3, %v13879_v18  ;;  %v13759_v6 = vld [vmem:[%s20702_s9 + $0x908] sm:$0xf0]  ;;  %v13122_v3 = vor.u32 %v18811_v38, %v13119_v60  ;;  %v19051_v18 = vld [vmem:[%s20702_s9 + $0xb64] sm:$0xf]  ;;  %v18941_v60 = vld [vmem:[%s20702_s9 + $0x7f4] sm:$0xf] }
 0x5b1   : > { %11773 = vmatpush.bf16.msra.mxu0 %v17838_v14  ;;  %v18831_v14 = vld [vmem:[%s20702_s9 + $0x484] sm:$0xf] }
 0x5b2   : > { %11786 = vmatpush.bf16.msra.mxu1 %v18158_v15  ;;  %v13519_v15 = vld [vmem:[%s20702_s9 + $0x728] sm:$0xf0]  ;;  %v13202_v25 = vor.u32 %v18831_v14, %v13199_v0 }
 0x5b3   : > { %11799 = vmatpush.bf16.msra.mxu2 %v18478_v8  ;;  %v18991_v8 = vld [vmem:[%s20702_s9 + $0x984] sm:$0xf]  ;;  %v13522_v20 = vor.u32 %v18911_v54, %v13519_v15  ;;  %v19041_v54 = vld [vmem:[%s20702_s9 + $0xb14] sm:$0xf]  ;;  %v14039_v15 = vld [vmem:[%s20702_s9 + $0xb38] sm:$0xf0] }
 0x5b4   : > { %11812 = vmatpush.bf16.msra.mxu3 %v12722_v47  ;;  %v13842_v17 = vor.u32 %v18991_v8, %v13839_v57  ;;  %v13159_v47 = vld [vmem:[%s20702_s9 + $0x458] sm:$0xf0]  ;;  %v18791_v8 = vld [vmem:[%s20702_s9 + $0x344] sm:$0xf]  ;;  %v13722_v57 = vor.u32 %v18961_v40, %v13719_v26  ;;  %v19241_v26 = vld [vmem:[%s20702_s9 + $0x1154] sm:$0xf] }
 0x5b5   : > { %11774 = vmatpush.bf16.msra.mxu0 %v17798_v32  ;;  %v18981_v32 = vld [vmem:[%s20702_s9 + $0x934] sm:$0xf]  ;;  %v13162_v53 = vor.u32 %v18821_v30, %v13159_v47  ;;  %v14519_v40 = vld [vmem:[%s20702_s9 + $0xef8] sm:$0xf0] }
 0x5b6   : > { %11787 = vmatpush.bf16.msra.mxu1 %v18118_v19  ;;  %v13482_v19 = vor.u32 %v18901_v23, %v13479_v33  ;;  %v13802_v5 = vor.u32 %v18981_v32, %v13799_v31  ;;  %v19031_v32 = vld [vmem:[%s20702_s9 + $0xac4] sm:$0xf]  ;;  %v13999_v31 = vld [vmem:[%s20702_s9 + $0xae8] sm:$0xf0] }
 0x5b7   : > { %11800 = vmatpush.bf16.msra.mxu2 %v18438_v52  ;;  %v19061_v52 = vld [vmem:[%s20702_s9 + $0xbb4] sm:$0xf] }
 0x5b8   : > { %11813 = vmatpush.bf16.msra.mxu3 %v12682_v62  ;;  %v18971_v62 = vld [vmem:[%s20702_s9 + $0x8e4] sm:$0xf]  ;;  %v14122_v58 = vor.u32 %v19061_v52, %v14119_v39  ;;  %v18861_v52 = vld [vmem:[%s20702_s9 + $0x574] sm:$0xf]  ;;  %v13319_v39 = vld [vmem:[%s20702_s9 + $0x598] sm:$0xf0] }
 0x5b9   : > { %11775 = vmatpush.bf16.msra.mxu0 %v17758_v7  ;;  %v13442_v7 = vor.u32 %v18891_v10, %v13439_v63  ;;  %v13762_v29 = vor.u32 %v18971_v62, %v13759_v6  ;;  %v13639_v10 = vld [vmem:[%s20702_s9 + $0x818] sm:$0xf0]  ;;  %v14002_v6 = vor.u32 %v19031_v32, %v13999_v31  ;;  %v19231_v32 = vld [vmem:[%s20702_s9 + $0x1104] sm:$0xf] }
 0x5ba   : > { %11788 = vmatpush.bf16.msra.mxu1 %v18078_v9  ;;  %v13079_v9 = vld [vmem:[%s20702_s9 + $0x3b8] sm:$0xf0] }
 0x5bb   : > { %11801 = vmatpush.bf16.msra.mxu2 %v18398_v1  ;;  %v13399_v1 = vld [vmem:[%s20702_s9 + $0x638] sm:$0xf0] }
 0x5bc   : > { %11814 = vmatpush.bf16.msra.mxu3 %v12642_v41  ;;  %11776 = vmatmul.bf16.vlgmr.msra.gmra.mxu0 %v21121_v49  ;;  %v13082_v41 = vor.u32 %v18801_v16, %v13079_v9  ;;  %v12959_v16 = vld [vmem:[%s20702_s9 + $0x2c8] sm:$0xf0]  ;;  %v13642_v9 = vor.u32 %v18941_v60, %v13639_v10 }
 0x5bd   : > { %11820 = vmatpush.bf16.msrb.mxu0 %v13242_v46  ;;  %11789 = vmatmul.bf16.vlgmr.msra.gmra.mxu1 %v21127_v56  ;;  %v11569_v46 = vpop.f32.mrf.mxu0 }
 0x5be   : > { %11833 = vmatpush.bf16.msrb.mxu1 %v13562_v12  ;;  %11802 = vmatmul.bf16.vlgmr.msra.gmra.mxu2 %v21123_v50  ;;  %v11582_v12 = vpop.f32.mrf.mxu1 }
 0x5bf   : > { %11846 = vmatpush.bf16.msrb.mxu2 %v13882_v13  ;;  %11815 = vmatmul.bf16.vlgmr.msra.gmra.mxu3 %v20829_v27  ;;  %v18881_v27 = vld [vmem:[%s20702_s9 + $0x614] sm:$0xf]  ;;  %v11583_v14 = vadd.f32 %v11582_v12, %v11569_v46  ;;  %v14082_v13 = vor.u32 %v19051_v18, %v14079_v4  ;;  %v13322_v18 = vor.u32 %v18861_v52, %v13319_v39  ;;  %v18771_v4 = vld [vmem:[%s20702_s9 + $0x2a4] sm:$0xf]  ;;  %v13599_v46 = vld [vmem:[%s20702_s9 + $0x7c8] sm:$0xf0] }
 0x5c0   : > { %11859 = vmatpush.bf16.msrb.mxu3 %v14202_v11  ;;  %v13402_v0 = vor.u32 %v18881_v27, %v13399_v1  ;;  %v13039_v11 = vld [vmem:[%s20702_s9 + $0x368] sm:$0xf0]  ;;  %v18931_v1 = vld [vmem:[%s20702_s9 + $0x7a4] sm:$0xf]  ;;  %v19161_v12 = vld [vmem:[%s20702_s9 + $0xed4] sm:$0xf] }
 0x5c1   : > { %11821 = vmatpush.bf16.msrb.mxu0 %v13202_v25  ;;  %v18871_v25 = vld [vmem:[%s20702_s9 + $0x5c4] sm:$0xf]  ;;  %v11595_v30 = vpop.f32.mrf.mxu2  ;;  %v13042_v23 = vor.u32 %v18791_v8, %v13039_v11  ;;  %v13279_v27 = vld [vmem:[%s20702_s9 + $0x548] sm:$0xf0] }
 0x5c2   : > { %11834 = vmatpush.bf16.msrb.mxu1 %v13522_v20  ;;  %v13359_v20 = vld [vmem:[%s20702_s9 + $0x5e8] sm:$0xf0]  ;;  %v11596_v47 = vadd.f32 %v11595_v30, %v11583_v14  ;;  %v11608_v38 = vpop.f32.mrf.mxu3 }
 0x5c3   : > { %11847 = vmatpush.bf16.msrb.mxu2 %v13842_v17  ;;  %v14042_v17 = vor.u32 %v19041_v54, %v14039_v15  ;;  %v13362_v33 = vor.u32 %v18871_v25, %v13359_v20  ;;  %v15159_v54 = vld [vmem:[%s20702_s9 + $0x13f8] sm:$0xf0]  ;;  %v12962_v15 = vor.u32 %v18771_v4, %v12959_v16  ;;  %v13919_v11 = vld [vmem:[%s20702_s9 + $0xa48] sm:$0xf0]  ;;  %v13602_v25 = vor.u32 %v18931_v1, %v13599_v46 }
 0x5c4   : > { %11860 = vmatpush.bf16.msrb.mxu3 %v14162_v59  ;;  %v18781_v59 = vld [vmem:[%s20702_s9 + $0x2f4] sm:$0xf]  ;;  %v24033_v63 = vadd.f32 %v11608_v38, %v11596_v47  ;;  %v14522_v20 = vor.u32 %v19161_v12, %v14519_v40  ;;  %v19391_v38 = vld [vmem:[%s20702_s9 + $0x1604] sm:$0xf]  ;;  %v14399_v46 = vld [vmem:[%s20702_s9 + $0xe08] sm:$0xf0] }
 0x5c5   : > { %11822 = vmatpush.bf16.msrb.mxu0 %v13162_v53  ;;  %v13682_v53 = vor.u32 %v18951_v2, %v13679_v24  ;;  %v19401_v2 = vld [vmem:[%s20702_s9 + $0x1654] sm:$0xf]  ;;  %v15479_v24 = vld [vmem:[%s20702_s9 + $0x1678] sm:$0xf0]  ;;  %v19211_v12 = vld [vmem:[%s20702_s9 + $0x1064] sm:$0xf] }
 0x5c6   : > { %11835 = vmatpush.bf16.msrb.mxu1 %v13482_v19  ;;  %v12999_v19 = vld [vmem:[%s20702_s9 + $0x318] sm:$0xf0]  ;;  %v11584_v62 = vpop.f32.mrf.mxu1  ;;  %v15482_v52 = vor.u32 %v19401_v2, %v15479_v24  ;;  %v14719_v40 = vld [vmem:[%s20702_s9 + $0x1088] sm:$0xf0] }
 0x5c7   : > { %11848 = vmatpush.bf16.msrb.mxu2 %v13802_v5  ;;  %v11571_v5 = vpop.f32.mrf.mxu0  ;;  %v19141_v62 = vld [vmem:[%s20702_s9 + $0xe34] sm:$0xf]  ;;  %v14999_v2 = vld [vmem:[%s20702_s9 + $0x12b8] sm:$0xf0] }
 0x5c8   : > { %11861 = vmatpush.bf16.msrb.mxu3 %v14122_v58  ;;  %v19021_v58 = vld [vmem:[%s20702_s9 + $0xa74] sm:$0xf]  ;;  %v15439_v5 = vld [vmem:[%s20702_s9 + $0x1628] sm:$0xf0] }
 0x5c9   : > { %11823 = vmatpush.bf16.msrb.mxu0 %v13122_v3  ;;  %v13959_v3 = vld [vmem:[%s20702_s9 + $0xa98] sm:$0xf0]  ;;  %v11597_v14 = vpop.f32.mrf.mxu2  ;;  %v15442_v4 = vor.u32 %v19391_v38, %v15439_v5 }
 0x5ca   : > { %11836 = vmatpush.bf16.msrb.mxu1 %v13442_v7  ;;  %v13002_v7 = vor.u32 %v18781_v59, %v12999_v19  ;;  %v11610_v30 = vpop.f32.mrf.mxu3  ;;  %v14799_v59 = vld [vmem:[%s20702_s9 + $0x1128] sm:$0xf0] }
 0x5cb   : > { %11849 = vmatpush.bf16.msrb.mxu2 %v13762_v29  ;;  %v18851_v29 = vld [vmem:[%s20702_s9 + $0x524] sm:$0xf]  ;;  %v15119_v19 = vld [vmem:[%s20702_s9 + $0x13a8] sm:$0xf0]  ;;  %v14802_v60 = vor.u32 %v19231_v32, %v14799_v59 }
 0x5cc   : > { %11862 = vmatpush.bf16.msrb.mxu3 %v14082_v13  ;;  %v13962_v13 = vor.u32 %v19021_v58, %v13959_v3  ;;  %v13282_v8 = vor.u32 %v18851_v29, %v13279_v27  ;;  %v19221_v58 = vld [vmem:[%s20702_s9 + $0x10b4] sm:$0xf]  ;;  %v14759_v3 = vld [vmem:[%s20702_s9 + $0x10d8] sm:$0xf0]  ;;  %v14319_v59 = vld [vmem:[%s20702_s9 + $0xd68] sm:$0xf0] }
 0x5cd   : > { %11824 = vmatpush.bf16.msrb.mxu0 %v13082_v41  ;;  %v14839_v41 = vld [vmem:[%s20702_s9 + $0x1178] sm:$0xf0]  ;;  %v19381_v29 = vld [vmem:[%s20702_s9 + $0x15b4] sm:$0xf]  ;;  %v14762_v27 = vor.u32 %v19221_v58, %v14759_v3 }
 0x5ce   : > { %11837 = vmatpush.bf16.msrb.mxu1 %v13402_v0  ;;  %v19321_v0 = vld [vmem:[%s20702_s9 + $0x13d4] sm:$0xf] }
 0x5cf   : > { %11850 = vmatpush.bf16.msrb.mxu2 %v13722_v57  ;;  %v19011_v57 = vld [vmem:[%s20702_s9 + $0xa24] sm:$0xf]  ;;  %v15162_v47 = vor.u32 %v19321_v0, %v15159_v54  ;;  %v14722_v54 = vor.u32 %v19211_v12, %v14719_v40  ;;  %v19341_v40 = vld [vmem:[%s20702_s9 + $0x1474] sm:$0xf] }
 0x5d0   : > { %11863 = vmatpush.bf16.msrb.mxu3 %v14042_v17  ;;  %v14842_v17 = vor.u32 %v19241_v26, %v14839_v41  ;;  %v13922_v31 = vor.u32 %v19011_v57, %v13919_v11  ;;  %v19291_v26 = vld [vmem:[%s20702_s9 + $0x12e4] sm:$0xf]  ;;  %v15359_v41 = vld [vmem:[%s20702_s9 + $0x1588] sm:$0xf0]  ;;  %v19121_v57 = vld [vmem:[%s20702_s9 + $0xd94] sm:$0xf] }
 0x5d1   : > { %11825 = vmatpush.bf16.msrb.mxu0 %v13042_v23  ;;  %v19151_v23 = vld [vmem:[%s20702_s9 + $0xe84] sm:$0xf]  ;;  %v19201_v11 = vld [vmem:[%s20702_s9 + $0x1014] sm:$0xf] }
 0x5d2   : > { %11838 = vmatpush.bf16.msrb.mxu1 %v13362_v33  ;;  %v14479_v33 = vld [vmem:[%s20702_s9 + $0xea8] sm:$0xf0] }
 0x5d3   : > { %11851 = vmatpush.bf16.msrb.mxu2 %v13682_v53  ;;  %v19311_v53 = vld [vmem:[%s20702_s9 + $0x1384] sm:$0xf]  ;;  %v14482_v39 = vor.u32 %v19151_v23, %v14479_v33  ;;  %v19361_v23 = vld [vmem:[%s20702_s9 + $0x1514] sm:$0xf] }
 0x5d4   : > { %11864 = vmatpush.bf16.msrb.mxu3 %v14002_v6  ;;  %v15122_v10 = vor.u32 %v19311_v53, %v15119_v19  ;;  %v14439_v6 = vld [vmem:[%s20702_s9 + $0xe58] sm:$0xf0]  ;;  %v19191_v53 = vld [vmem:[%s20702_s9 + $0xfc4] sm:$0xf]  ;;  %v14639_v19 = vld [vmem:[%s20702_s9 + $0xfe8] sm:$0xf0] }
 0x5d5   : > { %11826 = vmatpush.bf16.msrb.mxu0 %v13002_v7  ;;  %v19301_v7 = vld [vmem:[%s20702_s9 + $0x1334] sm:$0xf]  ;;  %v14442_v16 = vor.u32 %v19141_v62, %v14439_v6  ;;  %v19351_v62 = vld [vmem:[%s20702_s9 + $0x14c4] sm:$0xf]  ;;  %v15279_v6 = vld [vmem:[%s20702_s9 + $0x14e8] sm:$0xf0]  ;;  %v14642_v3 = vor.u32 %v19191_v53, %v14639_v19 }
 0x5d6   : > { %11839 = vmatpush.bf16.msrb.mxu1 %v13322_v18  ;;  %v15079_v18 = vld [vmem:[%s20702_s9 + $0x1358] sm:$0xf0]  ;;  %v15282_v12 = vor.u32 %v19351_v62, %v15279_v6  ;;  %v19471_v19 = vld [vmem:[%s20702_s9 + $0x1884] sm:$0xf] }
 0x5d7   : > { %11852 = vmatpush.bf16.msrb.mxu2 %v13642_v9  ;;  %v15399_v9 = vld [vmem:[%s20702_s9 + $0x15d8] sm:$0xf0]  ;;  %v15082_v1 = vor.u32 %v19301_v7, %v15079_v18  ;;  %v19101_v18 = vld [vmem:[%s20702_s9 + $0xcf4] sm:$0xf]  ;;  %v19631_v6 = vld [vmem:[%s20702_s9 + $0x1d84] sm:$0xf] }
 0x5d8   : > { %11865 = vmatpush.bf16.msrb.mxu3 %v13962_v13  ;;  %v19371_v13 = vld [vmem:[%s20702_s9 + $0x1564] sm:$0xf] }
 0x5d9   : > { %11827 = vmatpush.bf16.msrb.mxu0 %v12962_v15  ;;  %v11621_v0 = vpop.f32.mrf.mxu0  ;;  %v15362_v30 = vor.u32 %v19371_v13, %v15359_v41 }
 0x5da   : > { %11840 = vmatpush.bf16.msrb.mxu1 %v13282_v8  ;;  %v11622_v8 = vadd.f32 %v11621_v0, %v24033_v63  ;;  %v11634_v24 = vpop.f32.mrf.mxu1  ;;  %v15319_v63 = vld [vmem:[%s20702_s9 + $0x1538] sm:$0xf0]  ;;  %v19171_v0 = vld [vmem:[%s20702_s9 + $0xf24] sm:$0xf] }
 0x5db   : > { %11853 = vmatpush.bf16.msrb.mxu2 %v13602_v25  ;;  %v14679_v25 = vld [vmem:[%s20702_s9 + $0x1038] sm:$0xf0]  ;;  %v15322_v38 = vor.u32 %v19361_v23, %v15319_v63  ;;  %v15199_v23 = vld [vmem:[%s20702_s9 + $0x1448] sm:$0xf0] }
 0x5dc   : > { %11866 = vmatpush.bf16.msrb.mxu3 %v13922_v31  ;;  %11828 = vmatmul.bf16.vlgmr.msrb.gmra.mxu0 %v20831_v28  ;;  %v19131_v28 = vld [vmem:[%s20702_s9 + $0xde4] sm:$0xf]  ;;  %v14682_v33 = vor.u32 %v19201_v11, %v14679_v25  ;;  %v19561_v25 = vld [vmem:[%s20702_s9 + $0x1b54] sm:$0xf] }
 0x5dd   : > { %11872 = vmatpush.bf16.msra.mxu0 %v14522_v20  ;;  %11841 = vmatmul.bf16.vlgmr.msrb.gmra.mxu1 %v20822_v21  ;;  %v15402_v21 = vor.u32 %v19381_v29, %v15399_v9  ;;  %v14402_v14 = vor.u32 %v19131_v28, %v14399_v46  ;;  %v19281_v20 = vld [vmem:[%s20702_s9 + $0x1294] sm:$0xf]  ;;  %v19111_v31 = vld [vmem:[%s20702_s9 + $0xd44] sm:$0xf]  ;;  %v14599_v9 = vld [vmem:[%s20702_s9 + $0xf98] sm:$0xf0] }
 0x5de   : > { %11885 = vmatpush.bf16.msra.mxu1 %v14842_v17  ;;  %11854 = vmatmul.bf16.vlgmr.msrb.gmra.mxu2 %v20824_v22  ;;  %v15039_v22 = vld [vmem:[%s20702_s9 + $0x1308] sm:$0xf0]  ;;  %v11635_v17 = vadd.f32 %v11634_v24, %v11622_v8  ;;  %v15002_v32 = vor.u32 %v19281_v20, %v14999_v2  ;;  %v16119_v20 = vld [vmem:[%s20702_s9 + $0x1b78] sm:$0xf0]  ;;  %v19641_v2 = vld [vmem:[%s20702_s9 + $0x1dd4] sm:$0xf] }
 0x5df   : > { %11898 = vmatpush.bf16.msra.mxu2 %v15162_v47  ;;  %11867 = vmatmul.bf16.vlgmr.msrb.gmra.mxu3 %v20889_v48  ;;  %v15042_v15 = vor.u32 %v19291_v26, %v15039_v22  ;;  %v14359_v48 = vld [vmem:[%s20702_s9 + $0xdb8] sm:$0xf0]  ;;  %v14879_v8 = vld [vmem:[%s20702_s9 + $0x11c8] sm:$0xf0]  ;;  %v16122_v53 = vor.u32 %v19561_v25, %v16119_v20  ;;  %v19441_v25 = vld [vmem:[%s20702_s9 + $0x1794] sm:$0xf] }
 0x5e0   : > { %11911 = vmatpush.bf16.msra.mxu3 %v15482_v52  ;;  %v14362_v47 = vor.u32 %v19121_v57, %v14359_v48  ;;  %v19271_v52 = vld [vmem:[%s20702_s9 + $0x1244] sm:$0xf]  ;;  %v15239_v22 = vld [vmem:[%s20702_s9 + $0x1498] sm:$0xf0]  ;;  %v19481_v57 = vld [vmem:[%s20702_s9 + $0x18d4] sm:$0xf] }
 0x5e1   : > { %11873 = vmatpush.bf16.msra.mxu0 %v14482_v39  ;;  %v14959_v39 = vld [vmem:[%s20702_s9 + $0x1268] sm:$0xf0]  ;;  %v11647_v5 = vpop.f32.mrf.mxu2  ;;  %v11623_v58 = vpop.f32.mrf.mxu0  ;;  %v15799_v48 = vld [vmem:[%s20702_s9 + $0x18f8] sm:$0xf0]  ;;  %v15242_v11 = vor.u32 %v19341_v40, %v15239_v22 }
 0x5e2   : > { %11886 = vmatpush.bf16.msra.mxu1 %v14802_v60  ;;  %v11648_v60 = vadd.f32 %v11647_v5, %v11635_v17  ;;  %v14962_v7 = vor.u32 %v19271_v52, %v14959_v39  ;;  %v11660_v29 = vpop.f32.mrf.mxu3  ;;  %v11636_v28 = vpop.f32.mrf.mxu1  ;;  %v16439_v17 = vld [vmem:[%s20702_s9 + $0x1df8] sm:$0xf0]  ;;  %v15759_v5 = vld [vmem:[%s20702_s9 + $0x18a8] sm:$0xf0] }
 0x5e3   : > { %11899 = vmatpush.bf16.msra.mxu2 %v15122_v10  ;;  %v14322_v10 = vor.u32 %v19111_v31, %v14319_v59  ;;  %v16759_v31 = vld [vmem:[%s20702_s9 + $0x2078] sm:$0xf0]  ;;  %v15802_v59 = vor.u32 %v19481_v57, %v15799_v48  ;;  %v16442_v39 = vor.u32 %v19641_v2, %v16439_v17  ;;  %v16399_v58 = vld [vmem:[%s20702_s9 + $0x1da8] sm:$0xf0] }
 0x5e4   : > { %11912 = vmatpush.bf16.msra.mxu3 %v15442_v4  ;;  %v14279_v4 = vld [vmem:[%s20702_s9 + $0xd18] sm:$0xf0]  ;;  %v24104_v46 = vadd.f32 %v11660_v29, %v11648_v60  ;;  %v19551_v60 = vld [vmem:[%s20702_s9 + $0x1b04] sm:$0xf]  ;;  %v16402_v29 = vor.u32 %v19631_v6, %v16399_v58  ;;  %v16639_v57 = vld [vmem:[%s20702_s9 + $0x1f88] sm:$0xf0] }
 0x5e5   : > { %11874 = vmatpush.bf16.msra.mxu0 %v14442_v16  ;;  %v19181_v16 = vld [vmem:[%s20702_s9 + $0xf74] sm:$0xf]  ;;  %v14282_v26 = vor.u32 %v19101_v18, %v14279_v4  ;;  %v15762_v18 = vor.u32 %v19471_v19, %v15759_v5  ;;  %v16359_v40 = vld [vmem:[%s20702_s9 + $0x1d58] sm:$0xf0]  ;;  %v19671_v6 = vld [vmem:[%s20702_s9 + $0x1ec4] sm:$0xf] }
 0x5e6   : > { %11887 = vmatpush.bf16.msra.mxu1 %v14762_v27  ;;  %v19261_v27 = vld [vmem:[%s20702_s9 + $0x11f4] sm:$0xf]  ;;  %v14602_v13 = vor.u32 %v19181_v16, %v14599_v9  ;;  %v15719_v9 = vld [vmem:[%s20702_s9 + $0x1858] sm:$0xf0]  ;;  %v16559_v58 = vld [vmem:[%s20702_s9 + $0x1ee8] sm:$0xf0] }
 0x5e7   : > { %11900 = vmatpush.bf16.msra.mxu2 %v15082_v1  ;;  %v14919_v1 = vld [vmem:[%s20702_s9 + $0x1218] sm:$0xf0]  ;;  %v19461_v16 = vld [vmem:[%s20702_s9 + $0x1834] sm:$0xf] }
 0x5e8   : > { %11913 = vmatpush.bf16.msra.mxu3 %v15402_v21  ;;  %v19091_v21 = vld [vmem:[%s20702_s9 + $0xca4] sm:$0xf]  ;;  %v14922_v41 = vor.u32 %v19261_v27, %v14919_v1  ;;  %v19541_v27 = vld [vmem:[%s20702_s9 + $0x1ab4] sm:$0xf]  ;;  %v16039_v1 = vld [vmem:[%s20702_s9 + $0x1ad8] sm:$0xf0] }
 0x5e9   : > { %11875 = vmatpush.bf16.msra.mxu0 %v14402_v14  ;;  %v14239_v14 = vld [vmem:[%s20702_s9 + $0xcc8] sm:$0xf0]  ;;  %v11649_v24 = vpop.f32.mrf.mxu2  ;;  %v16679_v22 = vld [vmem:[%s20702_s9 + $0x1fd8] sm:$0xf0] }
 0x5ea   : > { %11888 = vmatpush.bf16.msra.mxu1 %v14722_v54  ;;  %v14559_v54 = vld [vmem:[%s20702_s9 + $0xf48] sm:$0xf0]  ;;  %v11662_v52 = vpop.f32.mrf.mxu3  ;;  %v15639_v24 = vld [vmem:[%s20702_s9 + $0x17b8] sm:$0xf0] }
 0x5eb   : > { %11901 = vmatpush.bf16.msra.mxu2 %v15042_v15  ;;  %v19251_v15 = vld [vmem:[%s20702_s9 + $0x11a4] sm:$0xf]  ;;  %v14562_v63 = vor.u32 %v19171_v0, %v14559_v54  ;;  %v15999_v0 = vld [vmem:[%s20702_s9 + $0x1a88] sm:$0xf0]  ;;  %v15959_v17 = vld [vmem:[%s20702_s9 + $0x1a38] sm:$0xf0] }
 0x5ec   : > { %11914 = vmatpush.bf16.msra.mxu3 %v15362_v30  ;;  %v14242_v30 = vor.u32 %v19091_v21, %v14239_v14  ;;  %v15722_v21 = vor.u32 %v19461_v16, %v15719_v9  ;;  %v19451_v14 = vld [vmem:[%s20702_s9 + $0x17e4] sm:$0xf]  ;;  %v15599_v52 = vld [vmem:[%s20702_s9 + $0x1768] sm:$0xf0]  ;;  %v15559_v9 = vld [vmem:[%s20702_s9 + $0x1718] sm:$0xf0] }
 0x5ed   : > { %11876 = vmatpush.bf16.msra.mxu0 %v14362_v47  ;;  %v19331_v47 = vld [vmem:[%s20702_s9 + $0x1424] sm:$0xf] }
 0x5ee   : > { %11889 = vmatpush.bf16.msra.mxu1 %v14682_v33  ;;  %v14882_v33 = vor.u32 %v19251_v15, %v14879_v8  ;;  %v19611_v54 = vld [vmem:[%s20702_s9 + $0x1ce4] sm:$0xf]  ;;  %v16319_v15 = vld [vmem:[%s20702_s9 + $0x1d08] sm:$0xf0] }
 0x5ef   : > { %11902 = vmatpush.bf16.msra.mxu2 %v15002_v32  ;;  %v19721_v32 = vld [vmem:[%s20702_s9 + $0x2054] sm:$0xf]  ;;  %v19691_v8 = vld [vmem:[%s20702_s9 + $0x1f64] sm:$0xf]  ;;  %v16322_v20 = vor.u32 %v19611_v54, %v16319_v15  ;;  %v16159_v15 = vld [vmem:[%s20702_s9 + $0x1bc8] sm:$0xf0] }
 0x5f0   : > { %11915 = vmatpush.bf16.msra.mxu3 %v15322_v38  ;;  %v15202_v38 = vor.u32 %v19331_v47, %v15199_v23  ;;  %v16762_v62 = vor.u32 %v19721_v32, %v16759_v31  ;;  %v16642_v47 = vor.u32 %v19691_v8, %v16639_v57  ;;  %v19601_v23 = vld [vmem:[%s20702_s9 + $0x1c94] sm:$0xf]  ;;  %v16599_v32 = vld [vmem:[%s20702_s9 + $0x1f38] sm:$0xf0]  ;;  %v15642_v31 = vor.u32 %v19441_v25, %v15639_v24  ;;  %v19571_v54 = vld [vmem:[%s20702_s9 + $0x1ba4] sm:$0xf] }
 0x5f1   : > { %11877 = vmatpush.bf16.msra.mxu0 %v14322_v10  ;;  %v16079_v10 = vld [vmem:[%s20702_s9 + $0x1b28] sm:$0xf0]  ;;  %v19801_v57 = vld [vmem:[%s20702_s9 + $0x22d4] sm:$0xf] }
 0x5f2   : > { %11890 = vmatpush.bf16.msra.mxu1 %v14642_v3  ;;  %v19711_v3 = vld [vmem:[%s20702_s9 + $0x2004] sm:$0xf]  ;;  %v16082_v4 = vor.u32 %v19551_v60, %v16079_v10  ;;  %v19961_v24 = vld [vmem:[%s20702_s9 + $0x27d4] sm:$0xf] }
 0x5f3   : > { %11903 = vmatpush.bf16.msra.mxu2 %v14962_v7  ;;  %v16719_v7 = vld [vmem:[%s20702_s9 + $0x2028] sm:$0xf0]  ;;  %v19591_v10 = vld [vmem:[%s20702_s9 + $0x1c44] sm:$0xf] }
 0x5f4   : > { %11916 = vmatpush.bf16.msra.mxu3 %v15282_v12  ;;  %v16722_v28 = vor.u32 %v19711_v3, %v16719_v7  ;;  %v19621_v12 = vld [vmem:[%s20702_s9 + $0x1d34] sm:$0xf] }
 0x5f5   : > { %11878 = vmatpush.bf16.msra.mxu0 %v14282_v26  ;;  %v19701_v26 = vld [vmem:[%s20702_s9 + $0x1fb4] sm:$0xf] }
 0x5f6   : > { %11891 = vmatpush.bf16.msra.mxu1 %v14602_v13  ;;  %v16362_v13 = vor.u32 %v19621_v12, %v16359_v40  ;;  %v16562_v12 = vor.u32 %v19671_v6, %v16559_v58  ;;  %v19581_v40 = vld [vmem:[%s20702_s9 + $0x1bf4] sm:$0xf]  ;;  %v19951_v58 = vld [vmem:[%s20702_s9 + $0x2784] sm:$0xf] }
 0x5f7   : > { %11904 = vmatpush.bf16.msra.mxu2 %v14922_v41  ;;  %v15679_v41 = vld [vmem:[%s20702_s9 + $0x1808] sm:$0xf0] }
 0x5f8   : > { %11917 = vmatpush.bf16.msra.mxu3 %v15242_v11  ;;  %v15682_v48 = vor.u32 %v19451_v14, %v15679_v41  ;;  %v15519_v41 = vld [vmem:[%s20702_s9 + $0x16c8] sm:$0xf0] }
 0x5f9   : > { %11879 = vmatpush.bf16.msra.mxu0 %v14242_v30  ;;  %v19521_v30 = vld [vmem:[%s20702_s9 + $0x1a14] sm:$0xf] }
 0x5fa   : > { %11892 = vmatpush.bf16.msra.mxu1 %v14562_v63  ;;  %v24155_v2 = vpop.f32.mrf.mxu1  ;;  %v16279_v63 = vld [vmem:[%s20702_s9 + $0x1cb8] sm:$0xf0] }
 0x5fb   : > { %11905 = vmatpush.bf16.msra.mxu2 %v14882_v33  ;;  %v19681_v33 = vld [vmem:[%s20702_s9 + $0x1f14] sm:$0xf]  ;;  %v16282_v19 = vor.u32 %v19601_v23, %v16279_v63  ;;  %v19651_v23 = vld [vmem:[%s20702_s9 + $0x1e24] sm:$0xf]  ;;  %v16479_v63 = vld [vmem:[%s20702_s9 + $0x1e48] sm:$0xf0] }
 0x5fc   : > { %11918 = vmatpush.bf16.msra.mxu3 %v15202_v38  ;;  %11880 = vmatmul.bf16.vlgmr.msra.gmra.mxu0 %v20895_v55  ;;  %v19531_v55 = vld [vmem:[%s20702_s9 + $0x1a64] sm:$0xf]  ;;  %v15919_v38 = vld [vmem:[%s20702_s9 + $0x19e8] sm:$0xf0]  ;;  %v16602_v60 = vor.u32 %v19681_v33, %v16599_v32  ;;  %v16162_v32 = vor.u32 %v19571_v54, %v16159_v15 }
 0x5fd   : > { %11924 = vmatpush.bf16.msrb.mxu0 %v15802_v59  ;;  %11893 = vmatmul.bf16.vlgmr.msra.gmra.mxu1 %v20891_v51  ;;  %v16682_v51 = vor.u32 %v19701_v26, %v16679_v22  ;;  %v16002_v11 = vor.u32 %v19531_v55, %v15999_v0  ;;  %v15962_v59 = vor.u32 %v19521_v30, %v15959_v17  ;;  %v16199_v26 = vld [vmem:[%s20702_s9 + $0x1c18] sm:$0xf0]  ;;  %v19661_v22 = vld [vmem:[%s20702_s9 + $0x1e74] sm:$0xf]  ;;  %v19491_v55 = vld [vmem:[%s20702_s9 + $0x1924] sm:$0xf] }
 0x5fe   : > { %11937 = vmatpush.bf16.msrb.mxu1 %v16122_v53  ;;  %11906 = vmatmul.bf16.vlgmr.msra.gmra.mxu2 %v20901_v61  ;;  %v16042_v61 = vor.u32 %v19541_v27, %v16039_v1  ;;  %v19431_v53 = vld [vmem:[%s20702_s9 + $0x1744] sm:$0xf]  ;;  %v19501_v27 = vld [vmem:[%s20702_s9 + $0x1974] sm:$0xf]  ;;  %v15879_v1 = vld [vmem:[%s20702_s9 + $0x1998] sm:$0xf0]  ;;  %v16202_v0 = vor.u32 %v19581_v40, %v16199_v26 }
 0x5ff   : > { %11950 = vmatpush.bf16.msrb.mxu2 %v16442_v39  ;;  %11919 = vmatmul.bf16.vlgmr.msra.gmra.mxu3 %v20964_v36  ;;  %v24152_v36 = vpop.f32.mrf.mxu0  ;;  %v19511_v39 = vld [vmem:[%s20702_s9 + $0x19c4] sm:$0xf]  ;;  %v15602_v7 = vor.u32 %v19431_v53, %v15599_v52  ;;  %v15882_v14 = vor.u32 %v19501_v27, %v15879_v1  ;;  %v17719_v30 = vld [vmem:[%s20702_s9 + $0x27f8] sm:$0xf0]  ;;  %v19941_v26 = vld [vmem:[%s20702_s9 + $0x2734] sm:$0xf] }
 0x600   : > { %11963 = vmatpush.bf16.msrb.mxu3 %v16762_v62  ;;  %v16239_v62 = vld [vmem:[%s20702_s9 + $0x1c68] sm:$0xf0]  ;;  %v18039_v53 = vld [vmem:[%s20702_s9 + $0x2a78] sm:$0xf0]  ;;  %v17722_v52 = vor.u32 %v19961_v24, %v17719_v30  ;;  %v20011_v15 = vld [vmem:[%s20702_s9 + $0x2964] sm:$0xf] }
 0x601   : > { %11925 = vmatpush.bf16.msrb.mxu0 %v15762_v18  ;;  %v24168_v5 = vpop.f32.mrf.mxu2  ;;  %v15922_v18 = vor.u32 %v19511_v39, %v15919_v38  ;;  %v19791_v39 = vld [vmem:[%s20702_s9 + $0x2284] sm:$0xf]  ;;  %v17039_v38 = vld [vmem:[%s20702_s9 + $0x22a8] sm:$0xf0]  ;;  %v16999_v27 = vld [vmem:[%s20702_s9 + $0x2258] sm:$0xf0] }
 0x602   : > { %11938 = vmatpush.bf16.msrb.mxu1 %v16082_v4  ;;  %v24174_v3 = vpop.f32.mrf.mxu3  ;;  %v19421_v4 = vld [vmem:[%s20702_s9 + $0x16f4] sm:$0xf]  ;;  %v17599_v54 = vld [vmem:[%s20702_s9 + $0x2708] sm:$0xf0] }
 0x603   : > { %11951 = vmatpush.bf16.msrb.mxu2 %v16402_v29  ;;  %v16242_v29 = vor.u32 %v19591_v10, %v16239_v62  ;;  %v19871_v10 = vld [vmem:[%s20702_s9 + $0x2504] sm:$0xf]  ;;  %v17359_v62 = vld [vmem:[%s20702_s9 + $0x2528] sm:$0xf0]  ;;  %v19841_v30 = vld [vmem:[%s20702_s9 + $0x2414] sm:$0xf] }
 0x604   : > { %11964 = vmatpush.bf16.msrb.mxu3 %v16722_v28  ;;  %v11688_v28 = vpop.f32.mrf.mxu1 }
 0x605   : > { %11926 = vmatpush.bf16.msrb.mxu0 %v15722_v21  ;;  %v16519_v21 = vld [vmem:[%s20702_s9 + $0x1e98] sm:$0xf0]  ;;  %v19861_v28 = vld [vmem:[%s20702_s9 + $0x24b4] sm:$0xf] }
 0x606   : > { %11939 = vmatpush.bf16.msrb.mxu1 %v16042_v61  ;;  %v15562_v61 = vor.u32 %v19421_v4, %v15559_v9  ;;  %v16522_v8 = vor.u32 %v19661_v22, %v16519_v21  ;;  %v20031_v4 = vld [vmem:[%s20702_s9 + $0x2a04] sm:$0xf]  ;;  %v19781_v9 = vld [vmem:[%s20702_s9 + $0x2234] sm:$0xf]  ;;  %v17639_v22 = vld [vmem:[%s20702_s9 + $0x2758] sm:$0xf0] }
 0x607   : > { %11952 = vmatpush.bf16.msrb.mxu2 %v16362_v13  ;;  %v11675_v16 = vpop.f32.mrf.mxu0  ;;  %v19411_v13 = vld [vmem:[%s20702_s9 + $0x16a4] sm:$0xf]  ;;  %v17002_v21 = vor.u32 %v19781_v9, %v16999_v27  ;;  %v19741_v9 = vld [vmem:[%s20702_s9 + $0x20f4] sm:$0xf]  ;;  %v16839_v27 = vld [vmem:[%s20702_s9 + $0x2118] sm:$0xf0] }
 0x608   : > { %11965 = vmatpush.bf16.msrb.mxu3 %v16682_v51  ;;  %v15839_v51 = vld [vmem:[%s20702_s9 + $0x1948] sm:$0xf0]  ;;  %v15522_v17 = vor.u32 %v19411_v13, %v15519_v41  ;;  %v17642_v41 = vor.u32 %v19941_v26, %v17639_v22  ;;  %v19901_v26 = vld [vmem:[%s20702_s9 + $0x25f4] sm:$0xf]  ;;  %v17479_v22 = vld [vmem:[%s20702_s9 + $0x2618] sm:$0xf0] }
 0x609   : > { %11927 = vmatpush.bf16.msrb.mxu0 %v15682_v48  ;;  %v17079_v48 = vld [vmem:[%s20702_s9 + $0x22f8] sm:$0xf0]  ;;  %v11701_v25 = vpop.f32.mrf.mxu2  ;;  %v17999_v16 = vld [vmem:[%s20702_s9 + $0x2a28] sm:$0xf0] }
 0x60a   : > { %11940 = vmatpush.bf16.msrb.mxu1 %v16002_v11  ;;  %v19881_v11 = vld [vmem:[%s20702_s9 + $0x2554] sm:$0xf]  ;;  %v11714_v33 = vpop.f32.mrf.mxu3  ;;  %v18002_v40 = vor.u32 %v20031_v4, %v17999_v16  ;;  %v16959_v13 = vld [vmem:[%s20702_s9 + $0x2208] sm:$0xf0]  ;;  %v16919_v25 = vld [vmem:[%s20702_s9 + $0x21b8] sm:$0xf0] }
 0x60b   : > { %11953 = vmatpush.bf16.msrb.mxu2 %v16322_v20  ;;  %v17399_v20 = vld [vmem:[%s20702_s9 + $0x2578] sm:$0xf0]  ;;  %v17839_v4 = vld [vmem:[%s20702_s9 + $0x28e8] sm:$0xf0] }
 0x60c   : > { %11966 = vmatpush.bf16.msrb.mxu3 %v16642_v47  ;;  %v15842_v47 = vor.u32 %v19491_v55, %v15839_v51  ;;  %v19851_v55 = vld [vmem:[%s20702_s9 + $0x2464] sm:$0xf] }
 0x60d   : > { %11928 = vmatpush.bf16.msrb.mxu0 %v15642_v31  ;;  %v17082_v31 = vor.u32 %v19801_v57, %v17079_v48  ;;  %v19931_v51 = vld [vmem:[%s20702_s9 + $0x26e4] sm:$0xf] }
 0x60e   : > { %11941 = vmatpush.bf16.msrb.mxu1 %v15962_v59  ;;  %v20041_v59 = vld [vmem:[%s20702_s9 + $0x2a54] sm:$0xf] }
 0x60f   : > { %11954 = vmatpush.bf16.msrb.mxu2 %v16282_v19  ;;  %v17402_v19 = vor.u32 %v19881_v11, %v17399_v20  ;;  %v18042_v6 = vor.u32 %v20041_v59, %v18039_v53  ;;  %v19761_v11 = vld [vmem:[%s20702_s9 + $0x2194] sm:$0xf]  ;;  %v17602_v20 = vor.u32 %v19931_v51, %v17599_v54  ;;  %v19751_v53 = vld [vmem:[%s20702_s9 + $0x2144] sm:$0xf] }
 0x610   : > { %11967 = vmatpush.bf16.msrb.mxu3 %v16602_v60  ;;  %v16482_v60 = vor.u32 %v19651_v23, %v16479_v63  ;;  %v19921_v23 = vld [vmem:[%s20702_s9 + $0x2694] sm:$0xf]  ;;  %v17559_v63 = vld [vmem:[%s20702_s9 + $0x26b8] sm:$0xf0]  ;;  %v16922_v33 = vor.u32 %v19761_v11, %v16919_v25  ;;  %v19891_v51 = vld [vmem:[%s20702_s9 + $0x25a4] sm:$0xf] }
 0x611   : > { %11929 = vmatpush.bf16.msrb.mxu0 %v15602_v7  ;;  %v17679_v7 = vld [vmem:[%s20702_s9 + $0x27a8] sm:$0xf0]  ;;  %v20121_v54 = vld [vmem:[%s20702_s9 + $0x2cd4] sm:$0xf]  ;;  %v18679_v11 = vld [vmem:[%s20702_s9 + $0x2f78] sm:$0xf0] }
 0x612   : > { %11942 = vmatpush.bf16.msrb.mxu1 %v15922_v18  ;;  %v17042_v18 = vor.u32 %v19791_v39, %v17039_v38  ;;  %v17682_v1 = vor.u32 %v19951_v58, %v17679_v7  ;;  %v19831_v39 = vld [vmem:[%s20702_s9 + $0x23c4] sm:$0xf]  ;;  %v17199_v38 = vld [vmem:[%s20702_s9 + $0x23e8] sm:$0xf0]  ;;  %v11674_v58 = vadd.f32 %v24152_v36, %v24104_v46  ;;  %v19821_v46 = vld [vmem:[%s20702_s9 + $0x2374] sm:$0xf] }
 0x613   : > { %11955 = vmatpush.bf16.msrb.mxu2 %v16242_v29  ;;  %v17362_v29 = vor.u32 %v19871_v10, %v17359_v62  ;;  %v19911_v62 = vld [vmem:[%s20702_s9 + $0x2644] sm:$0xf]  ;;  %v17159_v36 = vld [vmem:[%s20702_s9 + $0x2398] sm:$0xf0] }
 0x614   : > { %11968 = vmatpush.bf16.msrb.mxu3 %v16562_v12  ;;  %v17319_v12 = vld [vmem:[%s20702_s9 + $0x24d8] sm:$0xf0] }
 0x615   : > { %11930 = vmatpush.bf16.msrb.mxu0 %v15562_v61  ;;  %v17959_v61 = vld [vmem:[%s20702_s9 + $0x29d8] sm:$0xf0] }
 0x616   : > { %11943 = vmatpush.bf16.msrb.mxu1 %v15882_v14  ;;  %v19771_v14 = vld [vmem:[%s20702_s9 + $0x21e4] sm:$0xf] }
 0x617   : > { %11956 = vmatpush.bf16.msrb.mxu2 %v16202_v0 }
 0x618   : > { %11969 = vmatpush.bf16.msrb.mxu3 %v16522_v8  ;;  %v17919_v8 = vld [vmem:[%s20702_s9 + $0x2988] sm:$0xf0] }
 0x619   : > { %11931 = vmatpush.bf16.msrb.mxu0 %v15522_v17  ;;  %v24228_v57 = vpop.f32.mrf.mxu0  ;;  %v17239_v17 = vld [vmem:[%s20702_s9 + $0x2438] sm:$0xf0] }
 0x61a   : > { %11944 = vmatpush.bf16.msrb.mxu1 %v15842_v47  ;;  %v24232_v24 = vpop.f32.mrf.mxu1  ;;  %v17922_v47 = vor.u32 %v20011_v15, %v17919_v8  ;;  %v17242_v59 = vor.u32 %v19841_v30, %v17239_v17  ;;  %v17439_v8 = vld [vmem:[%s20702_s9 + $0x25c8] sm:$0xf0]  ;;  %v19971_v30 = vld [vmem:[%s20702_s9 + $0x2824] sm:$0xf] }
 0x61b   : > { %11957 = vmatpush.bf16.msrb.mxu2 %v16162_v32  ;;  %v20001_v32 = vld [vmem:[%s20702_s9 + $0x2914] sm:$0xf]  ;;  %v17759_v17 = vld [vmem:[%s20702_s9 + $0x2848] sm:$0xf0] }
 0x61c   : > { %11970 = vmatpush.bf16.msrb.mxu3 %v16482_v60  ;;  %11932 = vmatmul.bf16.vlgmr.msrb.gmra.mxu0 %v20971_v42  ;;  %v20021_v42 = vld [vmem:[%s20702_s9 + $0x29b4] sm:$0xf] }
 0x61d   : > { %11976 = vmatpush.bf16.msra.mxu0 %v17082_v31  ;;  %11945 = vmatmul.bf16.vlgmr.msrb.gmra.mxu1 %v20966_v37  ;;  %v17279_v37 = vld [vmem:[%s20702_s9 + $0x2488] sm:$0xf0]  ;;  %v17962_v0 = vor.u32 %v20021_v42, %v17959_v61  ;;  %v17879_v31 = vld [vmem:[%s20702_s9 + $0x2938] sm:$0xf0]  ;;  %v16842_v42 = vor.u32 %v19741_v9, %v16839_v27  ;;  %v19981_v61 = vld [vmem:[%s20702_s9 + $0x2874] sm:$0xf] }
 0x61e   : > { %11989 = vmatpush.bf16.msra.mxu1 %v17402_v19  ;;  %11958 = vmatmul.bf16.vlgmr.msrb.gmra.mxu2 %v20973_v43  ;;  %v17322_v43 = vor.u32 %v19861_v28, %v17319_v12  ;;  %v17282_v48 = vor.u32 %v19851_v55, %v17279_v37  ;;  %v16879_v19 = vld [vmem:[%s20702_s9 + $0x2168] sm:$0xf0]  ;;  %v17882_v10 = vor.u32 %v20001_v32, %v17879_v31  ;;  %v19811_v55 = vld [vmem:[%s20702_s9 + $0x2324] sm:$0xf]  ;;  %v20081_v27 = vld [vmem:[%s20702_s9 + $0x2b94] sm:$0xf] }
 0x61f   : > { %12002 = vmatpush.bf16.msra.mxu2 %v17722_v52  ;;  %11971 = vmatmul.bf16.vlgmr.msrb.gmra.mxu3 %v21042_v34  ;;  %v16962_v34 = vor.u32 %v19771_v14, %v16959_v13  ;;  %v17562_v52 = vor.u32 %v19921_v23, %v17559_v63  ;;  %v16882_v7 = vor.u32 %v19751_v53, %v16879_v19  ;;  %v19731_v14 = vld [vmem:[%s20702_s9 + $0x20a4] sm:$0xf]  ;;  %v17119_v37 = vld [vmem:[%s20702_s9 + $0x2348] sm:$0xf0] }
 0x620   : > { %12015 = vmatpush.bf16.msra.mxu3 %v18042_v6  ;;  %v17519_v6 = vld [vmem:[%s20702_s9 + $0x2668] sm:$0xf0]  ;;  %v17162_v13 = vor.u32 %v19821_v46, %v17159_v36  ;;  %v20111_v31 = vld [vmem:[%s20702_s9 + $0x2c84] sm:$0xf]  ;;  %v17762_v53 = vor.u32 %v19971_v30, %v17759_v17  ;;  %v18519_v46 = vld [vmem:[%s20702_s9 + $0x2e38] sm:$0xf0] }
 0x621   : > { %11977 = vmatpush.bf16.msra.mxu0 %v17042_v18  ;;  %v24244_v60 = vpop.f32.mrf.mxu2  ;;  %v19991_v18 = vld [vmem:[%s20702_s9 + $0x28c4] sm:$0xf]  ;;  %v17522_v28 = vor.u32 %v19911_v62, %v17519_v6  ;;  %v18279_v62 = vld [vmem:[%s20702_s9 + $0x2c58] sm:$0xf0]  ;;  %v20181_v6 = vld [vmem:[%s20702_s9 + $0x2eb4] sm:$0xf] }
 0x622   : > { %11990 = vmatpush.bf16.msra.mxu1 %v17362_v29  ;;  %v24252_v16 = vpop.f32.mrf.mxu3  ;;  %v17202_v29 = vor.u32 %v19831_v39, %v17199_v38  ;;  %v11740_v12 = vpop.f32.mrf.mxu1  ;;  %v20191_v19 = vld [vmem:[%s20702_s9 + $0x2f04] sm:$0xf]  ;;  %v18399_v17 = vld [vmem:[%s20702_s9 + $0x2d48] sm:$0xf0] }
 0x623   : > { %12003 = vmatpush.bf16.msra.mxu2 %v17682_v1  ;;  %v11727_v1 = vpop.f32.mrf.mxu0  ;;  %v20171_v9 = vld [vmem:[%s20702_s9 + $0x2e64] sm:$0xf] }
 0x624   : > { %12016 = vmatpush.bf16.msra.mxu3 %v18002_v40  ;;  %v17842_v40 = vor.u32 %v19991_v18, %v17839_v4  ;;  %v20091_v4 = vld [vmem:[%s20702_s9 + $0x2be4] sm:$0xf]  ;;  %v18199_v1 = vld [vmem:[%s20702_s9 + $0x2bb8] sm:$0xf0] }
 0x625   : > { %11978 = vmatpush.bf16.msra.mxu0 %v17002_v21  ;;  %v11687_v21 = vadd.f32 %v24155_v2, %v11674_v58  ;;  %v17482_v2 = vor.u32 %v19901_v26, %v17479_v22  ;;  %v18599_v58 = vld [vmem:[%s20702_s9 + $0x2ed8] sm:$0xf0]  ;;  %v18159_v22 = vld [vmem:[%s20702_s9 + $0x2b68] sm:$0xf0]  ;;  %v20131_v30 = vld [vmem:[%s20702_s9 + $0x2d24] sm:$0xf] }
 0x626   : > { %11991 = vmatpush.bf16.msra.mxu1 %v17322_v43  ;;  %v17799_v43 = vld [vmem:[%s20702_s9 + $0x2898] sm:$0xf0] }
 0x627   : > { %12004 = vmatpush.bf16.msra.mxu2 %v17642_v41  ;;  %v16799_v41 = vld [vmem:[%s20702_s9 + $0x20c8] sm:$0xf0]  ;;  %v17802_v15 = vor.u32 %v19981_v61, %v17799_v43  ;;  %v385_v43 = vld [vmem:[#allocation2 + $0x40] sm:$0xff] }
 0x628   : > { %12017 = vmatpush.bf16.msra.mxu3 %v17962_v0  ;;  %v11700_v0 = vadd.f32 %v24168_v5, %v11687_v21  ;;  %v17122_v5 = vor.u32 %v19811_v55, %v17119_v37  ;;  %v20151_v21 = vld [vmem:[%s20702_s9 + $0x2dc4] sm:$0xf]  ;;  %v20061_v37 = vld [vmem:[%s20702_s9 + $0x2af4] sm:$0xf] }
 0x629   : > { %11979 = vmatpush.bf16.msra.mxu0 %v16962_v34  ;;  %v18359_v34 = vld [vmem:[%s20702_s9 + $0x2cf8] sm:$0xf0]  ;;  %v11753_v25 = vpop.f32.mrf.mxu2 }
 0x62a   : > { %11992 = vmatpush.bf16.msra.mxu1 %v17282_v48  ;;  %v20201_v48 = vld [vmem:[%s20702_s9 + $0x2f54] sm:$0xf]  ;;  %v11766_v23 = vpop.f32.mrf.mxu3  ;;  %v11713_v63 = vadd.f32 %v24174_v3, %v11700_v0  ;;  %v18119_v0 = vld [vmem:[%s20702_s9 + $0x2b18] sm:$0xf0]  ;;  %v20051_v25 = vld [vmem:[%s20702_s9 + $0x2aa4] sm:$0xf] }
 0x62b   : > { %12005 = vmatpush.bf16.msra.mxu2 %v17602_v20  ;;  %v16802_v20 = vor.u32 %v19731_v14, %v16799_v41  ;;  %v18682_v32 = vor.u32 %v20201_v48, %v18679_v11  ;;  %v18122_v48 = vor.u32 %v20061_v37, %v18119_v0  ;;  %v18402_v23 = vor.u32 %v20131_v30, %v18399_v17 }
 0x62c   : > { %12018 = vmatpush.bf16.msra.mxu3 %v17922_v47  ;;  %v18362_v47 = vor.u32 %v20121_v54, %v18359_v34  ;;  %v11726_v39 = vadd.f32 %v24228_v57, %v11713_v63 }
 0x62d   : > { %11980 = vmatpush.bf16.msra.mxu0 %v16922_v33  ;;  %v17442_v33 = vor.u32 %v19891_v51, %v17439_v8  ;;  %v18439_v51 = vld [vmem:[%s20702_s9 + $0x2d98] sm:$0xf0] }
 0x62e   : > { %11993 = vmatpush.bf16.msra.mxu1 %v17242_v59  ;;  %v18319_v59 = vld [vmem:[%s20702_s9 + $0x2ca8] sm:$0xf0]  ;;  %v11739_v57 = vadd.f32 %v24232_v24, %v11726_v39 }
 0x62f   : > { %12006 = vmatpush.bf16.msra.mxu2 %v17562_v52  ;;  %v18639_v52 = vld [vmem:[%s20702_s9 + $0x2f28] sm:$0xf0]  ;;  %v18322_v38 = vor.u32 %v20111_v31, %v18319_v59 }
 0x630   : > { %12019 = vmatpush.bf16.msra.mxu3 %v17882_v10  ;;  %v18642_v3 = vor.u32 %v20191_v19, %v18639_v52  ;;  %v20101_v10 = vld [vmem:[%s20702_s9 + $0x2c34] sm:$0xf]  ;;  %v11752_v18 = vadd.f32 %v24244_v60, %v11739_v57  ;;  %v18559_v24 = vld [vmem:[%s20702_s9 + $0x2e88] sm:$0xf0] }
 0x631   : > { %11981 = vmatpush.bf16.msra.mxu0 %v16882_v7  ;;  %v18282_v7 = vor.u32 %v20101_v10, %v18279_v62  ;;  %v18562_v60 = vor.u32 %v20171_v9, %v18559_v24 }
 0x632   : > { %11994 = vmatpush.bf16.msra.mxu1 %v17202_v29  ;;  %v18239_v29 = vld [vmem:[%s20702_s9 + $0x2c08] sm:$0xf0] }
 0x633   : > { %12007 = vmatpush.bf16.msra.mxu2 %v17522_v28  ;;  %v20161_v28 = vld [vmem:[%s20702_s9 + $0x2e14] sm:$0xf] }
 0x634   : > { %12020 = vmatpush.bf16.msra.mxu3 %v17842_v40  ;;  %v18202_v40 = vor.u32 %v20081_v27, %v18199_v1  ;;  %v18522_v26 = vor.u32 %v20161_v28, %v18519_v46 }
 0x635   : > { %11982 = vmatpush.bf16.msra.mxu0 %v16842_v42  ;;  %v18479_v42 = vld [vmem:[%s20702_s9 + $0x2de8] sm:$0xf0] }
 0x636   : > { %11995 = vmatpush.bf16.msra.mxu1 %v17162_v13  ;;  %v18482_v55 = vor.u32 %v20151_v21, %v18479_v42 }
 0x637   : > { %12008 = vmatpush.bf16.msra.mxu2 %v17482_v2  ;;  %v20141_v2 = vld [vmem:[%s20702_s9 + $0x2d74] sm:$0xf] }
 0x638   : > { %12021 = vmatpush.bf16.msra.mxu3 %v17802_v15  ;;  %v18442_v11 = vor.u32 %v20141_v2, %v18439_v51 }
 0x639   : > { %11983 = vmatpush.bf16.msra.mxu0 %v16802_v20  ;;  %v18079_v20 = vld [vmem:[%s20702_s9 + $0x2ac8] sm:$0xf0] }
 0x63a   : > { %11996 = vmatpush.bf16.msra.mxu1 %v17122_v5  ;;  %v11790_v12 = vpop.f32.mrf.mxu1  ;;  %v18082_v5 = vor.u32 %v20051_v25, %v18079_v20 }
 0x63b   : > { %12009 = vmatpush.bf16.msra.mxu2 %v17442_v33 }
 0x63c   : > { %12022 = vmatpush.bf16.msra.mxu3 %v17762_v53  ;;  %11984 = vmatmul.bf16.vlgmr.msra.gmra.mxu0 %v21049_v44  ;;  %v18602_v44 = vor.u32 %v20181_v6, %v18599_v58 }
 0x63d   : > { %12028 = vmatpush.bf16.msrb.mxu0 %v18362_v47  ;;  %11997 = vmatmul.bf16.vlgmr.msra.gmra.mxu1 %v21044_v35  ;;  %v18242_v35 = vor.u32 %v20091_v4, %v18239_v29 }
 0x63e   : > { %12041 = vmatpush.bf16.msrb.mxu1 %v18682_v32  ;;  %12010 = vmatmul.bf16.vlgmr.msra.gmra.mxu2 %v21051_v45  ;;  %v11765_v45 = vadd.f32 %v24252_v16, %v11752_v18  ;;  %v20071_v16 = vld [vmem:[%s20702_s9 + $0x2b44] sm:$0xf] }
 0x63f   : > { %12023 = vmatmul.bf16.vlgmr.msra.gmra.mxu3 %v21121_v49  ;;  %v11777_v49 = vpop.f32.mrf.mxu0  ;;  %v18162_v13 = vor.u32 %v20071_v16, %v18159_v22 }
 0x640   : > { %v11778_v36 = vadd.f32 %v11777_v49, %v11765_v45 }
 0x641   : > { %12029 = vmatpush.bf16.msrb.mxu0 %v18322_v38  ;;  %v11803_v14 = vpop.f32.mrf.mxu2 }
 0x642   : > { %12042 = vmatpush.bf16.msrb.mxu1 %v18642_v3  ;;  %v11791_v61 = vadd.f32 %v11790_v12, %v11778_v36  ;;  %v11792_v15 = vpop.f32.mrf.mxu1  ;;  %v11816_v8 = vpop.f32.mrf.mxu3 }
 0x644   : > { %v11804_v41 = vadd.f32 %v11803_v14, %v11791_v61 }
 0x645   : > { %12030 = vmatpush.bf16.msrb.mxu0 %v18282_v7 }
 0x646   : > { %12043 = vmatpush.bf16.msrb.mxu1 %v18602_v44  ;;  %v12062_v34 = vadd.f32 %v11804_v41, %v385_v43 }
 0x647   : > { %v11779_v54 = vpop.f32.mrf.mxu0 }
 0x648   : > { %12072 = vst [vmem:[#allocation2 + $0x40] sm:$0xff] %v12062_v34  ;;  %v386_v34 = vld [vmem:[#allocation2 + $0x38] sm:$0xff] }
 0x649   : > { %12031 = vmatpush.bf16.msrb.mxu0 %v18242_v35  ;;  %v11805_v47 = vpop.f32.mrf.mxu2 }
 0x64a   : > { %12044 = vmatpush.bf16.msrb.mxu1 %v18562_v60  ;;  %v11818_v63 = vpop.f32.mrf.mxu3 }
 0x64d   : > { %12032 = vmatpush.bf16.msrb.mxu0 %v18202_v40 }
 0x64e   : > { %12045 = vmatpush.bf16.msrb.mxu1 %v18522_v26 }
 0x651   : > { %12033 = vmatpush.bf16.msrb.mxu0 %v18162_v13 }
 0x652   : > { %12046 = vmatpush.bf16.msrb.mxu1 %v18482_v55 }
 0x655   : > { %12034 = vmatpush.bf16.msrb.mxu0 %v18122_v48 }
 0x656   : > { %12047 = vmatpush.bf16.msrb.mxu1 %v18442_v11 }
 0x659   : > { %12035 = vmatpush.bf16.msrb.mxu0 %v18082_v5  ;;  %v11829_v33 = vpop.f32.mrf.mxu0 }
 0x65a   : > { %12048 = vmatpush.bf16.msrb.mxu1 %v18402_v23  ;;  %v11830_v32 = vadd.f32 %v11829_v33, %v11816_v8  ;;  %v11842_v31 = vpop.f32.mrf.mxu1 }
 0x65c   : > { %12036 = vmatmul.bf16.vlgmr.msrb.gmra.mxu0 %v21127_v56  ;;  %v11843_v59 = vadd.f32 %v11842_v31, %v11830_v32 }
 0x65d   : > { %12049 = vmatmul.bf16.vlgmr.msrb.gmra.mxu1 %v21123_v50 }
 0x661   : > { %v11855_v53 = vpop.f32.mrf.mxu2  ;;  %v11831_v52 = vpop.f32.mrf.mxu0 }
 0x662   : > { %v11856_v19 = vadd.f32 %v11855_v53, %v11843_v59  ;;  %v11868_v39 = vpop.f32.mrf.mxu3  ;;  %v11844_v38 = vpop.f32.mrf.mxu1 }
 0x664   : > { %v11869_v3 = vadd.f32 %v11868_v39, %v11856_v19 }
 0x669   : > { %v11857_v10 = vpop.f32.mrf.mxu2 }
 0x66a   : > { %v11870_v62 = vpop.f32.mrf.mxu3 }
 0x679   : > { %v11881_v6 = vpop.f32.mrf.mxu0 }
 0x67a   : > { %v11894_v58 = vpop.f32.mrf.mxu1  ;;  %v11882_v1 = vadd.f32 %v11881_v6, %v11869_v3 }
 0x67c   : > { %v11895_v49 = vadd.f32 %v11894_v58, %v11882_v1 }
 0x681   : > { %v11907_v57 = vpop.f32.mrf.mxu2  ;;  %v11883_v18 = vpop.f32.mrf.mxu0 }
 0x682   : > { %v11920_v7 = vpop.f32.mrf.mxu3  ;;  %v11896_v56 = vpop.f32.mrf.mxu1  ;;  %v11908_v28 = vadd.f32 %v11907_v57, %v11895_v49 }
 0x684   : > { %v11921_v12 = vadd.f32 %v11920_v7, %v11908_v28 }
 0x689   : > { %v11909_v44 = vpop.f32.mrf.mxu2 }
 0x68a   : > { %v11922_v50 = vpop.f32.mrf.mxu3 }
 0x699   : > { %v11933_v4 = vpop.f32.mrf.mxu0 }
 0x69a   : > { %v11946_v29 = vpop.f32.mrf.mxu1  ;;  %v11934_v40 = vadd.f32 %v11933_v4, %v11921_v12 }
 0x69c   : > { %v11947_v42 = vadd.f32 %v11946_v29, %v11934_v40 }
 0x6a1   : > { %v11959_v9 = vpop.f32.mrf.mxu2  ;;  %v11935_v24 = vpop.f32.mrf.mxu0 }
 0x6a2   : > { %v11972_v35 = vpop.f32.mrf.mxu3  ;;  %v11948_v45 = vpop.f32.mrf.mxu1  ;;  %v11960_v61 = vadd.f32 %v11959_v9, %v11947_v42 }
 0x6a4   : > { %v11973_v43 = vadd.f32 %v11972_v35, %v11960_v61 }
 0x6a9   : > { %v11961_v60 = vpop.f32.mrf.mxu2 }
 0x6aa   : > { %v11974_v27 = vpop.f32.mrf.mxu3 }
 0x6b9   : > { %v11985_v46 = vpop.f32.mrf.mxu0 }
 0x6ba   : > { %v11998_v36 = vpop.f32.mrf.mxu1  ;;  %v11986_v41 = vadd.f32 %v11985_v46, %v11973_v43 }
 0x6bc   : > { %v11999_v55 = vadd.f32 %v11998_v36, %v11986_v41 }
 0x6c1   : > { %v12011_v26 = vpop.f32.mrf.mxu2  ;;  %v11987_v16 = vpop.f32.mrf.mxu0 }
 0x6c2   : > { %v12024_v22 = vpop.f32.mrf.mxu3  ;;  %v12000_v21 = vpop.f32.mrf.mxu1  ;;  %v12012_v37 = vadd.f32 %v12011_v26, %v11999_v55 }
 0x6c4   : > { %v12025_v0 = vadd.f32 %v12024_v22, %v12012_v37 }
 0x6c9   : > { %v12013_v14 = vpop.f32.mrf.mxu2 }
 0x6ca   : > { %v12026_v13 = vpop.f32.mrf.mxu3 }
 0x6d9   : > { %v12037_v2 = vpop.f32.mrf.mxu0 }
 0x6da   : > { %v12038_v51 = vadd.f32 %v12037_v2, %v12025_v0  ;;  %v12050_v54 = vpop.f32.mrf.mxu1 }
 0x6dc   : > { %v12051_v15 = vadd.f32 %v12050_v54, %v12038_v51 }
 0x6de   : > { %v12063_v8 = vadd.f32 %v12051_v15, %v386_v34  ;;  %12077 = sbr.rel (%p18683_p9) target bundleno = 1991 (0x7c7), region = 56 }
 0x6e0   : > { %12073 = vst [vmem:[#allocation2 + $0x38] sm:$0xff] %v12063_v8 }
 0x6e1   : > { %v12039_v48 = vpop.f32.mrf.mxu0 }
 0x6e2   : > { %v12052_v11 = vpop.f32.mrf.mxu1 }
 0x6e3   : > { %v12113_v25 = vld [vmem:[%s20728_s11 + $0x78] sm:$0xff]  ;;  %v12112_v20 = vld [vmem:[%s20728_s11 + $0x70] sm:$0xff]  ;;  %v12111_v47 = vld [vmem:[%s20728_s11 + $0x68] sm:$0xff] }
 0x6e4   : > { %v12129_v30 = vld [vmem:[%s20728_s11 + $0xf8] sm:$0xff]  ;;  %12258 = vmatpush.msra.mxu0 %v12113_v25  ;;  %v12128_v17 = vld [vmem:[%s20728_s11 + $0xf0] sm:$0xff]  ;;  %v12127_v23 = vld [vmem:[%s20728_s11 + $0xe8] sm:$0xff] }
 0x6e5   : > { %12278 = vmatpush.msra.mxu1 %v12129_v30  ;;  %v12145_v5 = vld [vmem:[%s20728_s11 + $0x178] sm:$0xff]  ;;  %v12144_v63 = vld [vmem:[%s20728_s11 + $0x170] sm:$0xff]  ;;  %v12110_v33 = vld [vmem:[%s20728_s11 + $0x60] sm:$0xff] }
 0x6e6   : > { %12298 = vmatpush.msra.mxu2 %v12145_v5  ;;  %12259 = vmatpush.msra.mxu0 %v12112_v20  ;;  %v12161_v32 = vld [vmem:[%s20728_s11 + $0x1f8] sm:$0xff]  ;;  %v12126_v31 = vld [vmem:[%s20728_s11 + $0xe0] sm:$0xff]  ;;  %v12143_v59 = vld [vmem:[%s20728_s11 + $0x168] sm:$0xff] }
 0x6e7   : > { %12279 = vmatpush.msra.mxu1 %v12128_v17  ;;  %12318 = vmatpush.msra.mxu3 %v12161_v32  ;;  %v12160_v53 = vld [vmem:[%s20728_s11 + $0x1f0] sm:$0xff]  ;;  %v12142_v19 = vld [vmem:[%s20728_s11 + $0x160] sm:$0xff]  ;;  %v12159_v52 = vld [vmem:[%s20728_s11 + $0x1e8] sm:$0xff] }
 0x6e8   : > { %12299 = vmatpush.msra.mxu2 %v12144_v63  ;;  %12260 = vmatpush.msra.mxu0 %v12111_v47  ;;  %v12109_v39 = vld [vmem:[%s20728_s11 + $0x58] sm:$0xff]  ;;  %v12158_v10 = vld [vmem:[%s20728_s11 + $0x1e0] sm:$0xff]  ;;  %v12108_v62 = vld [vmem:[%s20728_s11 + $0x50] sm:$0xff] }
 0x6e9   : > { %12280 = vmatpush.msra.mxu1 %v12127_v23  ;;  %12319 = vmatpush.msra.mxu3 %v12160_v53  ;;  %v12125_v38 = vld [vmem:[%s20728_s11 + $0xd8] sm:$0xff]  ;;  %v12124_v6 = vld [vmem:[%s20728_s11 + $0xd0] sm:$0xff]  ;;  %v12107_v7 = vld [vmem:[%s20728_s11 + $0x48] sm:$0xff] }
 0x6ea   : > { %12300 = vmatpush.msra.mxu2 %v12143_v59  ;;  %12261 = vmatpush.msra.mxu0 %v12110_v33  ;;  %v12141_v3 = vld [vmem:[%s20728_s11 + $0x158] sm:$0xff]  ;;  %v12140_v58 = vld [vmem:[%s20728_s11 + $0x150] sm:$0xff]  ;;  %v12123_v18 = vld [vmem:[%s20728_s11 + $0xc8] sm:$0xff] }
 0x6eb   : > { %12281 = vmatpush.msra.mxu1 %v12126_v31  ;;  %12320 = vmatpush.msra.mxu3 %v12159_v52  ;;  %v12157_v57 = vld [vmem:[%s20728_s11 + $0x1d8] sm:$0xff]  ;;  %v12139_v56 = vld [vmem:[%s20728_s11 + $0x148] sm:$0xff]  ;;  %v12156_v44 = vld [vmem:[%s20728_s11 + $0x1d0] sm:$0xff] }
 0x6ec   : > { %12301 = vmatpush.msra.mxu2 %v12142_v19  ;;  %12262 = vmatpush.msra.mxu0 %v12109_v39  ;;  %v12106_v50 = vld [vmem:[%s20728_s11 + $0x40] sm:$0xff]  ;;  %v12155_v9 = vld [vmem:[%s20728_s11 + $0x1c8] sm:$0xff]  ;;  %v12105_v24 = vld [vmem:[%s20728_s11 + $0x38] sm:$0xff] }
 0x6ed   : > { %12282 = vmatpush.msra.mxu1 %v12125_v38  ;;  %12321 = vmatpush.msra.mxu3 %v12158_v10  ;;  %v12122_v4 = vld [vmem:[%s20728_s11 + $0xc0] sm:$0xff]  ;;  %v12121_v35 = vld [vmem:[%s20728_s11 + $0xb8] sm:$0xff]  ;;  %v12104_v27 = vld [vmem:[%s20728_s11 + $0x30] sm:$0xff] }
 0x6ee   : > { %12302 = vmatpush.msra.mxu2 %v12141_v3  ;;  %12263 = vmatpush.msra.mxu0 %v12108_v62  ;;  %v12138_v29 = vld [vmem:[%s20728_s11 + $0x140] sm:$0xff]  ;;  %v12137_v45 = vld [vmem:[%s20728_s11 + $0x138] sm:$0xff]  ;;  %v12120_v1 = vld [vmem:[%s20728_s11 + $0xb0] sm:$0xff] }
 0x6ef   : > { %12283 = vmatpush.msra.mxu1 %v12124_v6  ;;  %12322 = vmatpush.msra.mxu3 %v12157_v57  ;;  %v12154_v60 = vld [vmem:[%s20728_s11 + $0x1c0] sm:$0xff]  ;;  %v12136_v49 = vld [vmem:[%s20728_s11 + $0x130] sm:$0xff]  ;;  %v12153_v28 = vld [vmem:[%s20728_s11 + $0x1b8] sm:$0xff] }
 0x6f0   : > { %12303 = vmatpush.msra.mxu2 %v12140_v58  ;;  %12264 = vmatpush.msra.mxu0 %v12107_v7  ;;  %v12103_v46 = vld [vmem:[%s20728_s11 + $0x28] sm:$0xff]  ;;  %v12152_v40 = vld [vmem:[%s20728_s11 + $0x1b0] sm:$0xff]  ;;  %v12102_v26 = vld [vmem:[%s20728_s11 + $0x20] sm:$0xff] }
 0x6f1   : > { %12284 = vmatpush.msra.mxu1 %v12123_v18  ;;  %12323 = vmatpush.msra.mxu3 %v12156_v44  ;;  %v12119_v36 = vld [vmem:[%s20728_s11 + $0xa8] sm:$0xff]  ;;  %v12118_v16 = vld [vmem:[%s20728_s11 + $0xa0] sm:$0xff]  ;;  %v12101_v42 = vld [vmem:[%s20728_s11 + $0x18] sm:$0xff] }
 0x6f2   : > { %12304 = vmatpush.msra.mxu2 %v12139_v56  ;;  %12265 = vmatpush.msra.mxu0 %v12106_v50  ;;  %v12135_v12 = vld [vmem:[%s20728_s11 + $0x128] sm:$0xff]  ;;  %v12134_v22 = vld [vmem:[%s20728_s11 + $0x120] sm:$0xff]  ;;  %v12117_v61 = vld [vmem:[%s20728_s11 + $0x98] sm:$0xff] }
 0x6f3   : > { %12285 = vmatpush.msra.mxu1 %v12122_v4  ;;  %12324 = vmatpush.msra.mxu3 %v12155_v9  ;;  %v12151_v21 = vld [vmem:[%s20728_s11 + $0x1a8] sm:$0xff]  ;;  %v12133_v43 = vld [vmem:[%s20728_s11 + $0x118] sm:$0xff]  ;;  %v12150_v14 = vld [vmem:[%s20728_s11 + $0x1a0] sm:$0xff] }
 0x6f4   : > { %12305 = vmatpush.msra.mxu2 %v12138_v29  ;;  %12266 = vmatpush.msra.mxu0 %v12105_v24  ;;  %v12100_v13 = vld [vmem:[%s20728_s11 + $0x10] sm:$0xff]  ;;  %v12149_v37 = vld [vmem:[%s20728_s11 + $0x198] sm:$0xff]  ;;  %v12099_v0 = vld [vmem:[%s20728_s11 + $0x8] sm:$0xff] }
 0x6f5   : > { %12286 = vmatpush.msra.mxu1 %v12121_v35  ;;  %12325 = vmatpush.msra.mxu3 %v12154_v60  ;;  %v12116_v41 = vld [vmem:[%s20728_s11 + $0x90] sm:$0xff]  ;;  %v12115_v2 = vld [vmem:[%s20728_s11 + $0x88] sm:$0xff]  ;;  %v12098_v34 = vld [vmem:[%s20728_s11] sm:$0xff] }
 0x6f6   : > { %12306 = vmatpush.msra.mxu2 %v12137_v45  ;;  %12267 = vmatpush.msra.mxu0 %v12104_v27  ;;  %v12132_v55 = vld [vmem:[%s20728_s11 + $0x110] sm:$0xff]  ;;  %v12131_v51 = vld [vmem:[%s20728_s11 + $0x108] sm:$0xff]  ;;  %v12114_v15 = vld [vmem:[%s20728_s11 + $0x80] sm:$0xff] }
 0x6f7   : > { %12287 = vmatpush.msra.mxu1 %v12120_v1  ;;  %12326 = vmatpush.msra.mxu3 %v12153_v28  ;;  %v12148_v54 = vld [vmem:[%s20728_s11 + $0x190] sm:$0xff]  ;;  %v12177_v8 = vld [vmem:[%s20728_s11 + $0x278] sm:$0xff]  ;;  %v12130_v11 = vld [vmem:[%s20728_s11 + $0x100] sm:$0xff] }
 0x6f8   : > { %12307 = vmatpush.msra.mxu2 %v12136_v49  ;;  %12268 = vmatpush.msra.mxu0 %v12103_v46  ;;  %v12193_v48 = vld [vmem:[%s20728_s11 + $0x2f8] sm:$0xff]  ;;  %v12147_v25 = vld [vmem:[%s20728_s11 + $0x188] sm:$0xff]  ;;  %v12176_v20 = vld [vmem:[%s20728_s11 + $0x270] sm:$0xff] }
 0x6f9   : > { %12288 = vmatpush.msra.mxu1 %v12119_v36  ;;  %12327 = vmatpush.msra.mxu3 %v12152_v40  ;;  %v12192_v30 = vld [vmem:[%s20728_s11 + $0x2f0] sm:$0xff]  ;;  %v12209_v17 = vld [vmem:[%s20728_s11 + $0x378] sm:$0xff]  ;;  %v12146_v5 = vld [vmem:[%s20728_s11 + $0x180] sm:$0xff] }
 0x6fa   : > { %12308 = vmatpush.msra.mxu2 %v12135_v12  ;;  %12269 = vmatpush.msra.mxu0 %v12102_v26  ;;  %v12175_v47 = vld [vmem:[%s20728_s11 + $0x268] sm:$0xff]  ;;  %v12208_v63 = vld [vmem:[%s20728_s11 + $0x370] sm:$0xff]  ;;  %v12225_v33 = vld [vmem:[%s20728_s11 + $0x3f8] sm:$0xff] }
 0x6fb   : > { %12289 = vmatpush.msra.mxu1 %v12118_v16  ;;  %12328 = vmatpush.msra.mxu3 %v12151_v21  ;;  %v12191_v23 = vld [vmem:[%s20728_s11 + $0x2e8] sm:$0xff]  ;;  %v12174_v32 = vld [vmem:[%s20728_s11 + $0x260] sm:$0xff]  ;;  %v12224_v53 = vld [vmem:[%s20728_s11 + $0x3f0] sm:$0xff] }
 0x6fc   : > { %12309 = vmatpush.msra.mxu2 %v12134_v22  ;;  %12270 = vmatpush.msra.mxu0 %v12101_v42  ;;  %v12190_v31 = vld [vmem:[%s20728_s11 + $0x2e0] sm:$0xff]  ;;  %v12207_v59 = vld [vmem:[%s20728_s11 + $0x368] sm:$0xff]  ;;  %v12173_v19 = vld [vmem:[%s20728_s11 + $0x258] sm:$0xff] }
 0x6fd   : > { %12290 = vmatpush.msra.mxu1 %v12117_v61  ;;  %12329 = vmatpush.msra.mxu3 %v12150_v14  ;;  %v12189_v52 = vld [vmem:[%s20728_s11 + $0x2d8] sm:$0xff]  ;;  %v12206_v39 = vld [vmem:[%s20728_s11 + $0x360] sm:$0xff]  ;;  %v12223_v38 = vld [vmem:[%s20728_s11 + $0x3e8] sm:$0xff] }
 0x6fe   : > { %12310 = vmatpush.msra.mxu2 %v12133_v43  ;;  %12271 = vmatpush.msra.mxu0 %v12100_v13  ;;  %v12172_v3 = vld [vmem:[%s20728_s11 + $0x250] sm:$0xff]  ;;  %v12205_v62 = vld [vmem:[%s20728_s11 + $0x358] sm:$0xff]  ;;  %v12222_v6 = vld [vmem:[%s20728_s11 + $0x3e0] sm:$0xff] }
 0x6ff   : > { %12291 = vmatpush.msra.mxu1 %v12116_v41  ;;  %12330 = vmatpush.msra.mxu3 %v12149_v37  ;;  %v12188_v10 = vld [vmem:[%s20728_s11 + $0x2d0] sm:$0xff]  ;;  %v12171_v58 = vld [vmem:[%s20728_s11 + $0x248] sm:$0xff]  ;;  %v12221_v18 = vld [vmem:[%s20728_s11 + $0x3d8] sm:$0xff] }
 0x700   : > { %12311 = vmatpush.msra.mxu2 %v12132_v55  ;;  %12272 = vmatpush.msra.mxu0 %v12099_v0  ;;  %v12187_v57 = vld [vmem:[%s20728_s11 + $0x2c8] sm:$0xff]  ;;  %v12204_v7 = vld [vmem:[%s20728_s11 + $0x350] sm:$0xff]  ;;  %v12170_v56 = vld [vmem:[%s20728_s11 + $0x240] sm:$0xff] }
 0x701   : > { %12292 = vmatpush.msra.mxu1 %v12115_v2  ;;  %12331 = vmatpush.msra.mxu3 %v12148_v54  ;;  %v12186_v44 = vld [vmem:[%s20728_s11 + $0x2c0] sm:$0xff]  ;;  %v12203_v50 = vld [vmem:[%s20728_s11 + $0x348] sm:$0xff]  ;;  %v12220_v4 = vld [vmem:[%s20728_s11 + $0x3d0] sm:$0xff] }
 0x702   : > { %12312 = vmatpush.msra.mxu2 %v12131_v51  ;;  %12273 = vmatpush.msra.mxu0 %v12098_v34  ;;  %v12169_v29 = vld [vmem:[%s20728_s11 + $0x238] sm:$0xff]  ;;  %v12202_v24 = vld [vmem:[%s20728_s11 + $0x340] sm:$0xff]  ;;  %v12219_v35 = vld [vmem:[%s20728_s11 + $0x3c8] sm:$0xff] }
 0x703   : > { %12293 = vmatpush.msra.mxu1 %v12114_v15  ;;  %12332 = vmatpush.msra.mxu3 %v12147_v25  ;;  %v12185_v9 = vld [vmem:[%s20728_s11 + $0x2b8] sm:$0xff]  ;;  %v12168_v45 = vld [vmem:[%s20728_s11 + $0x230] sm:$0xff]  ;;  %v12218_v1 = vld [vmem:[%s20728_s11 + $0x3c0] sm:$0xff] }
 0x704   : > { %12338 = vmatpush.msrb.mxu0 %v12177_v8  ;;  %12313 = vmatpush.msra.mxu2 %v12130_v11  ;;  %v12184_v60 = vld [vmem:[%s20728_s11 + $0x2b0] sm:$0xff]  ;;  %v12201_v27 = vld [vmem:[%s20728_s11 + $0x338] sm:$0xff]  ;;  %v12167_v49 = vld [vmem:[%s20728_s11 + $0x228] sm:$0xff] }
 0x705   : > { %12358 = vmatpush.msrb.mxu1 %v12193_v48  ;;  %12333 = vmatpush.msra.mxu3 %v12146_v5  ;;  %v12183_v28 = vld [vmem:[%s20728_s11 + $0x2a8] sm:$0xff]  ;;  %v12200_v46 = vld [vmem:[%s20728_s11 + $0x330] sm:$0xff]  ;;  %v12217_v36 = vld [vmem:[%s20728_s11 + $0x3b8] sm:$0xff] }
 0x706   : > { %12339 = vmatpush.msrb.mxu0 %v12176_v20  ;;  %12378 = vmatpush.msrb.mxu2 %v12209_v17  ;;  %v12166_v12 = vld [vmem:[%s20728_s11 + $0x220] sm:$0xff]  ;;  %v12080_v26 = vld [vmem:[#allocation2 + $0x18] sm:$0xff]  ;;  %v12199_v16 = vld [vmem:[%s20728_s11 + $0x328] sm:$0xff] }
 0x707   : > { %12359 = vmatpush.msrb.mxu1 %v12192_v30  ;;  %12398 = vmatpush.msrb.mxu3 %v12225_v33  ;;  %v12182_v40 = vld [vmem:[%s20728_s11 + $0x2a0] sm:$0xff]  ;;  %v12216_v22 = vld [vmem:[%s20728_s11 + $0x3b0] sm:$0xff]  ;;  %v12165_v21 = vld [vmem:[%s20728_s11 + $0x218] sm:$0xff]  ;;  %v12090_v14 = vmax.f32 %v12080_v26, 0.0 }
 0x708   : > { %12340 = vmatpush.msrb.mxu0 %v12175_v47  ;;  %12379 = vmatpush.msrb.mxu2 %v12208_v63  ;;  %v12181_v42 = vld [vmem:[%s20728_s11 + $0x298] sm:$0xff]  ;;  %v12198_v61 = vld [vmem:[%s20728_s11 + $0x320] sm:$0xff]  ;;  %v12215_v43 = vld [vmem:[%s20728_s11 + $0x3a8] sm:$0xff] }
 0x709   : > { %12360 = vmatpush.msrb.mxu1 %v12191_v23  ;;  %12399 = vmatpush.msrb.mxu3 %v12224_v53  ;;  %v12078_v13 = vld [vmem:[#allocation2 + $0x30] sm:$0xff]  ;;  %v12197_v0 = vld [vmem:[%s20728_s11 + $0x318] sm:$0xff]  ;;  %v12214_v51 = vld [vmem:[%s20728_s11 + $0x3a0] sm:$0xff] }
 0x70a   : > { %12341 = vmatpush.msrb.mxu0 %v12174_v32  ;;  %12380 = vmatpush.msrb.mxu2 %v12207_v59  ;;  %v12081_v41 = vld [vmem:[#allocation2 + $0x10] sm:$0xff]  ;;  %v12088_v54 = vmax.f32 %v12078_v13, 0.0  ;;  %v12079_v15 = vld [vmem:[#allocation2] sm:$0xff]  ;;  %v12084_v17 = vld [vmem:[#allocation2 + $0x8] sm:$0xff] }
 0x70b   : > { %12361 = vmatpush.msrb.mxu1 %v12190_v31  ;;  %12400 = vmatpush.msrb.mxu3 %v12223_v38  ;;  %v12164_v55 = vld [vmem:[%s20728_s11 + $0x210] sm:$0xff]  ;;  %v12163_v2 = vld [vmem:[%s20728_s11 + $0x208] sm:$0xff]  ;;  %v12091_v34 = vmax.f32 %v12081_v41, 0.0  ;;  %v12162_v8 = vld [vmem:[%s20728_s11 + $0x200] sm:$0xff]  ;;  %v12089_v20 = vmax.f32 %v12079_v15, 0.0  ;;  %v12094_v59 = vmax.f32 %v12084_v17, 0.0 }
 0x70c   : > { %12342 = vmatpush.msrb.mxu0 %v12173_v19  ;;  %12381 = vmatpush.msrb.mxu2 %v12206_v39  ;;  %v12180_v37 = vld [vmem:[%s20728_s11 + $0x290] sm:$0xff]  ;;  %v12179_v48 = vld [vmem:[%s20728_s11 + $0x288] sm:$0xff]  ;;  %v12213_v25 = vld [vmem:[%s20728_s11 + $0x398] sm:$0xff] }
 0x70d   : > { %12362 = vmatpush.msrb.mxu1 %v12189_v52  ;;  %12401 = vmatpush.msrb.mxu3 %v12222_v6  ;;  %v12196_v11 = vld [vmem:[%s20728_s11 + $0x310] sm:$0xff]  ;;  %v12241_v30 = vld [vmem:[%s20728_s11 + $0x478] sm:$0xff]  ;;  %v12178_v5 = vld [vmem:[%s20728_s11 + $0x280] sm:$0xff] }
 0x70e   : > { %12343 = vmatpush.msrb.mxu0 %v12172_v3  ;;  %12382 = vmatpush.msrb.mxu2 %v12205_v62  ;;  %v12195_v47 = vld [vmem:[%s20728_s11 + $0x308] sm:$0xff]  ;;  %v12212_v23 = vld [vmem:[%s20728_s11 + $0x390] sm:$0xff]  ;;  %v12257_v32 = vld [vmem:[%s20728_s11 + $0x4f8] sm:$0xff] }
 0x70f   : > { %12363 = vmatpush.msrb.mxu1 %v12188_v10  ;;  %12402 = vmatpush.msrb.mxu3 %v12221_v18  ;;  %v12240_v63 = vld [vmem:[%s20728_s11 + $0x470] sm:$0xff]  ;;  %v12082_v33 = vld [vmem:[#allocation2 + $0x48] sm:$0xff]  ;;  %v12085_v53 = vld [vmem:[#allocation2 + $0x20] sm:$0xff] }
 0x710   : > { %12344 = vmatpush.msrb.mxu0 %v12171_v58  ;;  %12383 = vmatpush.msrb.mxu2 %v12204_v7  ;;  %v12194_v31 = vld [vmem:[%s20728_s11 + $0x300] sm:$0xff]  ;;  %v12211_v19 = vld [vmem:[%s20728_s11 + $0x388] sm:$0xff]  ;;  %v12256_v39 = vld [vmem:[%s20728_s11 + $0x4f0] sm:$0xff]  ;;  %v12092_v38 = vmax.f32 %v12082_v33, 0.0  ;;  %v12095_v62 = vmax.f32 %v12085_v53, 0.0 }
 0x711   : > { %12364 = vmatpush.msrb.mxu1 %v12187_v57  ;;  %12403 = vmatpush.msrb.mxu3 %v12220_v4  ;;  %v12239_v52 = vld [vmem:[%s20728_s11 + $0x468] sm:$0xff]  ;;  %v12210_v10 = vld [vmem:[%s20728_s11 + $0x380] sm:$0xff]  ;;  %v12237_v7 = vld [vmem:[%s20728_s11 + $0x458] sm:$0xff] }
 0x712   : > { %12345 = vmatpush.msrb.mxu0 %v12170_v56  ;;  %12384 = vmatpush.msrb.mxu2 %v12203_v50  ;;  %v12083_v3 = vld [vmem:[#allocation2 + $0x28] sm:$0xff]  ;;  %v12236_v56 = vld [vmem:[%s20728_s11 + $0x450] sm:$0xff]  ;;  %v12086_v26 = vld [vmem:[#allocation2 + $0x40] sm:$0xff] }
 0x713   : > { %12365 = vmatpush.msrb.mxu1 %v12186_v44  ;;  %12404 = vmatpush.msrb.mxu3 %v12219_v35  ;;  %v12238_v6 = vld [vmem:[%s20728_s11 + $0x460] sm:$0xff]  ;;  %v12255_v58 = vld [vmem:[%s20728_s11 + $0x4e8] sm:$0xff]  ;;  %v12093_v57 = vmax.f32 %v12083_v3, 0.0  ;;  %v12253_v44 = vld [vmem:[%s20728_s11 + $0x4d8] sm:$0xff] }
 0x714   : > { %12346 = vmatpush.msrb.mxu0 %v12169_v29  ;;  %12385 = vmatpush.msrb.mxu2 %v12202_v24  ;;  %v12254_v18 = vld [vmem:[%s20728_s11 + $0x4e0] sm:$0xff]  ;;  %v12235_v50 = vld [vmem:[%s20728_s11 + $0x448] sm:$0xff]  ;;  %v12252_v4 = vld [vmem:[%s20728_s11 + $0x4d0] sm:$0xff] }
 0x715   : > { %12366 = vmatpush.msrb.mxu1 %v12185_v9  ;;  %12405 = vmatpush.msrb.mxu3 %v12218_v1  ;;  %v12234_v29 = vld [vmem:[%s20728_s11 + $0x440] sm:$0xff]  ;;  %v12251_v9 = vld [vmem:[%s20728_s11 + $0x4c8] sm:$0xff]  ;;  %v12233_v24 = vld [vmem:[%s20728_s11 + $0x438] sm:$0xff] }
 0x716   : > { %12347 = vmatpush.msrb.mxu0 %v12168_v45  ;;  %12386 = vmatpush.msrb.mxu2 %v12201_v27  ;;  %v12250_v35 = vld [vmem:[%s20728_s11 + $0x4c0] sm:$0xff]  ;;  %v12232_v45 = vld [vmem:[%s20728_s11 + $0x430] sm:$0xff]  ;;  %v12231_v27 = vld [vmem:[%s20728_s11 + $0x428] sm:$0xff] }
 0x717   : > { %12367 = vmatpush.msrb.mxu1 %v12184_v60  ;;  %12406 = vmatpush.msrb.mxu3 %v12217_v36  ;;  %v12249_v60 = vld [vmem:[%s20728_s11 + $0x4b8] sm:$0xff]  ;;  %v12248_v1 = vld [vmem:[%s20728_s11 + $0x4b0] sm:$0xff]  ;;  %v12246_v36 = vld [vmem:[%s20728_s11 + $0x4a0] sm:$0xff] }
 0x718   : > { %12348 = vmatpush.msrb.mxu0 %v12167_v49  ;;  %12387 = vmatpush.msrb.mxu2 %v12200_v46  ;;  %v12230_v49 = vld [vmem:[%s20728_s11 + $0x420] sm:$0xff]  ;;  %v12229_v46 = vld [vmem:[%s20728_s11 + $0x418] sm:$0xff] }
 0x719   : > { %12368 = vmatpush.msrb.mxu1 %v12183_v28  ;;  %12407 = vmatpush.msrb.mxu3 %v12216_v22  ;;  %v12247_v28 = vld [vmem:[%s20728_s11 + $0x4a8] sm:$0xff]  ;;  %v12244_v22 = vld [vmem:[%s20728_s11 + $0x490] sm:$0xff] }
 0x71a   : > { %12349 = vmatpush.msrb.mxu0 %v12166_v12  ;;  %12388 = vmatpush.msrb.mxu2 %v12199_v16  ;;  %v12228_v12 = vld [vmem:[%s20728_s11 + $0x410] sm:$0xff]  ;;  %v12227_v16 = vld [vmem:[%s20728_s11 + $0x408] sm:$0xff] }
 0x71b   : > { %12369 = vmatpush.msrb.mxu1 %v12182_v40  ;;  %12408 = vmatpush.msrb.mxu3 %v12215_v43  ;;  %v12245_v40 = vld [vmem:[%s20728_s11 + $0x498] sm:$0xff]  ;;  %v12243_v43 = vld [vmem:[%s20728_s11 + $0x488] sm:$0xff] }
 0x71c   : > { %12350 = vmatpush.msrb.mxu0 %v12165_v21  ;;  %12389 = vmatpush.msrb.mxu2 %v12198_v61  ;;  %v12226_v21 = vld [vmem:[%s20728_s11 + $0x400] sm:$0xff]  ;;  %v12087_v61 = vld [vmem:[#allocation2 + $0x38] sm:$0xff] }
 0x71d   : > { %12370 = vmatpush.msrb.mxu1 %v12181_v42  ;;  %12314 = vmatmul.f32.vlgmr.msra.gmra.mxu2 %v12090_v14  ;;  %v12096_v42 = vmax.f32 %v12086_v26, 0.0  ;;  %v12242_v14 = vld [vmem:[%s20728_s11 + $0x480] sm:$0xff]  ;;  %v12097_v13 = vmax.f32 %v12087_v61, 0.0 }
 0x71e   : > { %12351 = vmatpush.msrb.mxu0 %v12164_v55  ;;  %12390 = vmatpush.msrb.mxu2 %v12197_v0 }
 0x71f   : > { %12371 = vmatpush.msrb.mxu1 %v12180_v37  ;;  %12409 = vmatpush.msrb.mxu3 %v12214_v51 }
 0x720   : > { %12352 = vmatpush.msrb.mxu0 %v12163_v2  ;;  %12334 = vmatmul.f32.vlgmr.msra.gmra.mxu3 %v12091_v34 }
 0x721   : > { %12274 = vmatmul.f32.vlgmr.msra.gmra.mxu0 %v12088_v54  ;;  %12372 = vmatpush.msrb.mxu1 %v12179_v48 }
 0x722   : > { %12353 = vmatpush.msrb.mxu0 %v12162_v8  ;;  %12391 = vmatpush.msrb.mxu2 %v12196_v11 }
 0x723   : > { %12410 = vmatpush.msrb.mxu3 %v12213_v25  ;;  %12294 = vmatmul.f32.vlgmr.msra.gmra.mxu1 %v12089_v20 }
 0x724   : > { %12418 = vmatpush.msra.mxu0 %v12241_v30  ;;  %12373 = vmatpush.msrb.mxu1 %v12178_v5 }
 0x725   : > { %12392 = vmatpush.msrb.mxu2 %v12195_v47  ;;  %12411 = vmatpush.msrb.mxu3 %v12212_v23 }
 0x726   : > { %12419 = vmatpush.msra.mxu0 %v12240_v63  ;;  %12438 = vmatpush.msra.mxu1 %v12257_v32 }
 0x727   : > { %12393 = vmatpush.msrb.mxu2 %v12194_v31  ;;  %12412 = vmatpush.msrb.mxu3 %v12211_v19 }
 0x728   : > { %12394 = vmatmul.f32.vlgmr.msrb.gmra.mxu2 %v12094_v59  ;;  %12420 = vmatpush.msra.mxu0 %v12239_v52 }
 0x729   : > { %12439 = vmatpush.msra.mxu1 %v12256_v39  ;;  %12413 = vmatpush.msrb.mxu3 %v12210_v10 }
 0x72a   : > { %12354 = vmatmul.f32.vlgmr.msrb.gmra.mxu0 %v12092_v38  ;;  %12414 = vmatmul.f32.vlgmr.msrb.gmra.mxu3 %v12095_v62 }
 0x72b   : > { %12421 = vmatpush.msra.mxu0 %v12238_v6  ;;  %12440 = vmatpush.msra.mxu1 %v12255_v58 }
 0x72c   : > { %12374 = vmatmul.f32.vlgmr.msrb.gmra.mxu1 %v12093_v57 }
 0x72d   : > { %12422 = vmatpush.msra.mxu0 %v12237_v7  ;;  %12441 = vmatpush.msra.mxu1 %v12254_v18 }
 0x72f   : > { %12423 = vmatpush.msra.mxu0 %v12236_v56  ;;  %12442 = vmatpush.msra.mxu1 %v12253_v44 }
 0x731   : > { %12424 = vmatpush.msra.mxu0 %v12235_v50  ;;  %12443 = vmatpush.msra.mxu1 %v12252_v4 }
 0x733   : > { %12425 = vmatpush.msra.mxu0 %v12234_v29  ;;  %12444 = vmatpush.msra.mxu1 %v12251_v9 }
 0x735   : > { %12426 = vmatpush.msra.mxu0 %v12233_v24  ;;  %12445 = vmatpush.msra.mxu1 %v12250_v35 }
 0x737   : > { %12427 = vmatpush.msra.mxu0 %v12232_v45  ;;  %12446 = vmatpush.msra.mxu1 %v12249_v60 }
 0x739   : > { %12428 = vmatpush.msra.mxu0 %v12231_v27  ;;  %12447 = vmatpush.msra.mxu1 %v12248_v1 }
 0x73b   : > { %12429 = vmatpush.msra.mxu0 %v12230_v49  ;;  %12448 = vmatpush.msra.mxu1 %v12247_v28 }
 0x73d   : > { %12430 = vmatpush.msra.mxu0 %v12229_v46  ;;  %12449 = vmatpush.msra.mxu1 %v12246_v36 }
 0x73f   : > { %12431 = vmatpush.msra.mxu0 %v12228_v12  ;;  %12450 = vmatpush.msra.mxu1 %v12245_v40 }
 0x741   : > { %12432 = vmatpush.msra.mxu0 %v12227_v16  ;;  %12451 = vmatpush.msra.mxu1 %v12244_v22 }
 0x743   : > { %12433 = vmatpush.msra.mxu0 %v12226_v21  ;;  %12452 = vmatpush.msra.mxu1 %v12243_v43 }
 0x744   : > { %12434 = vmatmul.f32.vlgmr.msra.gmra.mxu0 %v12096_v42 }
 0x745   : > { %12453 = vmatpush.msra.mxu1 %v12242_v14 }
 0x746   : > { %12454 = vmatmul.f32.vlgmr.msra.gmra.mxu1 %v12097_v13 }
 0x79e   : > { %v12275_v55 = vpop.f32.mrf.mxu0 }
 0x7a0   : > { %v12295_v41 = vpop.f32.mrf.mxu1  ;;  %v12315_v0 = vpop.f32.mrf.mxu2 }
 0x7a1   : > { %v12296_v37 = vadd.f32 %v12295_v41, %v12275_v55 }
 0x7a3   : > { %v12316_v2 = vadd.f32 %v12315_v0, %v12296_v37  ;;  %v12335_v51 = vpop.f32.mrf.mxu3 }
 0x7a5   : > { %v12336_v54 = vadd.f32 %v12335_v51, %v12316_v2 }
 0x7a7   : > { %v12355_v34 = vpop.f32.mrf.mxu0 }
 0x7a8   : > { %v12356_v15 = vadd.f32 %v12355_v34, %v12336_v54 }
 0x7a9   : > { %v12375_v8 = vpop.f32.mrf.mxu1 }
 0x7aa   : > { %v12376_v48 = vadd.f32 %v12375_v8, %v12356_v15 }
 0x7ab   : > { %v12395_v11 = vpop.f32.mrf.mxu2 }
 0x7ac   : > { %v12396_v25 = vadd.f32 %v12395_v11, %v12376_v48 }
 0x7ad   : > { %v12415_v20 = vpop.f32.mrf.mxu3 }
 0x7ae   : > { %v12416_v30 = vadd.f32 %v12415_v20, %v12396_v25 }
 0x7c1   : > { %v12435_v17 = vpop.f32.mrf.mxu0 }
 0x7c2   : > { %v12436_v5 = vadd.f32 %v12435_v17, %v12416_v30 }
 0x7c3   : > { %v12455_v47 = vpop.f32.mrf.mxu1 }
 0x7c4   : > { %v12456_v23 = vadd.f32 %v12455_v47, %v12436_v5 }
 0x7c6   : > { %12458 = vst [vmem:[%s20721_s0] sm:$0xff] %v12456_v23 }
 0x7c7 PF: > { %s20_s25 = sadd.s32 1, %s20509_s25   ;;  %s24545_s18 = sld [smem:[#allocation14_spill]] }
 0x7c8   : > { %p17_p10 = scmp.ge.s32.totalorder %s20_s25, 6   ;;  %s24546_s30 = sld [smem:[#allocation15_spill]] }
 0x7c9   : > { %s24547_s21 = sld [smem:[#allocation11_spill]]  ;;  %s24550_s15 = smov %s20473_s16 }
 0x7ca   : > { %s24548_s23 = sld [smem:[#allocation12_spill]]  ;;  %s24551_s16 = smov %s20477_s17 }
 0x7cb   : > { %s24549_s9 = sld [smem:[#allocation13_spill]]  ;;  %s24556_s22 = smov %s20505_s24 }
 0x7cd   : > { %s24552_s17 = smov %s24545_s18  ;;  %s24553_s18 = smov %s20485_s19 }
 0x7ce   : > { %s24554_s19 = smov %s20489_s20  ;;  %s24555_s20 = smov %s24546_s30 }
 0x7cf   :  { %19 = sbr.rel (!%p17_p10) target bundleno = 14 (0xe), region = 111 }
 0x7d1   : > { %s24557_s24 = smov %s24549_s9 }
 0x7d4   :  { %12478 = vsyncpa [#allocation4], 1 }
 0x7d5   :  { %12480 = vsyncpa [#allocation4 + $0x1], 1 }
 0x7d6   :  { %12481 = vsyncpa [#allocation6], 1 }
 0x7d7   :  { %12483 = vsyncpa [#allocation6 + $0x1], 1 }

</bundles_post_ra>
